<compile_context>
chip_gen: v7x
topology: tpu7x:2x2x1
jax: 0.10.0
libtpu: 0.0.40
codegen_flags: <defaults>
</compile_context>

<pallas_src>
import math

import jax
import jax.numpy as jnp
from jax.experimental import pallas as pl
from jax.experimental.pallas import tpu as pltpu

TOKEN_LEN = 288                         # d_model (E)
NHEAD = 8
HEAD_DIM = TOKEN_LEN // NHEAD           # 36
FF = TOKEN_LEN * 2                      # 576
N_ENC_LAYERS = 6
N_DEC_LAYERS = 6
LN_EPS = 1e-5
NEG_INF = -1e30
WDTYPE = jnp.bfloat16                   # storage dtype for weight matrices


# ----------------------------------------------------------------------------
# In-kernel building blocks (pure functions on values)
# ----------------------------------------------------------------------------
def _layer_norm(x, g, b):
    mu = jnp.mean(x, axis=-1, keepdims=True)
    d = x - mu
    var = jnp.mean(d * d, axis=-1, keepdims=True)
    return d * jax.lax.rsqrt(var + LN_EPS) * g + b


def _ffn(x, w1, b1, w2, b2):
    h = jnp.maximum(jnp.dot(x, w1, preferred_element_type=jnp.float32) + b1, 0.0)
    return jnp.dot(h, w2, preferred_element_type=jnp.float32) + b2


def _mha_core(q, k, v, wo, bo, hmask, bias):
    """Batched-over-heads attention on flattened (rows, E) slabs.

    q, k, v : already projected, f32; 1/sqrt(head_dim) is folded into q.
    hmask   : (NHEAD, 1, E) 0/1 per-head column masks.  Masking q and v and
              contracting over all E columns is exactly the per-head dot
              product (masked columns contribute exactly zero).
    bias    : additive (Mq, Mk) block-diagonal batch mask (0 / -1e30).
    """
    qm = q[None, :, :] * hmask                                    # (H, Mq, E)
    kb = jnp.broadcast_to(k[None, :, :], (NHEAD,) + k.shape)      # (H, Mk, E)
    s = jnp.einsum('hqe,hke->hqk', qm, kb,
                   preferred_element_type=jnp.float32) + bias     # (H, Mq, Mk)
    m = jnp.max(s, axis=-1, keepdims=True)
    p = jnp.exp(s - m)
    p = p / jnp.sum(p, axis=-1, keepdims=True)
    vm = v[None, :, :] * hmask                                    # (H, Mk, E)
    ctx = jnp.sum(jnp.einsum('hqk,hke->hqe', p, vm,
                             preferred_element_type=jnp.float32), axis=0)
    return jnp.dot(ctx, wo, preferred_element_type=jnp.float32) + bo


def _proj(x, w, b):
    return jnp.dot(x, w, preferred_element_type=jnp.float32) + b


# ----------------------------------------------------------------------------
# Fused transformer kernel (grid = encoder layers ++ decoder layers)
# ----------------------------------------------------------------------------
def _fused_kernel(*refs):
    (x_ref, ebias_ref, cbias_ref,
     e_wq, e_bq, e_wk, e_bk, e_wv, e_bv, e_wo, e_bo,
     e_n1g, e_n1b, e_w1, e_b1, e_w2, e_b2, e_n2g, e_n2b,
     enc_ng, enc_nb,
     d_swv, d_sbv, d_swo, d_sbo, d_n1g, d_n1b,
     d_cwq, d_cbq, d_cwk, d_cbk, d_cwv, d_cbv, d_cwo, d_cbo,
     d_n2g, d_n2b, d_w1, d_b1, d_w2, d_b2, d_n3g, d_n3b,
     dec_ng, dec_nb, hw1, hb1, hw2, hb2,
     o_ref, enc_acc, dec_acc) = refs

    i = pl.program_id(0)
    last = N_ENC_LAYERS + N_DEC_LAYERS - 1
    E = TOKEN_LEN

    # Per-head 0/1 column masks generated in-kernel (iota + compare, no HBM).
    h_idx = jax.lax.broadcasted_iota(jnp.int32, (NHEAD, 1, E), 0)
    e_idx = jax.lax.broadcasted_iota(jnp.int32, (NHEAD, 1, E), 2)
    lo = h_idx * HEAD_DIM
    hmask = jnp.where(jnp.logical_and(e_idx >= lo, e_idx < lo + HEAD_DIM),
                      1.0, 0.0).astype(jnp.float32)

    @pl.when(i == 0)
    def _init():
        enc_acc[...] = x_ref[...]
        # decoder_input = ones([1, N, E]) (PyTorch reference), flattened to (N, E)
        dec_acc[...] = jnp.ones(dec_acc.shape, jnp.float32)

    @pl.when(i < N_ENC_LAYERS)
    def _encoder_layer():
        x = enc_acc[...]
        q = _proj(x, e_wq[...], e_bq[...])      # 1/sqrt(head_dim) folded into wq/bq
        k = _proj(x, e_wk[...], e_bk[...])
        v = _proj(x, e_wv[...], e_bv[...])
        attn = _mha_core(q, k, v, e_wo[...], e_bo[...], hmask, ebias_ref[...])
        x1 = _layer_norm(x + attn, e_n1g[...], e_n1b[...])
        x2 = _layer_norm(x1 + _ffn(x1, e_w1[...], e_b1[...], e_w2[...], e_b2[...]),
                         e_n2g[...], e_n2b[...])
        enc_acc[...] = x2

    @pl.when(i >= N_ENC_LAYERS)
    def _decoder_layer():
        x = dec_acc[...]
        # Final encoder LayerNorm (recomputed per decoder step; (M, E) is tiny).
        mem = _layer_norm(enc_acc[...], enc_ng[...], enc_nb[...])

        # Decoder self-attention: tgt_len == 1, so every query attends only to
        # itself => softmax == 1 and self-attn is exactly V -> output proj.
        # (Exact only while decoder_input is [1, N, E].)
        sv = _proj(x, d_swv[...], d_sbv[...])
        sa = jnp.dot(sv, d_swo[...], preferred_element_type=jnp.float32) + d_sbo[...]
        x1 = _layer_norm(x + sa, d_n1g[...], d_n1b[...])

        # Cross attention against encoder memory.
        q = _proj(x1, d_cwq[...], d_cbq[...])   # scale folded into cwq/cbq
        k = _proj(mem, d_cwk[...], d_cbk[...])
        v = _proj(mem, d_cwv[...], d_cbv[...])
        ca = _mha_core(q, k, v, d_cwo[...], d_cbo[...], hmask, cbias_ref[...])
        x2 = _layer_norm(x1 + ca, d_n2g[...], d_n2b[...])

        x3 = _layer_norm(x2 + _ffn(x2, d_w1[...], d_b1[...], d_w2[...], d_b2[...]),
                         d_n3g[...], d_n3b[...])
        dec_acc[...] = x3

    @pl.when(i == last)
    def _final_head():
        # Final TransformerDecoder norm + Linear -> ReLU -> Linear head.
        y = _layer_norm(dec_acc[...], dec_ng[...], dec_nb[...])
        h = jnp.maximum(
            jnp.dot(y, hw1[...], preferred_element_type=jnp.float32) + hb1[...], 0.0)
        o_ref[...] = (jnp.dot(h, hw2[...], preferred_element_type=jnp.float32)
                      + hb2[...])


# ----------------------------------------------------------------------------
# BlockSpec helpers
# ----------------------------------------------------------------------------
def _const_spec(shape):
    nd = len(shape)
    return pl.BlockSpec(tuple(shape), lambda i, _n=nd: (0,) * _n)


def _enc_spec(shape):
    # shape = (N_ENC_LAYERS, ...); layer index clamped so decoder steps reuse
    # the already-resident last encoder block (no re-DMA).
    nd = len(shape)
    return pl.BlockSpec(
        (None,) + tuple(shape[1:]),
        lambda i, _n=nd: (jnp.minimum(i, N_ENC_LAYERS - 1),) + (0,) * (_n - 1))


def _dec_spec(shape):
    nd = len(shape)
    return pl.BlockSpec(
        (None,) + tuple(shape[1:]),
        lambda i, _n=nd: (jnp.maximum(i - N_ENC_LAYERS, 0),) + (0,) * (_n - 1))


def _block_bias(n, lq, lk):
    """Additive block-diagonal batch mask: 0 within a batch block, -1e30 across."""
    qb = jnp.repeat(jnp.arange(n, dtype=jnp.int32), lq)
    kb = jnp.repeat(jnp.arange(n, dtype=jnp.int32), lk)
    return jnp.where(qb[:, None] == kb[None, :], 0.0, NEG_INF).astype(jnp.float32)


_ENC_KEYS = ('wq', 'bq', 'wk', 'bk', 'wv', 'bv', 'wo', 'bo',
             'n1g', 'n1b', 'w1', 'b1', 'w2', 'b2', 'n2g', 'n2b')

_DEC_KEYS = ('swv', 'sbv', 'swo', 'sbo', 'n1g', 'n1b',
             'cwq', 'cbq', 'cwk', 'cbk', 'cwv', 'cbv', 'cwo', 'cbo', 'n2g', 'n2b',
             'w1', 'b1', 'w2', 'b2', 'n3g', 'n3b')


# ----------------------------------------------------------------------------
# pallas_call wrapper
# ----------------------------------------------------------------------------
def _fused_transformer(params, x2d, n_batch, seq_len):
    E = TOKEN_LEN
    M = n_batch * seq_len
    enc, dec = params['enc'], params['dec']

    enc_bias = _block_bias(n_batch, seq_len, seq_len)     # (M, M)
    cross_bias = _block_bias(n_batch, 1, seq_len)         # (N, M)

    enc_stacked = [enc[k] for k in _ENC_KEYS]
    dec_stacked = [dec[k] for k in _DEC_KEYS]
    enc_tail = [params['enc_norm_g'], params['enc_norm_b']]
    dec_tail = [params['dec_norm_g'], params['dec_norm_b'],
                params['head_w1'], params['head_b1'],
                params['head_w2'], params['head_b2']]

    inputs = ([x2d, enc_bias, cross_bias]
              + enc_stacked + enc_tail + dec_stacked + dec_tail)
    in_specs = ([_const_spec(x2d.shape), _const_spec(enc_bias.shape),
                 _const_spec(cross_bias.shape)]
                + [_enc_spec(a.shape) for a in enc_stacked]
                + [_const_spec(a.shape) for a in enc_tail]
                + [_dec_spec(a.shape) for a in dec_stacked]
                + [_const_spec(a.shape) for a in dec_tail])

    return pl.pallas_call(
        _fused_kernel,
        grid=(N_ENC_LAYERS + N_DEC_LAYERS,),
        out_shape=jax.ShapeDtypeStruct((n_batch, E), jnp.float32),
        in_specs=in_specs,
        out_specs=_const_spec((n_batch, E)),
        scratch_shapes=[pltpu.VMEM((M, E), jnp.float32),        # encoder acts / memory
                        pltpu.VMEM((n_batch, E), jnp.float32)],  # decoder acts
        compiler_params=pltpu.CompilerParams(
            dimension_semantics=("arbitrary",),
            vmem_limit_bytes=32 * 1024 * 1024),
    )(*inputs)


# ----------------------------------------------------------------------------
# Forward pass
# ----------------------------------------------------------------------------
def make_positional_encoding(max_len, d_model):
    position = jnp.arange(max_len, dtype=jnp.float32)[:, None]
    div_term = jnp.exp(jnp.arange(0, d_model, 2, dtype=jnp.float32)
                       * (-math.log(10000.0) / d_model))
    pe = jnp.zeros((max_len, d_model), jnp.float32)
    pe = pe.at[:, 0::2].set(jnp.sin(position * div_term))
    pe = pe.at[:, 1::2].set(jnp.cos(position * div_term))
    return pe


def action_net_forward(params, state):
    """state: (S, N, E) seq-first float32 -> (1, N, E)  (batch_first=False)."""
    S, N, E = state.shape
    assert E == TOKEN_LEN
    x = state + params['pe'][:S][:, None, :]            # PositionalEncoding (dropout=id)
    # Batch-major rows (n*S + s) so per-batch attention blocks are contiguous.
    x2d = jnp.transpose(x, (1, 0, 2)).reshape(N * S, E)
    out = _fused_transformer(params, x2d, N, S)          # (N, E) -- tgt len 1
    return out.reshape(1, N, E)


# ----------------------------------------------------------------------------
# Deterministic parameter initialization (synthetic — not a checkpoint load).
# Weight matrices are pre-transposed (in, out), stacked over layers, cast to
# bfloat16 (HBM traffic is the bottleneck); biases / LayerNorm params stay f32.
# The 1/sqrt(head_dim) attention scale is folded into wq / bq.
# ----------------------------------------------------------------------------
def init_params(key, max_len=64):
    E, H = TOKEN_LEN, FF
    keys = iter(jax.random.split(key, 2048))
    qscale = 1.0 / math.sqrt(HEAD_DIM)

    def wf(shape, scale=0.02):
        return jax.random.normal(next(keys), shape, jnp.float32) * scale

    def bf(shape, scale=0.01):
        return jax.random.normal(next(keys), shape, jnp.float32) * scale

    ones = lambda s: jnp.ones(s, jnp.float32)
    zeros = lambda s: jnp.zeros(s, jnp.float32)

    def enc_layer():
        return {'wq': (wf((E, E)) * qscale).astype(WDTYPE), 'bq': bf((1, E)) * qscale,
                'wk': wf((E, E)).astype(WDTYPE), 'bk': bf((1, E)),
                'wv': wf((E, E)).astype(WDTYPE), 'bv': bf((1, E)),
                'wo': wf((E, E)).astype(WDTYPE), 'bo': bf((1, E)),
                'n1g': ones((1, E)), 'n1b': zeros((1, E)),
                'w1': wf((E, H)).astype(WDTYPE), 'b1': bf((1, H)),
                'w2': wf((H, E)).astype(WDTYPE), 'b2': bf((1, E)),
                'n2g': ones((1, E)), 'n2b': zeros((1, E))}

    def dec_layer():
        # Self-attn Q/K are mathematically irrelevant for tgt_len == 1 and are
        # not stored (exactly matches the reference output).
        return {'swv': wf((E, E)).astype(WDTYPE), 'sbv': bf((1, E)),
                'swo': wf((E, E)).astype(WDTYPE), 'sbo': bf((1, E)),
                'n1g': ones((1, E)), 'n1b': zeros((1, E)),
                'cwq': (wf((E, E)) * qscale).astype(WDTYPE), 'cbq': bf((1, E)) * qscale,
                'cwk': wf((E, E)).astype(WDTYPE), 'cbk': bf((1, E)),
                'cwv': wf((E, E)).astype(WDTYPE), 'cbv': bf((1, E)),
                'cwo': wf((E, E)).astype(WDTYPE), 'cbo': bf((1, E)),
                'n2g': ones((1, E)), 'n2b': zeros((1, E)),
                'w1': wf((E, H)).astype(WDTYPE), 'b1': bf((1, H)),
                'w2': wf((H, E)).astype(WDTYPE), 'b2': bf((1, E)),
                'n3g': ones((1, E)), 'n3b': zeros((1, E))}

    def stack(layers, key_order):
        return {k: jnp.stack([l[k] for l in layers], axis=0) for k in key_order}

    return dict(
        pe=make_positional_encoding(max_len, TOKEN_LEN),
        enc=stack([enc_layer() for _ in range(N_ENC_LAYERS)], _ENC_KEYS),
        dec=stack([dec_layer() for _ in range(N_DEC_LAYERS)], _DEC_KEYS),
        enc_norm_g=ones((1, E)), enc_norm_b=zeros((1, E)),
        dec_norm_g=ones((1, E)), dec_norm_b=zeros((1, E)),
        head_w1=wf((E, E)).astype(WDTYPE), head_b1=bf((1, E)),
        head_w2=wf((E, E)).astype(WDTYPE), head_b2=bf((1, E)),
    )


if __name__ == "__main__":
    key = jax.random.PRNGKey(0)
    pkey, xkey = jax.random.split(key)
    params = init_params(pkey)

    S, N = 8, 2                                   # seq=8, batch=2, d_model=288 (fixed)
    state = jax.random.normal(xkey, (S, N, TOKEN_LEN), jnp.float32)

    fwd = jax.jit(action_net_forward)
    out = jax.block_until_ready(fwd(params, state))

    assert out.shape == (1, N, TOKEN_LEN), out.shape
    assert bool(jnp.all(jnp.isfinite(out)))
    print("KERNEL_OK")
</pallas_src>

<mosaic_0001>
module attributes {stable_mosaic.version = 11 : i64} {
  func.func @_fused_kernel(%arg0: i32, %arg1: memref<16x288xf32, #tpu.memory_space<vmem>>, %arg2: memref<16x16xf32, #tpu.memory_space<vmem>>, %arg3: memref<2x16xf32, #tpu.memory_space<vmem>>, %arg4: memref<1x288x288xbf16, #tpu.memory_space<vmem>>, %arg5: memref<1x1x288xf32, #tpu.memory_space<vmem>>, %arg6: memref<1x288x288xbf16, #tpu.memory_space<vmem>>, %arg7: memref<1x1x288xf32, #tpu.memory_space<vmem>>, %arg8: memref<1x288x288xbf16, #tpu.memory_space<vmem>>, %arg9: memref<1x1x288xf32, #tpu.memory_space<vmem>>, %arg10: memref<1x288x288xbf16, #tpu.memory_space<vmem>>, %arg11: memref<1x1x288xf32, #tpu.memory_space<vmem>>, %arg12: memref<1x1x288xf32, #tpu.memory_space<vmem>>, %arg13: memref<1x1x288xf32, #tpu.memory_space<vmem>>, %arg14: memref<1x288x576xbf16, #tpu.memory_space<vmem>>, %arg15: memref<1x1x576xf32, #tpu.memory_space<vmem>>, %arg16: memref<1x576x288xbf16, #tpu.memory_space<vmem>>, %arg17: memref<1x1x288xf32, #tpu.memory_space<vmem>>, %arg18: memref<1x1x288xf32, #tpu.memory_space<vmem>>, %arg19: memref<1x1x288xf32, #tpu.memory_space<vmem>>, %arg20: memref<1x288xf32, #tpu.memory_space<vmem>>, %arg21: memref<1x288xf32, #tpu.memory_space<vmem>>, %arg22: memref<1x288x288xbf16, #tpu.memory_space<vmem>>, %arg23: memref<1x1x288xf32, #tpu.memory_space<vmem>>, %arg24: memref<1x288x288xbf16, #tpu.memory_space<vmem>>, %arg25: memref<1x1x288xf32, #tpu.memory_space<vmem>>, %arg26: memref<1x1x288xf32, #tpu.memory_space<vmem>>, %arg27: memref<1x1x288xf32, #tpu.memory_space<vmem>>, %arg28: memref<1x288x288xbf16, #tpu.memory_space<vmem>>, %arg29: memref<1x1x288xf32, #tpu.memory_space<vmem>>, %arg30: memref<1x288x288xbf16, #tpu.memory_space<vmem>>, %arg31: memref<1x1x288xf32, #tpu.memory_space<vmem>>, %arg32: memref<1x288x288xbf16, #tpu.memory_space<vmem>>, %arg33: memref<1x1x288xf32, #tpu.memory_space<vmem>>, %arg34: memref<1x288x288xbf16, #tpu.memory_space<vmem>>, %arg35: memref<1x1x288xf32, #tpu.memory_space<vmem>>, %arg36: memref<1x1x288xf32, #tpu.memory_space<vmem>>, %arg37: memref<1x1x288xf32, #tpu.memory_space<vmem>>, %arg38: memref<1x288x576xbf16, #tpu.memory_space<vmem>>, %arg39: memref<1x1x576xf32, #tpu.memory_space<vmem>>, %arg40: memref<1x576x288xbf16, #tpu.memory_space<vmem>>, %arg41: memref<1x1x288xf32, #tpu.memory_space<vmem>>, %arg42: memref<1x1x288xf32, #tpu.memory_space<vmem>>, %arg43: memref<1x1x288xf32, #tpu.memory_space<vmem>>, %arg44: memref<1x288xf32, #tpu.memory_space<vmem>>, %arg45: memref<1x288xf32, #tpu.memory_space<vmem>>, %arg46: memref<288x288xbf16, #tpu.memory_space<vmem>>, %arg47: memref<1x288xf32, #tpu.memory_space<vmem>>, %arg48: memref<288x288xbf16, #tpu.memory_space<vmem>>, %arg49: memref<1x288xf32, #tpu.memory_space<vmem>>, %arg50: memref<2x288xf32, #tpu.memory_space<vmem>>, %arg51: memref<16x288xf32, #tpu.memory_space<vmem>>, %arg52: memref<2x288xf32, #tpu.memory_space<vmem>>) attributes {dimension_semantics = [#tpu.dimension_semantics<arbitrary>], iteration_bounds = array<i64: 12>, scalar_prefetch = 0 : i64, scratch_operands = 2 : i64, tpu.core_type = #tpu.core_type<tc>, window_params = [{pipeline_mode = #tpu.pipeline_mode<synchronous>, transform_indices = @transform_0, window_bounds = array<i64: 16, 288>}, {pipeline_mode = #tpu.pipeline_mode<synchronous>, transform_indices = @transform_1, window_bounds = array<i64: 16, 16>}, {pipeline_mode = #tpu.pipeline_mode<synchronous>, transform_indices = @transform_2, window_bounds = array<i64: 2, 16>}, {transform_indices = @transform_3, window_bounds = array<i64: 1, 288, 288>}, {transform_indices = @transform_4, window_bounds = array<i64: 1, 1, 288>}, {transform_indices = @transform_5, window_bounds = array<i64: 1, 288, 288>}, {transform_indices = @transform_6, window_bounds = array<i64: 1, 1, 288>}, {transform_indices = @transform_7, window_bounds = array<i64: 1, 288, 288>}, {transform_indices = @transform_8, window_bounds = array<i64: 1, 1, 288>}, {transform_indices = @transform_9, window_bounds = array<i64: 1, 288, 288>}, {transform_indices = @transform_10, window_bounds = array<i64: 1, 1, 288>}, {transform_indices = @transform_11, window_bounds = array<i64: 1, 1, 288>}, {transform_indices = @transform_12, window_bounds = array<i64: 1, 1, 288>}, {transform_indices = @transform_13, window_bounds = array<i64: 1, 288, 576>}, {transform_indices = @transform_14, window_bounds = array<i64: 1, 1, 576>}, {transform_indices = @transform_15, window_bounds = array<i64: 1, 576, 288>}, {transform_indices = @transform_16, window_bounds = array<i64: 1, 1, 288>}, {transform_indices = @transform_17, window_bounds = array<i64: 1, 1, 288>}, {transform_indices = @transform_18, window_bounds = array<i64: 1, 1, 288>}, {pipeline_mode = #tpu.pipeline_mode<synchronous>, transform_indices = @transform_19, window_bounds = array<i64: 1, 288>}, {pipeline_mode = #tpu.pipeline_mode<synchronous>, transform_indices = @transform_20, window_bounds = array<i64: 1, 288>}, {transform_indices = @transform_21, window_bounds = array<i64: 1, 288, 288>}, {transform_indices = @transform_22, window_bounds = array<i64: 1, 1, 288>}, {transform_indices = @transform_23, window_bounds = array<i64: 1, 288, 288>}, {transform_indices = @transform_24, window_bounds = array<i64: 1, 1, 288>}, {transform_indices = @transform_25, window_bounds = array<i64: 1, 1, 288>}, {transform_indices = @transform_26, window_bounds = array<i64: 1, 1, 288>}, {transform_indices = @transform_27, window_bounds = array<i64: 1, 288, 288>}, {transform_indices = @transform_28, window_bounds = array<i64: 1, 1, 288>}, {transform_indices = @transform_29, window_bounds = array<i64: 1, 288, 288>}, {transform_indices = @transform_30, window_bounds = array<i64: 1, 1, 288>}, {transform_indices = @transform_31, window_bounds = array<i64: 1, 288, 288>}, {transform_indices = @transform_32, window_bounds = array<i64: 1, 1, 288>}, {transform_indices = @transform_33, window_bounds = array<i64: 1, 288, 288>}, {transform_indices = @transform_34, window_bounds = array<i64: 1, 1, 288>}, {transform_indices = @transform_35, window_bounds = array<i64: 1, 1, 288>}, {transform_indices = @transform_36, window_bounds = array<i64: 1, 1, 288>}, {transform_indices = @transform_37, window_bounds = array<i64: 1, 288, 576>}, {transform_indices = @transform_38, window_bounds = array<i64: 1, 1, 576>}, {transform_indices = @transform_39, window_bounds = array<i64: 1, 576, 288>}, {transform_indices = @transform_40, window_bounds = array<i64: 1, 1, 288>}, {transform_indices = @transform_41, window_bounds = array<i64: 1, 1, 288>}, {transform_indices = @transform_42, window_bounds = array<i64: 1, 1, 288>}, {pipeline_mode = #tpu.pipeline_mode<synchronous>, transform_indices = @transform_43, window_bounds = array<i64: 1, 288>}, {pipeline_mode = #tpu.pipeline_mode<synchronous>, transform_indices = @transform_44, window_bounds = array<i64: 1, 288>}, {pipeline_mode = #tpu.pipeline_mode<synchronous>, transform_indices = @transform_45, window_bounds = array<i64: 288, 288>}, {pipeline_mode = #tpu.pipeline_mode<synchronous>, transform_indices = @transform_46, window_bounds = array<i64: 1, 288>}, {pipeline_mode = #tpu.pipeline_mode<synchronous>, transform_indices = @transform_47, window_bounds = array<i64: 288, 288>}, {pipeline_mode = #tpu.pipeline_mode<synchronous>, transform_indices = @transform_48, window_bounds = array<i64: 1, 288>}, {pipeline_mode = #tpu.pipeline_mode<synchronous>, transform_indices = @transform_49, window_bounds = array<i64: 2, 288>}]} {
    %0 = tpu.iota {dimensions = array<i32: 0>} : vector<8x1x288xi32>
    %1 = tpu.iota {dimensions = array<i32: 2>} : vector<8x1x288xi32>
    %c36_i32 = arith.constant 36 : i32
    %2 = vector.broadcast %c36_i32 : i32 to vector<8x1x288xi32>
    %3 = arith.muli %0, %2 : vector<8x1x288xi32>
    %4 = arith.cmpi sge, %1, %3 : vector<8x1x288xi32>
    %c36_i32_0 = arith.constant 36 : i32
    %5 = vector.broadcast %c36_i32_0 : i32 to vector<8x1x288xi32>
    %6 = arith.addi %3, %5 : vector<8x1x288xi32>
    %7 = arith.cmpi slt, %1, %6 : vector<8x1x288xi32>
    %8 = arith.andi %4, %7 : vector<8x1x288xi1>
    %cst = arith.constant 1.000000e+00 : f32
    %cst_1 = arith.constant 0.000000e+00 : f32
    %9 = vector.broadcast %cst : f32 to vector<8x1x288xf32>
    %10 = vector.broadcast %cst_1 : f32 to vector<8x1x288xf32>
    %11 = arith.select %8, %9, %10 : vector<8x1x288xi1>, vector<8x1x288xf32>
    %c0_i32 = arith.constant 0 : i32
    %12 = arith.cmpi eq, %arg0, %c0_i32 : i32
    %13 = arith.extui %12 : i1 to i32
    %c0_i32_2 = arith.constant 0 : i32
    %14 = arith.cmpi ne, %13, %c0_i32_2 : i32
    scf.if %14 {
      %c0 = arith.constant 0 : index
      %c0_7 = arith.constant 0 : index
      %24 = vector.load %arg1[%c0, %c0_7] : memref<16x288xf32, #tpu.memory_space<vmem>>, vector<16x288xf32>
      %c0_8 = arith.constant 0 : index
      %c0_9 = arith.constant 0 : index
      %25 = vector.load %arg51[%c0_8, %c0_9] : memref<16x288xf32, #tpu.memory_space<vmem>>, vector<16x288xf32>
      tpu.vector_store %arg51[%c0_8, %c0_9], %24 {strides = array<i32>} : memref<16x288xf32, #tpu.memory_space<vmem>>, vector<16x288xf32>,
      %cst_10 = arith.constant 1.000000e+00 : f32
      %26 = vector.broadcast %cst_10 : f32 to vector<2x288xf32>
      %c0_11 = arith.constant 0 : index
      %c0_12 = arith.constant 0 : index
      %27 = vector.load %arg52[%c0_11, %c0_12] : memref<2x288xf32, #tpu.memory_space<vmem>>, vector<2x288xf32>
      tpu.vector_store %arg52[%c0_11, %c0_12], %26 {strides = array<i32>} : memref<2x288xf32, #tpu.memory_space<vmem>>, vector<2x288xf32>,
    } else {
    }
    %c6_i32 = arith.constant 6 : i32
    %15 = arith.cmpi slt, %arg0, %c6_i32 : i32
    %16 = arith.extui %15 : i1 to i32
    %c0_i32_3 = arith.constant 0 : i32
    %17 = arith.cmpi ne, %16, %c0_i32_3 : i32
    scf.if %17 {
      %c0 = arith.constant 0 : index
      %c0_7 = arith.constant 0 : index
      %24 = vector.load %arg51[%c0, %c0_7] : memref<16x288xf32, #tpu.memory_space<vmem>>, vector<16x288xf32>
      %c0_8 = arith.constant 0 : index
      %c0_9 = arith.constant 0 : index
      %c0_10 = arith.constant 0 : index
      %25 = vector.load %arg4[%c0_8, %c0_9, %c0_10] : memref<1x288x288xbf16, #tpu.memory_space<vmem>>, vector<1x288x288xbf16>
      %26 = vector.shape_cast %25 : vector<1x288x288xbf16> to vector<288x288xbf16>
      %c0_11 = arith.constant 0 : index
      %c0_12 = arith.constant 0 : index
      %c0_13 = arith.constant 0 : index
      %27 = vector.load %arg5[%c0_11, %c0_12, %c0_13] : memref<1x1x288xf32, #tpu.memory_space<vmem>>, vector<1x1x288xf32>
      %28 = vector.shape_cast %27 : vector<1x1x288xf32> to vector<1x288xf32>
      %cst_14 = arith.constant dense<0.000000e+00> : vector<16x288xf32>
      %29 = tpu.matmul %24, %26, %cst_14 {dimension_numbers = #tpu.dot_dimension_numbers<[1], [0], [0], [1], [0, 0, 1, 1], [], []>} : vector<16x288xf32>, vector<288x288xbf16>, vector<16x288xf32> -> vector<16x288xf32>
      %30 = vector.broadcast %28 : vector<1x288xf32> to vector<16x288xf32>
      %31 = arith.addf %29, %30 : vector<16x288xf32>
      %c0_15 = arith.constant 0 : index
      %c0_16 = arith.constant 0 : index
      %c0_17 = arith.constant 0 : index
      %32 = vector.load %arg6[%c0_15, %c0_16, %c0_17] : memref<1x288x288xbf16, #tpu.memory_space<vmem>>, vector<1x288x288xbf16>
      %33 = vector.shape_cast %32 : vector<1x288x288xbf16> to vector<288x288xbf16>
      %c0_18 = arith.constant 0 : index
      %c0_19 = arith.constant 0 : index
      %c0_20 = arith.constant 0 : index
      %34 = vector.load %arg7[%c0_18, %c0_19, %c0_20] : memref<1x1x288xf32, #tpu.memory_space<vmem>>, vector<1x1x288xf32>
      %35 = vector.shape_cast %34 : vector<1x1x288xf32> to vector<1x288xf32>
      %cst_21 = arith.constant dense<0.000000e+00> : vector<16x288xf32>
      %36 = tpu.matmul %24, %33, %cst_21 {dimension_numbers = #tpu.dot_dimension_numbers<[1], [0], [0], [1], [0, 0, 1, 1], [], []>} : vector<16x288xf32>, vector<288x288xbf16>, vector<16x288xf32> -> vector<16x288xf32>
      %37 = vector.broadcast %35 : vector<1x288xf32> to vector<16x288xf32>
      %38 = arith.addf %36, %37 : vector<16x288xf32>
      %c0_22 = arith.constant 0 : index
      %c0_23 = arith.constant 0 : index
      %c0_24 = arith.constant 0 : index
      %39 = vector.load %arg8[%c0_22, %c0_23, %c0_24] : memref<1x288x288xbf16, #tpu.memory_space<vmem>>, vector<1x288x288xbf16>
      %40 = vector.shape_cast %39 : vector<1x288x288xbf16> to vector<288x288xbf16>
      %c0_25 = arith.constant 0 : index
      %c0_26 = arith.constant 0 : index
      %c0_27 = arith.constant 0 : index
      %41 = vector.load %arg9[%c0_25, %c0_26, %c0_27] : memref<1x1x288xf32, #tpu.memory_space<vmem>>, vector<1x1x288xf32>
      %42 = vector.shape_cast %41 : vector<1x1x288xf32> to vector<1x288xf32>
      %cst_28 = arith.constant dense<0.000000e+00> : vector<16x288xf32>
      %43 = tpu.matmul %24, %40, %cst_28 {dimension_numbers = #tpu.dot_dimension_numbers<[1], [0], [0], [1], [0, 0, 1, 1], [], []>} : vector<16x288xf32>, vector<288x288xbf16>, vector<16x288xf32> -> vector<16x288xf32>
      %44 = vector.broadcast %42 : vector<1x288xf32> to vector<16x288xf32>
      %45 = arith.addf %43, %44 : vector<16x288xf32>
      %c0_29 = arith.constant 0 : index
      %c0_30 = arith.constant 0 : index
      %c0_31 = arith.constant 0 : index
      %46 = vector.load %arg10[%c0_29, %c0_30, %c0_31] : memref<1x288x288xbf16, #tpu.memory_space<vmem>>, vector<1x288x288xbf16>
      %47 = vector.shape_cast %46 : vector<1x288x288xbf16> to vector<288x288xbf16>
      %c0_32 = arith.constant 0 : index
      %c0_33 = arith.constant 0 : index
      %c0_34 = arith.constant 0 : index
      %48 = vector.load %arg11[%c0_32, %c0_33, %c0_34] : memref<1x1x288xf32, #tpu.memory_space<vmem>>, vector<1x1x288xf32>
      %49 = vector.shape_cast %48 : vector<1x1x288xf32> to vector<1x288xf32>
      %c0_35 = arith.constant 0 : index
      %c0_36 = arith.constant 0 : index
      %50 = vector.load %arg2[%c0_35, %c0_36] : memref<16x16xf32, #tpu.memory_space<vmem>>, vector<16x16xf32>
      %51 = vector.shape_cast %31 : vector<16x288xf32> to vector<1x16x288xf32>
      %52 = vector.broadcast %51 : vector<1x16x288xf32> to vector<8x16x288xf32>
      %53 = vector.broadcast %11 : vector<8x1x288xf32> to vector<8x16x288xf32>
      %54 = arith.mulf %52, %53 : vector<8x16x288xf32>
      %55 = vector.shape_cast %38 : vector<16x288xf32> to vector<1x16x288xf32>
      %56 = vector.shape_cast %55 : vector<1x16x288xf32> to vector<1x16x288xf32>
      %57 = vector.broadcast %56 : vector<1x16x288xf32> to vector<8x16x288xf32>
      "tpu.trace_start"() <{level = 10 : i32, message = "hqe,hke->hqk"}> : () -> ()
      %cst_37 = arith.constant dense<0.000000e+00> : vector<8x16x16xf32>
      %58 = tpu.matmul %54, %57, %cst_37 {dimension_numbers = #tpu.dot_dimension_numbers<[2], [2], [1], [1], [0, 0, 0, 1, 1, 1], [0], [0]>} : vector<8x16x288xf32>, vector<8x16x288xf32>, vector<8x16x16xf32> -> vector<8x16x16xf32>
      "tpu.trace_stop"() : () -> ()
      %59 = vector.shape_cast %50 : vector<16x16xf32> to vector<1x16x16xf32>
      %60 = vector.broadcast %59 : vector<1x16x16xf32> to vector<8x16x16xf32>
      %61 = arith.addf %58, %60 : vector<8x16x16xf32>
      %cst_38 = arith.constant dense<0xFF800000> : vector<8x16xf32>
      %62 = vector.multi_reduction <maximumf>, %61, %cst_38 [2] : vector<8x16x16xf32> to vector<8x16xf32>
      %63 = vector.shape_cast %62 : vector<8x16xf32> to vector<8x16x1xf32>
      %64 = vector.broadcast %63 : vector<8x16x1xf32> to vector<8x16x16xf32>
      %65 = arith.subf %61, %64 : vector<8x16x16xf32>
      %66 = math.exp %65 : vector<8x16x16xf32>
      %cst_39 = arith.constant dense<0.000000e+00> : vector<8x16xf32>
      %67 = vector.multi_reduction <add>, %66, %cst_39 [2] : vector<8x16x16xf32> to vector<8x16xf32>
      %68 = vector.shape_cast %67 : vector<8x16xf32> to vector<8x16x1xf32>
      %69 = vector.broadcast %68 : vector<8x16x1xf32> to vector<8x16x16xf32>
      %70 = arith.divf %66, %69 : vector<8x16x16xf32>
      %71 = vector.shape_cast %45 : vector<16x288xf32> to vector<1x16x288xf32>
      %72 = vector.broadcast %71 : vector<1x16x288xf32> to vector<8x16x288xf32>
      %73 = vector.broadcast %11 : vector<8x1x288xf32> to vector<8x16x288xf32>
      %74 = arith.mulf %72, %73 : vector<8x16x288xf32>
      "tpu.trace_start"() <{level = 10 : i32, message = "hqk,hke->hqe"}> : () -> ()
      %cst_40 = arith.constant dense<0.000000e+00> : vector<8x16x288xf32>
      %75 = tpu.matmul %70, %74, %cst_40 {dimension_numbers = #tpu.dot_dimension_numbers<[2], [1], [1], [2], [0, 0, 0, 1, 1, 2], [0], [0]>} : vector<8x16x16xf32>, vector<8x16x288xf32>, vector<8x16x288xf32> -> vector<8x16x288xf32>
      "tpu.trace_stop"() : () -> ()
      %cst_41 = arith.constant dense<0.000000e+00> : vector<16x288xf32>
      %76 = vector.multi_reduction <add>, %75, %cst_41 [0] : vector<8x16x288xf32> to vector<16x288xf32>
      %cst_42 = arith.constant dense<0.000000e+00> : vector<16x288xf32>
      %77 = tpu.matmul %76, %47, %cst_42 {dimension_numbers = #tpu.dot_dimension_numbers<[1], [0], [0], [1], [0, 0, 1, 1], [], []>} : vector<16x288xf32>, vector<288x288xbf16>, vector<16x288xf32> -> vector<16x288xf32>
      %78 = vector.broadcast %49 : vector<1x288xf32> to vector<16x288xf32>
      %79 = arith.addf %77, %78 : vector<16x288xf32>
      %80 = arith.addf %24, %79 : vector<16x288xf32>
      %c0_43 = arith.constant 0 : index
      %c0_44 = arith.constant 0 : index
      %c0_45 = arith.constant 0 : index
      %81 = vector.load %arg12[%c0_43, %c0_44, %c0_45] : memref<1x1x288xf32, #tpu.memory_space<vmem>>, vector<1x1x288xf32>
      %82 = vector.shape_cast %81 : vector<1x1x288xf32> to vector<1x288xf32>
      %c0_46 = arith.constant 0 : index
      %c0_47 = arith.constant 0 : index
      %c0_48 = arith.constant 0 : index
      %83 = vector.load %arg13[%c0_46, %c0_47, %c0_48] : memref<1x1x288xf32, #tpu.memory_space<vmem>>, vector<1x1x288xf32>
      %84 = vector.shape_cast %83 : vector<1x1x288xf32> to vector<1x288xf32>
      %cst_49 = arith.constant dense<0.000000e+00> : vector<16xf32>
      %85 = vector.multi_reduction <add>, %80, %cst_49 [1] : vector<16x288xf32> to vector<16xf32>
      %86 = vector.shape_cast %85 : vector<16xf32> to vector<16x1xf32>
      %cst_50 = arith.constant 2.880000e+02 : f32
      %87 = vector.broadcast %cst_50 : f32 to vector<16x1xf32>
      %88 = arith.divf %86, %87 : vector<16x1xf32>
      %89 = vector.broadcast %88 : vector<16x1xf32> to vector<16x288xf32>
      %90 = arith.subf %80, %89 : vector<16x288xf32>
      %91 = arith.mulf %90, %90 : vector<16x288xf32>
      %cst_51 = arith.constant dense<0.000000e+00> : vector<16xf32>
      %92 = vector.multi_reduction <add>, %91, %cst_51 [1] : vector<16x288xf32> to vector<16xf32>
      %93 = vector.shape_cast %92 : vector<16xf32> to vector<16x1xf32>
      %cst_52 = arith.constant 2.880000e+02 : f32
      %94 = vector.broadcast %cst_52 : f32 to vector<16x1xf32>
      %95 = arith.divf %93, %94 : vector<16x1xf32>
      %cst_53 = arith.constant 9.99999974E-6 : f32
      %96 = vector.broadcast %cst_53 : f32 to vector<16x1xf32>
      %97 = arith.addf %95, %96 : vector<16x1xf32>
      %98 = math.rsqrt %97 : vector<16x1xf32>
      %99 = vector.broadcast %98 : vector<16x1xf32> to vector<16x288xf32>
      %100 = arith.mulf %90, %99 : vector<16x288xf32>
      %101 = vector.broadcast %82 : vector<1x288xf32> to vector<16x288xf32>
      %102 = arith.mulf %100, %101 : vector<16x288xf32>
      %103 = vector.broadcast %84 : vector<1x288xf32> to vector<16x288xf32>
      %104 = arith.addf %102, %103 : vector<16x288xf32>
      %c0_54 = arith.constant 0 : index
      %c0_55 = arith.constant 0 : index
      %c0_56 = arith.constant 0 : index
      %105 = vector.load %arg14[%c0_54, %c0_55, %c0_56] : memref<1x288x576xbf16, #tpu.memory_space<vmem>>, vector<1x288x576xbf16>
      %106 = vector.shape_cast %105 : vector<1x288x576xbf16> to vector<288x576xbf16>
      %c0_57 = arith.constant 0 : index
      %c0_58 = arith.constant 0 : index
      %c0_59 = arith.constant 0 : index
      %107 = vector.load %arg15[%c0_57, %c0_58, %c0_59] : memref<1x1x576xf32, #tpu.memory_space<vmem>>, vector<1x1x576xf32>
      %108 = vector.shape_cast %107 : vector<1x1x576xf32> to vector<1x576xf32>
      %c0_60 = arith.constant 0 : index
      %c0_61 = arith.constant 0 : index
      %c0_62 = arith.constant 0 : index
      %109 = vector.load %arg16[%c0_60, %c0_61, %c0_62] : memref<1x576x288xbf16, #tpu.memory_space<vmem>>, vector<1x576x288xbf16>
      %110 = vector.shape_cast %109 : vector<1x576x288xbf16> to vector<576x288xbf16>
      %c0_63 = arith.constant 0 : index
      %c0_64 = arith.constant 0 : index
      %c0_65 = arith.constant 0 : index
      %111 = vector.load %arg17[%c0_63, %c0_64, %c0_65] : memref<1x1x288xf32, #tpu.memory_space<vmem>>, vector<1x1x288xf32>
      %112 = vector.shape_cast %111 : vector<1x1x288xf32> to vector<1x288xf32>
      %cst_66 = arith.constant dense<0.000000e+00> : vector<16x576xf32>
      %113 = tpu.matmul %104, %106, %cst_66 {dimension_numbers = #tpu.dot_dimension_numbers<[1], [0], [0], [1], [0, 0, 1, 1], [], []>} : vector<16x288xf32>, vector<288x576xbf16>, vector<16x576xf32> -> vector<16x576xf32>
      %114 = vector.broadcast %108 : vector<1x576xf32> to vector<16x576xf32>
      %115 = arith.addf %113, %114 : vector<16x576xf32>
      %cst_67 = arith.constant 0.000000e+00 : f32
      %116 = vector.broadcast %cst_67 : f32 to vector<16x576xf32>
      %117 = arith.maximumf %115, %116 : vector<16x576xf32>
      %cst_68 = arith.constant dense<0.000000e+00> : vector<16x288xf32>
      %118 = tpu.matmul %117, %110, %cst_68 {dimension_numbers = #tpu.dot_dimension_numbers<[1], [0], [0], [1], [0, 0, 1, 1], [], []>} : vector<16x576xf32>, vector<576x288xbf16>, vector<16x288xf32> -> vector<16x288xf32>
      %119 = vector.broadcast %112 : vector<1x288xf32> to vector<16x288xf32>
      %120 = arith.addf %118, %119 : vector<16x288xf32>
      %121 = arith.addf %104, %120 : vector<16x288xf32>
      %c0_69 = arith.constant 0 : index
      %c0_70 = arith.constant 0 : index
      %c0_71 = arith.constant 0 : index
      %122 = vector.load %arg18[%c0_69, %c0_70, %c0_71] : memref<1x1x288xf32, #tpu.memory_space<vmem>>, vector<1x1x288xf32>
      %123 = vector.shape_cast %122 : vector<1x1x288xf32> to vector<1x288xf32>
      %c0_72 = arith.constant 0 : index
      %c0_73 = arith.constant 0 : index
      %c0_74 = arith.constant 0 : index
      %124 = vector.load %arg19[%c0_72, %c0_73, %c0_74] : memref<1x1x288xf32, #tpu.memory_space<vmem>>, vector<1x1x288xf32>
      %125 = vector.shape_cast %124 : vector<1x1x288xf32> to vector<1x288xf32>
      %cst_75 = arith.constant dense<0.000000e+00> : vector<16xf32>
      %126 = vector.multi_reduction <add>, %121, %cst_75 [1] : vector<16x288xf32> to vector<16xf32>
      %127 = vector.shape_cast %126 : vector<16xf32> to vector<16x1xf32>
      %cst_76 = arith.constant 2.880000e+02 : f32
      %128 = vector.broadcast %cst_76 : f32 to vector<16x1xf32>
      %129 = arith.divf %127, %128 : vector<16x1xf32>
      %130 = vector.broadcast %129 : vector<16x1xf32> to vector<16x288xf32>
      %131 = arith.subf %121, %130 : vector<16x288xf32>
      %132 = arith.mulf %131, %131 : vector<16x288xf32>
      %cst_77 = arith.constant dense<0.000000e+00> : vector<16xf32>
      %133 = vector.multi_reduction <add>, %132, %cst_77 [1] : vector<16x288xf32> to vector<16xf32>
      %134 = vector.shape_cast %133 : vector<16xf32> to vector<16x1xf32>
      %cst_78 = arith.constant 2.880000e+02 : f32
      %135 = vector.broadcast %cst_78 : f32 to vector<16x1xf32>
      %136 = arith.divf %134, %135 : vector<16x1xf32>
      %cst_79 = arith.constant 9.99999974E-6 : f32
      %137 = vector.broadcast %cst_79 : f32 to vector<16x1xf32>
      %138 = arith.addf %136, %137 : vector<16x1xf32>
      %139 = math.rsqrt %138 : vector<16x1xf32>
      %140 = vector.broadcast %139 : vector<16x1xf32> to vector<16x288xf32>
      %141 = arith.mulf %131, %140 : vector<16x288xf32>
      %142 = vector.broadcast %123 : vector<1x288xf32> to vector<16x288xf32>
      %143 = arith.mulf %141, %142 : vector<16x288xf32>
      %144 = vector.broadcast %125 : vector<1x288xf32> to vector<16x288xf32>
      %145 = arith.addf %143, %144 : vector<16x288xf32>
      %c0_80 = arith.constant 0 : index
      %c0_81 = arith.constant 0 : index
      %146 = vector.load %arg51[%c0_80, %c0_81] : memref<16x288xf32, #tpu.memory_space<vmem>>, vector<16x288xf32>
      tpu.vector_store %arg51[%c0_80, %c0_81], %145 {strides = array<i32>} : memref<16x288xf32, #tpu.memory_space<vmem>>, vector<16x288xf32>,
    } else {
    }
    %c6_i32_4 = arith.constant 6 : i32
    %18 = arith.cmpi sge, %arg0, %c6_i32_4 : i32
    %19 = arith.extui %18 : i1 to i32
    %c0_i32_5 = arith.constant 0 : i32
    %20 = arith.cmpi ne, %19, %c0_i32_5 : i32
    scf.if %20 {
      %c0 = arith.constant 0 : index
      %c0_7 = arith.constant 0 : index
      %24 = vector.load %arg52[%c0, %c0_7] : memref<2x288xf32, #tpu.memory_space<vmem>>, vector<2x288xf32>
      %c0_8 = arith.constant 0 : index
      %c0_9 = arith.constant 0 : index
      %25 = vector.load %arg51[%c0_8, %c0_9] : memref<16x288xf32, #tpu.memory_space<vmem>>, vector<16x288xf32>
      %c0_10 = arith.constant 0 : index
      %c0_11 = arith.constant 0 : index
      %26 = vector.load %arg20[%c0_10, %c0_11] : memref<1x288xf32, #tpu.memory_space<vmem>>, vector<1x288xf32>
      %c0_12 = arith.constant 0 : index
      %c0_13 = arith.constant 0 : index
      %27 = vector.load %arg21[%c0_12, %c0_13] : memref<1x288xf32, #tpu.memory_space<vmem>>, vector<1x288xf32>
      %cst_14 = arith.constant dense<0.000000e+00> : vector<16xf32>
      %28 = vector.multi_reduction <add>, %25, %cst_14 [1] : vector<16x288xf32> to vector<16xf32>
      %29 = vector.shape_cast %28 : vector<16xf32> to vector<16x1xf32>
      %cst_15 = arith.constant 2.880000e+02 : f32
      %30 = vector.broadcast %cst_15 : f32 to vector<16x1xf32>
      %31 = arith.divf %29, %30 : vector<16x1xf32>
      %32 = vector.broadcast %31 : vector<16x1xf32> to vector<16x288xf32>
      %33 = arith.subf %25, %32 : vector<16x288xf32>
      %34 = arith.mulf %33, %33 : vector<16x288xf32>
      %cst_16 = arith.constant dense<0.000000e+00> : vector<16xf32>
      %35 = vector.multi_reduction <add>, %34, %cst_16 [1] : vector<16x288xf32> to vector<16xf32>
      %36 = vector.shape_cast %35 : vector<16xf32> to vector<16x1xf32>
      %cst_17 = arith.constant 2.880000e+02 : f32
      %37 = vector.broadcast %cst_17 : f32 to vector<16x1xf32>
      %38 = arith.divf %36, %37 : vector<16x1xf32>
      %cst_18 = arith.constant 9.99999974E-6 : f32
      %39 = vector.broadcast %cst_18 : f32 to vector<16x1xf32>
      %40 = arith.addf %38, %39 : vector<16x1xf32>
      %41 = math.rsqrt %40 : vector<16x1xf32>
      %42 = vector.broadcast %41 : vector<16x1xf32> to vector<16x288xf32>
      %43 = arith.mulf %33, %42 : vector<16x288xf32>
      %44 = vector.broadcast %26 : vector<1x288xf32> to vector<16x288xf32>
      %45 = arith.mulf %43, %44 : vector<16x288xf32>
      %46 = vector.broadcast %27 : vector<1x288xf32> to vector<16x288xf32>
      %47 = arith.addf %45, %46 : vector<16x288xf32>
      %c0_19 = arith.constant 0 : index
      %c0_20 = arith.constant 0 : index
      %c0_21 = arith.constant 0 : index
      %48 = vector.load %arg22[%c0_19, %c0_20, %c0_21] : memref<1x288x288xbf16, #tpu.memory_space<vmem>>, vector<1x288x288xbf16>
      %49 = vector.shape_cast %48 : vector<1x288x288xbf16> to vector<288x288xbf16>
      %c0_22 = arith.constant 0 : index
      %c0_23 = arith.constant 0 : index
      %c0_24 = arith.constant 0 : index
      %50 = vector.load %arg23[%c0_22, %c0_23, %c0_24] : memref<1x1x288xf32, #tpu.memory_space<vmem>>, vector<1x1x288xf32>
      %51 = vector.shape_cast %50 : vector<1x1x288xf32> to vector<1x288xf32>
      %cst_25 = arith.constant dense<0.000000e+00> : vector<2x288xf32>
      %52 = tpu.matmul %24, %49, %cst_25 {dimension_numbers = #tpu.dot_dimension_numbers<[1], [0], [0], [1], [0, 0, 1, 1], [], []>} : vector<2x288xf32>, vector<288x288xbf16>, vector<2x288xf32> -> vector<2x288xf32>
      %53 = vector.broadcast %51 : vector<1x288xf32> to vector<2x288xf32>
      %54 = arith.addf %52, %53 : vector<2x288xf32>
      %c0_26 = arith.constant 0 : index
      %c0_27 = arith.constant 0 : index
      %c0_28 = arith.constant 0 : index
      %55 = vector.load %arg24[%c0_26, %c0_27, %c0_28] : memref<1x288x288xbf16, #tpu.memory_space<vmem>>, vector<1x288x288xbf16>
      %56 = vector.shape_cast %55 : vector<1x288x288xbf16> to vector<288x288xbf16>
      %cst_29 = arith.constant dense<0.000000e+00> : vector<2x288xf32>
      %57 = tpu.matmul %54, %56, %cst_29 {dimension_numbers = #tpu.dot_dimension_numbers<[1], [0], [0], [1], [0, 0, 1, 1], [], []>} : vector<2x288xf32>, vector<288x288xbf16>, vector<2x288xf32> -> vector<2x288xf32>
      %c0_30 = arith.constant 0 : index
      %c0_31 = arith.constant 0 : index
      %c0_32 = arith.constant 0 : index
      %58 = vector.load %arg25[%c0_30, %c0_31, %c0_32] : memref<1x1x288xf32, #tpu.memory_space<vmem>>, vector<1x1x288xf32>
      %59 = vector.shape_cast %58 : vector<1x1x288xf32> to vector<1x288xf32>
      %60 = vector.broadcast %59 : vector<1x288xf32> to vector<2x288xf32>
      %61 = arith.addf %57, %60 : vector<2x288xf32>
      %62 = arith.addf %24, %61 : vector<2x288xf32>
      %c0_33 = arith.constant 0 : index
      %c0_34 = arith.constant 0 : index
      %c0_35 = arith.constant 0 : index
      %63 = vector.load %arg26[%c0_33, %c0_34, %c0_35] : memref<1x1x288xf32, #tpu.memory_space<vmem>>, vector<1x1x288xf32>
      %64 = vector.shape_cast %63 : vector<1x1x288xf32> to vector<1x288xf32>
      %c0_36 = arith.constant 0 : index
      %c0_37 = arith.constant 0 : index
      %c0_38 = arith.constant 0 : index
      %65 = vector.load %arg27[%c0_36, %c0_37, %c0_38] : memref<1x1x288xf32, #tpu.memory_space<vmem>>, vector<1x1x288xf32>
      %66 = vector.shape_cast %65 : vector<1x1x288xf32> to vector<1x288xf32>
      %cst_39 = arith.constant dense<0.000000e+00> : vector<2xf32>
      %67 = vector.multi_reduction <add>, %62, %cst_39 [1] : vector<2x288xf32> to vector<2xf32>
      %68 = vector.shape_cast %67 : vector<2xf32> to vector<2x1xf32>
      %cst_40 = arith.constant 2.880000e+02 : f32
      %69 = vector.broadcast %cst_40 : f32 to vector<2x1xf32>
      %70 = arith.divf %68, %69 : vector<2x1xf32>
      %71 = vector.broadcast %70 : vector<2x1xf32> to vector<2x288xf32>
      %72 = arith.subf %62, %71 : vector<2x288xf32>
      %73 = arith.mulf %72, %72 : vector<2x288xf32>
      %cst_41 = arith.constant dense<0.000000e+00> : vector<2xf32>
      %74 = vector.multi_reduction <add>, %73, %cst_41 [1] : vector<2x288xf32> to vector<2xf32>
      %75 = vector.shape_cast %74 : vector<2xf32> to vector<2x1xf32>
      %cst_42 = arith.constant 2.880000e+02 : f32
      %76 = vector.broadcast %cst_42 : f32 to vector<2x1xf32>
      %77 = arith.divf %75, %76 : vector<2x1xf32>
      %cst_43 = arith.constant 9.99999974E-6 : f32
      %78 = vector.broadcast %cst_43 : f32 to vector<2x1xf32>
      %79 = arith.addf %77, %78 : vector<2x1xf32>
      %80 = math.rsqrt %79 : vector<2x1xf32>
      %81 = vector.broadcast %80 : vector<2x1xf32> to vector<2x288xf32>
      %82 = arith.mulf %72, %81 : vector<2x288xf32>
      %83 = vector.broadcast %64 : vector<1x288xf32> to vector<2x288xf32>
      %84 = arith.mulf %82, %83 : vector<2x288xf32>
      %85 = vector.broadcast %66 : vector<1x288xf32> to vector<2x288xf32>
      %86 = arith.addf %84, %85 : vector<2x288xf32>
      %c0_44 = arith.constant 0 : index
      %c0_45 = arith.constant 0 : index
      %c0_46 = arith.constant 0 : index
      %87 = vector.load %arg28[%c0_44, %c0_45, %c0_46] : memref<1x288x288xbf16, #tpu.memory_space<vmem>>, vector<1x288x288xbf16>
      %88 = vector.shape_cast %87 : vector<1x288x288xbf16> to vector<288x288xbf16>
      %c0_47 = arith.constant 0 : index
      %c0_48 = arith.constant 0 : index
      %c0_49 = arith.constant 0 : index
      %89 = vector.load %arg29[%c0_47, %c0_48, %c0_49] : memref<1x1x288xf32, #tpu.memory_space<vmem>>, vector<1x1x288xf32>
      %90 = vector.shape_cast %89 : vector<1x1x288xf32> to vector<1x288xf32>
      %cst_50 = arith.constant dense<0.000000e+00> : vector<2x288xf32>
      %91 = tpu.matmul %86, %88, %cst_50 {dimension_numbers = #tpu.dot_dimension_numbers<[1], [0], [0], [1], [0, 0, 1, 1], [], []>} : vector<2x288xf32>, vector<288x288xbf16>, vector<2x288xf32> -> vector<2x288xf32>
      %92 = vector.broadcast %90 : vector<1x288xf32> to vector<2x288xf32>
      %93 = arith.addf %91, %92 : vector<2x288xf32>
      %c0_51 = arith.constant 0 : index
      %c0_52 = arith.constant 0 : index
      %c0_53 = arith.constant 0 : index
      %94 = vector.load %arg30[%c0_51, %c0_52, %c0_53] : memref<1x288x288xbf16, #tpu.memory_space<vmem>>, vector<1x288x288xbf16>
      %95 = vector.shape_cast %94 : vector<1x288x288xbf16> to vector<288x288xbf16>
      %c0_54 = arith.constant 0 : index
      %c0_55 = arith.constant 0 : index
      %c0_56 = arith.constant 0 : index
      %96 = vector.load %arg31[%c0_54, %c0_55, %c0_56] : memref<1x1x288xf32, #tpu.memory_space<vmem>>, vector<1x1x288xf32>
      %97 = vector.shape_cast %96 : vector<1x1x288xf32> to vector<1x288xf32>
      %cst_57 = arith.constant dense<0.000000e+00> : vector<16x288xf32>
      %98 = tpu.matmul %47, %95, %cst_57 {dimension_numbers = #tpu.dot_dimension_numbers<[1], [0], [0], [1], [0, 0, 1, 1], [], []>} : vector<16x288xf32>, vector<288x288xbf16>, vector<16x288xf32> -> vector<16x288xf32>
      %99 = vector.broadcast %97 : vector<1x288xf32> to vector<16x288xf32>
      %100 = arith.addf %98, %99 : vector<16x288xf32>
      %c0_58 = arith.constant 0 : index
      %c0_59 = arith.constant 0 : index
      %c0_60 = arith.constant 0 : index
      %101 = vector.load %arg32[%c0_58, %c0_59, %c0_60] : memref<1x288x288xbf16, #tpu.memory_space<vmem>>, vector<1x288x288xbf16>
      %102 = vector.shape_cast %101 : vector<1x288x288xbf16> to vector<288x288xbf16>
      %c0_61 = arith.constant 0 : index
      %c0_62 = arith.constant 0 : index
      %c0_63 = arith.constant 0 : index
      %103 = vector.load %arg33[%c0_61, %c0_62, %c0_63] : memref<1x1x288xf32, #tpu.memory_space<vmem>>, vector<1x1x288xf32>
      %104 = vector.shape_cast %103 : vector<1x1x288xf32> to vector<1x288xf32>
      %cst_64 = arith.constant dense<0.000000e+00> : vector<16x288xf32>
      %105 = tpu.matmul %47, %102, %cst_64 {dimension_numbers = #tpu.dot_dimension_numbers<[1], [0], [0], [1], [0, 0, 1, 1], [], []>} : vector<16x288xf32>, vector<288x288xbf16>, vector<16x288xf32> -> vector<16x288xf32>
      %106 = vector.broadcast %104 : vector<1x288xf32> to vector<16x288xf32>
      %107 = arith.addf %105, %106 : vector<16x288xf32>
      %c0_65 = arith.constant 0 : index
      %c0_66 = arith.constant 0 : index
      %c0_67 = arith.constant 0 : index
      %108 = vector.load %arg34[%c0_65, %c0_66, %c0_67] : memref<1x288x288xbf16, #tpu.memory_space<vmem>>, vector<1x288x288xbf16>
      %109 = vector.shape_cast %108 : vector<1x288x288xbf16> to vector<288x288xbf16>
      %c0_68 = arith.constant 0 : index
      %c0_69 = arith.constant 0 : index
      %c0_70 = arith.constant 0 : index
      %110 = vector.load %arg35[%c0_68, %c0_69, %c0_70] : memref<1x1x288xf32, #tpu.memory_space<vmem>>, vector<1x1x288xf32>
      %111 = vector.shape_cast %110 : vector<1x1x288xf32> to vector<1x288xf32>
      %c0_71 = arith.constant 0 : index
      %c0_72 = arith.constant 0 : index
      %112 = vector.load %arg3[%c0_71, %c0_72] : memref<2x16xf32, #tpu.memory_space<vmem>>, vector<2x16xf32>
      %113 = vector.shape_cast %93 : vector<2x288xf32> to vector<1x2x288xf32>
      %114 = vector.broadcast %113 : vector<1x2x288xf32> to vector<8x2x288xf32>
      %115 = vector.broadcast %11 : vector<8x1x288xf32> to vector<8x2x288xf32>
      %116 = arith.mulf %114, %115 : vector<8x2x288xf32>
      %117 = vector.shape_cast %100 : vector<16x288xf32> to vector<1x16x288xf32>
      %118 = vector.shape_cast %117 : vector<1x16x288xf32> to vector<1x16x288xf32>
      %119 = vector.broadcast %118 : vector<1x16x288xf32> to vector<8x16x288xf32>
      "tpu.trace_start"() <{level = 10 : i32, message = "hqe,hke->hqk"}> : () -> ()
      %cst_73 = arith.constant dense<0.000000e+00> : vector<8x2x16xf32>
      %120 = tpu.matmul %116, %119, %cst_73 {dimension_numbers = #tpu.dot_dimension_numbers<[2], [2], [1], [1], [0, 0, 0, 1, 1, 1], [0], [0]>} : vector<8x2x288xf32>, vector<8x16x288xf32>, vector<8x2x16xf32> -> vector<8x2x16xf32>
      "tpu.trace_stop"() : () -> ()
      %121 = vector.shape_cast %112 : vector<2x16xf32> to vector<1x2x16xf32>
      %122 = vector.broadcast %121 : vector<1x2x16xf32> to vector<8x2x16xf32>
      %123 = arith.addf %120, %122 : vector<8x2x16xf32>
      %cst_74 = arith.constant dense<0xFF800000> : vector<8x2xf32>
      %124 = vector.multi_reduction <maximumf>, %123, %cst_74 [2] : vector<8x2x16xf32> to vector<8x2xf32>
      %125 = vector.shape_cast %124 : vector<8x2xf32> to vector<8x2x1xf32>
      %126 = vector.broadcast %125 : vector<8x2x1xf32> to vector<8x2x16xf32>
      %127 = arith.subf %123, %126 : vector<8x2x16xf32>
      %128 = math.exp %127 : vector<8x2x16xf32>
      %cst_75 = arith.constant dense<0.000000e+00> : vector<8x2xf32>
      %129 = vector.multi_reduction <add>, %128, %cst_75 [2] : vector<8x2x16xf32> to vector<8x2xf32>
      %130 = vector.shape_cast %129 : vector<8x2xf32> to vector<8x2x1xf32>
      %131 = vector.broadcast %130 : vector<8x2x1xf32> to vector<8x2x16xf32>
      %132 = arith.divf %128, %131 : vector<8x2x16xf32>
      %133 = vector.shape_cast %107 : vector<16x288xf32> to vector<1x16x288xf32>
      %134 = vector.broadcast %133 : vector<1x16x288xf32> to vector<8x16x288xf32>
      %135 = vector.broadcast %11 : vector<8x1x288xf32> to vector<8x16x288xf32>
      %136 = arith.mulf %134, %135 : vector<8x16x288xf32>
      "tpu.trace_start"() <{level = 10 : i32, message = "hqk,hke->hqe"}> : () -> ()
      %cst_76 = arith.constant dense<0.000000e+00> : vector<8x2x288xf32>
      %137 = tpu.matmul %132, %136, %cst_76 {dimension_numbers = #tpu.dot_dimension_numbers<[2], [1], [1], [2], [0, 0, 0, 1, 1, 2], [0], [0]>} : vector<8x2x16xf32>, vector<8x16x288xf32>, vector<8x2x288xf32> -> vector<8x2x288xf32>
      "tpu.trace_stop"() : () -> ()
      %cst_77 = arith.constant dense<0.000000e+00> : vector<2x288xf32>
      %138 = vector.multi_reduction <add>, %137, %cst_77 [0] : vector<8x2x288xf32> to vector<2x288xf32>
      %cst_78 = arith.constant dense<0.000000e+00> : vector<2x288xf32>
      %139 = tpu.matmul %138, %109, %cst_78 {dimension_numbers = #tpu.dot_dimension_numbers<[1], [0], [0], [1], [0, 0, 1, 1], [], []>} : vector<2x288xf32>, vector<288x288xbf16>, vector<2x288xf32> -> vector<2x288xf32>
      %140 = vector.broadcast %111 : vector<1x288xf32> to vector<2x288xf32>
      %141 = arith.addf %139, %140 : vector<2x288xf32>
      %142 = arith.addf %86, %141 : vector<2x288xf32>
      %c0_79 = arith.constant 0 : index
      %c0_80 = arith.constant 0 : index
      %c0_81 = arith.constant 0 : index
      %143 = vector.load %arg36[%c0_79, %c0_80, %c0_81] : memref<1x1x288xf32, #tpu.memory_space<vmem>>, vector<1x1x288xf32>
      %144 = vector.shape_cast %143 : vector<1x1x288xf32> to vector<1x288xf32>
      %c0_82 = arith.constant 0 : index
      %c0_83 = arith.constant 0 : index
      %c0_84 = arith.constant 0 : index
      %145 = vector.load %arg37[%c0_82, %c0_83, %c0_84] : memref<1x1x288xf32, #tpu.memory_space<vmem>>, vector<1x1x288xf32>
      %146 = vector.shape_cast %145 : vector<1x1x288xf32> to vector<1x288xf32>
      %cst_85 = arith.constant dense<0.000000e+00> : vector<2xf32>
      %147 = vector.multi_reduction <add>, %142, %cst_85 [1] : vector<2x288xf32> to vector<2xf32>
      %148 = vector.shape_cast %147 : vector<2xf32> to vector<2x1xf32>
      %cst_86 = arith.constant 2.880000e+02 : f32
      %149 = vector.broadcast %cst_86 : f32 to vector<2x1xf32>
      %150 = arith.divf %148, %149 : vector<2x1xf32>
      %151 = vector.broadcast %150 : vector<2x1xf32> to vector<2x288xf32>
      %152 = arith.subf %142, %151 : vector<2x288xf32>
      %153 = arith.mulf %152, %152 : vector<2x288xf32>
      %cst_87 = arith.constant dense<0.000000e+00> : vector<2xf32>
      %154 = vector.multi_reduction <add>, %153, %cst_87 [1] : vector<2x288xf32> to vector<2xf32>
      %155 = vector.shape_cast %154 : vector<2xf32> to vector<2x1xf32>
      %cst_88 = arith.constant 2.880000e+02 : f32
      %156 = vector.broadcast %cst_88 : f32 to vector<2x1xf32>
      %157 = arith.divf %155, %156 : vector<2x1xf32>
      %cst_89 = arith.constant 9.99999974E-6 : f32
      %158 = vector.broadcast %cst_89 : f32 to vector<2x1xf32>
      %159 = arith.addf %157, %158 : vector<2x1xf32>
      %160 = math.rsqrt %159 : vector<2x1xf32>
      %161 = vector.broadcast %160 : vector<2x1xf32> to vector<2x288xf32>
      %162 = arith.mulf %152, %161 : vector<2x288xf32>
      %163 = vector.broadcast %144 : vector<1x288xf32> to vector<2x288xf32>
      %164 = arith.mulf %162, %163 : vector<2x288xf32>
      %165 = vector.broadcast %146 : vector<1x288xf32> to vector<2x288xf32>
      %166 = arith.addf %164, %165 : vector<2x288xf32>
      %c0_90 = arith.constant 0 : index
      %c0_91 = arith.constant 0 : index
      %c0_92 = arith.constant 0 : index
      %167 = vector.load %arg38[%c0_90, %c0_91, %c0_92] : memref<1x288x576xbf16, #tpu.memory_space<vmem>>, vector<1x288x576xbf16>
      %168 = vector.shape_cast %167 : vector<1x288x576xbf16> to vector<288x576xbf16>
      %c0_93 = arith.constant 0 : index
      %c0_94 = arith.constant 0 : index
      %c0_95 = arith.constant 0 : index
      %169 = vector.load %arg39[%c0_93, %c0_94, %c0_95] : memref<1x1x576xf32, #tpu.memory_space<vmem>>, vector<1x1x576xf32>
      %170 = vector.shape_cast %169 : vector<1x1x576xf32> to vector<1x576xf32>
      %c0_96 = arith.constant 0 : index
      %c0_97 = arith.constant 0 : index
      %c0_98 = arith.constant 0 : index
      %171 = vector.load %arg40[%c0_96, %c0_97, %c0_98] : memref<1x576x288xbf16, #tpu.memory_space<vmem>>, vector<1x576x288xbf16>
      %172 = vector.shape_cast %171 : vector<1x576x288xbf16> to vector<576x288xbf16>
      %c0_99 = arith.constant 0 : index
      %c0_100 = arith.constant 0 : index
      %c0_101 = arith.constant 0 : index
      %173 = vector.load %arg41[%c0_99, %c0_100, %c0_101] : memref<1x1x288xf32, #tpu.memory_space<vmem>>, vector<1x1x288xf32>
      %174 = vector.shape_cast %173 : vector<1x1x288xf32> to vector<1x288xf32>
      %cst_102 = arith.constant dense<0.000000e+00> : vector<2x576xf32>
      %175 = tpu.matmul %166, %168, %cst_102 {dimension_numbers = #tpu.dot_dimension_numbers<[1], [0], [0], [1], [0, 0, 1, 1], [], []>} : vector<2x288xf32>, vector<288x576xbf16>, vector<2x576xf32> -> vector<2x576xf32>
      %176 = vector.broadcast %170 : vector<1x576xf32> to vector<2x576xf32>
      %177 = arith.addf %175, %176 : vector<2x576xf32>
      %cst_103 = arith.constant 0.000000e+00 : f32
      %178 = vector.broadcast %cst_103 : f32 to vector<2x576xf32>
      %179 = arith.maximumf %177, %178 : vector<2x576xf32>
      %cst_104 = arith.constant dense<0.000000e+00> : vector<2x288xf32>
      %180 = tpu.matmul %179, %172, %cst_104 {dimension_numbers = #tpu.dot_dimension_numbers<[1], [0], [0], [1], [0, 0, 1, 1], [], []>} : vector<2x576xf32>, vector<576x288xbf16>, vector<2x288xf32> -> vector<2x288xf32>
      %181 = vector.broadcast %174 : vector<1x288xf32> to vector<2x288xf32>
      %182 = arith.addf %180, %181 : vector<2x288xf32>
      %183 = arith.addf %166, %182 : vector<2x288xf32>
      %c0_105 = arith.constant 0 : index
      %c0_106 = arith.constant 0 : index
      %c0_107 = arith.constant 0 : index
      %184 = vector.load %arg42[%c0_105, %c0_106, %c0_107] : memref<1x1x288xf32, #tpu.memory_space<vmem>>, vector<1x1x288xf32>
      %185 = vector.shape_cast %184 : vector<1x1x288xf32> to vector<1x288xf32>
      %c0_108 = arith.constant 0 : index
      %c0_109 = arith.constant 0 : index
      %c0_110 = arith.constant 0 : index
      %186 = vector.load %arg43[%c0_108, %c0_109, %c0_110] : memref<1x1x288xf32, #tpu.memory_space<vmem>>, vector<1x1x288xf32>
      %187 = vector.shape_cast %186 : vector<1x1x288xf32> to vector<1x288xf32>
      %cst_111 = arith.constant dense<0.000000e+00> : vector<2xf32>
      %188 = vector.multi_reduction <add>, %183, %cst_111 [1] : vector<2x288xf32> to vector<2xf32>
      %189 = vector.shape_cast %188 : vector<2xf32> to vector<2x1xf32>
      %cst_112 = arith.constant 2.880000e+02 : f32
      %190 = vector.broadcast %cst_112 : f32 to vector<2x1xf32>
      %191 = arith.divf %189, %190 : vector<2x1xf32>
      %192 = vector.broadcast %191 : vector<2x1xf32> to vector<2x288xf32>
      %193 = arith.subf %183, %192 : vector<2x288xf32>
      %194 = arith.mulf %193, %193 : vector<2x288xf32>
      %cst_113 = arith.constant dense<0.000000e+00> : vector<2xf32>
      %195 = vector.multi_reduction <add>, %194, %cst_113 [1] : vector<2x288xf32> to vector<2xf32>
      %196 = vector.shape_cast %195 : vector<2xf32> to vector<2x1xf32>
      %cst_114 = arith.constant 2.880000e+02 : f32
      %197 = vector.broadcast %cst_114 : f32 to vector<2x1xf32>
      %198 = arith.divf %196, %197 : vector<2x1xf32>
      %cst_115 = arith.constant 9.99999974E-6 : f32
      %199 = vector.broadcast %cst_115 : f32 to vector<2x1xf32>
      %200 = arith.addf %198, %199 : vector<2x1xf32>
      %201 = math.rsqrt %200 : vector<2x1xf32>
      %202 = vector.broadcast %201 : vector<2x1xf32> to vector<2x288xf32>
      %203 = arith.mulf %193, %202 : vector<2x288xf32>
      %204 = vector.broadcast %185 : vector<1x288xf32> to vector<2x288xf32>
      %205 = arith.mulf %203, %204 : vector<2x288xf32>
      %206 = vector.broadcast %187 : vector<1x288xf32> to vector<2x288xf32>
      %207 = arith.addf %205, %206 : vector<2x288xf32>
      %c0_116 = arith.constant 0 : index
      %c0_117 = arith.constant 0 : index
      %208 = vector.load %arg52[%c0_116, %c0_117] : memref<2x288xf32, #tpu.memory_space<vmem>>, vector<2x288xf32>
      tpu.vector_store %arg52[%c0_116, %c0_117], %207 {strides = array<i32>} : memref<2x288xf32, #tpu.memory_space<vmem>>, vector<2x288xf32>,
    } else {
    }
    %c11_i32 = arith.constant 11 : i32
    %21 = arith.cmpi eq, %arg0, %c11_i32 : i32
    %22 = arith.extui %21 : i1 to i32
    %c0_i32_6 = arith.constant 0 : i32
    %23 = arith.cmpi ne, %22, %c0_i32_6 : i32
    scf.if %23 {
      %c0 = arith.constant 0 : index
      %c0_7 = arith.constant 0 : index
      %24 = vector.load %arg52[%c0, %c0_7] : memref<2x288xf32, #tpu.memory_space<vmem>>, vector<2x288xf32>
      %c0_8 = arith.constant 0 : index
      %c0_9 = arith.constant 0 : index
      %25 = vector.load %arg44[%c0_8, %c0_9] : memref<1x288xf32, #tpu.memory_space<vmem>>, vector<1x288xf32>
      %c0_10 = arith.constant 0 : index
      %c0_11 = arith.constant 0 : index
      %26 = vector.load %arg45[%c0_10, %c0_11] : memref<1x288xf32, #tpu.memory_space<vmem>>, vector<1x288xf32>
      %cst_12 = arith.constant dense<0.000000e+00> : vector<2xf32>
      %27 = vector.multi_reduction <add>, %24, %cst_12 [1] : vector<2x288xf32> to vector<2xf32>
      %28 = vector.shape_cast %27 : vector<2xf32> to vector<2x1xf32>
      %cst_13 = arith.constant 2.880000e+02 : f32
      %29 = vector.broadcast %cst_13 : f32 to vector<2x1xf32>
      %30 = arith.divf %28, %29 : vector<2x1xf32>
      %31 = vector.broadcast %30 : vector<2x1xf32> to vector<2x288xf32>
      %32 = arith.subf %24, %31 : vector<2x288xf32>
      %33 = arith.mulf %32, %32 : vector<2x288xf32>
      %cst_14 = arith.constant dense<0.000000e+00> : vector<2xf32>
      %34 = vector.multi_reduction <add>, %33, %cst_14 [1] : vector<2x288xf32> to vector<2xf32>
      %35 = vector.shape_cast %34 : vector<2xf32> to vector<2x1xf32>
      %cst_15 = arith.constant 2.880000e+02 : f32
      %36 = vector.broadcast %cst_15 : f32 to vector<2x1xf32>
      %37 = arith.divf %35, %36 : vector<2x1xf32>
      %cst_16 = arith.constant 9.99999974E-6 : f32
      %38 = vector.broadcast %cst_16 : f32 to vector<2x1xf32>
      %39 = arith.addf %37, %38 : vector<2x1xf32>
      %40 = math.rsqrt %39 : vector<2x1xf32>
      %41 = vector.broadcast %40 : vector<2x1xf32> to vector<2x288xf32>
      %42 = arith.mulf %32, %41 : vector<2x288xf32>
      %43 = vector.broadcast %25 : vector<1x288xf32> to vector<2x288xf32>
      %44 = arith.mulf %42, %43 : vector<2x288xf32>
      %45 = vector.broadcast %26 : vector<1x288xf32> to vector<2x288xf32>
      %46 = arith.addf %44, %45 : vector<2x288xf32>
      %c0_17 = arith.constant 0 : index
      %c0_18 = arith.constant 0 : index
      %47 = vector.load %arg46[%c0_17, %c0_18] : memref<288x288xbf16, #tpu.memory_space<vmem>>, vector<288x288xbf16>
      %cst_19 = arith.constant dense<0.000000e+00> : vector<2x288xf32>
      %48 = tpu.matmul %46, %47, %cst_19 {dimension_numbers = #tpu.dot_dimension_numbers<[1], [0], [0], [1], [0, 0, 1, 1], [], []>} : vector<2x288xf32>, vector<288x288xbf16>, vector<2x288xf32> -> vector<2x288xf32>
      %c0_20 = arith.constant 0 : index
      %c0_21 = arith.constant 0 : index
      %49 = vector.load %arg47[%c0_20, %c0_21] : memref<1x288xf32, #tpu.memory_space<vmem>>, vector<1x288xf32>
      %50 = vector.broadcast %49 : vector<1x288xf32> to vector<2x288xf32>
      %51 = arith.addf %48, %50 : vector<2x288xf32>
      %cst_22 = arith.constant 0.000000e+00 : f32
      %52 = vector.broadcast %cst_22 : f32 to vector<2x288xf32>
      %53 = arith.maximumf %51, %52 : vector<2x288xf32>
      %c0_23 = arith.constant 0 : index
      %c0_24 = arith.constant 0 : index
      %54 = vector.load %arg48[%c0_23, %c0_24] : memref<288x288xbf16, #tpu.memory_space<vmem>>, vector<288x288xbf16>
      %cst_25 = arith.constant dense<0.000000e+00> : vector<2x288xf32>
      %55 = tpu.matmul %53, %54, %cst_25 {dimension_numbers = #tpu.dot_dimension_numbers<[1], [0], [0], [1], [0, 0, 1, 1], [], []>} : vector<2x288xf32>, vector<288x288xbf16>, vector<2x288xf32> -> vector<2x288xf32>
      %c0_26 = arith.constant 0 : index
      %c0_27 = arith.constant 0 : index
      %56 = vector.load %arg49[%c0_26, %c0_27] : memref<1x288xf32, #tpu.memory_space<vmem>>, vector<1x288xf32>
      %57 = vector.broadcast %56 : vector<1x288xf32> to vector<2x288xf32>
      %58 = arith.addf %55, %57 : vector<2x288xf32>
      %c0_28 = arith.constant 0 : index
      %c0_29 = arith.constant 0 : index
      %59 = vector.load %arg50[%c0_28, %c0_29] : memref<2x288xf32, #tpu.memory_space<vmem>>, vector<2x288xf32>
      tpu.vector_store %arg50[%c0_28, %c0_29], %58 {strides = array<i32>} : memref<2x288xf32, #tpu.memory_space<vmem>>, vector<2x288xf32>,
    } else {
    }
    return
  }
  func.func @transform_0(%arg0: i32) -> (i32, i32) {
    %c0_i32 = arith.constant 0 : i32
    %c0_i32_0 = arith.constant 0 : i32
    %c0_i32_1 = arith.constant 0 : i32
    return %c0_i32, %c0_i32_0 : i32, i32
  }
  func.func @transform_1(%arg0: i32) -> (i32, i32) {
    %c0_i32 = arith.constant 0 : i32
    %c0_i32_0 = arith.constant 0 : i32
    %c0_i32_1 = arith.constant 0 : i32
    return %c0_i32, %c0_i32_0 : i32, i32
  }
  func.func @transform_2(%arg0: i32) -> (i32, i32) {
    %c0_i32 = arith.constant 0 : i32
    %c0_i32_0 = arith.constant 0 : i32
    %c0_i32_1 = arith.constant 0 : i32
    return %c0_i32, %c0_i32_0 : i32, i32
  }
  func.func @transform_3(%arg0: i32) -> (i32, i32, i32) {
    %c5_i32 = arith.constant 5 : i32
    %0 = arith.minsi %arg0, %c5_i32 : i32
    %c0_i32 = arith.constant 0 : i32
    %c0_i32_0 = arith.constant 0 : i32
    %c0_i32_1 = arith.constant 0 : i32
    return %0, %c0_i32, %c0_i32_0 : i32, i32, i32
  }
  func.func @transform_4(%arg0: i32) -> (i32, i32, i32) {
    %c5_i32 = arith.constant 5 : i32
    %0 = arith.minsi %arg0, %c5_i32 : i32
    %c0_i32 = arith.constant 0 : i32
    %c0_i32_0 = arith.constant 0 : i32
    %c0_i32_1 = arith.constant 0 : i32
    return %0, %c0_i32, %c0_i32_0 : i32, i32, i32
  }
  func.func @transform_5(%arg0: i32) -> (i32, i32, i32) {
    %c5_i32 = arith.constant 5 : i32
    %0 = arith.minsi %arg0, %c5_i32 : i32
    %c0_i32 = arith.constant 0 : i32
    %c0_i32_0 = arith.constant 0 : i32
    %c0_i32_1 = arith.constant 0 : i32
    return %0, %c0_i32, %c0_i32_0 : i32, i32, i32
  }
  func.func @transform_6(%arg0: i32) -> (i32, i32, i32) {
    %c5_i32 = arith.constant 5 : i32
    %0 = arith.minsi %arg0, %c5_i32 : i32
    %c0_i32 = arith.constant 0 : i32
    %c0_i32_0 = arith.constant 0 : i32
    %c0_i32_1 = arith.constant 0 : i32
    return %0, %c0_i32, %c0_i32_0 : i32, i32, i32
  }
  func.func @transform_7(%arg0: i32) -> (i32, i32, i32) {
    %c5_i32 = arith.constant 5 : i32
    %0 = arith.minsi %arg0, %c5_i32 : i32
    %c0_i32 = arith.constant 0 : i32
    %c0_i32_0 = arith.constant 0 : i32
    %c0_i32_1 = arith.constant 0 : i32
    return %0, %c0_i32, %c0_i32_0 : i32, i32, i32
  }
  func.func @transform_8(%arg0: i32) -> (i32, i32, i32) {
    %c5_i32 = arith.constant 5 : i32
    %0 = arith.minsi %arg0, %c5_i32 : i32
    %c0_i32 = arith.constant 0 : i32
    %c0_i32_0 = arith.constant 0 : i32
    %c0_i32_1 = arith.constant 0 : i32
    return %0, %c0_i32, %c0_i32_0 : i32, i32, i32
  }
  func.func @transform_9(%arg0: i32) -> (i32, i32, i32) {
    %c5_i32 = arith.constant 5 : i32
    %0 = arith.minsi %arg0, %c5_i32 : i32
    %c0_i32 = arith.constant 0 : i32
    %c0_i32_0 = arith.constant 0 : i32
    %c0_i32_1 = arith.constant 0 : i32
    return %0, %c0_i32, %c0_i32_0 : i32, i32, i32
  }
  func.func @transform_10(%arg0: i32) -> (i32, i32, i32) {
    %c5_i32 = arith.constant 5 : i32
    %0 = arith.minsi %arg0, %c5_i32 : i32
    %c0_i32 = arith.constant 0 : i32
    %c0_i32_0 = arith.constant 0 : i32
    %c0_i32_1 = arith.constant 0 : i32
    return %0, %c0_i32, %c0_i32_0 : i32, i32, i32
  }
  func.func @transform_11(%arg0: i32) -> (i32, i32, i32) {
    %c5_i32 = arith.constant 5 : i32
    %0 = arith.minsi %arg0, %c5_i32 : i32
    %c0_i32 = arith.constant 0 : i32
    %c0_i32_0 = arith.constant 0 : i32
    %c0_i32_1 = arith.constant 0 : i32
    return %0, %c0_i32, %c0_i32_0 : i32, i32, i32
  }
  func.func @transform_12(%arg0: i32) -> (i32, i32, i32) {
    %c5_i32 = arith.constant 5 : i32
    %0 = arith.minsi %arg0, %c5_i32 : i32
    %c0_i32 = arith.constant 0 : i32
    %c0_i32_0 = arith.constant 0 : i32
    %c0_i32_1 = arith.constant 0 : i32
    return %0, %c0_i32, %c0_i32_0 : i32, i32, i32
  }
  func.func @transform_13(%arg0: i32) -> (i32, i32, i32) {
    %c5_i32 = arith.constant 5 : i32
    %0 = arith.minsi %arg0, %c5_i32 : i32
    %c0_i32 = arith.constant 0 : i32
    %c0_i32_0 = arith.constant 0 : i32
    %c0_i32_1 = arith.constant 0 : i32
    return %0, %c0_i32, %c0_i32_0 : i32, i32, i32
  }
  func.func @transform_14(%arg0: i32) -> (i32, i32, i32) {
    %c5_i32 = arith.constant 5 : i32
    %0 = arith.minsi %arg0, %c5_i32 : i32
    %c0_i32 = arith.constant 0 : i32
    %c0_i32_0 = arith.constant 0 : i32
    %c0_i32_1 = arith.constant 0 : i32
    return %0, %c0_i32, %c0_i32_0 : i32, i32, i32
  }
  func.func @transform_15(%arg0: i32) -> (i32, i32, i32) {
    %c5_i32 = arith.constant 5 : i32
    %0 = arith.minsi %arg0, %c5_i32 : i32
    %c0_i32 = arith.constant 0 : i32
    %c0_i32_0 = arith.constant 0 : i32
    %c0_i32_1 = arith.constant 0 : i32
    return %0, %c0_i32, %c0_i32_0 : i32, i32, i32
  }
  func.func @transform_16(%arg0: i32) -> (i32, i32, i32) {
    %c5_i32 = arith.constant 5 : i32
    %0 = arith.minsi %arg0, %c5_i32 : i32
    %c0_i32 = arith.constant 0 : i32
    %c0_i32_0 = arith.constant 0 : i32
    %c0_i32_1 = arith.constant 0 : i32
    return %0, %c0_i32, %c0_i32_0 : i32, i32, i32
  }
  func.func @transform_17(%arg0: i32) -> (i32, i32, i32) {
    %c5_i32 = arith.constant 5 : i32
    %0 = arith.minsi %arg0, %c5_i32 : i32
    %c0_i32 = arith.constant 0 : i32
    %c0_i32_0 = arith.constant 0 : i32
    %c0_i32_1 = arith.constant 0 : i32
    return %0, %c0_i32, %c0_i32_0 : i32, i32, i32
  }
  func.func @transform_18(%arg0: i32) -> (i32, i32, i32) {
    %c5_i32 = arith.constant 5 : i32
    %0 = arith.minsi %arg0, %c5_i32 : i32
    %c0_i32 = arith.constant 0 : i32
    %c0_i32_0 = arith.constant 0 : i32
    %c0_i32_1 = arith.constant 0 : i32
    return %0, %c0_i32, %c0_i32_0 : i32, i32, i32
  }
  func.func @transform_19(%arg0: i32) -> (i32, i32) {
    %c0_i32 = arith.constant 0 : i32
    %c0_i32_0 = arith.constant 0 : i32
    %c0_i32_1 = arith.constant 0 : i32
    return %c0_i32, %c0_i32_0 : i32, i32
  }
  func.func @transform_20(%arg0: i32) -> (i32, i32) {
    %c0_i32 = arith.constant 0 : i32
    %c0_i32_0 = arith.constant 0 : i32
    %c0_i32_1 = arith.constant 0 : i32
    return %c0_i32, %c0_i32_0 : i32, i32
  }
  func.func @transform_21(%arg0: i32) -> (i32, i32, i32) {
    %c6_i32 = arith.constant 6 : i32
    %0 = arith.subi %arg0, %c6_i32 : i32
    %c0_i32 = arith.constant 0 : i32
    %1 = arith.maxsi %0, %c0_i32 : i32
    %c0_i32_0 = arith.constant 0 : i32
    %c0_i32_1 = arith.constant 0 : i32
    %c0_i32_2 = arith.constant 0 : i32
    return %1, %c0_i32_0, %c0_i32_1 : i32, i32, i32
  }
  func.func @transform_22(%arg0: i32) -> (i32, i32, i32) {
    %c6_i32 = arith.constant 6 : i32
    %0 = arith.subi %arg0, %c6_i32 : i32
    %c0_i32 = arith.constant 0 : i32
    %1 = arith.maxsi %0, %c0_i32 : i32
    %c0_i32_0 = arith.constant 0 : i32
    %c0_i32_1 = arith.constant 0 : i32
    %c0_i32_2 = arith.constant 0 : i32
    return %1, %c0_i32_0, %c0_i32_1 : i32, i32, i32
  }
  func.func @transform_23(%arg0: i32) -> (i32, i32, i32) {
    %c6_i32 = arith.constant 6 : i32
    %0 = arith.subi %arg0, %c6_i32 : i32
    %c0_i32 = arith.constant 0 : i32
    %1 = arith.maxsi %0, %c0_i32 : i32
    %c0_i32_0 = arith.constant 0 : i32
    %c0_i32_1 = arith.constant 0 : i32
    %c0_i32_2 = arith.constant 0 : i32
    return %1, %c0_i32_0, %c0_i32_1 : i32, i32, i32
  }
  func.func @transform_24(%arg0: i32) -> (i32, i32, i32) {
    %c6_i32 = arith.constant 6 : i32
    %0 = arith.subi %arg0, %c6_i32 : i32
    %c0_i32 = arith.constant 0 : i32
    %1 = arith.maxsi %0, %c0_i32 : i32
    %c0_i32_0 = arith.constant 0 : i32
    %c0_i32_1 = arith.constant 0 : i32
    %c0_i32_2 = arith.constant 0 : i32
    return %1, %c0_i32_0, %c0_i32_1 : i32, i32, i32
  }
  func.func @transform_25(%arg0: i32) -> (i32, i32, i32) {
    %c6_i32 = arith.constant 6 : i32
    %0 = arith.subi %arg0, %c6_i32 : i32
    %c0_i32 = arith.constant 0 : i32
    %1 = arith.maxsi %0, %c0_i32 : i32
    %c0_i32_0 = arith.constant 0 : i32
    %c0_i32_1 = arith.constant 0 : i32
    %c0_i32_2 = arith.constant 0 : i32
    return %1, %c0_i32_0, %c0_i32_1 : i32, i32, i32
  }
  func.func @transform_26(%arg0: i32) -> (i32, i32, i32) {
    %c6_i32 = arith.constant 6 : i32
    %0 = arith.subi %arg0, %c6_i32 : i32
    %c0_i32 = arith.constant 0 : i32
    %1 = arith.maxsi %0, %c0_i32 : i32
    %c0_i32_0 = arith.constant 0 : i32
    %c0_i32_1 = arith.constant 0 : i32
    %c0_i32_2 = arith.constant 0 : i32
    return %1, %c0_i32_0, %c0_i32_1 : i32, i32, i32
  }
  func.func @transform_27(%arg0: i32) -> (i32, i32, i32) {
    %c6_i32 = arith.constant 6 : i32
    %0 = arith.subi %arg0, %c6_i32 : i32
    %c0_i32 = arith.constant 0 : i32
    %1 = arith.maxsi %0, %c0_i32 : i32
    %c0_i32_0 = arith.constant 0 : i32
    %c0_i32_1 = arith.constant 0 : i32
    %c0_i32_2 = arith.constant 0 : i32
    return %1, %c0_i32_0, %c0_i32_1 : i32, i32, i32
  }
  func.func @transform_28(%arg0: i32) -> (i32, i32, i32) {
    %c6_i32 = arith.constant 6 : i32
    %0 = arith.subi %arg0, %c6_i32 : i32
    %c0_i32 = arith.constant 0 : i32
    %1 = arith.maxsi %0, %c0_i32 : i32
    %c0_i32_0 = arith.constant 0 : i32
    %c0_i32_1 = arith.constant 0 : i32
    %c0_i32_2 = arith.constant 0 : i32
    return %1, %c0_i32_0, %c0_i32_1 : i32, i32, i32
  }
  func.func @transform_29(%arg0: i32) -> (i32, i32, i32) {
    %c6_i32 = arith.constant 6 : i32
    %0 = arith.subi %arg0, %c6_i32 : i32
    %c0_i32 = arith.constant 0 : i32
    %1 = arith.maxsi %0, %c0_i32 : i32
    %c0_i32_0 = arith.constant 0 : i32
    %c0_i32_1 = arith.constant 0 : i32
    %c0_i32_2 = arith.constant 0 : i32
    return %1, %c0_i32_0, %c0_i32_1 : i32, i32, i32
  }
  func.func @transform_30(%arg0: i32) -> (i32, i32, i32) {
    %c6_i32 = arith.constant 6 : i32
    %0 = arith.subi %arg0, %c6_i32 : i32
    %c0_i32 = arith.constant 0 : i32
    %1 = arith.maxsi %0, %c0_i32 : i32
    %c0_i32_0 = arith.constant 0 : i32
    %c0_i32_1 = arith.constant 0 : i32
    %c0_i32_2 = arith.constant 0 : i32
    return %1, %c0_i32_0, %c0_i32_1 : i32, i32, i32
  }
  func.func @transform_31(%arg0: i32) -> (i32, i32, i32) {
    %c6_i32 = arith.constant 6 : i32
    %0 = arith.subi %arg0, %c6_i32 : i32
    %c0_i32 = arith.constant 0 : i32
    %1 = arith.maxsi %0, %c0_i32 : i32
    %c0_i32_0 = arith.constant 0 : i32
    %c0_i32_1 = arith.constant 0 : i32
    %c0_i32_2 = arith.constant 0 : i32
    return %1, %c0_i32_0, %c0_i32_1 : i32, i32, i32
  }
  func.func @transform_32(%arg0: i32) -> (i32, i32, i32) {
    %c6_i32 = arith.constant 6 : i32
    %0 = arith.subi %arg0, %c6_i32 : i32
    %c0_i32 = arith.constant 0 : i32
    %1 = arith.maxsi %0, %c0_i32 : i32
    %c0_i32_0 = arith.constant 0 : i32
    %c0_i32_1 = arith.constant 0 : i32
    %c0_i32_2 = arith.constant 0 : i32
    return %1, %c0_i32_0, %c0_i32_1 : i32, i32, i32
  }
  func.func @transform_33(%arg0: i32) -> (i32, i32, i32) {
    %c6_i32 = arith.constant 6 : i32
    %0 = arith.subi %arg0, %c6_i32 : i32
    %c0_i32 = arith.constant 0 : i32
    %1 = arith.maxsi %0, %c0_i32 : i32
    %c0_i32_0 = arith.constant 0 : i32
    %c0_i32_1 = arith.constant 0 : i32
    %c0_i32_2 = arith.constant 0 : i32
    return %1, %c0_i32_0, %c0_i32_1 : i32, i32, i32
  }
  func.func @transform_34(%arg0: i32) -> (i32, i32, i32) {
    %c6_i32 = arith.constant 6 : i32
    %0 = arith.subi %arg0, %c6_i32 : i32
    %c0_i32 = arith.constant 0 : i32
    %1 = arith.maxsi %0, %c0_i32 : i32
    %c0_i32_0 = arith.constant 0 : i32
    %c0_i32_1 = arith.constant 0 : i32
    %c0_i32_2 = arith.constant 0 : i32
    return %1, %c0_i32_0, %c0_i32_1 : i32, i32, i32
  }
  func.func @transform_35(%arg0: i32) -> (i32, i32, i32) {
    %c6_i32 = arith.constant 6 : i32
    %0 = arith.subi %arg0, %c6_i32 : i32
    %c0_i32 = arith.constant 0 : i32
    %1 = arith.maxsi %0, %c0_i32 : i32
    %c0_i32_0 = arith.constant 0 : i32
    %c0_i32_1 = arith.constant 0 : i32
    %c0_i32_2 = arith.constant 0 : i32
    return %1, %c0_i32_0, %c0_i32_1 : i32, i32, i32
  }
  func.func @transform_36(%arg0: i32) -> (i32, i32, i32) {
    %c6_i32 = arith.constant 6 : i32
    %0 = arith.subi %arg0, %c6_i32 : i32
    %c0_i32 = arith.constant 0 : i32
    %1 = arith.maxsi %0, %c0_i32 : i32
    %c0_i32_0 = arith.constant 0 : i32
    %c0_i32_1 = arith.constant 0 : i32
    %c0_i32_2 = arith.constant 0 : i32
    return %1, %c0_i32_0, %c0_i32_1 : i32, i32, i32
  }
  func.func @transform_37(%arg0: i32) -> (i32, i32, i32) {
    %c6_i32 = arith.constant 6 : i32
    %0 = arith.subi %arg0, %c6_i32 : i32
    %c0_i32 = arith.constant 0 : i32
    %1 = arith.maxsi %0, %c0_i32 : i32
    %c0_i32_0 = arith.constant 0 : i32
    %c0_i32_1 = arith.constant 0 : i32
    %c0_i32_2 = arith.constant 0 : i32
    return %1, %c0_i32_0, %c0_i32_1 : i32, i32, i32
  }
  func.func @transform_38(%arg0: i32) -> (i32, i32, i32) {
    %c6_i32 = arith.constant 6 : i32
    %0 = arith.subi %arg0, %c6_i32 : i32
    %c0_i32 = arith.constant 0 : i32
    %1 = arith.maxsi %0, %c0_i32 : i32
    %c0_i32_0 = arith.constant 0 : i32
    %c0_i32_1 = arith.constant 0 : i32
    %c0_i32_2 = arith.constant 0 : i32
    return %1, %c0_i32_0, %c0_i32_1 : i32, i32, i32
  }
  func.func @transform_39(%arg0: i32) -> (i32, i32, i32) {
    %c6_i32 = arith.constant 6 : i32
    %0 = arith.subi %arg0, %c6_i32 : i32
    %c0_i32 = arith.constant 0 : i32
    %1 = arith.maxsi %0, %c0_i32 : i32
    %c0_i32_0 = arith.constant 0 : i32
    %c0_i32_1 = arith.constant 0 : i32
    %c0_i32_2 = arith.constant 0 : i32
    return %1, %c0_i32_0, %c0_i32_1 : i32, i32, i32
  }
  func.func @transform_40(%arg0: i32) -> (i32, i32, i32) {
    %c6_i32 = arith.constant 6 : i32
    %0 = arith.subi %arg0, %c6_i32 : i32
    %c0_i32 = arith.constant 0 : i32
    %1 = arith.maxsi %0, %c0_i32 : i32
    %c0_i32_0 = arith.constant 0 : i32
    %c0_i32_1 = arith.constant 0 : i32
    %c0_i32_2 = arith.constant 0 : i32
    return %1, %c0_i32_0, %c0_i32_1 : i32, i32, i32
  }
  func.func @transform_41(%arg0: i32) -> (i32, i32, i32) {
    %c6_i32 = arith.constant 6 : i32
    %0 = arith.subi %arg0, %c6_i32 : i32
    %c0_i32 = arith.constant 0 : i32
    %1 = arith.maxsi %0, %c0_i32 : i32
    %c0_i32_0 = arith.constant 0 : i32
    %c0_i32_1 = arith.constant 0 : i32
    %c0_i32_2 = arith.constant 0 : i32
    return %1, %c0_i32_0, %c0_i32_1 : i32, i32, i32
  }
  func.func @transform_42(%arg0: i32) -> (i32, i32, i32) {
    %c6_i32 = arith.constant 6 : i32
    %0 = arith.subi %arg0, %c6_i32 : i32
    %c0_i32 = arith.constant 0 : i32
    %1 = arith.maxsi %0, %c0_i32 : i32
    %c0_i32_0 = arith.constant 0 : i32
    %c0_i32_1 = arith.constant 0 : i32
    %c0_i32_2 = arith.constant 0 : i32
    return %1, %c0_i32_0, %c0_i32_1 : i32, i32, i32
  }
  func.func @transform_43(%arg0: i32) -> (i32, i32) {
    %c0_i32 = arith.constant 0 : i32
    %c0_i32_0 = arith.constant 0 : i32
    %c0_i32_1 = arith.constant 0 : i32
    return %c0_i32, %c0_i32_0 : i32, i32
  }
  func.func @transform_44(%arg0: i32) -> (i32, i32) {
    %c0_i32 = arith.constant 0 : i32
    %c0_i32_0 = arith.constant 0 : i32
    %c0_i32_1 = arith.constant 0 : i32
    return %c0_i32, %c0_i32_0 : i32, i32
  }
  func.func @transform_45(%arg0: i32) -> (i32, i32) {
    %c0_i32 = arith.constant 0 : i32
    %c0_i32_0 = arith.constant 0 : i32
    %c0_i32_1 = arith.constant 0 : i32
    return %c0_i32, %c0_i32_0 : i32, i32
  }
  func.func @transform_46(%arg0: i32) -> (i32, i32) {
    %c0_i32 = arith.constant 0 : i32
    %c0_i32_0 = arith.constant 0 : i32
    %c0_i32_1 = arith.constant 0 : i32
    return %c0_i32, %c0_i32_0 : i32, i32
  }
  func.func @transform_47(%arg0: i32) -> (i32, i32) {
    %c0_i32 = arith.constant 0 : i32
    %c0_i32_0 = arith.constant 0 : i32
    %c0_i32_1 = arith.constant 0 : i32
    return %c0_i32, %c0_i32_0 : i32, i32
  }
  func.func @transform_48(%arg0: i32) -> (i32, i32) {
    %c0_i32 = arith.constant 0 : i32
    %c0_i32_0 = arith.constant 0 : i32
    %c0_i32_1 = arith.constant 0 : i32
    return %c0_i32, %c0_i32_0 : i32, i32
  }
  func.func @transform_49(%arg0: i32) -> (i32, i32) {
    %c0_i32 = arith.constant 0 : i32
    %c0_i32_0 = arith.constant 0 : i32
    %c0_i32_1 = arith.constant 0 : i32
    return %c0_i32, %c0_i32_0 : i32, i32
  }
}

</mosaic_0001>

<bundles_post_ra>
// kernel: eq.15
= control target key start
LH: loop header
LB: loop body
LE: loop exit
PB: predicated region body
PF: predicated region fallthrough
CT: control target
= control target key end

     0   :  { %vm7_vm0 = vcmask 64512   ;;  %vm13_vm1 = vcmask 130112   ;;  %s39_s0 = inlined_call_operand.vmem [shape: s32[2,8], index: 0, kind: input, shape index: {}]   ;;  %s40_s1 = inlined_call_operand.vmem [shape: s32[16], index: 1, kind: output, shape index: {}]  }
   0x1   :  { %v4_v0 = vld [vmem:[%s39_s0] sm:$0x3]  ;;  %s22_s0 = smov 8  }
   0x2   :  { %5 = vst [vmem:[#allocation1] sm:$0x3] %v4_v0 }
   0x9   :  { %v10_v1 = vld [vmem:[#allocation1 + $0x1] sm:$0x1]   ;;  %v6_v2 = vld [vmem:[#allocation1] sm:$0x1]  }
   0xa   :  { %11 = vrot.lane.b32.xlu0 %v10_v1, %s22_s0  ;;  %8 = vst.msk [vmem:[#allocation0] sm:$0x1] %vm7_vm0, %v6_v2  }
  0x7c   :  { %v12_v3 = vpop.permute.xlu0 %11  }
  0x7d   :  { %14 = vst.msk [vmem:[#allocation0] sm:$0x1] %vm13_vm1, %v12_v3  }
  0x84   :  { %v18_v4 = vld [vmem:[#allocation0] sm:$0x1] }
  0x85   :  { %20 = vst [vmem:[%s40_s1] sm:$0x1] %v18_v4 }

// kernel: action_net_forward.1
= control target key start
LH: loop header
LB: loop body
LE: loop exit
PB: predicated region body
PF: predicated region fallthrough
CT: control target
= control target key end

     0   :  { %s25726_s6 = smov 1   ;;  %s25727_s10 = smov 2   ;;  %s29673_s0 = inlined_call_operand.smem [shape: u32[50], index: -1, kind: input, shape index: {}] }
   0x1   :  { %s25819_s5 = sld [smem:[%s29673_s0]]   ;;  %s25728_s14 = smov 3  }
   0x2   :  { %s25824_s9 = sld [smem:[%s29673_s0 + %s25726_s6]]   ;;  %s25729_s18 = smov 4  }
   0x3   :  { %s25829_s13 = sld [smem:[%s29673_s0 + %s25727_s10]]   ;;  %s25730_s22 = smov 5  }
   0x4   :  { %s25834_s17 = sld [smem:[%s29673_s0 + %s25728_s14]]   ;;  %s25731_s26 = smov 6  }
   0x5   :  { %s25839_s21 = sld [smem:[%s29673_s0 + %s25729_s18]]   ;;  %s25732_s30 = smov 7  }
   0x6   :  { %s25844_s25 = sld [smem:[%s29673_s0 + %s25730_s22]]   ;;  %s25733_s4 = smov 8  }
   0x7   :  { %29756 = sst [smem:[#allocation51_spill]] %s25819_s5  ;;  %s25734_s10 = smov 9  }
   0x8   :  { %29757 = sst [smem:[#allocation52_spill]] %s25824_s9  ;;  %s25735_s15 = smov 10  }
   0x9   :  { %29758 = sst [smem:[#allocation53_spill]] %s25829_s13  ;;  %s25736_s20 = smov 11  }
   0xa   :  { %29759 = sst [smem:[#allocation54_spill]] %s25834_s17  ;;  %s25738_s1 = smov 13  }
   0xb   :  { %29760 = sst [smem:[#allocation55_spill]] %s25839_s21  ;;  %s25739_s7 = smov 14  }
   0xc   :  { %29761 = sst [smem:[#allocation56_spill]] %s25844_s25  ;;  %s25741_s22 = smov 16  }
   0xd   :  { %s25849_s29 = sld [smem:[%s29673_s0 + %s25731_s26]]   ;;  %s25737_s26 = smov 12  }
   0xe   :  { %s25854_s3 = sld [smem:[%s29673_s0 + %s25732_s30]]   ;;  %s25742_s28 = smov 17  }
   0xf   :  { %s25859_s8 = sld [smem:[%s29673_s0 + %s25733_s4]]  }
  0x10   :  { %s25864_s14 = sld [smem:[%s29673_s0 + %s25734_s10]]  }
  0x11   :  { %s25869_s19 = sld [smem:[%s29673_s0 + %s25735_s15]]   ;;  %s25740_s15 = smov 15  }
  0x12   :  { %s25874_s24 = sld [smem:[%s29673_s0 + %s25736_s20]]  }
  0x13   :  { %29762 = sst [smem:[#allocation57_spill]] %s25849_s29 }
  0x14   :  { %29763 = sst [smem:[#allocation58_spill]] %s25854_s3 }
  0x15   :  { %29764 = sst [smem:[#allocation59_spill]] %s25859_s8 }
  0x16   :  { %29765 = sst [smem:[#allocation60_spill]] %s25864_s14 }
  0x17   :  { %29766 = sst [smem:[#allocation61_spill]] %s25869_s19 }
  0x18   :  { %29767 = sst [smem:[#allocation62_spill]] %s25874_s24 }
  0x19   :  { %s25879_s30 = sld [smem:[%s29673_s0 + %s25737_s26]]  }
  0x1a   :  { %s25884_s6 = sld [smem:[%s29673_s0 + %s25738_s1]]  }
  0x1b   :  { %s25889_s12 = sld [smem:[%s29673_s0 + %s25739_s7]]   ;;  %s25743_s7 = smov 18  }
  0x1c   :  { %s25894_s20 = sld [smem:[%s29673_s0 + %s25740_s15]]   ;;  %s25744_s15 = smov 19  }
  0x1d   :  { %s25899_s27 = sld [smem:[%s29673_s0 + %s25741_s22]]   ;;  %s25745_s22 = smov 20  }
  0x1e   :  { %s25904_s4 = sld [smem:[%s29673_s0 + %s25742_s28]]   ;;  %s25746_s28 = smov 21  }
  0x1f   :  { %29768 = sst [smem:[#allocation63_spill]] %s25879_s30 }
  0x20   :  { %29769 = sst [smem:[#allocation64_spill]] %s25884_s6 }
  0x21   :  { %29770 = sst [smem:[#allocation65_spill]] %s25889_s12 }
  0x22   :  { %29771 = sst [smem:[#allocation66_spill]] %s25894_s20 }
  0x23   :  { %29772 = sst [smem:[#allocation67_spill]] %s25899_s27 }
  0x24   :  { %29773 = sst [smem:[#allocation68_spill]] %s25904_s4 }
  0x25   :  { %s25909_s13 = sld [smem:[%s29673_s0 + %s25743_s7]]   ;;  %s25747_s7 = smov 22  }
  0x26   :  { %s25914_s9 = sld [smem:[%s29673_s0 + %s25744_s15]]   ;;  %s25748_s15 = smov 23  }
  0x27   :  { %s25919_s5 = sld [smem:[%s29673_s0 + %s25745_s22]]   ;;  %s25749_s22 = smov 24  }
  0x28   :  { %s25924_s20 = sld [smem:[%s29673_s0 + %s25746_s28]]   ;;  %s25750_s28 = smov 25  }
  0x29   :  { %s25944_s12 = sld [smem:[%s29673_s0 + %s25750_s28]]   ;;  %s25754_s28 = smov 29  }
  0x2a   :  { %s25964_s30 = sld [smem:[%s29673_s0 + %s25754_s28]]   ;;  %s25758_s28 = smov 33  }
  0x2b   :  { %29774 = sst [smem:[#allocation69_spill]] %s25909_s13 }
  0x2c   :  { %29775 = sst [smem:[#allocation70_spill]] %s25914_s9 }
  0x2d   :  { %29776 = sst [smem:[#allocation71_spill]] %s25919_s5 }
  0x2e   :  { %29777 = sst [smem:[#allocation72_spill]] %s25924_s20 }
  0x2f   :  { %s25929_s13 = sld [smem:[%s29673_s0 + %s25747_s7]]   ;;  %s25751_s7 = smov 26  }
  0x30   :  { %s25934_s9 = sld [smem:[%s29673_s0 + %s25748_s15]]   ;;  %s25752_s15 = smov 27  }
  0x31   :  { %s25939_s5 = sld [smem:[%s29673_s0 + %s25749_s22]]   ;;  %s25753_s22 = smov 28  }
  0x32   :  { %29781 = sst [smem:[#allocation76_spill]] %s25944_s12 }
  0x33   :  { %s25949_s6 = sld [smem:[%s29673_s0 + %s25751_s7]]   ;;  %s25755_s7 = smov 30  }
  0x34   :  { %s25954_s4 = sld [smem:[%s29673_s0 + %s25752_s15]]   ;;  %s25756_s15 = smov 31  }
  0x35   :  { %29778 = sst [smem:[#allocation73_spill]] %s25929_s13 }
  0x36   :  { %29779 = sst [smem:[#allocation74_spill]] %s25934_s9 }
  0x37   :  { %29780 = sst [smem:[#allocation75_spill]] %s25939_s5 }
  0x38   :  { %s25959_s27 = sld [smem:[%s29673_s0 + %s25753_s22]]   ;;  %s25757_s22 = smov 32  }
  0x39   :  { %29782 = sst [smem:[#allocation77_spill]] %s25949_s6 }
  0x3a   :  { %29783 = sst [smem:[#allocation78_spill]] %s25954_s4 }
  0x3b   :  { %29785 = sst [smem:[#allocation80_spill]] %s25964_s30 }
  0x3c   :  { %s25969_s24 = sld [smem:[%s29673_s0 + %s25755_s7]]   ;;  %s25759_s7 = smov 34  }
  0x3d   :  { %s25974_s19 = sld [smem:[%s29673_s0 + %s25756_s15]]   ;;  %s25760_s15 = smov 35  }
  0x3e   :  { %29784 = sst [smem:[#allocation79_spill]] %s25959_s27 }
  0x3f   :  { %s25979_s8 = sld [smem:[%s29673_s0 + %s25757_s22]]   ;;  %s25761_s22 = smov 36  }
  0x40   :  { %s25984_s29 = sld [smem:[%s29673_s0 + %s25758_s28]]   ;;  %s25762_s28 = smov 37  }
  0x41   :  { %s25989_s21 = sld [smem:[%s29673_s0 + %s25759_s7]]   ;;  %s25763_s7 = smov 38  }
  0x42   :  { %29786 = sst [smem:[#allocation81_spill]] %s25969_s24 }
  0x43   :  { %29787 = sst [smem:[#allocation82_spill]] %s25974_s19 }
  0x44   :  { %s25994_s25 = sld [smem:[%s29673_s0 + %s25760_s15]]   ;;  %s25764_s15 = smov 39  }
  0x45   :  { %29788 = sst [smem:[#allocation83_spill]] %s25979_s8 }
  0x46   :  { %29789 = sst [smem:[#allocation84_spill]] %s25984_s29 }
  0x47   :  { %29790 = sst [smem:[#allocation85_spill]] %s25989_s21 }
  0x48   :  { %s25999_s17 = sld [smem:[%s29673_s0 + %s25761_s22]]   ;;  %s25765_s22 = smov 40  }
  0x49   :  { %s26004_s29 = sld [smem:[%s29673_s0 + %s25762_s28]]   ;;  %s25766_s28 = smov 41  }
  0x4a   :  { %29791 = sst [smem:[#allocation86_spill]] %s25994_s25 }
  0x4b   :  { %s26009_s19 = sld [smem:[%s29673_s0 + %s25763_s7]]   ;;  %s25767_s7 = smov 42  }
  0x4c   :  { %s26014_s25 = sld [smem:[%s29673_s0 + %s25764_s15]]   ;;  %s25768_s15 = smov 43  }
  0x4d   :  { %s26019_s30 = sld [smem:[%s29673_s0 + %s25765_s22]]   ;;  %s25769_s22 = smov 44  }
  0x4e   :  { %29792 = sst [smem:[#allocation87_spill]] %s25999_s17 }
  0x4f   :  { %29793 = sst [smem:[#allocation88_spill]] %s26004_s29 }
  0x50   :  { %s26024_s29 = sld [smem:[%s29673_s0 + %s25766_s28]]   ;;  %s25770_s28 = smov 45  }
  0x51   :  { %29794 = sst [smem:[#allocation89_spill]] %s26009_s19 }
  0x52   :  { %29795 = sst [smem:[#allocation90_spill]] %s26014_s25 }
  0x53   :  { %29796 = sst [smem:[#allocation91_spill]] %s26019_s30 }
  0x54   :  { %s26029_s19 = sld [smem:[%s29673_s0 + %s25767_s7]]   ;;  %s25771_s7 = smov 46  }
  0x55   :  { %s26034_s25 = sld [smem:[%s29673_s0 + %s25768_s15]]   ;;  %s25772_s15 = smov 47  }
  0x56   :  { %29797 = sst [smem:[#allocation92_spill]] %s26024_s29 }
  0x57   :  { %s26039_s30 = sld [smem:[%s29673_s0 + %s25769_s22]]   ;;  %s25773_s22 = smov 48  }
  0x58   :  { %s26044_s4 = sld [smem:[%s29673_s0 + %s25770_s28]]   ;;  %s25774_s28 = smov 49  }
  0x5a   :  { %29798 = sst [smem:[#allocation93_spill]] %s26029_s19 }
  0x5b   :  { %29799 = sst [smem:[#allocation94_spill]] %s26034_s25 }
  0x5c   :  { %s26049_s19 = sld [smem:[%s29673_s0 + %s25771_s7]]  }
  0x5d   :  { %29800 = sst [smem:[#allocation95_spill]] %s26039_s30 }
  0x5e   :  { %29801 = sst [smem:[#allocation96_spill]] %s26044_s4 }
  0x5f   :  { %s26054_s25 = sld [smem:[%s29673_s0 + %s25772_s15]]  }
  0x60   :  { %s26059_s30 = sld [smem:[%s29673_s0 + %s25773_s22]]  }
  0x61   :  { %s26064_s4 = sld [smem:[%s29673_s0 + %s25774_s28]]  }
  0x62   :  { %29802 = sst [smem:[#allocation97_spill]] %s26049_s19 }
  0x65   :  { %29803 = sst [smem:[#allocation98_spill]] %s26054_s25 }
  0x66   :  { %29804 = sst [smem:[#allocation99_spill]] %s26059_s30 }
  0x67   :  { %29805 = sst [smem:[#allocation100_spill]] %s26064_s4 }
  0x68   :  { %104 = vsyncpa [#allocation5], 0 }
  0x69   :  { %106 = vsyncpa [#allocation5 + $0x1], 0 }
  0x6a   :  { %107 = vsyncpa [#allocation8], 0 }
  0x6b   :  { %109 = vsyncpa [#allocation8 + $0x1], 0 }
  0x6c   :  { %110 = vsyncpa [#allocation11], 0 }
  0x6d   :  { %112 = vsyncpa [#allocation11 + $0x1], 0 }
  0x6e   :  { %113 = vsyncpa [#allocation14], 0 }
  0x6f   :  { %115 = vsyncpa [#allocation14 + $0x1], 0 }
  0x70   :  { %116 = vsyncpa [#allocation17], 0 }
  0x71   :  { %118 = vsyncpa [#allocation17 + $0x1], 0 }
  0x72   :  { %119 = vsyncpa [#allocation20], 0 }
  0x73   :  { %121 = vsyncpa [#allocation20 + $0x1], 0 }
  0x74   :  { %122 = vsyncpa [#allocation23], 0 }
  0x75   :  { %124 = vsyncpa [#allocation23 + $0x1], 0 }
  0x76   :  { %125 = vsyncpa [#allocation26], 0 }
  0x77   :  { %127 = vsyncpa [#allocation26 + $0x1], 0 }
  0x78   :  { %128 = vsyncpa [#allocation29], 0 }
  0x79   :  { %130 = vsyncpa [#allocation29 + $0x1], 0 }
  0x7a   :  { %131 = vsyncpa [#allocation32], 0 }
  0x7b   :  { %133 = vsyncpa [#allocation32 + $0x1], 0 }
  0x7c   :  { %134 = vsyncpa [#allocation35], 0 }
  0x7d   :  { %136 = vsyncpa [#allocation35 + $0x1], 0 }
  0x7e   :  { %137 = vsyncpa [#allocation6], 0  ;;  %s26066_s0 = smov 0   ;;  %s26068_s7 = smov 0  }
  0x7f   :  { %s26070_s10 = smov 0   ;;  %s26072_s11 = smov 0  }
  0x80   :  { %s26074_s15 = smov 0   ;;  %s26076_s16 = smov 0  }
  0x81   :  { %s26078_s18 = smov 0  }
  0x82 LB: > { %s29806_s29 = sld [smem:[#allocation92_spill]]  ;;  %s29807_s27 = sld [smem:[#allocation79_spill]]  ;;  %s25716_s15 = sphi %s26074_s15, %s29972_s15   ;;  %s25712_s11 = sphi %s26072_s11, %s29971_s11   ;;  %s25708_s10 = sphi %s26070_s10, %s29970_s10   ;;  %s25704_s7 = sphi %s26068_s7, %s29969_s7   ;;  %s25700_s0 = sphi %s26066_s0, %s29968_s0   ;;  %s25724_s18 = sphi %s26078_s18, %s29967_s18   ;;  %s25720_s16 = sphi %s26076_s16, %s29973_s16  }
  0x83   : > { %s29808_s24 = sld [smem:[#allocation81_spill]]  ;;  %s29809_s21 = sld [smem:[#allocation85_spill]] }
  0x84   : > { %s29810_s20 = sld [smem:[#allocation72_spill]]  ;;  %s29811_s17 = sld [smem:[#allocation87_spill]] }
  0x85   : > { %s29812_s13 = sld [smem:[#allocation73_spill]]  ;;  %s29813_s8 = sld [smem:[#allocation83_spill]] }
  0x86   : > { %s29814_s3 = sld [smem:[#allocation58_spill]]  ;;  %s29815_s6 = sld [smem:[#allocation77_spill]] }
  0x87   : > { %s29816_s5 = sld [smem:[#allocation75_spill]]  ;;  %s29817_s14 = sld [smem:[#allocation60_spill]] }
  0x88   : > { %29818 = sst [smem:[#allocation101_spill]] %s25704_s7  ;;  %s26100_s22 = sadd.s32 4294967295, %s25724_s18  }
  0x89   : > { %29819 = sst [smem:[#allocation102_spill]] %s25708_s10  ;;  %s26103_s23 = sadd.s32 1, %s25724_s18  }
  0x8a   : > { %29820 = sst [smem:[#allocation103_spill]] %s25716_s15  ;;  %p330_p0 = scmp.lt.s32.totalorder %s25724_s18, 5 }
  0x8b   : > { %29821 = sst [smem:[#allocation104_spill]] %s25720_s16  ;;  %p332_p1 = scmp.lt.s32.totalorder %s26103_s23, 5 }
  0x8c   : > { %29822 = sst [smem:[#allocation105_spill]] %s25724_s18  ;;  %s337_s26 = sadd.s32 1, %s25720_s16 }
  0x8d   : > { %29823 = sst [smem:[#allocation106_spill]] %s26100_s22  ;;  %p344_p2 = scmp.ne.s32.totalorder %s25720_s16, %s25716_s15 }
  0x8e   : > { %29824 = sst [smem:[#allocation107_spill]] %s26103_s23  ;;  %p345_p3 = scmp.eq.s32.totalorder %s25724_s18, 0 }
  0x8f   : > { %s26111_s28 = scalar_select %p330_p0, %s25724_s18, 5 }
  0x90   : > { %s333_s1 = scalar_select %p332_p1, %s26103_s23, 5 }
  0x91   : > { %p350_p4 = scmp.ne.s32.totalorder %s25716_s15, %s25712_s11  ;;  %p351_p5 = scmp.eq.s32.totalorder %s26100_s22, 0 }
  0x92   : > { %s334_s2 = ssub.s32 %s26111_s28, %s333_s1  ;;  %p26120_p7 = por %p345_p3, %p344_p2 }
  0x93   : > { %p335_p6 = scmp.eq.s32.totalorder %s334_s2, 0  ;;  %p26126_p8 = por %p351_p5, %p350_p4 }
  0x94   : > { %s29825_s4 = scalar_select %p26120_p7, 1, 0 }
  0x95   : > { %s29826_s30 = scalar_select %p26126_p8, 1, 0 }
  0x96   : > { %s20567_s19 = sadd.s32 4294967290, %s25724_s18  ;;  %s20568_s11 = sadd.s32 4294967290, %s26103_s23 }
  0x97   : > { %29827 = sst [smem:[#allocation108_spill]] %s29826_s30  ;;  %p733_p9 = scmp.gt.s32.totalorder %s20567_s19, 0 }
  0x98   : > { %s26132_s25 = scalar_select %p335_p6, %s25720_s16, %s337_s26  }
  0x99   : > { %p736_p10 = scmp.gt.s32.totalorder %s20568_s11, 0  ;;  %s29975_s19 = smov (!%p733_p9, %s20567_s19), 0 }
  0x9a   : > { %29828 = sst [smem:[#allocation109_spill]] %s26132_s25  ;;  %p748_p11 = scmp.ne.s32.totalorder %s25708_s10, %s25704_s7 }
  0x9b   : > { %s29977_s11 = smov (!%p736_p10, %s20568_s11), 0  ;;  %p754_p12 = scmp.ne.s32.totalorder %s25704_s7, %s25700_s0 }
  0x9c   : > { %s738_s1 = ssub.s32 %s29975_s19, %s29977_s11  ;;  %s741_s2 = sadd.s32 1, %s25708_s10 }
  0x9d   : > { %p739_p13 = scmp.eq.s32.totalorder %s738_s1, 0  ;;  %p26145_p0 = por %p748_p11, %p345_p3 }
  0x9e   : > { %p26151_p1 = por %p754_p12, %p351_p5  ;;  %p20612_p2 = scmp.ge.s32.totalorder %s25724_s18, 12 }
  0x9f   : > { %s26156_s25 = scalar_select %p739_p13, %s25708_s10, %s741_s2  }
  0xa0   : > { %s29830_s26 = scalar_select %p26151_p1, 1, 0 }
  0xa1   : > { %29832 = sst [smem:[#allocation111_spill]] %s26156_s25  ;;  %1626 = sbr.rel (%p20612_p2) target bundleno = 681 (0x2a9), region = 60 }
  0xa2   : > { %29831 = sst [smem:[#allocation110_spill]] %s29830_s26  ;;  %s29697_s0 = sand.u32 (!%p20612_p2), 1, %s25720_s16  }
  0xa3   : > { %s29700_s11 = smul.u32 (!%p20612_p2), 6912, %s26111_s28  ;;  %s26166_s2 = sand.u32 (!%p20612_p2), 1, %s25724_s18  }
  0xa4   : > { %s26163_s1 = smul.u32 (!%p20612_p2), 432, %s29697_s0  ;;  %s25008_s0 = scalar_lea.hbm (!%p20612_p2), %s29817_s14, 41472 }
  0xa5   : > { %s26171_s25 = scalar_lea.hbm (!%p20612_p2), %s29817_s14, %s29700_s11 }
  0xa6   : > { %s1714_s23 = scalar_lea.vmem (!%p20612_p2), [#allocation7], %s26163_s1  ;;  %s25004_s30 = scalar_lea.hbm (!%p20612_p2), %s26171_s25, 6912 }
  0xa7   : > { %s1723_s26 = sshll.u32 (!%p20612_p2), %s1714_s23, 4  ;;  %p25005_p3 = scmp.ne.s32.totalorder (!%p20612_p2), %s26171_s25, %s25004_s30  ;;  %s26174_s26 = int_to_ptr.vmem [resolvable:$true] %s1723_s26 }
  0xa8   : > { %p25009_p6 = scmp.lt.u32.totalorder %s26171_s25, %s29817_s14  ;;  %p25010_p9 = scmp.lt.u32.totalorder %s25008_s0, %s25004_s30 }
  0xa9   : > { %p25006_p4 = pnand %p25005_p3, %p26120_p7  ;;  %p25012_p11 = scmp.lt.u32.totalorder %s25004_s30, %s26171_s25 }
  0xaa   : > { %p25011_p10 = por %p25010_p9, %p25009_p6 }
  0xab   : > { %p25007_p5 = pneg %p25006_p4 }
  0xac   : > { %p25013_p12 = por %p25012_p11, %p25011_p10 }
  0xae   : > { %p25014_p13 = pnand %p25013_p12, %p25007_p5 }
  0xb0   : > { %25017 = shalt.err (!%p25014_p13)
}
  0xb1   : > { %s25018_s23 = scalar_lea.vmem %s26174_s26, 6912  ;;  %s25775_s11 = smov [#allocation7]  }
  0xb2   : > { %p25019_p2 = scmp.ne.s32.totalorder %s26174_s26, %s25018_s23  ;;  %s25022_s7 = sshll.u32 %s25775_s11, 4  ;;  %s25023_s7 = int_to_ptr.vmem [resolvable:$false] %s25022_s7 }
  0xb3   : > { %s25024_s22 = scalar_lea.vmem %s25023_s7, 13824  ;;  %p25025_p3 = scmp.lt.s32.totalorder %s26174_s26, %s25023_s7 }
  0xb4   : > { %p25020_p1 = pnand %p25019_p2, %p26120_p7  ;;  %p25026_p4 = scmp.lt.s32.totalorder %s25024_s22, %s25018_s23 }
  0xb6   : > { %p25021_p8 = pneg %p25020_p1  ;;  %p25027_p6 = por %p25026_p4, %p25025_p3 }
  0xb8   : > { %p25028_p9 = pnand %p25027_p6, %p25021_p8 }
  0xba   : > { %25031 = shalt.err (!%p25028_p9)
}
  0xbb   : > { %s29706_s30 = smov 192   ;;  %s29708_s0 = smov 12  }
  0xbc   : > { %s29833_s7 = scalar_lea.sflag [#allocation8], %s26166_s2  ;;  %s29834_s22 = sand.u32 1, %s25708_s10  }
  0xbd   : > { %23302 = dma.hbm_to_vmem [thread:$0]  (%p26120_p7), %s26171_s25, 6912, %s26174_s26, %s29833_s7, %s29706_s30, %s29706_s30, %s29708_s0  }
  0xbe   : > { %s26202_s11 = smul.u32 3, %s29834_s22  ;;  %s29719_s25 = scalar_lea.sflag [#allocation11], %s26166_s2 }
  0xbf   : > { %s26205_s23 = smul.u32 48, %s29975_s19  ;;  %s25036_s7 = scalar_lea.hbm %s29812_s13, 288 }
  0xc0   : > { %s1862_s18 = scalar_lea.vmem [#allocation10], %s26202_s11 }
  0xc1   : > { %s26209_s14 = scalar_lea.hbm %s29812_s13, %s26205_s23  ;;  %s1873_s12 = sshll.u32 %s1862_s18, 4  ;;  %s26212_s12 = int_to_ptr.vmem [resolvable:$true] %s1873_s12 }
  0xc2   : > { %s26216_s9 = scalar_lea.hbm %s29816_s5, %s26205_s23  ;;  %s25032_s26 = scalar_lea.hbm %s26209_s14, 48 }
  0xc3   : > { %p25033_p8 = scmp.ne.s32.totalorder %s26209_s14, %s25032_s26  ;;  %p25037_p10 = scmp.lt.u32.totalorder %s26209_s14, %s29812_s13 }
  0xc4   : > { %p25038_p11 = scmp.lt.u32.totalorder %s25036_s7, %s25032_s26  ;;  %p25040_p13 = scmp.lt.u32.totalorder %s25032_s26, %s26209_s14 }
  0xc5   : > { %p25034_p1 = pnand %p25033_p8, %p26145_p0 }
  0xc6   : > { %p25039_p12 = por %p25038_p11, %p25037_p10 }
  0xc7   : > { %p25035_p5 = pneg %p25034_p1 }
  0xc8   : > { %p25041_p2 = por %p25040_p13, %p25039_p12 }
  0xca   : > { %p25042_p3 = pnand %p25041_p2, %p25035_p5 }
  0xcc   : > { %25045 = shalt.err (!%p25042_p3)
}
  0xcd   : > { %s25046_s18 = scalar_lea.vmem %s26212_s12, 48  ;;  %s25778_s22 = smov [#allocation10]  }
  0xce   : > { %p25047_p4 = scmp.ne.s32.totalorder %s26212_s12, %s25046_s18  ;;  %s25050_s30 = sshll.u32 %s25778_s22, 4  ;;  %s25051_s30 = int_to_ptr.vmem [resolvable:$false] %s25050_s30 }
  0xcf   : > { %s25052_s0 = scalar_lea.vmem %s25051_s30, 96  ;;  %p25053_p8 = scmp.lt.s32.totalorder %s26212_s12, %s25051_s30 }
  0xd0   : > { %p25048_p6 = pnand %p25047_p4, %p26145_p0  ;;  %p25054_p1 = scmp.lt.s32.totalorder %s25052_s0, %s25046_s18 }
  0xd2   : > { %p25049_p9 = pneg %p25048_p6  ;;  %p25055_p10 = por %p25054_p1, %p25053_p8 }
  0xd4   : > { %p25056_p11 = pnand %p25055_p10, %p25049_p9 }
  0xd6   : > { %25059 = shalt.err (!%p25056_p11)
}
  0xd7   : > { %23304 = dma.hbm_to_vmem [thread:$0]  (%p26145_p0), %s26209_s14, 48, %s26212_s12, %s29719_s25  }
  0xd8   : > { %s1908_s30 = scalar_lea.vmem [#allocation13], %s26202_s11  ;;  %s29712_s26 = scalar_lea.sflag [#allocation14], %s26166_s2 }
  0xd9   : > { %s1919_s0 = sshll.u32 %s1908_s30, 4  ;;  %s25060_s7 = scalar_lea.hbm %s26216_s9, 48  ;;  %s1920_s0 = int_to_ptr.vmem [resolvable:$true] %s1919_s0 }
  0xda   : > { %p25061_p5 = scmp.ne.s32.totalorder %s26216_s9, %s25060_s7  ;;  %s25064_s18 = scalar_lea.hbm %s29816_s5, 288 }
  0xdb   : > { %p25065_p2 = scmp.lt.u32.totalorder %s26216_s9, %s29816_s5  ;;  %p25066_p3 = scmp.lt.u32.totalorder %s25064_s18, %s25060_s7 }
  0xdc   : > { %p25062_p12 = pnand %p25061_p5, %p26145_p0  ;;  %p25068_p6 = scmp.lt.u32.totalorder %s25060_s7, %s26216_s9 }
  0xdd   : > { %p25067_p4 = por %p25066_p3, %p25065_p2 }
  0xde   : > { %p25063_p13 = pneg %p25062_p12 }
  0xdf   : > { %p25069_p9 = por %p25068_p6, %p25067_p4 }
  0xe1   : > { %p25070_p8 = pnand %p25069_p9, %p25063_p13 }
  0xe3   : > { %25073 = shalt.err (!%p25070_p8)
}
  0xe4   : > { %s25074_s22 = scalar_lea.vmem %s1920_s0, 48  ;;  %s25779_s14 = smov [#allocation13]  }
  0xe5   : > { %p25075_p1 = scmp.ne.s32.totalorder %s1920_s0, %s25074_s22  ;;  %s25078_s12 = sshll.u32 %s25779_s14, 4  ;;  %s25079_s12 = int_to_ptr.vmem [resolvable:$false] %s25078_s12 }
  0xe6   : > { %s25080_s30 = scalar_lea.vmem %s25079_s12, 96  ;;  %p25081_p5 = scmp.lt.s32.totalorder %s1920_s0, %s25079_s12 }
  0xe7   : > { %p25076_p10 = pnand %p25075_p1, %p26145_p0  ;;  %p25082_p12 = scmp.lt.s32.totalorder %s25080_s30, %s25074_s22 }
  0xe9   : > { %p25077_p11 = pneg %p25076_p10  ;;  %p25083_p7 = por %p25082_p12, %p25081_p5 }
  0xeb   : > { %p25084_p2 = pnand %p25083_p7, %p25077_p11 }
  0xed   : > { %25087 = shalt.err (!%p25084_p2)
}
  0xee   : > { %23306 = dma.hbm_to_vmem [thread:$0]  (%p26145_p0), %s26216_s9, 48, %s1920_s0, %s29712_s26  }
  0xef   : > { %s26257_s7 = scalar_lea.hbm %s29815_s6, %s26205_s23  ;;  %s1952_s18 = scalar_lea.vmem [#allocation16], %s26202_s11 }
  0xf0   : > { %s1963_s22 = sshll.u32 %s1952_s18, 4  ;;  %s29713_s14 = scalar_lea.sflag [#allocation17], %s26166_s2  ;;  %s1964_s22 = int_to_ptr.vmem [resolvable:$true] %s1963_s22 }
  0xf1   : > { %s25088_s12 = scalar_lea.hbm %s26257_s7, 48  ;;  %s25092_s30 = scalar_lea.hbm %s29815_s6, 288 }
  0xf2   : > { %p25089_p7 = scmp.ne.s32.totalorder %s26257_s7, %s25088_s12  ;;  %p25093_p4 = scmp.lt.u32.totalorder %s26257_s7, %s29815_s6 }
  0xf3   : > { %p25094_p6 = scmp.lt.u32.totalorder %s25092_s30, %s25088_s12  ;;  %p25096_p8 = scmp.lt.u32.totalorder %s25088_s12, %s26257_s7 }
  0xf4   : > { %p25090_p13 = pnand %p25089_p7, %p26145_p0 }
  0xf5   : > { %p25095_p9 = por %p25094_p6, %p25093_p4 }
  0xf6   : > { %p25091_p3 = pneg %p25090_p13 }
  0xf7   : > { %p25097_p1 = por %p25096_p8, %p25095_p9 }
  0xf9   : > { %p25098_p10 = pnand %p25097_p1, %p25091_p3 }
  0xfb   : > { %25101 = shalt.err (!%p25098_p10)
}
  0xfc   : > { %s25102_s9 = scalar_lea.vmem %s1964_s22, 48  ;;  %s25780_s0 = smov [#allocation16]  }
  0xfd   : > { %p25103_p11 = scmp.ne.s32.totalorder %s1964_s22, %s25102_s9  ;;  %s25106_s18 = sshll.u32 %s25780_s0, 4  ;;  %s25107_s18 = int_to_ptr.vmem [resolvable:$false] %s25106_s18 }
  0xfe   : > { %s25108_s26 = scalar_lea.vmem %s25107_s18, 96  ;;  %p25109_p2 = scmp.lt.s32.totalorder %s1964_s22, %s25107_s18 }
  0xff   : > { %p25104_p5 = pnand %p25103_p11, %p26145_p0  ;;  %p25110_p7 = scmp.lt.s32.totalorder %s25108_s26, %s25102_s9 }
 0x101   : > { %p25105_p12 = pneg %p25104_p5  ;;  %p25111_p13 = por %p25110_p7, %p25109_p2 }
 0x103   : > { %p25112_p4 = pnand %p25111_p13, %p25105_p12 }
 0x105   : > { %25115 = shalt.err (!%p25112_p4)
}
 0x106   : > { %23308 = dma.hbm_to_vmem [thread:$0]  (%p26145_p0), %s26257_s7, 48, %s1964_s22, %s29713_s14  }
 0x107   : > { %s26278_s12 = scalar_lea.hbm %s29807_s27, %s26205_s23  ;;  %s1998_s26 = scalar_lea.vmem [#allocation19], %s26202_s11 }
 0x108   : > { %s2009_s30 = sshll.u32 %s1998_s26, 4  ;;  %s29714_s9 = scalar_lea.sflag [#allocation20], %s26166_s2  ;;  %s2010_s30 = int_to_ptr.vmem [resolvable:$true] %s2009_s30 }
 0x109   : > { %s25116_s0 = scalar_lea.hbm %s26278_s12, 48  ;;  %s25120_s18 = scalar_lea.hbm %s29807_s27, 288 }
 0x10a   : > { %p25117_p3 = scmp.ne.s32.totalorder %s26278_s12, %s25116_s0  ;;  %p25121_p8 = scmp.lt.u32.totalorder %s26278_s12, %s29807_s27 }
 0x10b   : > { %p25122_p1 = scmp.lt.u32.totalorder %s25120_s18, %s25116_s0  ;;  %p25124_p11 = scmp.lt.u32.totalorder %s25116_s0, %s26278_s12 }
 0x10c   : > { %p25118_p6 = pnand %p25117_p3, %p26145_p0 }
 0x10d   : > { %p25123_p10 = por %p25122_p1, %p25121_p8 }
 0x10e   : > { %p25119_p9 = pneg %p25118_p6 }
 0x10f   : > { %p25125_p5 = por %p25124_p11, %p25123_p10 }
 0x111   : > { %p25126_p12 = pnand %p25125_p5, %p25119_p9 }
 0x113   : > { %25129 = shalt.err (!%p25126_p12)
}
 0x114   : > { %s25130_s7 = scalar_lea.vmem %s2010_s30, 48  ;;  %s25781_s22 = smov [#allocation19]  }
 0x115   : > { %p25131_p2 = scmp.ne.s32.totalorder %s2010_s30, %s25130_s7  ;;  %s25134_s26 = sshll.u32 %s25781_s22, 4  ;;  %s25135_s26 = int_to_ptr.vmem [resolvable:$false] %s25134_s26 }
 0x116   : > { %s25136_s14 = scalar_lea.vmem %s25135_s26, 96  ;;  %p25137_p4 = scmp.lt.s32.totalorder %s2010_s30, %s25135_s26 }
 0x117   : > { %p25132_p7 = pnand %p25131_p2, %p26145_p0  ;;  %p25138_p3 = scmp.lt.s32.totalorder %s25136_s14, %s25130_s7 }
 0x119   : > { %p25133_p13 = pneg %p25132_p7  ;;  %p25139_p6 = por %p25138_p3, %p25137_p4 }
 0x11b   : > { %p25140_p1 = pnand %p25139_p6, %p25133_p13 }
 0x11d   : > { %25143 = shalt.err (!%p25140_p1)
}
 0x11e   : > { %23310 = dma.hbm_to_vmem [thread:$0]  (%p26145_p0), %s26278_s12, 48, %s2010_s30, %s29714_s9  }
 0x11f   : > { %s26299_s0 = scalar_lea.hbm %s29808_s24, %s26205_s23  ;;  %s2044_s14 = scalar_lea.vmem [#allocation22], %s26202_s11 }
 0x120   : > { %s2055_s18 = sshll.u32 %s2044_s14, 4  ;;  %s29715_s7 = scalar_lea.sflag [#allocation23], %s26166_s2  ;;  %s2056_s18 = int_to_ptr.vmem [resolvable:$true] %s2055_s18 }
 0x121   : > { %s25144_s22 = scalar_lea.hbm %s26299_s0, 48  ;;  %s25148_s26 = scalar_lea.hbm %s29808_s24, 288 }
 0x122   : > { %p25145_p9 = scmp.ne.s32.totalorder %s26299_s0, %s25144_s22  ;;  %p25149_p11 = scmp.lt.u32.totalorder %s26299_s0, %s29808_s24 }
 0x123   : > { %p25150_p5 = scmp.lt.u32.totalorder %s25148_s26, %s25144_s22  ;;  %p25152_p2 = scmp.lt.u32.totalorder %s25144_s22, %s26299_s0 }
 0x124   : > { %p25146_p8 = pnand %p25145_p9, %p26145_p0 }
 0x125   : > { %p25151_p12 = por %p25150_p5, %p25149_p11 }
 0x126   : > { %p25147_p10 = pneg %p25146_p8 }
 0x127   : > { %p25153_p7 = por %p25152_p2, %p25151_p12 }
 0x129   : > { %p25154_p13 = pnand %p25153_p7, %p25147_p10 }
 0x12b   : > { %25157 = shalt.err (!%p25154_p13)
}
 0x12c   : > { %s25158_s12 = scalar_lea.vmem %s2056_s18, 48  ;;  %s25782_s30 = smov [#allocation22]  }
 0x12d   : > { %p25159_p4 = scmp.ne.s32.totalorder %s2056_s18, %s25158_s12  ;;  %s25162_s14 = sshll.u32 %s25782_s30, 4  ;;  %s25163_s14 = int_to_ptr.vmem [resolvable:$false] %s25162_s14 }
 0x12e   : > { %s25164_s9 = scalar_lea.vmem %s25163_s14, 96  ;;  %p25165_p1 = scmp.lt.s32.totalorder %s2056_s18, %s25163_s14 }
 0x12f   : > { %p25160_p3 = pnand %p25159_p4, %p26145_p0  ;;  %p25166_p9 = scmp.lt.s32.totalorder %s25164_s9, %s25158_s12 }
 0x131   : > { %p25161_p6 = pneg %p25160_p3  ;;  %p25167_p8 = por %p25166_p9, %p25165_p1 }
 0x133   : > { %p25168_p5 = pnand %p25167_p8, %p25161_p6 }
 0x135   : > { %25171 = shalt.err (!%p25168_p5)
}
 0x136   : > { %23312 = dma.hbm_to_vmem [thread:$0]  (%p26145_p0), %s26299_s0, 48, %s2056_s18, %s29715_s7  }
 0x137   : > { %s26320_s22 = scalar_lea.hbm %s29813_s8, %s26205_s23  ;;  %s2090_s9 = scalar_lea.vmem [#allocation25], %s26202_s11 }
 0x138   : > { %s2101_s26 = sshll.u32 %s2090_s9, 4  ;;  %s29716_s12 = scalar_lea.sflag [#allocation26], %s26166_s2  ;;  %s2102_s26 = int_to_ptr.vmem [resolvable:$true] %s2101_s26 }
 0x139   : > { %s25172_s30 = scalar_lea.hbm %s26320_s22, 48  ;;  %s25176_s14 = scalar_lea.hbm %s29813_s8, 288 }
 0x13a   : > { %p25173_p10 = scmp.ne.s32.totalorder %s26320_s22, %s25172_s30  ;;  %p25177_p2 = scmp.lt.u32.totalorder %s26320_s22, %s29813_s8 }
 0x13b   : > { %p25178_p7 = scmp.lt.u32.totalorder %s25176_s14, %s25172_s30  ;;  %p25180_p4 = scmp.lt.u32.totalorder %s25172_s30, %s26320_s22 }
 0x13c   : > { %p25174_p11 = pnand %p25173_p10, %p26145_p0 }
 0x13d   : > { %p25179_p13 = por %p25178_p7, %p25177_p2 }
 0x13e   : > { %p25175_p12 = pneg %p25174_p11 }
 0x13f   : > { %p25181_p3 = por %p25180_p4, %p25179_p13 }
 0x141   : > { %p25182_p6 = pnand %p25181_p3, %p25175_p12 }
 0x143   : > { %25185 = shalt.err (!%p25182_p6)
}
 0x144   : > { %s25186_s0 = scalar_lea.vmem %s2102_s26, 48  ;;  %s25783_s18 = smov [#allocation25]  }
 0x145   : > { %p25187_p1 = scmp.ne.s32.totalorder %s2102_s26, %s25186_s0  ;;  %s25190_s9 = sshll.u32 %s25783_s18, 4  ;;  %s25191_s9 = int_to_ptr.vmem [resolvable:$false] %s25190_s9 }
 0x146   : > { %s25192_s7 = scalar_lea.vmem %s25191_s9, 96  ;;  %p25193_p5 = scmp.lt.s32.totalorder %s2102_s26, %s25191_s9 }
 0x147   : > { %p25188_p9 = pnand %p25187_p1, %p26145_p0  ;;  %p25194_p10 = scmp.lt.s32.totalorder %s25192_s7, %s25186_s0 }
 0x149   : > { %p25189_p8 = pneg %p25188_p9  ;;  %p25195_p11 = por %p25194_p10, %p25193_p5 }
 0x14b   : > { %p25196_p2 = pnand %p25195_p11, %p25189_p8 }
 0x14d   : > { %25199 = shalt.err (!%p25196_p2)
}
 0x14e   : > { %23314 = dma.hbm_to_vmem [thread:$0]  (%p26145_p0), %s26320_s22, 48, %s2102_s26, %s29716_s12  }
 0x14f   : > { %s26341_s30 = scalar_lea.hbm %s29809_s21, %s26205_s23  ;;  %s2136_s7 = scalar_lea.vmem [#allocation28], %s26202_s11 }
 0x150   : > { %s2147_s14 = sshll.u32 %s2136_s7, 4  ;;  %s29717_s0 = scalar_lea.sflag [#allocation29], %s26166_s2  ;;  %s2148_s14 = int_to_ptr.vmem [resolvable:$true] %s2147_s14 }
 0x151   : > { %s25200_s18 = scalar_lea.hbm %s26341_s30, 48  ;;  %s25204_s9 = scalar_lea.hbm %s29809_s21, 288 }
 0x152   : > { %p25201_p12 = scmp.ne.s32.totalorder %s26341_s30, %s25200_s18  ;;  %p25205_p4 = scmp.lt.u32.totalorder %s26341_s30, %s29809_s21 }
 0x153   : > { %p25206_p3 = scmp.lt.u32.totalorder %s25204_s9, %s25200_s18  ;;  %p25208_p1 = scmp.lt.u32.totalorder %s25200_s18, %s26341_s30 }
 0x154   : > { %p25202_p7 = pnand %p25201_p12, %p26145_p0 }
 0x155   : > { %p25207_p6 = por %p25206_p3, %p25205_p4 }
 0x156   : > { %p25203_p13 = pneg %p25202_p7 }
 0x157   : > { %p25209_p9 = por %p25208_p1, %p25207_p6 }
 0x159   : > { %p25210_p8 = pnand %p25209_p9, %p25203_p13 }
 0x15b   : > { %25213 = shalt.err (!%p25210_p8)
}
 0x15c   : > { %s25214_s22 = scalar_lea.vmem %s2148_s14, 48  ;;  %s25784_s26 = smov [#allocation28]  }
 0x15d   : > { %p25215_p5 = scmp.ne.s32.totalorder %s2148_s14, %s25214_s22  ;;  %s25218_s7 = sshll.u32 %s25784_s26, 4  ;;  %s25219_s7 = int_to_ptr.vmem [resolvable:$false] %s25218_s7 }
 0x15e   : > { %s25220_s12 = scalar_lea.vmem %s25219_s7, 96  ;;  %p25221_p2 = scmp.lt.s32.totalorder %s2148_s14, %s25219_s7 }
 0x15f   : > { %p25216_p10 = pnand %p25215_p5, %p26145_p0  ;;  %p25222_p12 = scmp.lt.s32.totalorder %s25220_s12, %s25214_s22 }
 0x161   : > { %p25217_p11 = pneg %p25216_p10  ;;  %p25223_p7 = por %p25222_p12, %p25221_p2 }
 0x163   : > { %p25224_p3 = pnand %p25223_p7, %p25217_p11 }
 0x165   : > { %25227 = shalt.err (!%p25224_p3)
}
 0x166   : > { %23316 = dma.hbm_to_vmem [thread:$0]  (%p26145_p0), %s26341_s30, 48, %s2148_s14, %s29717_s0  }
 0x167   : > { %s26362_s18 = scalar_lea.hbm %s29811_s17, %s26205_s23  ;;  %s2180_s12 = scalar_lea.vmem [#allocation31], %s26202_s11 }
 0x168   : > { %s2191_s9 = sshll.u32 %s2180_s12, 4  ;;  %s29718_s22 = scalar_lea.sflag [#allocation32], %s26166_s2  ;;  %s2192_s9 = int_to_ptr.vmem [resolvable:$true] %s2191_s9 }
 0x169   : > { %s25228_s26 = scalar_lea.hbm %s26362_s18, 48  ;;  %s25232_s7 = scalar_lea.hbm %s29811_s17, 288 }
 0x16a   : > { %p25229_p13 = scmp.ne.s32.totalorder %s26362_s18, %s25228_s26  ;;  %p25233_p1 = scmp.lt.u32.totalorder %s26362_s18, %s29811_s17 }
 0x16b   : > { %p25234_p9 = scmp.lt.u32.totalorder %s25232_s7, %s25228_s26  ;;  %p25236_p5 = scmp.lt.u32.totalorder %s25228_s26, %s26362_s18 }
 0x16c   : > { %p25230_p4 = pnand %p25229_p13, %p26145_p0 }
 0x16d   : > { %p25235_p8 = por %p25234_p9, %p25233_p1 }
 0x16e   : > { %p25231_p6 = pneg %p25230_p4 }
 0x16f   : > { %p25237_p10 = por %p25236_p5, %p25235_p8 }
 0x171   : > { %p25238_p11 = pnand %p25237_p10, %p25231_p6 }
 0x173   : > { %25241 = shalt.err (!%p25238_p11)
}
 0x174   : > { %s25242_s30 = scalar_lea.vmem %s2192_s9, 48  ;;  %s25785_s14 = smov [#allocation31]  }
 0x175   : > { %p25243_p2 = scmp.ne.s32.totalorder %s2192_s9, %s25242_s30  ;;  %s25246_s12 = sshll.u32 %s25785_s14, 4  ;;  %s25247_s12 = int_to_ptr.vmem [resolvable:$false] %s25246_s12 }
 0x176   : > { %s25248_s0 = scalar_lea.vmem %s25247_s12, 96  ;;  %p25249_p3 = scmp.lt.s32.totalorder %s2192_s9, %s25247_s12 }
 0x177   : > { %p25244_p12 = pnand %p25243_p2, %p26145_p0  ;;  %p25250_p13 = scmp.lt.s32.totalorder %s25248_s0, %s25242_s30 }
 0x179   : > { %p25245_p7 = pneg %p25244_p12  ;;  %p25251_p4 = por %p25250_p13, %p25249_p3 }
 0x17b   : > { %p25252_p1 = pnand %p25251_p4, %p25245_p7 }
 0x17d   : > { %25255 = shalt.err (!%p25252_p1)
}
 0x17e   : > { %23318 = dma.hbm_to_vmem [thread:$0]  (%p26145_p0), %s26362_s18, 48, %s2192_s9, %s29718_s22  }
 0x17f   : > { %s26383_s26 = scalar_lea.hbm %s29806_s29, %s26205_s23  ;;  %s2265_s0 = scalar_lea.vmem [#allocation34], %s26202_s11 }
 0x180   : > { %s2276_s7 = sshll.u32 %s2265_s0, 4  ;;  %s29722_s30 = scalar_lea.sflag [#allocation35], %s26166_s2  ;;  %s2277_s7 = int_to_ptr.vmem [resolvable:$true] %s2276_s7 }
 0x181   : > { %s25256_s14 = scalar_lea.hbm %s26383_s26, 48  ;;  %s25260_s12 = scalar_lea.hbm %s29806_s29, 288 }
 0x182   : > { %p25257_p6 = scmp.ne.s32.totalorder %s26383_s26, %s25256_s14  ;;  %p25261_p5 = scmp.lt.u32.totalorder %s26383_s26, %s29806_s29 }
 0x183   : > { %p25262_p10 = scmp.lt.u32.totalorder %s25260_s12, %s25256_s14  ;;  %p25264_p2 = scmp.lt.u32.totalorder %s25256_s14, %s26383_s26 }
 0x184   : > { %p25258_p9 = pnand %p25257_p6, %p26145_p0 }
 0x185   : > { %p25263_p11 = por %p25262_p10, %p25261_p5 }
 0x186   : > { %p25259_p8 = pneg %p25258_p9 }
 0x187   : > { %p25265_p12 = por %p25264_p2, %p25263_p11 }
 0x189   : > { %p25266_p7 = pnand %p25265_p12, %p25259_p8 }
 0x18b   : > { %25269 = shalt.err (!%p25266_p7)
}
 0x18c   : > { %s25270_s18 = scalar_lea.vmem %s2277_s7, 48  ;;  %s25786_s9 = smov [#allocation34]  }
 0x18d   : > { %p25271_p3 = scmp.ne.s32.totalorder %s2277_s7, %s25270_s18  ;;  %s25274_s0 = sshll.u32 %s25786_s9, 4  ;;  %s25275_s0 = int_to_ptr.vmem [resolvable:$false] %s25274_s0 }
 0x18e   : > { %s25276_s22 = scalar_lea.vmem %s25275_s0, 96  ;;  %p25277_p1 = scmp.lt.s32.totalorder %s2277_s7, %s25275_s0 }
 0x18f   : > { %p25272_p13 = pnand %p25271_p3, %p26145_p0  ;;  %p25278_p6 = scmp.lt.s32.totalorder %s25276_s22, %s25270_s18 }
 0x191   : > { %p25273_p4 = pneg %p25272_p13  ;;  %p25279_p9 = por %p25278_p6, %p25277_p1 }
 0x193   : > { %p25280_p5 = pnand %p25279_p9, %p25273_p4 }
 0x195   : > { %25283 = shalt.err (!%p25280_p5)
}
 0x196   : > { %23320 = dma.hbm_to_vmem [thread:$0]  (%p26145_p0), %s26383_s26, 48, %s2277_s7, %s29722_s30  }
 0x197   : > { %s29835_s14 = smul.u32 6912, %s26111_s28  ;;  %s1680_s12 = scalar_lea.vmem [#allocation4], %s26163_s1 }
 0x198   : > { %s1689_s18 = sshll.u32 %s1680_s12, 4  ;;  %s29836_s9 = sand.u32 1, %s25708_s10   ;;  %s26412_s18 = int_to_ptr.vmem [resolvable:$true] %s1689_s18 }
 0x199   : > { %s26405_s22 = scalar_lea.hbm %s29814_s3, %s29835_s14  ;;  %s26410_s0 = smul.u32 432, %s29836_s9 }
 0x19a   : > { %s26415_s25 = smul.u32 6912, %s29975_s19  ;;  %s29837_s5 = sand.u32 1, %s25720_s16  }
 0x19b   : > { %s26419_s6 = scalar_lea.sflag [#allocation5], %s29837_s5  ;;  %s25284_s26 = scalar_lea.hbm %s26405_s22, 6912 }
 0x19c   : > { %p25285_p8 = scmp.ne.s32.totalorder %s26405_s22, %s25284_s26  ;;  %p29838_p10 = scmp.ne.s32.totalorder %s29825_s4, 0 }
 0x19d   : > { %s25288_s28 = scalar_lea.hbm %s29814_s3, 41472  ;;  %p25289_p12 = scmp.lt.u32.totalorder %s26405_s22, %s29814_s3 }
 0x19e   : > { %p25286_p11 = pnand %p25285_p8, %p29838_p10  ;;  %p25290_p7 = scmp.lt.u32.totalorder %s25288_s28, %s25284_s26 }
 0x19f   : > { %p25292_p13 = scmp.lt.u32.totalorder %s25284_s26, %s26405_s22 }
 0x1a0   : > { %p25287_p2 = pneg %p25286_p11  ;;  %p25291_p3 = por %p25290_p7, %p25289_p12 }
 0x1a2   : > { %p25293_p4 = por %p25292_p13, %p25291_p3 }
 0x1a4   : > { %p25294_p1 = pnand %p25293_p4, %p25287_p2 }
 0x1a6   : > { %25297 = shalt.err (!%p25294_p1)
}
 0x1a7   : > { %s25298_s19 = scalar_lea.vmem %s26412_s18, 6912  ;;  %s25787_s5 = smov [#allocation4]  }
 0x1a8   : > { %p25299_p6 = scmp.ne.s32.totalorder %s26412_s18, %s25298_s19  ;;  %s25302_s1 = sshll.u32 %s25787_s5, 4  ;;  %s25303_s1 = int_to_ptr.vmem [resolvable:$false] %s25302_s1 }
 0x1a9   : > { %s25304_s7 = scalar_lea.vmem %s25303_s1, 13824  ;;  %p25305_p8 = scmp.lt.s32.totalorder %s26412_s18, %s25303_s1 }
 0x1aa   : > { %p25300_p9 = pnand %p25299_p6, %p29838_p10  ;;  %p25306_p11 = scmp.lt.s32.totalorder %s25304_s7, %s25298_s19 }
 0x1ac   : > { %p25301_p5 = pneg %p25300_p9  ;;  %p25307_p12 = por %p25306_p11, %p25305_p8 }
 0x1ae   : > { %p25308_p7 = pnand %p25307_p12, %p25301_p5 }
 0x1b0   : > { %25311 = shalt.err (!%p25308_p7)
}
 0x1b1   : > { %s29839_s14 = smov 12   ;;  %s29840_s12 = smov 192  }
 0x1b2   : > { %s29841_s9 = sld [smem:[#allocation74_spill]]  ;;  %s26444_s26 = scalar_lea.hbm %s29810_s20, %s26415_s25 }
 0x1b3   : > { %23301 = dma.hbm_to_vmem [thread:$0]  (%p29838_p10), %s26405_s22, 6912, %s26412_s18, %s26419_s6, %s29840_s12, %s29840_s12, %s29839_s14  }
 0x1b4   : > { %s1838_s4 = scalar_lea.vmem [#allocation9], %s26410_s0  ;;  %s25312_s5 = scalar_lea.hbm %s26444_s26, 6912 }
 0x1b5   : > { %s1848_s28 = sshll.u32 %s1838_s4, 4  ;;  %p25313_p2 = scmp.ne.s32.totalorder %s26444_s26, %s25312_s5  ;;  %s26447_s28 = int_to_ptr.vmem [resolvable:$true] %s1848_s28 }
 0x1b6   : > { %s25316_s1 = scalar_lea.hbm %s29810_s20, 41472  ;;  %p25317_p4 = scmp.lt.u32.totalorder %s26444_s26, %s29810_s20 }
 0x1b7   : > { %p25314_p3 = pnand %p25313_p2, %p26145_p0  ;;  %p25318_p10 = scmp.lt.u32.totalorder %s25316_s1, %s25312_s5 }
 0x1b8   : > { %s26451_s19 = scalar_lea.hbm %s29841_s9, %s26415_s25  ;;  %p25320_p6 = scmp.lt.u32.totalorder %s25312_s5, %s26444_s26 }
 0x1b9   : > { %p25315_p13 = pneg %p25314_p3  ;;  %p25319_p1 = por %p25318_p10, %p25317_p4 }
 0x1bb   : > { %p25321_p9 = por %p25320_p6, %p25319_p1 }
 0x1bd   : > { %p25322_p5 = pnand %p25321_p9, %p25315_p13 }
 0x1bf   : > { %25325 = shalt.err (!%p25322_p5)
}
 0x1c0   : > { %s25326_s6 = scalar_lea.vmem %s26447_s28, 6912  ;;  %s25788_s22 = smov [#allocation9]  }
 0x1c1   : > { %p25327_p8 = scmp.ne.s32.totalorder %s26447_s28, %s25326_s6  ;;  %s25330_s18 = sshll.u32 %s25788_s22, 4  ;;  %s25331_s18 = int_to_ptr.vmem [resolvable:$false] %s25330_s18 }
 0x1c2   : > { %s25332_s7 = scalar_lea.vmem %s25331_s18, 13824  ;;  %p25333_p7 = scmp.lt.s32.totalorder %s26447_s28, %s25331_s18 }
 0x1c3   : > { %p25328_p11 = pnand %p25327_p8, %p26145_p0  ;;  %p25334_p2 = scmp.lt.s32.totalorder %s25332_s7, %s25326_s6 }
 0x1c5   : > { %p25329_p12 = pneg %p25328_p11  ;;  %p25335_p3 = por %p25334_p2, %p25333_p7 }
 0x1c7   : > { %p25336_p4 = pnand %p25335_p3, %p25329_p12 }
 0x1c9   : > { %25339 = shalt.err (!%p25336_p4)
}
 0x1ca   : > { %s29842_s4 = scalar_lea.sflag [#allocation8], %s26166_s2  ;;  %s29843_s5 = sld [smem:[#allocation76_spill]] }
 0x1cb   : > { %23303 = dma.hbm_to_vmem [thread:$0]  (%p26145_p0), %s26444_s26, 6912, %s26447_s28, %s29842_s4, %s29840_s12, %s29840_s12, %s29839_s14  }
 0x1cc   : > { %s1884_s1 = scalar_lea.vmem [#allocation12], %s26410_s0  ;;  %s25340_s18 = scalar_lea.hbm %s26451_s19, 6912 }
 0x1cd   : > { %s1894_s6 = sshll.u32 %s1884_s1, 4  ;;  %p25341_p13 = scmp.ne.s32.totalorder %s26451_s19, %s25340_s18  ;;  %s26476_s6 = int_to_ptr.vmem [resolvable:$true] %s1894_s6 }
 0x1ce   : > { %s25344_s7 = scalar_lea.hbm %s29841_s9, 41472  ;;  %p25345_p6 = scmp.lt.u32.totalorder %s26451_s19, %s29841_s9 }
 0x1cf   : > { %p25342_p10 = pnand %p25341_p13, %p26145_p0  ;;  %p25346_p9 = scmp.lt.u32.totalorder %s25344_s7, %s25340_s18 }
 0x1d0   : > { %s26480_s22 = scalar_lea.hbm %s29843_s5, %s26205_s23  ;;  %p25348_p8 = scmp.lt.u32.totalorder %s25340_s18, %s26451_s19 }
 0x1d1   : > { %p25343_p1 = pneg %p25342_p10  ;;  %p25347_p5 = por %p25346_p9, %p25345_p6 }
 0x1d3   : > { %p25349_p11 = por %p25348_p8, %p25347_p5 }
 0x1d5   : > { %p25350_p12 = pnand %p25349_p11, %p25343_p1 }
 0x1d7   : > { %25353 = shalt.err (!%p25350_p12)
}
 0x1d8   : > { %s25354_s26 = scalar_lea.vmem %s26476_s6, 6912  ;;  %s25789_s28 = smov [#allocation12]  }
 0x1d9   : > { %p25355_p7 = scmp.ne.s32.totalorder %s26476_s6, %s25354_s26  ;;  %s25358_s4 = sshll.u32 %s25789_s28, 4  ;;  %s25359_s4 = int_to_ptr.vmem [resolvable:$false] %s25358_s4 }
 0x1da   : > { %s25360_s1 = scalar_lea.vmem %s25359_s4, 13824  ;;  %p25361_p4 = scmp.lt.s32.totalorder %s26476_s6, %s25359_s4 }
 0x1db   : > { %p25356_p2 = pnand %p25355_p7, %p26145_p0  ;;  %p25362_p13 = scmp.lt.s32.totalorder %s25360_s1, %s25354_s26 }
 0x1dd   : > { %p25357_p3 = pneg %p25356_p2  ;;  %p25363_p10 = por %p25362_p13, %p25361_p4 }
 0x1df   : > { %p25364_p6 = pnand %p25363_p10, %p25357_p3 }
 0x1e1   : > { %25367 = shalt.err (!%p25364_p6)
}
 0x1e2   : > { %s29844_s18 = scalar_lea.sflag [#allocation11], %s26166_s2  ;;  %s29845_s7 = sld [smem:[#allocation78_spill]] }
 0x1e3   : > { %23305 = dma.hbm_to_vmem [thread:$0]  (%p26145_p0), %s26451_s19, 6912, %s26476_s6, %s29844_s18, %s29840_s12, %s29840_s12, %s29839_s14  }
 0x1e4   : > { %s1930_s26 = scalar_lea.vmem [#allocation15], %s26202_s11  ;;  %s25368_s1 = scalar_lea.hbm %s26480_s22, 48 }
 0x1e5   : > { %s1941_s28 = sshll.u32 %s1930_s26, 4  ;;  %p25369_p1 = scmp.ne.s32.totalorder %s26480_s22, %s25368_s1  ;;  %s1942_s28 = int_to_ptr.vmem [resolvable:$true] %s1941_s28 }
 0x1e6   : > { %s25372_s3 = scalar_lea.hbm %s29843_s5, 288  ;;  %p25373_p8 = scmp.lt.u32.totalorder %s26480_s22, %s29843_s5 }
 0x1e7   : > { %p25370_p9 = pnand %p25369_p1, %p26145_p0  ;;  %p25374_p11 = scmp.lt.u32.totalorder %s25372_s3, %s25368_s1 }
 0x1e8   : > { %s29846_s30 = smov %s29845_s7  ;;  %s26507_s4 = scalar_lea.hbm %s29845_s7, %s26415_s25 }
 0x1e9   : > { %p25371_p5 = pneg %p25370_p9  ;;  %p25375_p12 = por %p25374_p11, %p25373_p8 }
 0x1ea   : > { %p25376_p7 = scmp.lt.u32.totalorder %s25368_s1, %s26480_s22 }
 0x1ec   : > { %p25377_p2 = por %p25376_p7, %p25375_p12 }
 0x1ee   : > { %p25378_p3 = pnand %p25377_p2, %p25371_p5 }
 0x1f0   : > { %25381 = shalt.err (!%p25378_p3)
}
 0x1f1   : > { %s25382_s8 = scalar_lea.vmem %s1942_s28, 48  ;;  %s25790_s19 = smov [#allocation15]  }
 0x1f2   : > { %p25383_p4 = scmp.ne.s32.totalorder %s1942_s28, %s25382_s8  ;;  %s25386_s6 = sshll.u32 %s25790_s19, 4  ;;  %s25387_s6 = int_to_ptr.vmem [resolvable:$false] %s25386_s6 }
 0x1f3   : > { %s25388_s18 = scalar_lea.vmem %s25387_s6, 96  ;;  %p25389_p6 = scmp.lt.s32.totalorder %s1942_s28, %s25387_s6 }
 0x1f4   : > { %p25384_p13 = pnand %p25383_p4, %p26145_p0  ;;  %p25390_p1 = scmp.lt.s32.totalorder %s25388_s18, %s25382_s8 }
 0x1f6   : > { %p25385_p10 = pneg %p25384_p13  ;;  %p25391_p9 = por %p25390_p1, %p25389_p6 }
 0x1f8   : > { %p25392_p8 = pnand %p25391_p9, %p25385_p10 }
 0x1fa   : > { %25395 = shalt.err (!%p25392_p8)
}
 0x1fb   : > { %s29847_s3 = scalar_lea.sflag [#allocation14], %s26166_s2  ;;  %s29848_s7 = sld [smem:[#allocation80_spill]] }
 0x1fc   : > { %23307 = dma.hbm_to_vmem [thread:$0]  (%p26145_p0), %s26480_s22, 48, %s1942_s28, %s29847_s3  }
 0x1fd   : > { %s1974_s8 = scalar_lea.vmem [#allocation18], %s26410_s0  ;;  %s25396_s6 = scalar_lea.hbm %s26507_s4, 6912 }
 0x1fe   : > { %s1984_s1 = sshll.u32 %s1974_s8, 4  ;;  %p25397_p5 = scmp.ne.s32.totalorder %s26507_s4, %s25396_s6  ;;  %s26525_s1 = int_to_ptr.vmem [resolvable:$true] %s1984_s1 }
 0x1ff   : > { %s25400_s18 = scalar_lea.hbm %s29846_s30, 41472  ;;  %p25401_p7 = scmp.lt.u32.totalorder %s26507_s4, %s29846_s30 }
 0x200   : > { %p25398_p11 = pnand %p25397_p5, %p26145_p0  ;;  %p25402_p2 = scmp.lt.u32.totalorder %s25400_s18, %s25396_s6 }
 0x201   : > { %s29849_s26 = smov %s29848_s7  ;;  %s26529_s19 = scalar_lea.hbm %s29848_s7, %s26415_s25 }
 0x202   : > { %p25399_p12 = pneg %p25398_p11  ;;  %p25403_p3 = por %p25402_p2, %p25401_p7 }
 0x203   : > { %p25404_p4 = scmp.lt.u32.totalorder %s25396_s6, %s26507_s4 }
 0x205   : > { %p25405_p13 = por %p25404_p4, %p25403_p3 }
 0x207   : > { %p25406_p10 = pnand %p25405_p13, %p25399_p12 }
 0x209   : > { %25409 = shalt.err (!%p25406_p10)
}
 0x20a   : > { %s25410_s22 = scalar_lea.vmem %s26525_s1, 6912  ;;  %s25791_s28 = smov [#allocation18]  }
 0x20b   : > { %p25411_p6 = scmp.ne.s32.totalorder %s26525_s1, %s25410_s22  ;;  %s25414_s3 = sshll.u32 %s25791_s28, 4  ;;  %s25415_s3 = int_to_ptr.vmem [resolvable:$false] %s25414_s3 }
 0x20c   : > { %s25416_s7 = scalar_lea.vmem %s25415_s3, 13824  ;;  %p25417_p8 = scmp.lt.s32.totalorder %s26525_s1, %s25415_s3 }
 0x20d   : > { %p25412_p1 = pnand %p25411_p6, %p26145_p0  ;;  %p25418_p5 = scmp.lt.s32.totalorder %s25416_s7, %s25410_s22 }
 0x20f   : > { %p25413_p9 = pneg %p25412_p1  ;;  %p25419_p11 = por %p25418_p5, %p25417_p8 }
 0x211   : > { %p25420_p7 = pnand %p25419_p11, %p25413_p9 }
 0x213   : > { %25423 = shalt.err (!%p25420_p7)
}
 0x214   : > { %s29850_s8 = scalar_lea.sflag [#allocation17], %s26166_s2  ;;  %s29851_s6 = sld [smem:[#allocation82_spill]] }
 0x215   : > { %23309 = dma.hbm_to_vmem [thread:$0]  (%p26145_p0), %s26507_s4, 6912, %s26525_s1, %s29850_s8, %s29840_s12, %s29840_s12, %s29839_s14  }
 0x216   : > { %s2020_s18 = scalar_lea.vmem [#allocation21], %s26410_s0  ;;  %s25424_s3 = scalar_lea.hbm %s26529_s19, 6912 }
 0x217   : > { %s2030_s22 = sshll.u32 %s2020_s18, 4  ;;  %p25425_p12 = scmp.ne.s32.totalorder %s26529_s19, %s25424_s3  ;;  %s26554_s22 = int_to_ptr.vmem [resolvable:$true] %s2030_s22 }
 0x218   : > { %s25428_s7 = scalar_lea.hbm %s29849_s26, 41472  ;;  %p25429_p4 = scmp.lt.u32.totalorder %s26529_s19, %s29849_s26 }
 0x219   : > { %p25426_p2 = pnand %p25425_p12, %p26145_p0  ;;  %p25430_p13 = scmp.lt.u32.totalorder %s25428_s7, %s25424_s3 }
 0x21a   : > { %s26558_s28 = scalar_lea.hbm %s29851_s6, %s26415_s25  ;;  %p25432_p6 = scmp.lt.u32.totalorder %s25424_s3, %s26529_s19 }
 0x21b   : > { %p25427_p3 = pneg %p25426_p2  ;;  %p25431_p10 = por %p25430_p13, %p25429_p4 }
 0x21d   : > { %p25433_p1 = por %p25432_p6, %p25431_p10 }
 0x21f   : > { %p25434_p9 = pnand %p25433_p1, %p25427_p3 }
 0x221   : > { %25437 = shalt.err (!%p25434_p9)
}
 0x222   : > { %s25438_s4 = scalar_lea.vmem %s26554_s22, 6912  ;;  %s25792_s1 = smov [#allocation21]  }
 0x223   : > { %p25439_p8 = scmp.ne.s32.totalorder %s26554_s22, %s25438_s4  ;;  %s25442_s8 = sshll.u32 %s25792_s1, 4  ;;  %s25443_s8 = int_to_ptr.vmem [resolvable:$false] %s25442_s8 }
 0x224   : > { %s25444_s18 = scalar_lea.vmem %s25443_s8, 13824  ;;  %p25445_p7 = scmp.lt.s32.totalorder %s26554_s22, %s25443_s8 }
 0x225   : > { %p25440_p5 = pnand %p25439_p8, %p26145_p0  ;;  %p25446_p12 = scmp.lt.s32.totalorder %s25444_s18, %s25438_s4 }
 0x227   : > { %p25441_p11 = pneg %p25440_p5  ;;  %p25447_p2 = por %p25446_p12, %p25445_p7 }
 0x229   : > { %p25448_p4 = pnand %p25447_p2, %p25441_p11 }
 0x22b   : > { %25451 = shalt.err (!%p25448_p4)
}
 0x22c   : > { %s29852_s3 = scalar_lea.sflag [#allocation20], %s26166_s2  ;;  %s29853_s7 = sld [smem:[#allocation84_spill]] }
 0x22d   : > { %23311 = dma.hbm_to_vmem [thread:$0]  (%p26145_p0), %s26529_s19, 6912, %s26554_s22, %s29852_s3, %s29840_s12, %s29840_s12, %s29839_s14  }
 0x22e   : > { %s2066_s4 = scalar_lea.vmem [#allocation24], %s26410_s0  ;;  %s25452_s18 = scalar_lea.hbm %s26558_s28, 6912 }
 0x22f   : > { %s2076_s1 = sshll.u32 %s2066_s4, 4  ;;  %p25453_p3 = scmp.ne.s32.totalorder %s26558_s28, %s25452_s18  ;;  %s26583_s1 = int_to_ptr.vmem [resolvable:$true] %s2076_s1 }
 0x230   : > { %s25456_s9 = scalar_lea.hbm %s29851_s6, 41472  ;;  %p25457_p6 = scmp.lt.u32.totalorder %s26558_s28, %s29851_s6 }
 0x231   : > { %p25454_p13 = pnand %p25453_p3, %p26145_p0  ;;  %p25458_p1 = scmp.lt.u32.totalorder %s25456_s9, %s25452_s18 }
 0x232   : > { %s29854_s5 = smov %s29853_s7  ;;  %s26587_s8 = scalar_lea.hbm %s29853_s7, %s26415_s25 }
 0x233   : > { %p25455_p10 = pneg %p25454_p13  ;;  %p25459_p9 = por %p25458_p1, %p25457_p6 }
 0x234   : > { %p25460_p8 = scmp.lt.u32.totalorder %s25452_s18, %s26558_s28 }
 0x236   : > { %p25461_p5 = por %p25460_p8, %p25459_p9 }
 0x238   : > { %p25462_p11 = pnand %p25461_p5, %p25455_p10 }
 0x23a   : > { %25465 = shalt.err (!%p25462_p11)
}
 0x23b   : > { %s25466_s19 = scalar_lea.vmem %s26583_s1, 6912  ;;  %s25793_s25 = smov [#allocation24]  }
 0x23c   : > { %p25467_p7 = scmp.ne.s32.totalorder %s26583_s1, %s25466_s19  ;;  %s25470_s22 = sshll.u32 %s25793_s25, 4  ;;  %s25471_s22 = int_to_ptr.vmem [resolvable:$false] %s25470_s22 }
 0x23d   : > { %s25472_s3 = scalar_lea.vmem %s25471_s22, 13824  ;;  %p25473_p4 = scmp.lt.s32.totalorder %s26583_s1, %s25471_s22 }
 0x23e   : > { %p25468_p12 = pnand %p25467_p7, %p26145_p0  ;;  %p25474_p3 = scmp.lt.s32.totalorder %s25472_s3, %s25466_s19 }
 0x240   : > { %p25469_p2 = pneg %p25468_p12  ;;  %p25475_p13 = por %p25474_p3, %p25473_p4 }
 0x242   : > { %p25476_p6 = pnand %p25475_p13, %p25469_p2 }
 0x244   : > { %25479 = shalt.err (!%p25476_p6)
}
 0x245   : > { %s29855_s9 = scalar_lea.sflag [#allocation23], %s26166_s2  ;;  %s29856_s7 = sld [smem:[#allocation86_spill]] }
 0x246   : > { %23313 = dma.hbm_to_vmem [thread:$0]  (%p26145_p0), %s26558_s28, 6912, %s26583_s1, %s29855_s9, %s29840_s12, %s29840_s12, %s29839_s14  }
 0x247   : > { %s2112_s18 = scalar_lea.vmem [#allocation27], %s26410_s0  ;;  %s25480_s22 = scalar_lea.hbm %s26587_s8, 6912 }
 0x248   : > { %s2122_s19 = sshll.u32 %s2112_s18, 4  ;;  %p25481_p10 = scmp.ne.s32.totalorder %s26587_s8, %s25480_s22  ;;  %s26612_s19 = int_to_ptr.vmem [resolvable:$true] %s2122_s19 }
 0x249   : > { %s25484_s3 = scalar_lea.hbm %s29854_s5, 41472  ;;  %p25485_p8 = scmp.lt.u32.totalorder %s26587_s8, %s29854_s5 }
 0x24a   : > { %p25482_p1 = pnand %p25481_p10, %p26145_p0  ;;  %p25486_p5 = scmp.lt.u32.totalorder %s25484_s3, %s25480_s22 }
 0x24b   : > { %s29857_s4 = smov %s29856_s7  ;;  %s26616_s25 = scalar_lea.hbm %s29856_s7, %s26205_s23 }
 0x24c   : > { %p25483_p9 = pneg %p25482_p1  ;;  %p25487_p11 = por %p25486_p5, %p25485_p8 }
 0x24d   : > { %p25488_p7 = scmp.lt.u32.totalorder %s25480_s22, %s26587_s8 }
 0x24f   : > { %p25489_p12 = por %p25488_p7, %p25487_p11 }
 0x251   : > { %p25490_p2 = pnand %p25489_p12, %p25483_p9 }
 0x253   : > { %25493 = shalt.err (!%p25490_p2)
}
 0x254   : > { %s25494_s0 = scalar_lea.vmem %s26612_s19, 6912  ;;  %s25794_s28 = smov [#allocation27]  }
 0x255   : > { %p25495_p4 = scmp.ne.s32.totalorder %s26612_s19, %s25494_s0  ;;  %s25498_s1 = sshll.u32 %s25794_s28, 4  ;;  %s25499_s1 = int_to_ptr.vmem [resolvable:$false] %s25498_s1 }
 0x256   : > { %s25500_s9 = scalar_lea.vmem %s25499_s1, 13824  ;;  %p25501_p6 = scmp.lt.s32.totalorder %s26612_s19, %s25499_s1 }
 0x257   : > { %p25496_p3 = pnand %p25495_p4, %p26145_p0  ;;  %p25502_p10 = scmp.lt.s32.totalorder %s25500_s9, %s25494_s0 }
 0x259   : > { %p25497_p13 = pneg %p25496_p3  ;;  %p25503_p1 = por %p25502_p10, %p25501_p6 }
 0x25b   : > { %p25504_p8 = pnand %p25503_p1, %p25497_p13 }
 0x25d   : > { %25507 = shalt.err (!%p25504_p8)
}
 0x25e   : > { %s29858_s7 = scalar_lea.sflag [#allocation26], %s26166_s2  ;;  %s29859_s18 = sld [smem:[#allocation91_spill]] }
 0x25f   : > { %23315 = dma.hbm_to_vmem [thread:$0]  (%p26145_p0), %s26587_s8, 6912, %s26612_s19, %s29858_s7, %s29840_s12, %s29840_s12, %s29839_s14  }
 0x260   : > { %s2158_s3 = scalar_lea.vmem [#allocation30], %s26202_s11  ;;  %s25508_s1 = scalar_lea.hbm %s26616_s25, 48 }
 0x261   : > { %s2169_s0 = sshll.u32 %s2158_s3, 4  ;;  %p25509_p9 = scmp.ne.s32.totalorder %s26616_s25, %s25508_s1  ;;  %s2170_s0 = int_to_ptr.vmem [resolvable:$true] %s2169_s0 }
 0x262   : > { %s25512_s9 = scalar_lea.hbm %s29857_s4, 288  ;;  %p25513_p7 = scmp.lt.u32.totalorder %s26616_s25, %s29857_s4 }
 0x263   : > { %p25510_p5 = pnand %p25509_p9, %p26145_p0  ;;  %p25514_p12 = scmp.lt.u32.totalorder %s25512_s9, %s25508_s1 }
 0x264   : > { %s29860_s22 = smov %s29859_s18  ;;  %s26643_s28 = scalar_lea.hbm %s29859_s18, %s26205_s23 }
 0x265   : > { %p25511_p11 = pneg %p25510_p5  ;;  %p25515_p2 = por %p25514_p12, %p25513_p7 }
 0x266   : > { %p25516_p4 = scmp.lt.u32.totalorder %s25508_s1, %s26616_s25 }
 0x268   : > { %p25517_p3 = por %p25516_p4, %p25515_p2 }
 0x26a   : > { %p25518_p13 = pnand %p25517_p3, %p25511_p11 }
 0x26c   : > { %25521 = shalt.err (!%p25518_p13)
}
 0x26d   : > { %s25522_s5 = scalar_lea.vmem %s2170_s0, 48  ;;  %s25795_s14 = smov [#allocation30]  }
 0x26e   : > { %p25523_p6 = scmp.ne.s32.totalorder %s2170_s0, %s25522_s5  ;;  %s25526_s12 = sshll.u32 %s25795_s14, 4  ;;  %s25527_s12 = int_to_ptr.vmem [resolvable:$false] %s25526_s12 }
 0x26f   : > { %s25528_s8 = scalar_lea.vmem %s25527_s12, 96  ;;  %p25529_p8 = scmp.lt.s32.totalorder %s2170_s0, %s25527_s12 }
 0x270   : > { %p25524_p10 = pnand %p25523_p6, %p26145_p0  ;;  %p25530_p9 = scmp.lt.s32.totalorder %s25528_s8, %s25522_s5 }
 0x272   : > { %p25525_p1 = pneg %p25524_p10  ;;  %p25531_p5 = por %p25530_p9, %p25529_p8 }
 0x274   : > { %p25532_p7 = pnand %p25531_p5, %p25525_p1 }
 0x276   : > { %25535 = shalt.err (!%p25532_p7)
}
 0x277   : > { %s29861_s19 = scalar_lea.sflag [#allocation29], %s26166_s2  ;;  %s29862_s7 = sld [smem:[#allocation93_spill]] }
 0x278   : > { %23317 = dma.hbm_to_vmem [thread:$0]  (%p26145_p0), %s26616_s25, 48, %s2170_s0, %s29861_s19  }
 0x279   : > { %s2243_s5 = scalar_lea.vmem [#allocation33], %s26202_s11  ;;  %s25536_s9 = scalar_lea.hbm %s26643_s28, 48 }
 0x27a   : > { %s2254_s18 = sshll.u32 %s2243_s5, 4  ;;  %p25537_p11 = scmp.ne.s32.totalorder %s26643_s28, %s25536_s9  ;;  %s2255_s18 = int_to_ptr.vmem [resolvable:$true] %s2254_s18 }
 0x27b   : > { %s25540_s14 = scalar_lea.hbm %s29860_s22, 288  ;;  %p25541_p4 = scmp.lt.u32.totalorder %s26643_s28, %s29860_s22 }
 0x27c   : > { %p25538_p12 = pnand %p25537_p11, %p26145_p0  ;;  %p25542_p3 = scmp.lt.u32.totalorder %s25540_s14, %s25536_s9 }
 0x27d   : > { %s29863_s3 = smov %s29862_s7  ;;  %s26663_s1 = scalar_lea.hbm %s29862_s7, %s26205_s23 }
 0x27e   : > { %p25539_p2 = pneg %p25538_p12  ;;  %p25543_p13 = por %p25542_p3, %p25541_p4 }
 0x27f   : > { %p25544_p6 = scmp.lt.u32.totalorder %s25536_s9, %s26643_s28 }
 0x281   : > { %p25545_p10 = por %p25544_p6, %p25543_p13 }
 0x283   : > { %p25546_p1 = pnand %p25545_p10, %p25539_p2 }
 0x285   : > { %25549 = shalt.err (!%p25546_p1)
}
 0x286   : > { %s25550_s12 = scalar_lea.vmem %s2255_s18, 48  ;;  %s25796_s23 = smov [#allocation33]  }
 0x287   : > { %p25551_p8 = scmp.ne.s32.totalorder %s2255_s18, %s25550_s12  ;;  %s25554_s25 = sshll.u32 %s25796_s23, 4  ;;  %s25555_s25 = int_to_ptr.vmem [resolvable:$false] %s25554_s25 }
 0x288   : > { %s25556_s0 = scalar_lea.vmem %s25555_s25, 96  ;;  %p25557_p7 = scmp.lt.s32.totalorder %s2255_s18, %s25555_s25 }
 0x289   : > { %p25552_p9 = pnand %p25551_p8, %p26145_p0  ;;  %p25558_p11 = scmp.lt.s32.totalorder %s25556_s0, %s25550_s12 }
 0x28b   : > { %p25553_p5 = pneg %p25552_p9  ;;  %p25559_p12 = por %p25558_p11, %p25557_p7 }
 0x28d   : > { %p25560_p3 = pnand %p25559_p12, %p25553_p5 }
 0x28f   : > { %25563 = shalt.err (!%p25560_p3)
}
 0x290   : > { %s29864_s8 = scalar_lea.sflag [#allocation32], %s26166_s2  ;;  %s2287_s19 = scalar_lea.vmem [#allocation36], %s26202_s11 }
 0x291   : > { %23319 = dma.hbm_to_vmem [thread:$0]  (%p26145_p0), %s26643_s28, 48, %s2255_s18, %s29864_s8  }
 0x292   : > { %s2298_s7 = sshll.u32 %s2287_s19, 4  ;;  %s25564_s5 = scalar_lea.hbm %s26663_s1, 48  ;;  %s2299_s7 = int_to_ptr.vmem [resolvable:$true] %s2298_s7 }
 0x293   : > { %p25565_p2 = scmp.ne.s32.totalorder %s26663_s1, %s25564_s5  ;;  %s25568_s9 = scalar_lea.hbm %s29863_s3, 288 }
 0x294   : > { %p25569_p6 = scmp.lt.u32.totalorder %s26663_s1, %s29863_s3  ;;  %p25570_p10 = scmp.lt.u32.totalorder %s25568_s9, %s25564_s5 }
 0x295   : > { %p25566_p4 = pnand %p25565_p2, %p26145_p0  ;;  %p25572_p8 = scmp.lt.u32.totalorder %s25564_s5, %s26663_s1 }
 0x296   : > { %p25571_p1 = por %p25570_p10, %p25569_p6 }
 0x297   : > { %p25567_p13 = pneg %p25566_p4 }
 0x298   : > { %p25573_p9 = por %p25572_p8, %p25571_p1 }
 0x29a   : > { %p25574_p5 = pnand %p25573_p9, %p25567_p13 }
 0x29c   : > { %25577 = shalt.err (!%p25574_p5)
}
 0x29d   : > { %s25578_s14 = scalar_lea.vmem %s2299_s7, 48  ;;  %s25797_s11 = smov [#allocation36]  }
 0x29e   : > { %p25579_p7 = scmp.ne.s32.totalorder %s2299_s7, %s25578_s14  ;;  %s25582_s28 = sshll.u32 %s25797_s11, 4  ;;  %s25583_s28 = int_to_ptr.vmem [resolvable:$false] %s25582_s28 }
 0x29f   : > { %s25584_s18 = scalar_lea.vmem %s25583_s28, 96  ;;  %p25585_p3 = scmp.lt.s32.totalorder %s2299_s7, %s25583_s28 }
 0x2a0   : > { %p25580_p11 = pnand %p25579_p7, %p26145_p0  ;;  %p25586_p2 = scmp.lt.s32.totalorder %s25584_s18, %s25578_s14 }
 0x2a2   : > { %p25581_p12 = pneg %p25580_p11  ;;  %p25587_p4 = por %p25586_p2, %p25585_p3 }
 0x2a4   : > { %p25588_p6 = pnand %p25587_p4, %p25581_p12 }
 0x2a6   : > { %25591 = shalt.err (!%p25588_p6)
}
 0x2a7   : > { %s29865_s12 = scalar_lea.sflag [#allocation35], %s26166_s2 }
 0x2a8   : > { %23321 = dma.hbm_to_vmem [thread:$0]  (%p26145_p0), %s26663_s1, 48, %s2299_s7, %s29865_s12  }
 0x2a9 PF: > { %s29866_s23 = sld [smem:[#allocation105_spill]] }
 0x2af   : > { %p20653_p13 = scmp.ge.s32.totalorder %s29866_s23, 1  ;;  %p2303_p10 = scmp.lt.s32.totalorder %s29866_s23, 13 }
 0x2b1   : > { %p2304_p1 = pnand %p20653_p13, %p2303_p10 }
 0x2b3   : > { %2307 = sbr.rel (%p2304_p1) target bundleno = 7670 (0x1df6), region = 216 }
 0x2ba   : > { %s29867_s25 = sld [smem:[#allocation103_spill]]  ;;  %s29868_s0 = sld [smem:[#allocation108_spill]] }
 0x2c0   : > { %s2309_s8 = sand.u32 1, %s29867_s25   ;;  %p29870_p8 = scmp.ne.s32.totalorder %s29868_s0, 0 }
 0x2c1   : > { %s23290_s19 = smul.u32 432, %s2309_s8  ;;  %s2310_s5 = scalar_lea.sflag [#allocation5], %s2309_s8 }
 0x2c3   : > { %s26699_s9 = scalar_lea.vmem [#allocation4], %s23290_s19 }
 0x2c4   : > { %29869 = sst [smem:[#allocation112_spill]] %s26699_s9 }
 0x2c5   : > { %25647 = dma.done.wait (%p29870_p8), %s2310_s5, 6912  }
 0x2c6   : > { %25649 = vsyncadd (%p29870_p8), %s2310_s5, 4294960384  ;;  %s29871_s15 = sld [smem:[#allocation106_spill]]  ;;  %s26709_s7 = scalar_lea.vmem [#allocation7], %s23290_s19 }
 0x2c7   : > { %29872 = sst [smem:[#allocation113_spill]] %s26709_s7 }
 0x2cc   : > { %s26706_s2 = sand.u32 1, %s29871_s15  }
 0x2cd   : > { %s2319_s1 = scalar_lea.sflag [#allocation8], %s26706_s2 }
 0x2ce   : > { %25651 = dma.done.wait (%p29870_p8), %s2319_s1, 6912  }
 0x2cf   : > { %25653 = vsyncadd (%p29870_p8), %s2319_s1, 4294960384  ;;  %s29873_s14 = sld [smem:[#allocation101_spill]]  ;;  %s29874_s11 = sld [smem:[#allocation110_spill]] }
 0x2d5   : > { %s2329_s28 = sand.u32 1, %s29873_s14   ;;  %p29876_p0 = scmp.ne.s32.totalorder %s29874_s11, 0 }
 0x2d6   : > { %s26716_s18 = smul.u32 432, %s2329_s28 }
 0x2d8   : > { %s26719_s12 = scalar_lea.vmem [#allocation9], %s26716_s18 }
 0x2d9   : > { %29875 = sst [smem:[#allocation114_spill]] %s26719_s12 }
 0x2da   : > { %25655 = dma.done.wait (%p29876_p0), %s2319_s1, 6912  }
 0x2db   : > { %25657 = vsyncadd (%p29876_p0), %s2319_s1, 4294960384  ;;  %s26725_s23 = smul.u32 3, %s2329_s28  ;;  %s2337_s25 = scalar_lea.sflag [#allocation11], %s26706_s2 }
 0x2dc   : > { %25659 = dma.done.wait (%p29876_p0), %s2337_s25, 6960  }
 0x2dd   : > { %25661 = vsyncadd (%p29876_p0), %s2337_s25, 4294960336  ;;  %s26734_s8 = scalar_lea.vmem [#allocation12], %s26716_s18  ;;  %s2355_s19 = scalar_lea.sflag [#allocation14], %s26706_s2 }
 0x2de   : > { %29877 = sst [smem:[#allocation115_spill]] %s26734_s8 }
 0x2df   : > { %25663 = dma.done.wait (%p29876_p0), %s2355_s19, 96  }
 0x2e0   : > { %25665 = vsyncadd (%p29876_p0), %s2355_s19, 4294967200  ;;  %s2373_s14 = scalar_lea.sflag [#allocation17], %s26706_s2 }
 0x2e1   : > { %25667 = dma.done.wait (%p29876_p0), %s2373_s14, 6960  }
 0x2e2   : > { %25669 = vsyncadd (%p29876_p0), %s2373_s14, 4294960336  ;;  %s26750_s25 = scalar_lea.vmem [#allocation18], %s26716_s18  ;;  %s2391_s5 = scalar_lea.sflag [#allocation20], %s26706_s2 }
 0x2e3   : > { %29878 = sst [smem:[#allocation116_spill]] %s26750_s25 }
 0x2e4   : > { %25671 = dma.done.wait (%p29876_p0), %s2391_s5, 6960  }
 0x2e5   : > { %25673 = vsyncadd (%p29876_p0), %s2391_s5, 4294960336  ;;  %s26759_s28 = scalar_lea.vmem [#allocation21], %s26716_s18  ;;  %s2409_s14 = scalar_lea.sflag [#allocation23], %s26706_s2 }
 0x2e6   : > { %29879 = sst [smem:[#allocation117_spill]] %s26759_s28 }
 0x2e7   : > { %25675 = dma.done.wait (%p29876_p0), %s2409_s14, 6960  }
 0x2e8   : > { %25677 = vsyncadd (%p29876_p0), %s2409_s14, 4294960336  ;;  %s26768_s19 = scalar_lea.vmem [#allocation24], %s26716_s18  ;;  %s2427_s5 = scalar_lea.sflag [#allocation26], %s26706_s2 }
 0x2e9   : > { %29880 = sst [smem:[#allocation118_spill]] %s26768_s19 }
 0x2ea   : > { %25679 = dma.done.wait (%p29876_p0), %s2427_s5, 6960  }
 0x2eb   : > { %25681 = vsyncadd (%p29876_p0), %s2427_s5, 4294960336  ;;  %s26777_s1 = scalar_lea.vmem [#allocation27], %s26716_s18  ;;  %s2445_s14 = scalar_lea.sflag [#allocation29], %s26706_s2 }
 0x2ec   : > { %29881 = sst [smem:[#allocation119_spill]] %s26777_s1 }
 0x2ed   : > { %25683 = dma.done.wait (%p29876_p0), %s2445_s14, 96  }
 0x2ee   : > { %25685 = vsyncadd (%p29876_p0), %s2445_s14, 4294967200  ;;  %s2463_s4 = scalar_lea.sflag [#allocation32], %s26706_s2 }
 0x2ef   : > { %25687 = dma.done.wait (%p29876_p0), %s2463_s4, 96  }
 0x2f0   : > { %25689 = vsyncadd (%p29876_p0), %s2463_s4, 4294967200  ;;  %s2481_s3 = scalar_lea.sflag [#allocation35], %s26706_s2 }
 0x2f1   : > { %25691 = dma.done.wait (%p29876_p0), %s2481_s3, 96  }
 0x2f2   : > { %25693 = vsyncadd (%p29876_p0), %s2481_s3, 4294967200  ;;  %p2814_p9 = scmp.lt.s32.totalorder %s29871_s15, 5  ;;  %v29751_v0 = vlaneseq  ;;  %s26801_s14 = sadd.s32 4294967290, %s29871_s15  ;;  %v25798_v4 = vmov 0.0  }
 0x2f3   : > { %p2983_p5 = scmp.gt.s32.totalorder %s26801_s14, 0  ;;  %s29882_s2 = sld [smem:[#allocation54_spill]] }
 0x2f4   : > { %s2815_s4 = scalar_select %p2814_p9, %s29871_s15, 5  ;;  %v3025_v1 = vand.u32 127, %v29751_v0 }
 0x2f5   : > { %s26809_s3 = scalar_select %p2983_p5, %s26801_s14, 0 }
 0x2f6   : > { %s29979_s4 = smov (!%p2814_p9, %s2815_s4), 5  ;;  %v3026_v2 = vadd.s32 128, %v3025_v1  ;;  %v3027_v3 = vadd.s32 256, %v3025_v1  ;;  %vm3031_vm0 = vcmp.ge.s32.totalorder %v3025_v1, 36  ;;  %vm3034_vm1 = vcmp.ge.s32.totalorder %v3025_v1, 72  ;;  %s29883_s11 = sld [smem:[#allocation56_spill]] }
 0x2f7   : > { %vm3037_vm2 = vcmp.ge.s32.totalorder %v3025_v1, 108  ;;  %vm3052_vm3 = vcmp.lt.s32.totalorder %v3025_v1, 36  ;;  %vm3055_vm4 = vcmp.lt.s32.totalorder %v3025_v1, 72  ;;  %vm3058_vm5 = vcmp.lt.s32.totalorder %v3025_v1, 108  ;;  %s23293_s6 = smul.u32 432, %s29979_s4  ;;  %p20701_p7 = scmp.lt.s32.totalorder %s26801_s14, 5 }
 0x2f8   : > { %vm3041_vm6 = vcmp.ge.s32.totalorder %v3026_v2, 144  ;;  %vm3044_vm7 = vcmp.ge.s32.totalorder %v3026_v2, 180  ;;  %vm3047_vm8 = vcmp.ge.s32.totalorder %v3026_v2, 216  ;;  %vm3050_vm9 = vcmp.ge.s32.totalorder %v3026_v2, 252  ;;  %vm3079_vm10 = vmand %vm3031_vm0, %vm3055_vm4  ;;  %s26813_s5 = smul.u32 3, %s29979_s4  ;;  %s29891_s26 = sld [smem:[#allocation68_spill]] }
 0x2f9   : > { %vm3062_vm11 = vcmp.lt.s32.totalorder %v3026_v2, 144  ;;  %vm3065_vm12 = vcmp.lt.s32.totalorder %v3026_v2, 180  ;;  %vm3068_vm13 = vcmp.lt.s32.totalorder %v3026_v2, 216  ;;  %vm3071_vm14 = vcmp.lt.s32.totalorder %v3026_v2, 252  ;;  %vm3082_vm15 = vmand %vm3034_vm1, %vm3058_vm5  ;;  %s26818_s17 = scalar_lea.vmem %s29882_s2, %s23293_s6  ;;  %s29892_s27 = sld [smem:[#allocation64_spill]] }
 0x2fa   : > { %vm3075_vm0 = vcmp.lt.s32.totalorder %v3027_v3, 288  ;;  %vm3089_vm4 = vmand %vm3041_vm6, %vm3065_vm12  ;;  %v26825_v5 = vsel %vm3052_vm3, 1.0, %v25798_v4  ;;  %v26827_v6 = vsel %vm3079_vm10, 1.0, %v25798_v4  ;;  %v26829_v7 = vsel %vm3082_vm15, 1.0, %v25798_v4  ;;  %s29893_s18 = sld [smem:[#allocation65_spill]]  ;;  %s29895_s0 = sld [smem:[#allocation69_spill]] }
 0x2fb   : > { %vm3092_vm1 = vmand %vm3044_vm7, %vm3068_vm13  ;;  %v26837_v8 = vsel %vm3037_vm2, 1.0, %v25798_v4  ;;  %v26840_v9 = vsel %vm3062_vm11, 1.0, %v25798_v4  ;;  %v26842_v10 = vsel %vm3089_vm4, 1.0, %v25798_v4  ;;  %v26845_v11 = vsel %vm3050_vm9, 1.0, %v25798_v4  ;;  %s29896_s2 = sld [smem:[#allocation66_spill]]  ;;  %s29897_s30 = sld [smem:[#allocation88_spill]] }
 0x2fc   : > { %s26821_s21 = scalar_lea.vmem %s29883_s11, %s23293_s6  ;;  %s29890_s6 = sld [smem:[#allocation67_spill]]  ;;  %29894 = vst [vmem:[#allocation120_spill] sm:$0xff] %v26845_v11  ;;  %vm3095_vm2 = vmand %vm3047_vm8, %vm3071_vm14  ;;  %v26853_v12 = vsel %vm3092_vm1, 1.0, %v25798_v4  ;;  %v26856_v13 = vsel %vm3075_vm0, 1.0, %v25798_v4 }
 0x2fd   : > { %s29898_s1 = sld [smem:[#allocation89_spill]]  ;;  %v26862_v14 = vsel %vm3095_vm2, 1.0, %v25798_v4  ;;  %s29899_s19 = sld [smem:[#allocation90_spill]] }
 0x2fe   : > { %s23295_s13 = smul.u32 720, %s29979_s4  ;;  %s2923_s11 = scalar_lea.vmem %s29891_s26, %s26813_s5 }
 0x2ff   : > { %s23296_s29 = smul.u32 5, %s29979_s4  ;;  %s29981_s3 = smov (!%p20701_p7, %s26809_s3), 5 }
 0x300   : > { %s26871_s28 = scalar_lea.vmem %s29892_s27, %s23295_s13  ;;  %s23297_s25 = smul.u32 864, %s29979_s4 }
 0x301   : > { %s26875_s8 = scalar_lea.vmem %s29893_s18, %s23296_s29  ;;  %s2931_s12 = scalar_lea.vmem %s29895_s0, %s26813_s5 }
 0x302   : > { %s2915_s20 = scalar_lea.vmem %s29890_s6, %s26813_s5  ;;  %s26880_s7 = scalar_lea.vmem %s29896_s2, %s23297_s25 }
 0x303   : > { %s23298_s24 = smul.u32 720, %s29981_s3  ;;  %s2493_s26 = scalar_lea.vmem [#allocation36], %s26725_s23 }
 0x304   : > { %s23299_s22 = smul.u32 5, %s29981_s3  ;;  %p20720_p11 = scmp.ne.s32.totalorder %s29871_s15, 0 }
 0x305   : > { %s26886_s10 = scalar_lea.vmem %s29897_s30, %s23298_s24  ;;  %s23300_s16 = smul.u32 864, %s29981_s3  ;;  %vm3136_vm3 = vcmask (!%p20720_p11), 261120   ;;  %vm3141_vm5 = vcmask (!%p20720_p11), 1041408   ;;  %vm3142_vm6 = vcmask (!%p20720_p11), 1043458   ;;  %vm3144_vm7 = vcmask (!%p20720_p11), 259076  }
 0x306   : > { %s26889_s9 = scalar_lea.vmem %s29898_s1, %s23299_s22  ;;  %3127 = sbr.rel (%p20720_p11) target bundleno = 785 (0x311), region = 304  ;;  %vm3143_vm8 = vmor (!%p20720_p11), %vm3142_vm6, %vm3141_vm5  ;;  %v25799_v21 = vmov (!%p20720_p11), 1.0  }
 0x307   : > { %s26892_s6 = scalar_lea.vmem %s29899_s19, %s23300_s16  ;;  %s29900_s29 = sld [smem:[#allocation51_spill]] (!%p20720_p11)  ;;  %vm3145_vm9 = vmor (!%p20720_p11), %vm3144_vm7, %vm3143_vm8 }
 0x308   : > { %3146 = vst.msk [vmem:[#allocation3] sm:$0x3f] (!%p20720_p11), %vm3145_vm9, %v25799_v21 }
 0x30d   : > { %v3128_v15 = vld [vmem:[%s29900_s29] sm:$0xff]  ;;  %v3129_v16 = vld [vmem:[%s29900_s29 + $0x8] sm:$0xff]  ;;  %v3130_v17 = vld [vmem:[%s29900_s29 + $0x10] sm:$0xff] }
 0x30e   : > { %3134 = vst [vmem:[#allocation2] sm:$0xff] %v3128_v15  ;;  %3135 = vst [vmem:[#allocation2 + $0x8] sm:$0xff] %v3129_v16  ;;  %v3131_v18 = vld [vmem:[%s29900_s29 + $0x18] sm:$0xff]  ;;  %v3132_v19 = vld [vmem:[%s29900_s29 + $0x20] sm:$0xff] }
 0x30f   : > { %3137 = vst.msk [vmem:[#allocation2 + $0x10] sm:$0xff] %vm3136_vm3, %v3130_v17  ;;  %v3133_v20 = vld [vmem:[%s29900_s29 + $0x28] sm:$0xff]  ;;  %3138 = vst [vmem:[#allocation2 + $0x18] sm:$0xff] %v3131_v18 }
 0x310   : > { %3139 = vst [vmem:[#allocation2 + $0x20] sm:$0xff] %v3132_v19  ;;  %3140 = vst.msk [vmem:[#allocation2 + $0x28] sm:$0xff] %vm3136_vm3, %v3133_v20 }
 0x311 PF: > { %s29901_s27 = sld [smem:[#allocation106_spill]] }
 0x317   : > { %p20721_p12 = scmp.ge.s32.totalorder %s29901_s27, 6 }
 0x318   : > { %v23469_v22 = vld [vmem:[%s26818_s17 + $0xc8] ss:$12 sps:$4 sm:$0xff] (!%p20721_p12)   ;;  %v23471_v24 = vld [vmem:[%s26818_s17 + $0xe0] ss:$12 sps:$4 sm:$0xff] (!%p20721_p12)   ;;  %v23473_v26 = vld [vmem:[%s26818_s17 + $0xf8] ss:$12 sps:$4 sm:$0xff] (!%p20721_p12)  }
 0x319   : > { %3150 = sbr.rel (%p20721_p12) target bundleno = 3371 (0xd2b), region = 308  ;;  %v23470_v23 = vld [vmem:[%s26818_s17 + $0x8] ss:$12 sps:$4 sm:$0xff] (!%p20721_p12)   ;;  %21933 = vmatprep.subr.bf16.mxu1 (!%p20721_p12), %v23469_v22  ;;  %v23472_v25 = vld [vmem:[%s26818_s17 + $0x20] ss:$12 sps:$4 sm:$0xff] (!%p20721_p12)   ;;  %v26937_v50 = vld [vmem:[#allocation2 + $0x18] sm:$0xff] (!%p20721_p12) }
 0x31a   : > { %21934 = vmatpush3.bf16.msra.mxu1 (!%p20721_p12), %v23470_v23  ;;  %v23474_v27 = vld [vmem:[%s26818_s17 + $0x38] ss:$12 sps:$4 sm:$0xff] (!%p20721_p12)   ;;  %v23475_v28 = vld [vmem:[%s26818_s17 + $0x110] ss:$12 sps:$4 sm:$0xff] (!%p20721_p12)   ;;  %v23477_v30 = vld [vmem:[%s26818_s17 + $0x128] ss:$12 sps:$4 sm:$0xff] (!%p20721_p12)  }
 0x31b   : > { %21935 = vmatprep.subr.bf16.mxu1 (!%p20721_p12), %v23471_v24  ;;  %v23476_v29 = vld [vmem:[%s26818_s17 + $0x50] ss:$12 sps:$4 sm:$0xff] (!%p20721_p12)   ;;  %v23478_v31 = vld [vmem:[%s26818_s17 + $0x68] ss:$12 sps:$4 sm:$0xff] (!%p20721_p12)   ;;  %v23479_v32 = vld [vmem:[%s26818_s17 + $0x140] ss:$12 sps:$4 sm:$0xff] (!%p20721_p12)  }
 0x31c   : > { %v26914_v33 = vld [vmem:[#allocation2 + $0x8] sm:$0xff] (!%p20721_p12)  ;;  %v23481_v35 = vld [vmem:[%s26818_s17 + $0x158] ss:$12 sps:$4 sm:$0xff] (!%p20721_p12)   ;;  %v23483_v37 = vld [vmem:[%s26818_s17 + $0x170] ss:$12 sps:$4 sm:$0xff] (!%p20721_p12)   ;;  %vm3534_vm10 = vcmask (!%p20721_p12), 261120  }
 0x31d   : > { %3663 = vmatprep.mubr.f32.mxu1 (!%p20721_p12), %v26914_v33  ;;  %3573 = vmatprep.mubr.f32.mxu0 (!%p20721_p12), %v26914_v33  ;;  %v23480_v34 = vld [vmem:[%s26818_s17 + $0x80] ss:$12 sps:$4 sm:$0xff] (!%p20721_p12)   ;;  %v23482_v36 = vld [vmem:[%s26818_s17 + $0x98] ss:$12 sps:$4 sm:$0xff] (!%p20721_p12)   ;;  %v23484_v40 = vld [vmem:[%s26818_s17 + $0xb0] ss:$12 sps:$4 sm:$0xff] (!%p20721_p12)  }
 0x31e   : > { %21936 = vmatpush3.bf16.msra.mxu1 (!%p20721_p12), %v23472_v25  ;;  %v23496_v38 = vld [vmem:[%s26818_s17 + $0x4] ss:$12 sps:$4 sm:$0xff] (!%p20721_p12)   ;;  %v23498_v39 = vld [vmem:[%s26818_s17] ss:$12 sps:$4 sm:$0xff] (!%p20721_p12)   ;;  %v23502_v41 = vld [vmem:[%s26818_s17 + $0x1c] ss:$12 sps:$4 sm:$0xff] (!%p20721_p12)  }
 0x31f   : > { %21937 = vmatprep.subr.bf16.mxu1 (!%p20721_p12), %v23473_v26  ;;  %3541 = vmatprep.subr.bf16.mxu0 (!%p20721_p12), %v23496_v38  ;;  %v23504_v42 = vld [vmem:[%s26818_s17 + $0x18] ss:$12 sps:$4 sm:$0xff] (!%p20721_p12)   ;;  %v23485_v43 = vld [vmem:[%s26818_s17 + $0x188] ss:$12 sps:$4 sm:$0xff] (!%p20721_p12)   ;;  %v23486_v47 = vld [vmem:[%s26818_s17 + $0x1a0] ss:$12 sps:$4 sm:$0xff] (!%p20721_p12)  }
 0x320   : > { %3542 = vmatpush1.bf16.msra.mxu0 %v23498_v39  ;;  %v26928_v44 = vld [vmem:[#allocation2] sm:$0xff]  ;;  %v23510_v48 = vld [vmem:[%s26818_s17 + $0x30] ss:$12 sps:$4 sm:$0xff]   ;;  %v23514_v49 = vld [vmem:[%s26818_s17 + $0x4c] ss:$12 sps:$4 sm:$0xff]   ;;  %s29905_s30 = sld [smem:[#allocation57_spill]] }
 0x321   : > { %3543 = vmatprep.subr.bf16.mxu0 %v23502_v41  ;;  %v23508_v45 = vld [vmem:[%s26818_s17 + $0x34] ss:$12 sps:$4 sm:$0xff]   ;;  %v23489_v52 = vld [vmem:[%s26821_s21 + $0x4] ss:$12 sps:$4 sm:$0xff]   ;;  %v26946_v55 = vld [vmem:[#allocation2 + $0x28] sm:$0xff]  ;;  %s29909_s1 = sld [smem:[#allocation59_spill]] }
 0x322   : > { %21938 = vmatpush3.bf16.msra.mxu1 %v23474_v27  ;;  %v26931_v46 = vld [vmem:[#allocation2 + $0x20] sm:$0xff]  ;;  %v26940_v51 = vld [vmem:[#allocation2 + $0x10] sm:$0xff]  ;;  %v23492_v57 = vld [vmem:[%s26821_s21 + $0x1c] ss:$12 sps:$4 sm:$0xff]   ;;  %s29911_s19 = sld [smem:[#allocation52_spill]]  ;;  %vm6200_vm12 = vcmask 130048  }
 0x323   : > { %21939 = vmatprep.subr.bf16.mxu1 %v23475_v28  ;;  %v23516_v53 = vld [vmem:[%s26818_s17 + $0x48] ss:$12 sps:$4 sm:$0xff]   ;;  %v23520_v54 = vld [vmem:[%s26818_s17 + $0x64] ss:$12 sps:$4 sm:$0xff]   ;;  %v23487_v56 = vld [vmem:[%s26821_s21] ss:$12 sps:$4 sm:$0xff]  }
 0x324   : > { %3544 = vmatpush1.bf16.msra.mxu0 %v23504_v42  ;;  %v23522_v58 = vld [vmem:[%s26818_s17 + $0x60] ss:$12 sps:$4 sm:$0xff]   ;;  %v23526_v59 = vld [vmem:[%s26818_s17 + $0x7c] ss:$12 sps:$4 sm:$0xff]   ;;  %v23490_v60 = vld [vmem:[%s26821_s21 + $0x18] ss:$12 sps:$4 sm:$0xff]  }
 0x325   : > { %3545 = vmatprep.subr.bf16.mxu0 %v23508_v45  ;;  %v23495_v61 = vld [vmem:[%s26821_s21 + $0x34] ss:$12 sps:$4 sm:$0xff]   ;;  %v23528_v62 = vld [vmem:[%s26818_s17 + $0x78] ss:$12 sps:$4 sm:$0xff]   ;;  %v23493_v1 = vld [vmem:[%s26821_s21 + $0x30] ss:$12 sps:$4 sm:$0xff]  }
 0x326   : > { %21940 = vmatpush3.bf16.msra.mxu1 %v23476_v29  ;;  %v23532_v63 = vld [vmem:[%s26818_s17 + $0x94] ss:$12 sps:$4 sm:$0xff]   ;;  %v23501_v2 = vld [vmem:[%s26821_s21 + $0x4c] ss:$12 sps:$4 sm:$0xff]   ;;  %v23534_v3 = vld [vmem:[%s26818_s17 + $0x90] ss:$12 sps:$4 sm:$0xff]   ;;  %s29906_s15 = scalar_lea.vmem %s29905_s30, %s26813_s5 }
 0x327   : > { %21941 = vmatprep.subr.bf16.mxu1 %v23477_v30  ;;  %v23538_v4 = vld [vmem:[%s26818_s17 + $0xac] ss:$12 sps:$4 sm:$0xff]   ;;  %v23499_v15 = vld [vmem:[%s26821_s21 + $0x48] ss:$12 sps:$4 sm:$0xff]   ;;  %v23507_v16 = vld [vmem:[%s26821_s21 + $0x64] ss:$12 sps:$4 sm:$0xff]   ;;  %s29910_s25 = scalar_lea.vmem %s29909_s1, %s26813_s5 }
 0x328   : > { %3546 = vmatpush1.bf16.msra.mxu0 %v23510_v48  ;;  %v23540_v17 = vld [vmem:[%s26818_s17 + $0xa8] ss:$12 sps:$4 sm:$0xff]   ;;  %v23544_v18 = vld [vmem:[%s26818_s17 + $0xc4] ss:$12 sps:$4 sm:$0xff]   ;;  %v23505_v19 = vld [vmem:[%s26821_s21 + $0x60] ss:$12 sps:$4 sm:$0xff]  }
 0x329   : > { %3547 = vmatprep.subr.bf16.mxu0 %v23514_v49  ;;  %v23513_v20 = vld [vmem:[%s26821_s21 + $0x7c] ss:$12 sps:$4 sm:$0xff]   ;;  %v23546_v21 = vld [vmem:[%s26818_s17 + $0xc0] ss:$12 sps:$4 sm:$0xff]   ;;  %v23511_v23 = vld [vmem:[%s26821_s21 + $0x78] ss:$12 sps:$4 sm:$0xff]  }
 0x32a   : > { %21942 = vmatpush3.bf16.msra.mxu1 %v23478_v31  ;;  %v23550_v22 = vld [vmem:[%s26818_s17 + $0xdc] ss:$12 sps:$4 sm:$0xff]   ;;  %v23519_v24 = vld [vmem:[%s26821_s21 + $0x94] ss:$12 sps:$4 sm:$0xff]   ;;  %v23552_v25 = vld [vmem:[%s26818_s17 + $0xd8] ss:$12 sps:$4 sm:$0xff]  }
 0x32b   : > { %21943 = vmatprep.subr.bf16.mxu1 %v23479_v32  ;;  %v23556_v26 = vld [vmem:[%s26818_s17 + $0xf4] ss:$12 sps:$4 sm:$0xff]   ;;  %v23517_v27 = vld [vmem:[%s26821_s21 + $0x90] ss:$12 sps:$4 sm:$0xff]   ;;  %v23525_v28 = vld [vmem:[%s26821_s21 + $0xac] ss:$12 sps:$4 sm:$0xff]  }
 0x32c   : > { %3548 = vmatpush1.bf16.msra.mxu0 %v23516_v53  ;;  %v23558_v29 = vld [vmem:[%s26818_s17 + $0xf0] ss:$12 sps:$4 sm:$0xff]   ;;  %v23562_v30 = vld [vmem:[%s26818_s17 + $0x10c] ss:$12 sps:$4 sm:$0xff]   ;;  %v23523_v31 = vld [vmem:[%s26821_s21 + $0xa8] ss:$12 sps:$4 sm:$0xff]  }
 0x32d   : > { %3549 = vmatprep.subr.bf16.mxu0 %v23520_v54  ;;  %v23531_v32 = vld [vmem:[%s26821_s21 + $0xc4] ss:$12 sps:$4 sm:$0xff]   ;;  %v23570_v38 = vld [vmem:[%s26818_s17 + $0x120] ss:$12 sps:$4 sm:$0xff]   ;;  %v23574_v39 = vld [vmem:[%s26818_s17 + $0x13c] ss:$12 sps:$4 sm:$0xff]  }
 0x32e   : > { %21944 = vmatpush3.bf16.msra.mxu1 %v23480_v34  ;;  %v23564_v34 = vld [vmem:[%s26818_s17 + $0x108] ss:$12 sps:$4 sm:$0xff]   ;;  %v23576_v42 = vld [vmem:[%s26818_s17 + $0x138] ss:$12 sps:$4 sm:$0xff]   ;;  %v23541_v45 = vld [vmem:[%s26821_s21 + $0xf0] ss:$12 sps:$4 sm:$0xff]  }
 0x32f   : > { %21945 = vmatprep.subr.bf16.mxu1 %v23481_v35  ;;  %v23568_v35 = vld [vmem:[%s26818_s17 + $0x124] ss:$12 sps:$4 sm:$0xff]   ;;  %v23543_v41 = vld [vmem:[%s26821_s21 + $0xf4] ss:$12 sps:$4 sm:$0xff]   ;;  %v23586_v49 = vld [vmem:[%s26818_s17 + $0x16c] ss:$12 sps:$4 sm:$0xff]  }
 0x330   : > { %3550 = vmatpush1.bf16.msra.mxu0 %v23522_v58  ;;  %v23582_v48 = vld [vmem:[%s26818_s17 + $0x150] ss:$12 sps:$4 sm:$0xff]   ;;  %v23588_v54 = vld [vmem:[%s26818_s17 + $0x168] ss:$12 sps:$4 sm:$0xff]   ;;  %vm27221_vm11 = vmpackc.low %vm3534_vm10, %vm3534_vm10  ;;  %s29920_s14 = sld [smem:[#allocation113_spill]]  ;;  %s29922_s4 = sld [smem:[#allocation61_spill]] }
 0x331   : > { %3551 = vmatprep.subr.bf16.mxu0 %v23526_v59  ;;  %v23555_v53 = vld [vmem:[%s26821_s21 + $0x124] ss:$12 sps:$4 sm:$0xff]   ;;  %v23561_v58 = vld [vmem:[%s26821_s21 + $0x13c] ss:$12 sps:$4 sm:$0xff]   ;;  %v23591_v59 = vld [vmem:[%s26818_s17 + $0x180] ss:$12 sps:$4 sm:$0xff]  }
 0x332   : > { %21946 = vmatpush3.bf16.msra.mxu1 %v23482_v36  ;;  %v23529_v36 = vld [vmem:[%s26821_s21 + $0xc0] ss:$12 sps:$4 sm:$0xff]   ;;  %s29924_s2 = sld [smem:[#allocation62_spill]]  ;;  %s29925_s18 = sld [smem:[#allocation63_spill]]  ;;  %vm9954_vm13 = vcmask 523264  }
 0x333   : > { %21947 = vmatprep.subr.bf16.mxu1 %v23483_v37  ;;  %v23537_v37 = vld [vmem:[%s26821_s21 + $0xdc] ss:$12 sps:$4 sm:$0xff]  }
 0x334   : > { %3552 = vmatpush1.bf16.msra.mxu0 %v23528_v62  ;;  %v23567_v62 = vld [vmem:[%s26821_s21 + $0x154] ss:$12 sps:$4 sm:$0xff]  }
 0x335   : > { %3553 = vmatprep.subr.bf16.mxu0 %v23532_v63  ;;  %v23596_v63 = vld [vmem:[%s26818_s17 + $0x198] ss:$12 sps:$4 sm:$0xff]  }
 0x336   : > { %21948 = vmatpush3.bf16.msra.mxu1 %v23484_v40  ;;  %v23535_v40 = vld [vmem:[%s26821_s21 + $0xd8] ss:$12 sps:$4 sm:$0xff]   ;;  %s29923_s3 = scalar_lea.vmem %s29922_s4, %s26813_s5 }
 0x337   : > { %22474 = vmatprep.subr.bf16.mxu1 %v23485_v43 }
 0x338   : > { %3554 = vmatpush1.bf16.msra.mxu0 %v23534_v3  ;;  %v23573_v3 = vld [vmem:[%s26821_s21 + $0x16c] ss:$12 sps:$4 sm:$0xff]   ;;  %s29926_s0 = scalar_lea.vmem %s29924_s2, %s26813_s5  ;;  %s29927_s13 = scalar_lea.vmem %s29925_s18, %s26813_s5 }
 0x339   : > { %3664 = vmatmul.mubr.f32.vlgmr.msra.gmra.mrb[0].mxu1 %v26928_v44  ;;  %3555 = vmatprep.subr.bf16.mxu0 %v23538_v4  ;;  %v23612_v4 = vld [vmem:[%s26821_s21 + $0x1a0] ss:$12 sps:$4 sm:$0xff]  }
 0x33a   : > { %22475 = vmatpush3.bf16.msra.mxu1 %v23485_v43  ;;  %3668 = vmatprep.mubr.f32.mxu1 %v26931_v46  ;;  %v23580_v43 = vld [vmem:[%s26818_s17 + $0x154] ss:$12 sps:$4 sm:$0xff]  }
 0x33b   : > { %22476 = vmatprep.subr.bf16.mxu1 %v23486_v47 }
 0x33c   : > { %3556 = vmatpush1.bf16.msra.mxu0 %v23540_v17  ;;  %v23579_v17 = vld [vmem:[%s26821_s21 + $0x184] ss:$12 sps:$4 sm:$0xff]  }
 0x33d   : > { %3669 = vmatmul.mubr.f32.gmra.mrb[2].mxu1 %v26937_v50  ;;  %3557 = vmatprep.subr.bf16.mxu0 %v23544_v18  ;;  %v23577_v18 = vld [vmem:[%s26821_s21 + $0x180] ss:$12 sps:$4 sm:$0xff]  }
 0x33e   : > { %22477 = vmatpush3.bf16.msra.mxu1 %v23486_v47  ;;  %22478 = vmatprep.mubr.msk.f32.mxu1 %vm3534_vm10, %v26940_v51  ;;  %v23549_v47 = vld [vmem:[%s26821_s21 + $0x10c] ss:$12 sps:$4 sm:$0xff]  }
 0x33f   : > { %4094 = vmatprep.subr.bf16.mxu1 %v23489_v52  ;;  %v23547_v52 = vld [vmem:[%s26821_s21 + $0x108] ss:$12 sps:$4 sm:$0xff]  }
 0x340   : > { %3558 = vmatpush1.bf16.msra.mxu0 %v23546_v21  ;;  %v23589_v21 = vld [vmem:[%s26821_s21 + $0xc8] ss:$12 sps:$4 sm:$0xff]  }
 0x341   : > { %22479 = vmatmul.mubr.msk.f32.vlgmr.msra.gmra.mrb[4].mxu1 %vm3534_vm10, %v26946_v55  ;;  %3559 = vmatprep.subr.bf16.mxu0 %v23550_v22  ;;  %v23590_v22 = vld [vmem:[%s26821_s21 + $0x8] ss:$12 sps:$4 sm:$0xff]  }
 0x342   : > { %4095 = vmatpush1.bf16.msra.mxu1 %v23487_v56  ;;  %4126 = vmatprep.mubr.f32.mxu1 %v26914_v33  ;;  %v23553_v56 = vld [vmem:[%s26821_s21 + $0x120] ss:$12 sps:$4 sm:$0xff]  }
 0x343   : > { %4096 = vmatprep.subr.bf16.mxu1 %v23492_v57  ;;  %v23593_v57 = vld [vmem:[%s26818_s17 + $0x184] ss:$12 sps:$4 sm:$0xff]  }
 0x344   : > { %3560 = vmatpush1.bf16.msra.mxu0 %v23552_v25  ;;  %v23599_v25 = vld [vmem:[%s26821_s21 + $0xf8] ss:$12 sps:$4 sm:$0xff]  }
 0x345   : > { %3561 = vmatprep.subr.bf16.mxu0 %v23556_v26  ;;  %v23600_v26 = vld [vmem:[%s26821_s21 + $0x38] ss:$12 sps:$4 sm:$0xff]  }
 0x346   : > { %4097 = vmatpush1.bf16.msra.mxu1 %v23490_v60  ;;  %v23598_v60 = vld [vmem:[%s26818_s17 + $0x19c] ss:$12 sps:$4 sm:$0xff]   ;;  %s29902_s17 = sld [smem:[#allocation112_spill]] }
 0x347   : > { %4098 = vmatprep.subr.bf16.mxu1 %v23495_v61  ;;  %v23559_v61 = vld [vmem:[%s26821_s21 + $0x138] ss:$12 sps:$4 sm:$0xff]  }
 0x348   : > { %3562 = vmatpush1.bf16.msra.mxu0 %v23558_v29  ;;  %v23604_v29 = vld [vmem:[%s26821_s21 + $0x68] ss:$12 sps:$4 sm:$0xff]  }
 0x349   : > { %3563 = vmatprep.subr.bf16.mxu0 %v23562_v30  ;;  %v23605_v30 = vld [vmem:[%s26821_s21 + $0x140] ss:$12 sps:$4 sm:$0xff]  }
 0x34a   : > { %4099 = vmatpush1.bf16.msra.mxu1 %v23493_v1  ;;  %v23610_v1 = vld [vmem:[%s26821_s21 + $0x188] ss:$12 sps:$4 sm:$0xff]  }
 0x34b   : > { %4100 = vmatprep.subr.bf16.mxu1 %v23501_v2  ;;  %v23565_v2 = vld [vmem:[%s26821_s21 + $0x150] ss:$12 sps:$4 sm:$0xff]  }
 0x34c   : > { %3564 = vmatpush1.bf16.msra.mxu0 %v23564_v34  ;;  %v23616_v34 = vld [vmem:[%s29902_s17 + $0x18] ss:$12 sps:$4 sm:$0xff]  }
 0x34d   : > { %3565 = vmatprep.subr.bf16.mxu0 %v23568_v35  ;;  %v23607_v35 = vld [vmem:[%s26821_s21 + $0x158] ss:$12 sps:$4 sm:$0xff]  }
 0x34e   : > { %4101 = vmatpush1.bf16.msra.mxu1 %v23499_v15  ;;  %v23571_v15 = vld [vmem:[%s26821_s21 + $0x168] ss:$12 sps:$4 sm:$0xff]  }
 0x34f   : > { %4102 = vmatprep.subr.bf16.mxu1 %v23507_v16  ;;  %v29752_v16 = vmov 0.0  }
 0x350   : > { %3566 = vmatpush1.bf16.msra.mxu0 %v23570_v38  ;;  %v23619_v38 = vld [vmem:[%s29902_s17 + $0x30] ss:$12 sps:$4 sm:$0xff]  }
 0x351   : > { %3567 = vmatprep.subr.bf16.mxu0 %v23574_v39  ;;  %v23609_v39 = vld [vmem:[%s26821_s21 + $0x170] ss:$12 sps:$4 sm:$0xff]  }
 0x352   : > { %4103 = vmatpush1.bf16.msra.mxu1 %v23505_v19  ;;  %v23585_v19 = vld [vmem:[%s26821_s21 + $0x19c] ss:$12 sps:$4 sm:$0xff]  }
 0x353   : > { %4104 = vmatprep.subr.bf16.mxu1 %v23513_v20  ;;  %v23583_v20 = vld [vmem:[%s26821_s21 + $0x198] ss:$12 sps:$4 sm:$0xff]  }
 0x354   : > { %3568 = vmatpush1.bf16.msra.mxu0 %v23576_v42  ;;  %v23622_v42 = vld [vmem:[%s29902_s17 + $0x48] ss:$12 sps:$4 sm:$0xff]  }
 0x355   : > { %3569 = vmatprep.subr.bf16.mxu0 %v23580_v43  ;;  %v23627_v43 = vld [vmem:[%s29902_s17 + $0x64] ss:$12 sps:$4 sm:$0xff]  }
 0x356   : > { %4105 = vmatpush1.bf16.msra.mxu1 %v23511_v23  ;;  %v23594_v23 = vld [vmem:[%s26821_s21 + $0xe0] ss:$12 sps:$4 sm:$0xff]  }
 0x357   : > { %4106 = vmatprep.subr.bf16.mxu1 %v23519_v24  ;;  %v23595_v24 = vld [vmem:[%s26821_s21 + $0x20] ss:$12 sps:$4 sm:$0xff]  }
 0x358   : > { %3570 = vmatpush1.bf16.msra.mxu0 %v23582_v48  ;;  %v23630_v48 = vld [vmem:[%s29902_s17 + $0x7c] ss:$12 sps:$4 sm:$0xff]  }
 0x359   : > { %3571 = vmatprep.subr.bf16.mxu0 %v23586_v49  ;;  %v23641_v49 = vld [vmem:[%s29902_s17 + $0x8] ss:$12 sps:$4 sm:$0xff]  }
 0x35a   : > { %4107 = vmatpush1.bf16.msra.mxu1 %v23517_v27  ;;  %v23601_v27 = vld [vmem:[%s26821_s21 + $0x110] ss:$12 sps:$4 sm:$0xff]  }
 0x35b   : > { %4108 = vmatprep.subr.bf16.mxu1 %v23525_v28  ;;  %v23603_v28 = vld [vmem:[%s26821_s21 + $0x128] ss:$12 sps:$4 sm:$0xff]  }
 0x35c   : > { %3572 = vmatpush1.bf16.msra.mxu0 %v23588_v54  ;;  %v23633_v54 = vld [vmem:[%s29902_s17 + $0x94] ss:$12 sps:$4 sm:$0xff]  }
 0x35d   : > { %3586 = vmatprep.subr.bf16.mxu0 %v23593_v57  ;;  %v23650_v57 = vld [vmem:[%s29902_s17 + $0xf8] ss:$12 sps:$4 sm:$0xff]  }
 0x35e   : > { %4109 = vmatpush1.bf16.msra.mxu1 %v23523_v31  ;;  %v23613_v31 = vld [vmem:[%s29902_s17] ss:$12 sps:$4 sm:$0xff]  }
 0x35f   : > { %4110 = vmatprep.subr.bf16.mxu1 %v23531_v32  ;;  %3574 = vmatmul.mubr.f32.vlgmr.msra.gmra.mrb[0].mxu0 %v26928_v44  ;;  %v23618_v32 = vld [vmem:[%s29902_s17 + $0x1c] ss:$12 sps:$4 sm:$0xff]  }
 0x360   : > { %3587 = vmatpush1.bf16.msra.mxu0 %v23591_v59  ;;  %3579 = vmatprep.mubr.f32.mxu0 %v26931_v46  ;;  %v23636_v59 = vld [vmem:[%s29902_s17 + $0xac] ss:$12 sps:$4 sm:$0xff]  }
 0x361   : > { %3588 = vmatprep.subr.bf16.mxu0 %v23598_v60  ;;  %v23651_v60 = vld [vmem:[%s29902_s17 + $0x38] ss:$12 sps:$4 sm:$0xff]  }
 0x362   : > { %4111 = vmatpush1.bf16.msra.mxu1 %v23529_v36  ;;  %v23621_v36 = vld [vmem:[%s29902_s17 + $0x34] ss:$12 sps:$4 sm:$0xff]  }
 0x363   : > { %4112 = vmatprep.subr.bf16.mxu1 %v23537_v37  ;;  %3580 = vmatmul.mubr.f32.gmra.mrb[2].mxu0 %v26937_v50  ;;  %v23608_v37 = vld [vmem:[%s26821_s21 + $0x98] ss:$12 sps:$4 sm:$0xff]  }
 0x364   : > { %3589 = vmatpush1.bf16.msra.mxu0 %v23596_v63  ;;  %3618 = vmatprep.mubr.f32.mxu0 %v29752_v16  ;;  %v23656_v63 = vld [vmem:[%s29902_s17 + $0x50] ss:$12 sps:$4 sm:$0xff]  }
 0x365   : > { %22481 = vmatprep.subr.bf16.mxu0 %v23610_v1 }
 0x366   : > { %4113 = vmatpush1.bf16.msra.mxu1 %v23535_v40  ;;  %v23624_v40 = vld [vmem:[%s29902_s17 + $0x4c] ss:$12 sps:$4 sm:$0xff]  }
 0x367   : > { %4114 = vmatprep.subr.bf16.mxu1 %v23543_v41  ;;  %20776 = vmatmul.mubr.msk.f32.vlgmr.msra.gmra.mrb[0].mxu0 %vm3534_vm10, %v26940_v51  ;;  %v23611_v41 = vld [vmem:[%s26821_s21 + $0xb0] ss:$12 sps:$4 sm:$0xff]  }
 0x368   : > { %3624 = vmatprep.mubr.f32.mxu0 %v29752_v16  ;;  %22482 = vmatpush3.bf16.msra.mxu0 %v23610_v1  ;;  %v23637_v1 = vld [vmem:[%s29902_s17 + $0xc0] ss:$12 sps:$4 sm:$0xff]  }
 0x369   : > { %22483 = vmatprep.subr.bf16.mxu0 %v23612_v4 }
 0x36a   : > { %4115 = vmatpush1.bf16.msra.mxu1 %v23541_v45  ;;  %v23640_v45 = vld [vmem:[%s29902_s17 + $0xc8] ss:$12 sps:$4 sm:$0xff]  }
 0x36b   : > { %4116 = vmatprep.subr.bf16.mxu1 %v23549_v47  ;;  %20777 = vmatmul.mubr.msk.f32.gmra.mrb[2].mxu0 %vm3534_vm10, %v26946_v55  ;;  %v23625_v47 = vld [vmem:[%s29902_s17 + $0x60] ss:$12 sps:$4 sm:$0xff]  }
 0x36c   : > { %22485 = vmatprep.mubr.msk.f32.mxu0 %vm3534_vm10, %v26940_v51  ;;  %22484 = vmatpush3.bf16.msra.mxu0 %v23612_v4  ;;  %v23665_v4 = vld [vmem:[%s29902_s17 + $0x140] ss:$12 sps:$4 sm:$0xff]  }
 0x36e   : > { %4117 = vmatpush1.bf16.msra.mxu1 %v23547_v52  ;;  %v23628_v52 = vld [vmem:[%s29902_s17 + $0x78] ss:$12 sps:$4 sm:$0xff]  }
 0x36f   : > { %4118 = vmatprep.subr.bf16.mxu1 %v23555_v53  ;;  %22486 = vmatmul.mubr.msk.f32.vlgmr.msra.gmra.mrb[4].mxu0 %vm3534_vm10, %v26946_v55  ;;  %v23645_v53 = vld [vmem:[%s29902_s17 + $0xe0] ss:$12 sps:$4 sm:$0xff]  }
 0x370   : > { %4679 = vmatprep.mubr.f32.mxu0 %v26914_v33 }
 0x372   : > { %4119 = vmatpush1.bf16.msra.mxu1 %v23553_v56  ;;  %v23646_v56 = vld [vmem:[%s29902_s17 + $0x20] ss:$12 sps:$4 sm:$0xff]  }
 0x373   : > { %4120 = vmatprep.subr.bf16.mxu1 %v23561_v58  ;;  %v23631_v58 = vld [vmem:[%s29902_s17 + $0x90] ss:$12 sps:$4 sm:$0xff]  }
 0x376   : > { %4121 = vmatpush1.bf16.msra.mxu1 %v23559_v61  ;;  %v23634_v61 = vld [vmem:[%s29902_s17 + $0xa8] ss:$12 sps:$4 sm:$0xff]  }
 0x377   : > { %4122 = vmatprep.subr.bf16.mxu1 %v23567_v62  ;;  %v23639_v62 = vld [vmem:[%s29902_s17 + $0xc4] ss:$12 sps:$4 sm:$0xff]  }
 0x37a   : > { %4123 = vmatpush1.bf16.msra.mxu1 %v23565_v2  ;;  %v23644_v2 = vld [vmem:[%s29902_s17 + $0xdc] ss:$12 sps:$4 sm:$0xff]  }
 0x37b   : > { %4124 = vmatprep.subr.bf16.mxu1 %v23573_v3  ;;  %v23661_v3 = vld [vmem:[%s29902_s17 + $0x68] ss:$12 sps:$4 sm:$0xff]  }
 0x37e   : > { %4125 = vmatpush1.bf16.msra.mxu1 %v23571_v15  ;;  %v23642_v15 = vld [vmem:[%s29902_s17 + $0xd8] ss:$12 sps:$4 sm:$0xff]  }
 0x37f   : > { %4139 = vmatprep.subr.bf16.mxu1 %v23579_v17  ;;  %v23649_v17 = vld [vmem:[%s29902_s17 + $0xf4] ss:$12 sps:$4 sm:$0xff]  }
 0x381   : > { %4127 = vmatmul.mubr.f32.vlgmr.msra.gmra.mrb[6].mxu1 %v26928_v44 }
 0x382   : > { %4140 = vmatpush1.bf16.msra.mxu1 %v23577_v18  ;;  %4132 = vmatprep.mubr.f32.mxu1 %v26931_v46  ;;  %v23666_v18 = vld [vmem:[%s29902_s17 + $0x80] ss:$12 sps:$4 sm:$0xff]  }
 0x383   : > { %4141 = vmatprep.subr.bf16.mxu1 %v23585_v19  ;;  %v23670_v19 = vld [vmem:[%s29902_s17 + $0x158] ss:$12 sps:$4 sm:$0xff]  }
 0x385   : > { %4133 = vmatmul.mubr.f32.gmra.mrb[8].mxu1 %v26937_v50 }
 0x386   : > { %4142 = vmatpush1.bf16.msra.mxu1 %v23583_v20  ;;  %4171 = vmatprep.mubr.f32.mxu1 %v29752_v16  ;;  %v23647_v20 = vld [vmem:[%s29902_s17 + $0xf0] ss:$12 sps:$4 sm:$0xff]  }
 0x387   : > { %21959 = vmatprep.subr.bf16.mxu1 %v23589_v21  ;;  %v23654_v21 = vld [vmem:[%s29902_s17 + $0x10c] ss:$12 sps:$4 sm:$0xff]  }
 0x389   : > { %20834 = vmatmul.mubr.msk.f32.vlgmr.msra.gmra.mrb[6].mxu1 %vm3534_vm10, %v26940_v51  ;;  %v23602_v51 = vld [vmem:[%s26821_s21 + $0x50] ss:$12 sps:$4 sm:$0xff]  }
 0x38a   : > { %21960 = vmatpush3.bf16.msra.mxu1 %v23590_v22  ;;  %4177 = vmatprep.mubr.f32.mxu1 %v29752_v16  ;;  %v23671_v22 = vld [vmem:[%s29902_s17 + $0x98] ss:$12 sps:$4 sm:$0xff]  }
 0x38b   : > { %21961 = vmatprep.subr.bf16.mxu1 %v23594_v23  ;;  %v23675_v23 = vld [vmem:[%s29902_s17 + $0x170] ss:$12 sps:$4 sm:$0xff]  }
 0x38d   : > { %20835 = vmatmul.mubr.msk.f32.gmra.mrb[8].mxu1 %vm3534_vm10, %v26946_v55  ;;  %v23615_v55 = vld [vmem:[%s29902_s17 + $0x4] ss:$12 sps:$4 sm:$0xff]  }
 0x38e   : > { %21962 = vmatpush3.bf16.msra.mxu1 %v23595_v24  ;;  %4216 = vmatprep.mubr.f32.mxu1 %v26914_v33  ;;  %v23606_v33 = vld [vmem:[%s26821_s21 + $0x80] ss:$12 sps:$4 sm:$0xff]   ;;  %v23652_v24 = vld [vmem:[%s29902_s17 + $0x108] ss:$12 sps:$4 sm:$0xff]   ;;  %s29903_s21 = sld [smem:[#allocation55_spill]] }
 0x38f   : > { %21963 = vmatprep.subr.bf16.mxu1 %v23599_v25  ;;  %4647 = vmatprep.subr.bf16.mxu0 %v23615_v55  ;;  %v23659_v25 = vld [vmem:[%s29902_s17 + $0x124] ss:$12 sps:$4 sm:$0xff]  }
 0x390   : > { %4648 = vmatpush1.bf16.msra.mxu0 %v23613_v31  ;;  %v24100_v55 = vld [vmem:[#allocation2] sm:$0xff]  ;;  %v23667_v31 = vld [vmem:[%s29902_s17 + $0x150] ss:$12 sps:$4 sm:$0xff]  }
 0x391   : > { %4649 = vmatprep.subr.bf16.mxu0 %v23618_v32  ;;  %v24101_v32 = vld [vmem:[#allocation2 + $0x20] sm:$0xff] }
 0x392   : > { %21964 = vmatpush3.bf16.msra.mxu1 %v23600_v26  ;;  %v23676_v26 = vld [vmem:[%s29902_s17 + $0xb0] ss:$12 sps:$4 sm:$0xff]  }
 0x393   : > { %21965 = vmatprep.subr.bf16.mxu1 %v23601_v27  ;;  %v23680_v27 = vld [vmem:[%s29902_s17 + $0x188] ss:$12 sps:$4 sm:$0xff]  }
 0x394   : > { %4650 = vmatpush1.bf16.msra.mxu0 %v23616_v34  ;;  %v24102_v34 = vld [vmem:[#allocation2 + $0x18] sm:$0xff]  ;;  %s29904_s16 = scalar_lea.vmem %s29903_s21, %s26813_s5 }
 0x395   : > { %4651 = vmatprep.subr.bf16.mxu0 %v23621_v36  ;;  %v23672_v36 = vld [vmem:[%s29902_s17 + $0x168] ss:$12 sps:$4 sm:$0xff]  }
 0x396   : > { %21966 = vmatpush3.bf16.msra.mxu1 %v23602_v51  ;;  %v23657_v51 = vld [vmem:[%s29902_s17 + $0x120] ss:$12 sps:$4 sm:$0xff]  }
 0x397   : > { %21967 = vmatprep.subr.bf16.mxu1 %v23603_v28  ;;  %v23664_v28 = vld [vmem:[%s29902_s17 + $0x13c] ss:$12 sps:$4 sm:$0xff]  }
 0x398   : > { %4652 = vmatpush1.bf16.msra.mxu0 %v23619_v38  ;;  %v23677_v38 = vld [vmem:[%s29902_s17 + $0x180] ss:$12 sps:$4 sm:$0xff]  }
 0x399   : > { %4653 = vmatprep.subr.bf16.mxu0 %v23624_v40  ;;  %v23684_v40 = vld [vmem:[%s29902_s17 + $0x1a0] ss:$12 sps:$4 sm:$0xff]  }
 0x39a   : > { %21968 = vmatpush3.bf16.msra.mxu1 %v23604_v29  ;;  %v23662_v29 = vld [vmem:[%s29902_s17 + $0x138] ss:$12 sps:$4 sm:$0xff]  }
 0x39b   : > { %21969 = vmatprep.subr.bf16.mxu1 %v23605_v30  ;;  %v23669_v30 = vld [vmem:[%s29902_s17 + $0x154] ss:$12 sps:$4 sm:$0xff]  }
 0x39c   : > { %4654 = vmatpush1.bf16.msra.mxu0 %v23622_v42  ;;  %v24104_v42 = vld [vmem:[#allocation2 + $0x28] sm:$0xff] }
 0x39d   : > { %4655 = vmatprep.subr.bf16.mxu0 %v23627_v43  ;;  %v27121_v43 = vshrl.u32 %v29751_v0, 7 }
 0x39e   : > { %21970 = vmatpush3.bf16.msra.mxu1 %v23606_v33  ;;  %v23674_v33 = vld [vmem:[%s29902_s17 + $0x16c] ss:$12 sps:$4 sm:$0xff]  }
 0x39f   : > { %21971 = vmatprep.subr.bf16.mxu1 %v23607_v35  ;;  %v24103_v35 = vld [vmem:[#allocation2 + $0x10] sm:$0xff] }
 0x3a0   : > { %4656 = vmatpush1.bf16.msra.mxu0 %v23625_v47  ;;  %v27124_v47 = vsub.s32 2, %v27121_v43 }
 0x3a1   : > { %4657 = vmatprep.subr.bf16.mxu0 %v23630_v48 }
 0x3a2   : > { %21972 = vmatpush3.bf16.msra.mxu1 %v23608_v37  ;;  %v23679_v37 = vld [vmem:[%s29902_s17 + $0x184] ss:$12 sps:$4 sm:$0xff]  }
 0x3a3   : > { %21973 = vmatprep.subr.bf16.mxu1 %v23609_v39  ;;  %v23683_v39 = vld [vmem:[%s29902_s17 + $0x19c] ss:$12 sps:$4 sm:$0xff]  }
 0x3a4   : > { %4658 = vmatpush1.bf16.msra.mxu0 %v23628_v52 }
 0x3a5   : > { %4659 = vmatprep.subr.bf16.mxu0 %v23633_v54 }
 0x3a6   : > { %21974 = vmatpush3.bf16.msra.mxu1 %v23611_v41  ;;  %v23681_v41 = vld [vmem:[%s29902_s17 + $0x198] ss:$12 sps:$4 sm:$0xff]  }
 0x3a7   : > { %21985 = vmatprep.subr.bf16.mxu1 %v23640_v45 }
 0x3a8   : > { %4660 = vmatpush1.bf16.msra.mxu0 %v23631_v58 }
 0x3a9   : > { %4217 = vmatmul.mubr.f32.vlgmr.msra.gmra.mrb[10].mxu1 %v26928_v44  ;;  %v23655_v44 = vld [vmem:[%s29902_s17 + $0x110] ss:$12 sps:$4 sm:$0xff]   ;;  %4661 = vmatprep.subr.bf16.mxu0 %v23636_v59 }
 0x3aa   : > { %4221 = vmatprep.mubr.f32.mxu1 %v26931_v46  ;;  %21986 = vmatpush3.bf16.msra.mxu1 %v23641_v49  ;;  %v24099_v46 = vld [vmem:[#allocation2 + $0x8] sm:$0xff]  ;;  %v3229_v49 = vld [vmem:[%s29904_s16] sm:$0x7] }
 0x3ab   : > { %21987 = vmatprep.subr.bf16.mxu1 %v23645_v53  ;;  %v3242_v54 = vrot.slane %v3229_v49, %v27124_v47 }
 0x3ac   : > { %4662 = vmatpush1.bf16.msra.mxu0 %v23634_v61 }
 0x3ad   : > { %4222 = vmatmul.mubr.f32.gmra.mrb[12].mxu1 %v26937_v50  ;;  %v23660_v50 = vld [vmem:[%s29902_s17 + $0x128] ss:$12 sps:$4 sm:$0xff]   ;;  %4663 = vmatprep.subr.bf16.mxu0 %v23639_v62  ;;  %v27135_v62 = vsub.s32 1, %v27121_v43 }
 0x3ae   : > { %4769 = vmatprep.mubr.f32.mxu1 %v24099_v46  ;;  %21988 = vmatpush3.bf16.msra.mxu1 %v23646_v56 }
 0x3af   : > { %21989 = vmatprep.subr.bf16.mxu1 %v23650_v57 }
 0x3b0   : > { %4664 = vmatpush1.bf16.msra.mxu0 %v23637_v1 }
 0x3b1   : > { %4665 = vmatprep.subr.bf16.mxu0 %v23644_v2 }
 0x3b2   : > { %21990 = vmatpush3.bf16.msra.mxu1 %v23651_v60 }
 0x3b3   : > { %21991 = vmatprep.subr.bf16.mxu1 %v23655_v44 }
 0x3b4   : > { %4666 = vmatpush1.bf16.msra.mxu0 %v23642_v15 }
 0x3b5   : > { %4667 = vmatprep.subr.bf16.mxu0 %v23649_v17 }
 0x3b6   : > { %21992 = vmatpush3.bf16.msra.mxu1 %v23656_v63  ;;  %v3238_v63 = vrot.slane %v3229_v49, %v27135_v62 }
 0x3b7   : > { %21993 = vmatprep.subr.bf16.mxu1 %v23660_v50 }
 0x3b8   : > { %4668 = vmatpush1.bf16.msra.mxu0 %v23647_v20  ;;  %v3789_v20 = vld [vmem:[%s29906_s15] sm:$0x7] }
 0x3b9   : > { %4669 = vmatprep.subr.bf16.mxu0 %v23654_v21 }
 0x3ba   : > { %21994 = vmatpush3.bf16.msra.mxu1 %v23661_v3 }
 0x3bb   : > { %21995 = vmatprep.subr.bf16.mxu1 %v23665_v4 }
 0x3bc   : > { %4670 = vmatpush1.bf16.msra.mxu0 %v23652_v24  ;;  %v3798_v24 = vrot.slane %v3789_v20, %v27135_v62 }
 0x3bd   : > { %4671 = vmatprep.subr.bf16.mxu0 %v23659_v25 }
 0x3be   : > { %21996 = vmatpush3.bf16.msra.mxu1 %v23666_v18 }
 0x3bf   : > { %21997 = vmatprep.subr.bf16.mxu1 %v23670_v19  ;;  %v27150_v19 = vsub.s32 0, %v27121_v43 }
 0x3c0   : > { %4672 = vmatpush1.bf16.msra.mxu0 %v23657_v51 }
 0x3c1   : > { %4673 = vmatprep.subr.bf16.mxu0 %v23664_v28 }
 0x3c2   : > { %21998 = vmatpush3.bf16.msra.mxu1 %v23671_v22  ;;  %v3794_v22 = vrot.slane %v3789_v20, %v27150_v19 }
 0x3c3   : > { %21999 = vmatprep.subr.bf16.mxu1 %v23675_v23 }
 0x3c4   : > { %4674 = vmatpush1.bf16.msra.mxu0 %v23662_v29 }
 0x3c5   : > { %4675 = vmatprep.subr.bf16.mxu0 %v23669_v30  ;;  %v3234_v30 = vrot.slane %v3229_v49, %v27150_v19 }
 0x3c6   : > { %22000 = vmatpush3.bf16.msra.mxu1 %v23676_v26 }
 0x3c7   : > { %22488 = vmatprep.subr.bf16.mxu1 %v23680_v27 }
 0x3c8   : > { %4676 = vmatpush1.bf16.msra.mxu0 %v23667_v31 }
 0x3c9   : > { %4770 = vmatmul.mubr.f32.vlgmr.msra.gmra.mrb[14].mxu1 %v24100_v55  ;;  %4677 = vmatprep.subr.bf16.mxu0 %v23674_v33 }
 0x3ca   : > { %22489 = vmatpush3.bf16.msra.mxu1 %v23680_v27  ;;  %4774 = vmatprep.mubr.f32.mxu1 %v24101_v32 }
 0x3cb   : > { %22490 = vmatprep.subr.bf16.mxu1 %v23684_v40 }
 0x3cc   : > { %4678 = vmatpush1.bf16.msra.mxu0 %v23672_v36 }
 0x3cd   : > { %4775 = vmatmul.mubr.f32.gmra.mrb[16].mxu1 %v24102_v34  ;;  %4692 = vmatprep.subr.bf16.mxu0 %v23679_v37 }
 0x3ce   : > { %22492 = vmatprep.mubr.msk.f32.mxu1 %vm3534_vm10, %v24103_v35  ;;  %22491 = vmatpush3.bf16.msra.mxu1 %v23684_v40 }
 0x3cf   : > { %4680 = vmatmul.mubr.f32.vlgmr.msra.gmra.mrb[6].mxu0 %v24100_v55 }
 0x3d0   : > { %4693 = vmatpush1.bf16.msra.mxu0 %v23677_v38  ;;  %4685 = vmatprep.mubr.f32.mxu0 %v24101_v32 }
 0x3d1   : > { %4694 = vmatprep.subr.bf16.mxu0 %v23683_v39  ;;  %22493 = vmatmul.mubr.msk.f32.vlgmr.msra.gmra.mrb[18].mxu1 %vm3534_vm10, %v24104_v42 }
 0x3d3   : > { %4686 = vmatmul.mubr.f32.gmra.mrb[8].mxu0 %v24102_v34 }
 0x3d4   : > { %4695 = vmatpush1.bf16.msra.mxu0 %v23681_v41  ;;  %4724 = vmatprep.mubr.f32.mxu0 %v29752_v16 }
 0x3d7   : > { %20892 = vmatmul.mubr.msk.f32.vlgmr.msra.gmra.mrb[6].mxu0 %vm3534_vm10, %v24103_v35 }
 0x3d8   : > { %4730 = vmatprep.mubr.f32.mxu0 %v29752_v16 }
 0x3db   : > { %20893 = vmatmul.mubr.msk.f32.gmra.mrb[8].mxu0 %vm3534_vm10, %v24104_v42 }
 0x40c   : > { %v21949_v45 = vpop.f32.mrb[0].mxu1 }
 0x40d   : > { %v21950_v48 = vpop.f32.mrb[1].mxu1 }
 0x40e   : > { %v21951_v52 = vadd.f32 %v21950_v48, %v21949_v45 }
 0x410   : > { %v21952_v53 = vpop.f32.mrb[2].mxu1  ;;  %v3666_v60 = vadd.f32 %v21951_v52, %v3242_v54 }
 0x411   : > { %v21953_v56 = vpop.f32.mrb[3].mxu1 }
 0x412   : > { %v21954_v57 = vadd.f32 %v21953_v56, %v21952_v53 }
 0x414   : > { %v3671_v58 = vadd.f32 %v21954_v57, %v3242_v54  ;;  %v22480_v59 = vpop.f32.mrb[4].mxu1  ;;  %v3802_v54 = vrot.slane %v3789_v20, %v27124_v47 }
 0x415   : > { %v3708_v44 = vpop.f32.mrb[5].mxu1 }
 0x416   : > { %v27130_v46 = vadd.f32 %v22480_v59, %v3671_v58  ;;  %v27132_v61 = vadd.f32 %v3708_v44, %v3666_v60 }
 0x418   : > { %v27191_v41 = vmul.f32 0.0, %v27132_v61 }
 0x43a   : > { %v3620_v50 = vpop.f32.mrb[0].mxu0 }
 0x43b   : > { %v3622_v1 = vpop.f32.mrb[1].mxu0  ;;  %v27164_v32 = vadd.f32 %v3620_v50, %v3234_v30 }
 0x43c   : > { %v27138_v2 = vadd.f32 %v3622_v1, %v3238_v63 }
 0x43d   : > { %v4898_v35 = vmul.f32 %v27164_v32, %v26825_v5  ;;  %v4910_v36 = vmul.f32 %v27164_v32, %v26829_v7  ;;  %v4916_v42 = vmul.f32 %v27164_v32, %v26837_v8  ;;  %v4922_v53 = vmul.f32 0.0, %v27164_v32 }
 0x43e   : > { %v3626_v3 = vpop.f32.mrb[2].mxu0  ;;  %v27141_v4 = vmul.f32 0.0, %v27138_v2  ;;  %v4917_v40 = vmul.f32 %v27138_v2, %v26840_v9  ;;  %v4923_v49 = vmul.f32 %v27138_v2, %v26842_v10  ;;  %v4929_v50 = vmul.f32 %v27138_v2, %v26853_v12 }
 0x43f   : > { %v3628_v15 = vpop.f32.mrb[3].mxu0  ;;  %v27171_v34 = vadd.f32 %v3626_v3, %v3234_v30 }
 0x440   : > { %5022 = vmatprep.mubr.f32.mxu1 %v27141_v4  ;;  %5334 = vmatprep.mubr.f32.mxu0 %v27141_v4  ;;  %v27168_v33 = vadd.f32 %v3628_v15, %v3238_v63 }
 0x441   : > { %v4901_v38 = vmul.f32 %v27171_v34, %v26825_v5  ;;  %v4913_v39 = vmul.f32 %v27171_v34, %v26829_v7  ;;  %v4919_v48 = vmul.f32 %v27171_v34, %v26837_v8  ;;  %v4925_v44 = vmul.f32 0.0, %v27171_v34 }
 0x442   : > { %v27145_v17 = vpop.f32.mrb[4].mxu0  ;;  %v27178_v37 = vmul.f32 0.0, %v27168_v33  ;;  %v4920_v45 = vmul.f32 %v27168_v33, %v26840_v9  ;;  %v4926_v57 = vmul.f32 %v27168_v33, %v26842_v10  ;;  %v4932_v20 = vmul.f32 %v27168_v33, %v26853_v12 }
 0x443   : > { %v27147_v18 = vpop.f32.mrb[5].mxu0 }
 0x45c   : > { %v4173_v21 = vpop.f32.mrb[6].mxu1 }
 0x45d   : > { %v4175_v23 = vpop.f32.mrb[7].mxu1  ;;  %v23086_v26 = vadd.f32 %v4173_v21, %v3794_v22 }
 0x45e   : > { %v23087_v28 = vadd.f32 %v4175_v23, %v3798_v24 }
 0x460   : > { %v4179_v25 = vpop.f32.mrb[8].mxu1 }
 0x461   : > { %v23088_v27 = vadd.f32 %v4179_v25, %v3794_v22  ;;  %v4181_v51 = vpop.f32.mrb[9].mxu1  ;;  %v4941_v25 = vmul.f32 %v27138_v2, %v26845_v11 }
 0x462   : > { %v23089_v29 = vadd.f32 %v4181_v51, %v3798_v24  ;;  %v27241_v24 = vmul.f32 0.0, %v27130_v46 }
 0x463   : > { %v27158_v55 = vpack.c.bf16 %v23088_v27, %v23086_v26  ;;  %v4944_v26 = vmul.f32 %v27168_v33, %v26845_v11  ;;  %v4945_v27 = vmul.f32 %v27130_v46, %v26856_v13 }
 0x464   : > { %v27160_v31 = vpack.c.bf16 %v23089_v29, %v23087_v28 }
 0x466   : > { %22819 = vmatprep.subr.bf16.mxu1 %v27160_v31  ;;  %22839 = vmatprep.subr.bf16.mxu0 %v27160_v31 }
 0x467   : > { %22821 = vmatpush1.bf16.xpose.msra.mxu1 %v27158_v55  ;;  %22841 = vmatpush1.bf16.xpose.msra.mxu0 %v27158_v55 }
 0x468   : > { %22849 = vmatprep.subr.bf16.mxu0 %v27160_v31 }
 0x46e   : > { %5023 = vmatmul.mubr.f32.vlgmr.msra.gmra.mrb[20].mxu1 %v4898_v35  ;;  %5335 = vmatmul.mubr.f32.vlgmr.msra.gmra.mrb[10].mxu0 %v4910_v36  ;;  %v4342_v35 = vld [vmem:[%s29910_s25] sm:$0x7] }
 0x46f   : > { %22851 = vmatpush1.bf16.xpose.msra.mxu0 %v27158_v55  ;;  %5027 = vmatprep.mubr.f32.mxu1 %v27178_v37  ;;  %v4355_v36 = vrot.slane %v4342_v35, %v27124_v47 }
 0x470   : > { %22859 = vmatprep.subr.bf16.mxu0 %v27160_v31  ;;  %5339 = vmatprep.mubr.f32.mxu0 %v27178_v37 }
 0x472   : > { %5028 = vmatmul.mubr.f32.gmra.mrb[22].mxu1 %v4901_v38  ;;  %5340 = vmatmul.mubr.f32.gmra.mrb[12].mxu0 %v4913_v39 }
 0x473   : > { %22499 = vmatprep.mubr.msk.f32.mxu1 %vm3534_vm10, %v27191_v41  ;;  %5490 = vmatprep.mubr.f32.mxu0 %v4917_v40 }
 0x476   : > { %5491 = vmatmul.mubr.f32.vlgmr.msra.gmra.mrb[14].mxu0 %v4916_v42 }
 0x477   : > { %22861 = vmatpush1.bf16.xpose.msra.mxu0 %v27158_v55  ;;  %5495 = vmatprep.mubr.f32.mxu0 %v4920_v45 }
 0x478   : > { %22869 = vmatprep.subr.bf16.mxu0 %v27160_v31 }
 0x47a   : > { %5496 = vmatmul.mubr.f32.gmra.mrb[16].mxu0 %v4919_v48 }
 0x47b   : > { %5646 = vmatprep.mubr.f32.mxu0 %v4923_v49 }
 0x47c   : > { %v21975_v52 = vpop.f32.mrb[10].mxu1 }
 0x47d   : > { %v21976_v56 = vpop.f32.mrb[11].mxu1 }
 0x47e   : > { %v21977_v58 = vadd.f32 %v21976_v56, %v21975_v52  ;;  %5647 = vmatmul.mubr.f32.vlgmr.msra.gmra.mrb[18].mxu0 %v4922_v53  ;;  %v4351_v56 = vrot.slane %v4342_v35, %v27135_v62 }
 0x47f   : > { %5651 = vmatprep.mubr.f32.mxu0 %v4926_v57  ;;  %22871 = vmatpush1.bf16.xpose.msra.mxu0 %v27158_v55  ;;  %v4347_v57 = vrot.slane %v4342_v35, %v27150_v19 }
 0x480   : > { %v21978_v59 = vpop.f32.mrb[12].mxu1  ;;  %22879 = vmatprep.subr.bf16.mxu0 %v27160_v31  ;;  %v4219_v60 = vadd.f32 %v21977_v58, %v3802_v54 }
 0x481   : > { %v21979_v63 = vpop.f32.mrb[13].mxu1 }
 0x482   : > { %v21980_v1 = vadd.f32 %v21979_v63, %v21978_v59  ;;  %v4262_v3 = vadd.f32 %v27147_v18, %v4219_v60  ;;  %5652 = vmatmul.mubr.f32.gmra.mrb[20].mxu0 %v4925_v44  ;;  %v4935_v18 = vmul.f32 %v27138_v2, %v26862_v14  ;;  %v4904_v2 = vmul.f32 %v27164_v32, %v26827_v6 }
 0x483   : > { %5802 = vmatprep.mubr.f32.mxu0 %v4929_v50 }
 0x484   : > { %v4224_v15 = vadd.f32 %v21980_v1, %v3802_v54 }
 0x486   : > { %v4267_v21 = vadd.f32 %v27145_v17, %v4224_v15  ;;  %5803 = vmatmul.mubr.f32.vlgmr.msra.gmra.mrb[22].mxu0 %v4922_v53  ;;  %v4938_v17 = vmul.f32 %v27168_v33, %v26862_v14 }
 0x487   : > { %5807 = vmatprep.mubr.f32.mxu0 %v4932_v20  ;;  %22881 = vmatpush1.bf16.xpose.msra.mxu0 %v27158_v55 }
 0x488   : > { %v27225_v23 = vpack.c.bf16 %v4267_v21, %v4262_v3  ;;  %22889 = vmatprep.subr.bf16.mxu0 %v27160_v31 }
 0x48a   : > { %22824 = vmatprep.subr.msk.bf16.mxu1 %vm27221_vm11, %v27225_v23  ;;  %5808 = vmatmul.mubr.f32.gmra.mrb[24].mxu0 %v4925_v44 }
 0x48b   : > { %22827 = vmatpush3.bf16.xpose.msk.msra.mxu1 %vm27221_vm11, %v27225_v23  ;;  %5958 = vmatprep.mubr.f32.mxu0 %v4935_v18 }
 0x48c   : > { %22829 = vmatprep.subr.bf16.mxu1 %v27160_v31 }
 0x48e   : > { %5959 = vmatmul.mubr.f32.vlgmr.msra.gmra.mrb[26].mxu0 %v4922_v53 }
 0x48f   : > { %5963 = vmatprep.mubr.f32.mxu0 %v4938_v17  ;;  %22891 = vmatpush1.bf16.xpose.msra.mxu0 %v27158_v55 }
 0x490   : > { %22894 = vmatprep.subr.msk.bf16.mxu0 %vm27221_vm11, %v27225_v23 }
 0x492   : > { %22500 = vmatmul.mubr.msk.f32.vlgmr.msra.gmra.mrb[24].mxu1 %vm3534_vm10, %v27241_v24  ;;  %5964 = vmatmul.mubr.f32.gmra.mrb[28].mxu0 %v4925_v44 }
 0x493   : > { %22831 = vmatpush1.bf16.xpose.msra.mxu1 %v27158_v55  ;;  %5178 = vmatprep.mubr.f32.mxu1 %v27141_v4  ;;  %v4942_v4 = vmul.f32 %v27132_v61, %v26856_v13  ;;  %v4907_v61 = vmul.f32 %v27171_v34, %v26827_v6 }
 0x494   : > { %6114 = vmatprep.mubr.f32.mxu0 %v4941_v25  ;;  %22834 = vmatprep.subr.msk.bf16.mxu1 %vm27221_vm11, %v27225_v23 }
 0x496   : > { %6115 = vmatmul.mubr.f32.vlgmr.msra.gmra.mrb[30].mxu0 %v4922_v53 }
 0x497   : > { %6119 = vmatprep.mubr.f32.mxu0 %v4944_v26  ;;  %22897 = vmatpush3.bf16.xpose.msk.msra.mxu0 %vm27221_vm11, %v27225_v23 }
 0x49a   : > { %5179 = vmatmul.mubr.f32.vlgmr.msra.gmra.mrb[26].mxu1 %v4904_v2  ;;  %6120 = vmatmul.mubr.f32.gmra.mrb[32].mxu0 %v4925_v44 }
 0x49b   : > { %5183 = vmatprep.mubr.f32.mxu1 %v27178_v37  ;;  %22837 = vmatpush3.bf16.xpose.msk.msra.mxu1 %vm27221_vm11, %v27225_v23 }
 0x49c   : > { %22548 = vmatprep.mubr.msk.f32.mxu0 %vm3534_vm10, %v4942_v4  ;;  %22844 = vmatprep.subr.msk.bf16.mxu1 %vm27221_vm11, %v27225_v23  ;;  %v22001_v51 = vpop.f32.mrb[14].mxu1 }
 0x49d   : > { %v22002_v28 = vpop.f32.mrb[15].mxu1 }
 0x49e   : > { %5184 = vmatmul.mubr.f32.gmra.mrb[28].mxu1 %v4907_v61  ;;  %22549 = vmatmul.mubr.msk.f32.vlgmr.msra.gmra.mrb[34].mxu0 %vm3534_vm10, %v4945_v27  ;;  %v22003_v29 = vadd.f32 %v22002_v28, %v22001_v51 }
 0x49f   : > { %22506 = vmatprep.mubr.msk.f32.mxu1 %vm3534_vm10, %v27191_v41 }
 0x4a0   : > { %v22004_v30 = vpop.f32.mrb[16].mxu1  ;;  %v4772_v40 = vadd.f32 %v22003_v29, %v4355_v36 }
 0x4a1   : > { %v22005_v46 = vpop.f32.mrb[17].mxu1 }
 0x4a2   : > { %22507 = vmatmul.mubr.msk.f32.vlgmr.msra.gmra.mrb[30].mxu1 %vm3534_vm10, %v27241_v24  ;;  %v22006_v55 = vadd.f32 %v22005_v46, %v22004_v30 }
 0x4a3   : > { %22847 = vmatpush3.bf16.xpose.msk.msra.mxu1 %vm27221_vm11, %v27225_v23  ;;  %22513 = vmatprep.mubr.msk.f32.mxu1 %vm3534_vm10, %v27191_v41 }
 0x4a4   : > { %22854 = vmatprep.subr.msk.bf16.mxu1 %vm27221_vm11, %v27225_v23  ;;  %v22494_v37 = vpop.f32.mrb[18].mxu1  ;;  %v4777_v38 = vadd.f32 %v22006_v55, %v4355_v36 }
 0x4a5   : > { %v4814_v42 = vpop.f32.mrb[19].mxu1 }
 0x4a6   : > { %v4820_v39 = vadd.f32 %v22494_v37, %v4777_v38  ;;  %v4815_v48 = vadd.f32 %v4814_v42, %v4772_v40 }
 0x4a8   : > { %v6382_v45 = vmul.f32 0.0, %v4820_v39  ;;  %v6379_v49 = vmul.f32 0.0, %v4815_v48  ;;  %v6421_v53 = vmul.f32 %v4815_v48, %v26856_v13 }
 0x4aa   : > { %22514 = vmatmul.mubr.msk.f32.vlgmr.msra.gmra.mrb[32].mxu1 %vm3534_vm10, %v27241_v24  ;;  %v4726_v31 = vpop.f32.mrb[6].mxu0  ;;  %v27333_v52 = vpack.c.bf16 %v6382_v45, %v6379_v49 }
 0x4ab   : > { %22857 = vmatpush3.bf16.xpose.msk.msra.mxu1 %vm27221_vm11, %v27225_v23  ;;  %22520 = vmatprep.mubr.msk.f32.mxu1 %vm3534_vm10, %v27191_v41  ;;  %v4728_v32 = vpop.f32.mrb[7].mxu0  ;;  %v23090_v60 = vadd.f32 %v4726_v31, %v4347_v57 }
 0x4ac   : > { %22864 = vmatprep.subr.msk.bf16.mxu1 %vm27221_vm11, %v27225_v23  ;;  %22903 = vmatprep.subr.bf16.mxu0 %v27333_v52  ;;  %v23091_v58 = vadd.f32 %v4728_v32, %v4351_v56 }
 0x4ad   : > { %22905 = vmatpush3.bf16.msra.mxu0 %v27333_v52  ;;  %v6377_v1 = vmul.f32 %v23090_v60, %v26825_v5  ;;  %v27349_v20 = vmul.f32 %v23090_v60, %v26827_v6  ;;  %v27355_v22 = vmul.f32 %v23090_v60, %v26829_v7  ;;  %v27370_v26 = vmul.f32 %v23090_v60, %v26837_v8 }
 0x4ae   : > { %v4732_v33 = vpop.f32.mrb[8].mxu0  ;;  %22911 = vmatprep.subr.bf16.mxu0 %v27333_v52  ;;  %v6378_v63 = vmul.f32 0.0, %v23091_v58  ;;  %v27361_v17 = vmul.f32 %v23091_v58, %v26840_v9  ;;  %v27376_v4 = vmul.f32 %v23091_v58, %v26842_v10  ;;  %v6401_v29 = vmul.f32 0.0, %v23090_v60 }
 0x4af   : > { %v4734_v34 = vpop.f32.mrb[9].mxu0  ;;  %v23092_v44 = vadd.f32 %v4732_v33, %v4347_v57  ;;  %v27389_v46 = vmul.f32 %v23091_v58, %v26853_v12  ;;  %v27397_v32 = vmul.f32 %v23091_v58, %v26862_v14  ;;  %v27405_v35 = vmul.f32 %v23091_v58, %v26845_v11 }
 0x4b0   : > { %v23093_v59 = vadd.f32 %v4734_v34, %v4351_v56 }
 0x4b1   : > { %v6380_v3 = vmul.f32 %v23092_v44, %v26825_v5  ;;  %v27352_v21 = vmul.f32 %v23092_v44, %v26827_v6  ;;  %v27358_v18 = vmul.f32 %v23092_v44, %v26829_v7  ;;  %v27373_v2 = vmul.f32 %v23092_v44, %v26837_v8 }
 0x4b2   : > { %22521 = vmatmul.mubr.msk.f32.vlgmr.msra.gmra.mrb[34].mxu1 %vm3534_vm10, %v27241_v24  ;;  %v6381_v50 = vmul.f32 0.0, %v23093_v59  ;;  %v27383_v51 = vmul.f32 %v23093_v59, %v26842_v10  ;;  %v6404_v30 = vmul.f32 0.0, %v23092_v44  ;;  %v27394_v31 = vmul.f32 %v23093_v59, %v26853_v12 }
 0x4b3   : > { %22867 = vmatpush3.bf16.xpose.msk.msra.mxu1 %vm27221_vm11, %v27225_v23  ;;  %22527 = vmatprep.mubr.msk.f32.mxu1 %vm3534_vm10, %v27191_v41  ;;  %v27400_v33 = vmul.f32 %v23093_v59, %v26862_v14  ;;  %v27408_v36 = vmul.f32 %v23093_v59, %v26845_v11 }
 0x4b4   : > { %22874 = vmatprep.subr.msk.bf16.mxu1 %vm27221_vm11, %v27225_v23  ;;  %v27346_v15 = vpack.c.bf16 %v6381_v50, %v6378_v63  ;;  %v27402_v34 = vpack.c.bf16 %v6404_v30, %v6401_v29 }
 0x4ba   : > { %22528 = vmatmul.mubr.msk.f32.vlgmr.msra.gmra.mrb[36].mxu1 %vm3534_vm10, %v27241_v24 }
 0x4bb   : > { %22877 = vmatpush3.bf16.xpose.msk.msra.mxu1 %vm27221_vm11, %v27225_v23  ;;  %22534 = vmatprep.mubr.msk.f32.mxu1 %vm3534_vm10, %v27191_v41 }
 0x4bc   : > { %22884 = vmatprep.subr.msk.bf16.mxu1 %vm27221_vm11, %v27225_v23 }
 0x4c2   : > { %22535 = vmatmul.mubr.msk.f32.vlgmr.msra.gmra.mrb[38].mxu1 %vm3534_vm10, %v27241_v24 }
 0x4c3   : > { %22887 = vmatpush3.bf16.xpose.msk.msra.mxu1 %vm27221_vm11, %v27225_v23  ;;  %22541 = vmatprep.mubr.msk.f32.mxu1 %vm3534_vm10, %v27191_v41  ;;  %v6424_v41 = vmul.f32 %v4820_v39, %v26856_v13  ;;  %v22900_v23 = vpack.c.bf16 %v6380_v3, %v6377_v1 }
 0x4c4   : > { %22899 = vmatprep.subr.bf16.mxu1 %v27346_v15 }
 0x4c5   : > { %v27340_v54 = vpack.c.bf16 %v6424_v41, %v6421_v53 }
 0x4ca   : > { %22542 = vmatmul.mubr.msk.f32.vlgmr.msra.gmra.mrb[40].mxu1 %vm3534_vm10, %v27241_v24  ;;  %v27364_v24 = vmul.f32 %v23093_v59, %v26840_v9 }
 0x4cb   : > { %6495 = vmatprep.mubr.f32.mxu1 %v29752_v16  ;;  %22901 = vmatpush1.bf16.msra.mxu1 %v22900_v23 }
 0x4cc   : > { %22907 = vmatprep.subr.bf16.mxu1 %v27346_v15 }
 0x541   : > { %v5336_v40 = vpop.f32.mrb[10].mxu0  ;;  %v5024_v42 = vpop.f32.mrb[20].mxu1 }
 0x542   : > { %v5338_v45 = vpop.f32.mrb[11].mxu0  ;;  %v5026_v48 = vpop.f32.mrb[21].mxu1 }
 0x543   : > { %v27427_v45 = vld [vmem:[%s29911_s19 + $0x8] sm:$0xff] }
 0x545   : > { %v5341_v49 = vpop.f32.mrb[12].mxu0  ;;  %v5029_v41 = vpop.f32.mrb[22].mxu1 }
 0x546   : > { %v5343_v53 = vpop.f32.mrb[13].mxu0  ;;  %v5031_v56 = vpop.f32.mrb[23].mxu1 }
 0x547   : > { %v27432_v53 = vld [vmem:[%s29911_s19] sm:$0xff] }
 0x549   : > { %v27416_v57 = vpop.f32.mrb[14].mxu0 }
 0x54a   : > { %v5494_v58 = vpop.f32.mrb[15].mxu0 }
 0x54b   : > { %v5030_v58 = vadd.f32 %v5029_v41, %v27427_v45 }
 0x54d   : > { %v5497_v59 = vpop.f32.mrb[16].mxu0 }
 0x54e   : > { %v5499_v60 = vpop.f32.mrb[17].mxu0 }
 0x54f   : > { %v5025_v60 = vadd.f32 %v5024_v42, %v27432_v53 }
 0x551   : > { %v27418_v44 = vpop.f32.mrb[18].mxu0 }
 0x552   : > { %v5650_v63 = vpop.f32.mrb[19].mxu0 }
 0x555   : > { %v27420_v50 = vpop.f32.mrb[20].mxu0 }
 0x556   : > { %v5655_v1 = vpop.f32.mrb[21].mxu0 }
 0x559   : > { %v27422_v3 = vpop.f32.mrb[22].mxu0 }
 0x55a   : > { %v5806_v23 = vpop.f32.mrb[23].mxu0 }
 0x55d   : > { %v27424_v29 = vpop.f32.mrb[24].mxu0 }
 0x55e   : > { %v5811_v30 = vpop.f32.mrb[25].mxu0 }
 0x561   : > { %v27429_v48 = vpop.f32.mrb[26].mxu0 }
 0x562   : > { %v5962_v56 = vpop.f32.mrb[27].mxu0 }
 0x565   : > { %v22501_v63 = vpop.f32.mrb[24].mxu1  ;;  %v27436_v0 = vpop.f32.mrb[28].mxu0 }
 0x566   : > { %v27438_v1 = vadd.f32 %v22501_v63, %v5030_v58  ;;  %v5099_v23 = vpop.f32.mrb[25].mxu1  ;;  %v5967_v39 = vpop.f32.mrb[29].mxu0 }
 0x567   : > { %v27440_v30 = vadd.f32 %v5099_v23, %v5025_v60 }
 0x568   : > { %v6204_v42 = vsel %vm6200_vm12, %v27438_v1, -inf }
 0x569   : > { %v6116_v38 = vpop.f32.mrb[30].mxu0  ;;  %v6201_v37 = vsel %vm6200_vm12, %v27440_v30, -inf }
 0x56a   : > { %v6118_v55 = vpop.f32.mrb[31].mxu0  ;;  %6202 = vmax.xlane.f32.xlu0 %v6201_v37  ;;  %v6117_v39 = vadd.f32 %v6116_v38, %v27432_v53 }
 0x56d   : > { %v5180_v56 = vpop.f32.mrb[26].mxu1  ;;  %v6121_v41 = vpop.f32.mrb[32].mxu0 }
 0x56e   : > { %v5182_v28 = vpop.f32.mrb[27].mxu1  ;;  %v6123_v61 = vpop.f32.mrb[33].mxu0  ;;  %6205 = vmax.xlane.f32.xlu0 %v6204_v42  ;;  %v6122_v58 = vadd.f32 %v6121_v41, %v27427_v45  ;;  %v5181_v25 = vadd.f32 %v5180_v56, %v27432_v53  ;;  %v5342_v41 = vadd.f32 %v5341_v49, %v27427_v45  ;;  %v5493_v49 = vadd.f32 %v27416_v57, %v27432_v53 }
 0x56f   : > { %v5649_v57 = vadd.f32 %v27418_v44, %v27432_v53  ;;  %v5805_v44 = vadd.f32 %v27422_v3, %v27432_v53  ;;  %v5961_v3 = vadd.f32 %v27429_v48, %v27432_v53 }
 0x571   : > { %v5185_v60 = vpop.f32.mrb[28].mxu1  ;;  %v22550_v63 = vpop.f32.mrb[34].mxu0 }
 0x572   : > { %v27448_v23 = vadd.f32 %v22550_v63, %v6122_v58  ;;  %v5187_v27 = vpop.f32.mrb[29].mxu1  ;;  %v6191_v16 = vpop.f32.mrb[35].mxu0  ;;  %v5186_v37 = vadd.f32 %v5185_v60, %v27427_v45 }
 0x573   : > { %v27450_v55 = vadd.f32 %v6191_v16, %v6117_v39  ;;  %v5337_v27 = vadd.f32 %v5336_v40, %v27432_v53  ;;  %v5498_v40 = vadd.f32 %v5497_v59, %v27427_v45  ;;  %v5654_v59 = vadd.f32 %v27420_v50, %v27427_v45 }
 0x574   : > { %v5810_v50 = vadd.f32 %v27424_v29, %v27427_v45  ;;  %v5966_v29 = vadd.f32 %v27436_v0, %v27427_v45  ;;  %v6246_v0 = vsel %vm6200_vm12, %v27448_v23, -inf }
 0x575   : > { %v22508_v11 = vpop.f32.mrb[30].mxu1  ;;  %v6243_v45 = vsel %vm6200_vm12, %v27450_v55, -inf }
 0x576   : > { %v27454_v28 = vadd.f32 %v22508_v11, %v5186_v37  ;;  %v5255_v61 = vpop.f32.mrb[31].mxu1 }
 0x577   : > { %v27456_v42 = vadd.f32 %v5255_v61, %v5181_v25 }
 0x578   : > { %v6210_v58 = vsel %vm6200_vm12, %v27454_v28, -inf }
 0x579   : > { %v6207_v38 = vsel %vm6200_vm12, %v27456_v42, -inf }
 0x57a   : > { %6208 = vmax.xlane.f32.xlu1 %v6207_v38 }
 0x57d   : > { %v22515_v16 = vpop.f32.mrb[32].mxu1 }
 0x57e   : > { %v27464_v39 = vadd.f32 %v22515_v16, %v5342_v41  ;;  %v5411_v56 = vpop.f32.mrb[33].mxu1  ;;  %6211 = vmax.xlane.f32.xlu1 %v6210_v58 }
 0x57f   : > { %v27466_v11 = vadd.f32 %v5411_v56, %v5337_v27 }
 0x580   : > { %v6216_v25 = vsel %vm6200_vm12, %v27464_v39, -inf }
 0x581   : > { %v6213_v60 = vsel %vm6200_vm12, %v27466_v11, -inf }
 0x582   : > { %6217 = vmax.xlane.f32.xlu1 %v6216_v25  ;;  %6214 = vmax.xlane.f32.xlu0 %v6213_v60 }
 0x585   : > { %v22522_v63 = vpop.f32.mrb[34].mxu1 }
 0x586   : > { %v27475_v37 = vadd.f32 %v22522_v63, %v5498_v40  ;;  %v5567_v61 = vpop.f32.mrb[35].mxu1 }
 0x587   : > { %v27477_v38 = vadd.f32 %v5567_v61, %v5493_v49 }
 0x588   : > { %v6222_v41 = vsel %vm6200_vm12, %v27475_v37, -inf }
 0x589   : > { %6223 = vmax.xlane.f32.xlu1 %v6222_v41  ;;  %v6219_v27 = vsel %vm6200_vm12, %v27477_v38, -inf }
 0x58a   : > { %6220 = vmax.xlane.f32.xlu0 %v6219_v27 }
 0x58d   : > { %v22529_v16 = vpop.f32.mrb[36].mxu1 }
 0x58e   : > { %v27487_v58 = vadd.f32 %v22529_v16, %v5654_v59  ;;  %v5723_v56 = vpop.f32.mrb[37].mxu1 }
 0x58f   : > { %v27489_v25 = vadd.f32 %v5723_v56, %v5649_v57 }
 0x590   : > { %v6228_v60 = vsel %vm6200_vm12, %v27487_v58, -inf }
 0x591   : > { %6229 = vmax.xlane.f32.xlu1 %v6228_v60  ;;  %v6225_v40 = vsel %vm6200_vm12, %v27489_v25, -inf }
 0x592   : > { %6226 = vmax.xlane.f32.xlu0 %v6225_v40 }
 0x595   : > { %v22536_v49 = vpop.f32.mrb[38].mxu1 }
 0x596   : > { %v27499_v63 = vadd.f32 %v22536_v49, %v5810_v50  ;;  %v5879_v61 = vpop.f32.mrb[39].mxu1 }
 0x597   : > { %v27501_v41 = vadd.f32 %v5879_v61, %v5805_v44 }
 0x598   : > { %v6234_v27 = vsel %vm6200_vm12, %v27499_v63, -inf }
 0x599   : > { %6235 = vmax.xlane.f32.xlu1 %v6234_v27  ;;  %v6231_v59 = vsel %vm6200_vm12, %v27501_v41, -inf }
 0x59a   : > { %6232 = vmax.xlane.f32.xlu0 %v6231_v59 }
 0x59d   : > { %v22543_v57 = vpop.f32.mrb[40].mxu1 }
 0x59e   : > { %v27511_v16 = vadd.f32 %v22543_v57, %v5966_v29  ;;  %v6035_v56 = vpop.f32.mrb[41].mxu1 }
 0x59f   : > { %v27513_v60 = vadd.f32 %v6035_v56, %v5961_v3 }
 0x5a0   : > { %v6240_v40 = vsel %vm6200_vm12, %v27511_v16, -inf }
 0x5a1   : > { %6241 = vmax.xlane.f32.xlu1 %v6240_v40  ;;  %v6237_v50 = vsel %vm6200_vm12, %v27513_v60, -inf }
 0x5a2   : > { %6238 = vmax.xlane.f32.xlu0 %v6237_v50 }
 0x5a5   : > { %6247 = vmax.xlane.f32.xlu1 %v6246_v0 }
 0x5a6   : > { %6244 = vmax.xlane.f32.xlu0 %v6243_v45 }
 0x5f7   : > { %v6203_v48 = vpop.xlane.xlu0 %6202 }
 0x5f8   : > { %v6249_v53 = vsub.f32 %v27440_v30, %v6203_v48 }
 0x5fa   : > { %v6265_v44 = vmul.f32 1.442695, %v6249_v53 }
 0x5fb   : > { %v6206_v49 = vpop.xlane.xlu0 %6205 }
 0x5fc   : > { %24027 = vpow2.f32 %v6265_v44  ;;  %v6250_v61 = vsub.f32 %v27438_v1, %v6206_v49 }
 0x5fe   : > { %v6267_v27 = vmul.f32 1.442695, %v6250_v61 }
 0x600   : > { %24029 = vpow2.f32 %v6267_v27 }
 0x606   : > { %v27525_v59 = vpop.eup %24027 }
 0x607   : > { %v6209_v29 = vpop.xlane.xlu1 %6208  ;;  %v6297_v3 = vsel %vm6200_vm12, %v27525_v59, 0.0 }
 0x608   : > { %v6251_v57 = vsub.f32 %v27456_v42, %v6209_v29  ;;  %6298 = vadd.xlane.f32.xlu0 %v6297_v3 }
 0x60a   : > { %v27530_v56 = vpop.eup %24029  ;;  %v6269_v40 = vmul.f32 1.442695, %v6251_v57 }
 0x60b   : > { %v6212_v30 = vpop.xlane.xlu1 %6211  ;;  %v6300_v50 = vsel %vm6200_vm12, %v27530_v56, 0.0 }
 0x60c   : > { %24031 = vpow2.f32 %v6269_v40  ;;  %v6252_v1 = vsub.f32 %v27454_v28, %v6212_v30  ;;  %6301 = vadd.xlane.f32.xlu1 %v6300_v50 }
 0x60e   : > { %v6271_v0 = vmul.f32 1.442695, %v6252_v1 }
 0x60f   : > { %v6218_v45 = vpop.xlane.xlu1 %6217  ;;  %v6215_v48 = vpop.xlane.xlu0 %6214 }
 0x610   : > { %24033 = vpow2.f32 %v6271_v0  ;;  %v6254_v53 = vsub.f32 %v27464_v39, %v6218_v45  ;;  %v6253_v42 = vsub.f32 %v27466_v11, %v6215_v48 }
 0x612   : > { %v6275_v44 = vmul.f32 1.442695, %v6254_v53  ;;  %v6273_v49 = vmul.f32 1.442695, %v6253_v42 }
 0x614   : > { %24035 = vpow2.f32 %v6275_v44 }
 0x615   : > { %24037 = vpow2.f32 %v6273_v49 }
 0x616   : > { %v27537_v61 = vpop.eup %24031  ;;  %v6224_v27 = vpop.xlane.xlu1 %6223 }
 0x617   : > { %v6256_v29 = vsub.f32 %v27475_v37, %v6224_v27  ;;  %v6221_v3 = vpop.xlane.xlu0 %6220  ;;  %v6303_v28 = vsel %vm6200_vm12, %v27537_v61, 0.0 }
 0x618   : > { %v6255_v57 = vsub.f32 %v27477_v38, %v6221_v3  ;;  %6304 = vadd.xlane.f32.xlu0 %v6303_v28 }
 0x619   : > { %v6279_v40 = vmul.f32 1.442695, %v6256_v29 }
 0x61a   : > { %v27543_v39 = vpop.eup %24033  ;;  %v6277_v11 = vmul.f32 1.442695, %v6255_v57 }
 0x61b   : > { %24039 = vpow2.f32 %v6279_v40  ;;  %v6306_v30 = vsel %vm6200_vm12, %v27543_v39, 0.0 }
 0x61c   : > { %24041 = vpow2.f32 %v6277_v11  ;;  %6307 = vadd.xlane.f32.xlu1 %v6306_v30 }
 0x61e   : > { %v27547_v50 = vpop.eup %24035  ;;  %v6230_v37 = vpop.xlane.xlu1 %6229 }
 0x61f   : > { %v27549_v1 = vpop.eup %24037  ;;  %v6258_v0 = vsub.f32 %v27487_v58, %v6230_v37  ;;  %v6227_v45 = vpop.xlane.xlu0 %6226  ;;  %v6312_v38 = vsel %vm6200_vm12, %v27547_v50, 0.0 }
 0x620   : > { %v6257_v48 = vsub.f32 %v27489_v25, %v6227_v45  ;;  %6313 = vadd.xlane.f32.xlu1 %v6312_v38  ;;  %v6309_v53 = vsel %vm6200_vm12, %v27549_v1, 0.0 }
 0x621   : > { %v6283_v42 = vmul.f32 1.442695, %v6258_v0  ;;  %6310 = vadd.xlane.f32.xlu0 %v6309_v53 }
 0x622   : > { %v6281_v44 = vmul.f32 1.442695, %v6257_v48 }
 0x623   : > { %24043 = vpow2.f32 %v6283_v42 }
 0x624   : > { %24045 = vpow2.f32 %v6281_v44 }
 0x625   : > { %v27557_v49 = vpop.eup %24039 }
 0x626   : > { %v27559_v27 = vpop.eup %24041  ;;  %v6236_v58 = vpop.xlane.xlu1 %6235  ;;  %v6318_v29 = vsel %vm6200_vm12, %v27557_v49, 0.0 }
 0x627   : > { %v6260_v3 = vsub.f32 %v27499_v63, %v6236_v58  ;;  %6319 = vadd.xlane.f32.xlu1 %v6318_v29  ;;  %v6233_v25 = vpop.xlane.xlu0 %6232  ;;  %v6315_v28 = vsel %vm6200_vm12, %v27559_v27, 0.0 }
 0x628   : > { %v6259_v57 = vsub.f32 %v27501_v41, %v6233_v25  ;;  %6316 = vadd.xlane.f32.xlu0 %v6315_v28 }
 0x629   : > { %v6287_v40 = vmul.f32 1.442695, %v6260_v3 }
 0x62a   : > { %v6285_v11 = vmul.f32 1.442695, %v6259_v57 }
 0x62b   : > { %24047 = vpow2.f32 %v6287_v40 }
 0x62c   : > { %24049 = vpow2.f32 %v6285_v11 }
 0x62d   : > { %v27567_v30 = vpop.eup %24043 }
 0x62e   : > { %v27569_v37 = vpop.eup %24045  ;;  %v6242_v0 = vpop.xlane.xlu1 %6241  ;;  %v6324_v63 = vsel %vm6200_vm12, %v27567_v30, 0.0 }
 0x62f   : > { %v6262_v45 = vsub.f32 %v27511_v16, %v6242_v0  ;;  %6325 = vadd.xlane.f32.xlu1 %v6324_v63  ;;  %v6239_v38 = vpop.xlane.xlu0 %6238  ;;  %v6321_v41 = vsel %vm6200_vm12, %v27569_v37, 0.0 }
 0x630   : > { %v6261_v48 = vsub.f32 %v27513_v60, %v6239_v38  ;;  %6322 = vadd.xlane.f32.xlu0 %v6321_v41 }
 0x631   : > { %v6291_v53 = vmul.f32 1.442695, %v6262_v45 }
 0x632   : > { %v6289_v42 = vmul.f32 1.442695, %v6261_v48  ;;  %v6248_v44 = vpop.xlane.xlu1 %6247 }
 0x633   : > { %24051 = vpow2.f32 %v6291_v53  ;;  %v6264_v58 = vsub.f32 %v27448_v23, %v6248_v44  ;;  %v6245_v29 = vpop.xlane.xlu0 %6244 }
 0x634   : > { %24053 = vpow2.f32 %v6289_v42  ;;  %v6263_v3 = vsub.f32 %v27450_v55, %v6245_v29  ;;  %v29912_v29 = vpack.c.bf16 %v27352_v21, %v27349_v20 }
 0x635   : > { %v27579_v25 = vpop.eup %24047  ;;  %v6295_v16 = vmul.f32 1.442695, %v6264_v58 }
 0x636   : > { %v27581_v28 = vpop.eup %24049  ;;  %v6293_v57 = vmul.f32 1.442695, %v6263_v3  ;;  %v6330_v60 = vsel %vm6200_vm12, %v27579_v25, 0.0  ;;  %v29913_v3 = vmov 0.0  }
 0x637   : > { %24055 = vpow2.f32 %v6295_v16  ;;  %6331 = vadd.xlane.f32.xlu1 %v6330_v60  ;;  %v6327_v40 = vsel %vm6200_vm12, %v27581_v28, 0.0 }
 0x638   : > { %24057 = vpow2.f32 %v6293_v57  ;;  %6328 = vadd.xlane.f32.xlu0 %v6327_v40  ;;  %v29914_v40 = vpack.c.bf16 %v27358_v18, %v27355_v22 }
 0x63d   : > { %v27587_v23 = vpop.eup %24051 }
 0x63e   : > { %v27589_v11 = vpop.eup %24053  ;;  %v6336_v55 = vsel %vm6200_vm12, %v27587_v23, 0.0 }
 0x63f   : > { %6337 = vadd.xlane.f32.xlu1 %v6336_v55  ;;  %v6333_v0 = vsel %vm6200_vm12, %v27589_v11, 0.0 }
 0x640   : > { %6334 = vadd.xlane.f32.xlu0 %v6333_v0  ;;  %v29915_v0 = vpack.c.bf16 %v27364_v24, %v27361_v17 }
 0x641   : > { %v27595_v63 = vpop.eup %24055 }
 0x642   : > { %v27597_v45 = vpop.eup %24057  ;;  %v6342_v38 = vsel %vm6200_vm12, %v27595_v63, 0.0 }
 0x643   : > { %6343 = vadd.xlane.f32.xlu1 %v6342_v38  ;;  %v6339_v41 = vsel %vm6200_vm12, %v27597_v45, 0.0 }
 0x644   : > { %6340 = vadd.xlane.f32.xlu0 %v6339_v41 }
 0x695   : > { %v6299_v48 = vpop.xlane.xlu0 %6298 }
 0x696   : > { %24059 = vrcp.f32 %v6299_v48 }
 0x699   : > { %v6302_v53 = vpop.xlane.xlu1 %6301 }
 0x69a   : > { %24061 = vrcp.f32 %v6302_v53 }
 0x6a0   : > { %v24060_v42 = vpop.eup %24059 }
 0x6a1   : > { %v6346_v44 = vmul.f32 %v24060_v42, %v27525_v59 }
 0x6a3   : > { %20928 = vmatmul.mubr.msk.f32.vlgmr.msra.gmra.mrb[42].mxu1 %vm6200_vm12, %v6346_v44  ;;  %22555 = vmatprep.mubr.msk.f32.mxu0 %vm6200_vm12, %v6346_v44 }
 0x6a4   : > { %v24062_v58 = vpop.eup %24061  ;;  %22909 = vmatpush1.bf16.msra.mxu1 %v29912_v29  ;;  %6501 = vmatprep.mubr.f32.mxu1 %v29913_v3 }
 0x6a5   : > { %22915 = vmatprep.subr.bf16.mxu1 %v27346_v15  ;;  %v6305_v16 = vpop.xlane.xlu0 %6304  ;;  %v6348_v57 = vmul.f32 %v24062_v58, %v27530_v56 }
 0x6a6   : > { %24063 = vrcp.f32 %v6305_v16 }
 0x6a7   : > { %20929 = vmatmul.mubr.msk.f32.gmra.mrb[44].mxu1 %vm6200_vm12, %v6348_v57  ;;  %22556 = vmatmul.mubr.msk.f32.vlgmr.msra.gmra.mrb[36].mxu0 %vm6200_vm12, %v6348_v57 }
 0x6a8   : > { %22913 = vmatpush3.bf16.msra.mxu0 %v27333_v52  ;;  %6653 = vmatprep.mubr.f32.mxu1 %v29913_v3 }
 0x6a9   : > { %22919 = vmatprep.subr.bf16.mxu0 %v27333_v52  ;;  %v6308_v20 = vpop.xlane.xlu1 %6307 }
 0x6aa   : > { %24065 = vrcp.f32 %v6308_v20 }
 0x6ad   : > { %v6314_v21 = vpop.xlane.xlu1 %6313 }
 0x6ae   : > { %24067 = vrcp.f32 %v6314_v21  ;;  %v6311_v59 = vpop.xlane.xlu0 %6310 }
 0x6af   : > { %24069 = vrcp.f32 %v6311_v59 }
 0x6b0   : > { %v24064_v15 = vpop.eup %24063 }
 0x6b1   : > { %v6350_v56 = vmul.f32 %v24064_v15, %v27537_v61 }
 0x6b3   : > { %20932 = vmatmul.mubr.msk.f32.vlgmr.msra.gmra.mrb[42].mxu1 %vm6200_vm12, %v6350_v56  ;;  %22562 = vmatprep.mubr.msk.f32.mxu0 %vm6200_vm12, %v6350_v56  ;;  %v23696_v56 = vld [vmem:[%s29920_s14 + $0x4c] ss:$12 sps:$4 sm:$0xff]  }
 0x6b4   : > { %v24066_v60 = vpop.eup %24065  ;;  %22917 = vmatpush1.bf16.msra.mxu1 %v29914_v40  ;;  %v6320_v55 = vpop.xlane.xlu1 %6319  ;;  %6659 = vmatprep.mubr.f32.mxu1 %v29913_v3  ;;  %v23699_v40 = vld [vmem:[%s29920_s14 + $0x64] ss:$12 sps:$4 sm:$0xff]  }
 0x6b5   : > { %24071 = vrcp.f32 %v6320_v55  ;;  %22923 = vmatprep.subr.bf16.mxu1 %v29915_v0  ;;  %v6317_v38 = vpop.xlane.xlu0 %6316  ;;  %v6352_v61 = vmul.f32 %v24066_v60, %v27543_v39  ;;  %v29916_v39 = vpack.c.bf16 %v27373_v2, %v27370_v26  ;;  %v23694_v60 = vld [vmem:[%s29920_s14 + $0x48] ss:$12 sps:$4 sm:$0xff]   ;;  %v23697_v55 = vld [vmem:[%s29920_s14 + $0x60] ss:$12 sps:$4 sm:$0xff]   ;;  %v23700_v0 = vld [vmem:[%s29920_s14 + $0x78] ss:$12 sps:$4 sm:$0xff]  }
 0x6b6   : > { %24073 = vrcp.f32 %v6317_v38  ;;  %v23702_v38 = vld [vmem:[%s29920_s14 + $0x7c] ss:$12 sps:$4 sm:$0xff]  }
 0x6b7   : > { %20933 = vmatmul.mubr.msk.f32.gmra.mrb[44].mxu1 %vm6200_vm12, %v6352_v61  ;;  %22563 = vmatmul.mubr.msk.f32.vlgmr.msra.gmra.mrb[38].mxu0 %vm6200_vm12, %v6352_v61  ;;  %v23705_v61 = vld [vmem:[%s29920_s14 + $0x94] ss:$12 sps:$4 sm:$0xff]  }
 0x6b8   : > { %v24068_v41 = vpop.eup %24067  ;;  %22921 = vmatpush3.bf16.msra.mxu0 %v27333_v52  ;;  %6811 = vmatprep.mubr.f32.mxu1 %v29913_v3 }
 0x6b9   : > { %v24070_v22 = vpop.eup %24069  ;;  %v6356_v18 = vmul.f32 %v24068_v41, %v27547_v50  ;;  %22927 = vmatprep.subr.bf16.mxu0 %v27333_v52  ;;  %v29917_v50 = vpack.c.bf16 %v27383_v51, %v27376_v4  ;;  %v23703_v41 = vld [vmem:[%s29920_s14 + $0x90] ss:$12 sps:$4 sm:$0xff]  }
 0x6ba   : > { %v6354_v17 = vmul.f32 %v24070_v22, %v27549_v1  ;;  %v23708_v22 = vld [vmem:[%s29920_s14 + $0xac] ss:$12 sps:$4 sm:$0xff]  }
 0x6bc   : > { %20936 = vmatmul.mubr.msk.f32.vlgmr.msra.gmra.mrb[42].mxu1 %vm6200_vm12, %v6354_v17  ;;  %22569 = vmatprep.mubr.msk.f32.mxu0 %vm6200_vm12, %v6354_v17  ;;  %v6326_v24 = vpop.xlane.xlu1 %6325  ;;  %v23711_v17 = vld [vmem:[%s29920_s14 + $0xc4] ss:$12 sps:$4 sm:$0xff]  }
 0x6bd   : > { %22925 = vmatpush1.bf16.msra.mxu1 %v29916_v39  ;;  %24075 = vrcp.f32 %v6326_v24  ;;  %22570 = vmatmul.mubr.msk.f32.vlgmr.msra.gmra.mrb[40].mxu0 %vm6200_vm12, %v6356_v18  ;;  %v6323_v48 = vpop.xlane.xlu0 %6322  ;;  %v23712_v24 = vld [vmem:[%s29920_s14 + $0xc8] ss:$12 sps:$4 sm:$0xff]   ;;  %v23709_v39 = vld [vmem:[%s29920_s14 + $0xc0] ss:$12 sps:$4 sm:$0xff]  }
 0x6be   : > { %22929 = vmatpush3.bf16.msra.mxu0 %v27333_v52  ;;  %22931 = vmatprep.subr.bf16.mxu1 %v29917_v50  ;;  %24077 = vrcp.f32 %v6323_v48  ;;  %v23713_v48 = vld [vmem:[%s29920_s14 + $0x8] ss:$12 sps:$4 sm:$0xff]  }
 0x6bf   : > { %v24072_v1 = vpop.eup %24071  ;;  %22935 = vmatprep.subr.bf16.mxu0 %v27333_v52  ;;  %6817 = vmatprep.mubr.f32.mxu1 %v29913_v3  ;;  %v23716_v50 = vld [vmem:[%s29920_s14 + $0xdc] ss:$12 sps:$4 sm:$0xff]  }
 0x6c0   : > { %v24074_v53 = vpop.eup %24073  ;;  %20937 = vmatmul.mubr.msk.f32.gmra.mrb[44].mxu1 %vm6200_vm12, %v6356_v18  ;;  %v6360_v2 = vmul.f32 %v24072_v1, %v27557_v49  ;;  %v23706_v18 = vld [vmem:[%s29920_s14 + $0xa8] ss:$12 sps:$4 sm:$0xff]   ;;  %v23717_v1 = vld [vmem:[%s29920_s14 + $0xe0] ss:$12 sps:$4 sm:$0xff]  }
 0x6c1   : > { %v6358_v26 = vmul.f32 %v24074_v53, %v27559_v27  ;;  %6969 = vmatprep.mubr.f32.mxu1 %v29913_v3  ;;  %v29918_v27 = vpack.c.bf16 %v27394_v31, %v27389_v46  ;;  %v23714_v53 = vld [vmem:[%s29920_s14 + $0xd8] ss:$12 sps:$4 sm:$0xff]  }
 0x6c3   : > { %22576 = vmatprep.mubr.msk.f32.mxu0 %vm6200_vm12, %v6358_v26 }
 0x6c4   : > { %20940 = vmatmul.mubr.msk.f32.vlgmr.msra.gmra.mrb[42].mxu1 %vm6200_vm12, %v6358_v26  ;;  %v6332_v4 = vpop.xlane.xlu1 %6331  ;;  %22577 = vmatmul.mubr.msk.f32.vlgmr.msra.gmra.mrb[42].mxu0 %vm6200_vm12, %v6360_v2  ;;  %v23718_v26 = vld [vmem:[%s29920_s14 + $0x20] ss:$12 sps:$4 sm:$0xff]  }
 0x6c5   : > { %22933 = vmatpush1.bf16.msra.mxu1 %v27402_v34  ;;  %24079 = vrcp.f32 %v6332_v4  ;;  %22937 = vmatpush3.bf16.msra.mxu0 %v27333_v52  ;;  %v6329_v51 = vpop.xlane.xlu0 %6328  ;;  %v23722_v4 = vld [vmem:[%s29920_s14 + $0xf8] ss:$12 sps:$4 sm:$0xff]  }
 0x6c6   : > { %22939 = vmatprep.subr.bf16.mxu1 %v29918_v27  ;;  %22943 = vmatprep.subr.bf16.mxu0 %v27333_v52  ;;  %24081 = vrcp.f32 %v6329_v51  ;;  %v23719_v51 = vld [vmem:[%s29920_s14 + $0xf0] ss:$12 sps:$4 sm:$0xff]   ;;  %v23723_v27 = vld [vmem:[%s29920_s14 + $0x38] ss:$12 sps:$4 sm:$0xff]  }
 0x6c7   : > { %v24076_v49 = vpop.eup %24075  ;;  %6975 = vmatprep.mubr.f32.mxu1 %v29913_v3 }
 0x6c8   : > { %v24078_v42 = vpop.eup %24077  ;;  %20941 = vmatmul.mubr.msk.f32.gmra.mrb[44].mxu1 %vm6200_vm12, %v6360_v2  ;;  %v6364_v58 = vmul.f32 %v24076_v49, %v27567_v30  ;;  %v23721_v2 = vld [vmem:[%s29920_s14 + $0xf4] ss:$12 sps:$4 sm:$0xff]   ;;  %v23726_v49 = vld [vmem:[%s29920_s14 + $0x10c] ss:$12 sps:$4 sm:$0xff]  }
 0x6c9   : > { %v6362_v44 = vmul.f32 %v24078_v42, %v27569_v37  ;;  %7127 = vmatprep.mubr.f32.mxu1 %v29913_v3  ;;  %v29919_v37 = vpack.c.bf16 %v27400_v33, %v27397_v32  ;;  %v29921_v32 = vpack.c.bf16 %v27408_v36, %v27405_v35  ;;  %v23727_v42 = vld [vmem:[%s29920_s14 + $0x110] ss:$12 sps:$4 sm:$0xff]  }
 0x6cb   : > { %22583 = vmatprep.mubr.msk.f32.mxu0 %vm6200_vm12, %v6362_v44 }
 0x6cc   : > { %20944 = vmatmul.mubr.msk.f32.vlgmr.msra.gmra.mrb[42].mxu1 %vm6200_vm12, %v6362_v44  ;;  %v6338_v46 = vpop.xlane.xlu1 %6337  ;;  %22584 = vmatmul.mubr.msk.f32.vlgmr.msra.gmra.mrb[44].mxu0 %vm6200_vm12, %v6364_v58  ;;  %v23724_v44 = vld [vmem:[%s29920_s14 + $0x108] ss:$12 sps:$4 sm:$0xff]  }
 0x6cd   : > { %22941 = vmatpush1.bf16.msra.mxu1 %v27402_v34  ;;  %24083 = vrcp.f32 %v6338_v46  ;;  %22945 = vmatpush3.bf16.msra.mxu0 %v27333_v52  ;;  %v6335_v31 = vpop.xlane.xlu0 %6334  ;;  %v23731_v46 = vld [vmem:[%s29920_s14 + $0x124] ss:$12 sps:$4 sm:$0xff]  }
 0x6ce   : > { %22947 = vmatprep.subr.bf16.mxu1 %v29919_v37  ;;  %22951 = vmatprep.subr.bf16.mxu0 %v27333_v52  ;;  %24085 = vrcp.f32 %v6335_v31  ;;  %v23732_v31 = vld [vmem:[%s29920_s14 + $0x128] ss:$12 sps:$4 sm:$0xff]   ;;  %v23729_v37 = vld [vmem:[%s29920_s14 + $0x120] ss:$12 sps:$4 sm:$0xff]  }
 0x6cf   : > { %v24080_v30 = vpop.eup %24079  ;;  %7133 = vmatprep.mubr.f32.mxu1 %v29913_v3 }
 0x6d0   : > { %v24082_v29 = vpop.eup %24081  ;;  %20945 = vmatmul.mubr.msk.f32.gmra.mrb[44].mxu1 %vm6200_vm12, %v6364_v58  ;;  %v6344_v16 = vpop.xlane.xlu1 %6343  ;;  %v6368_v21 = vmul.f32 %v24080_v30, %v27579_v25  ;;  %v23728_v58 = vld [vmem:[%s29920_s14 + $0x50] ss:$12 sps:$4 sm:$0xff]   ;;  %v23733_v30 = vld [vmem:[%s29920_s14 + $0x68] ss:$12 sps:$4 sm:$0xff]  }
 0x6d1   : > { %v6366_v57 = vmul.f32 %v24082_v29, %v27581_v28  ;;  %24087 = vrcp.f32 %v6344_v16  ;;  %v6341_v20 = vpop.xlane.xlu0 %6340  ;;  %7285 = vmatprep.mubr.f32.mxu1 %v29913_v3  ;;  %v23736_v29 = vld [vmem:[%s29920_s14 + $0x13c] ss:$12 sps:$4 sm:$0xff]   ;;  %v23737_v16 = vld [vmem:[%s29920_s14 + $0x140] ss:$12 sps:$4 sm:$0xff]  }
 0x6d2   : > { %24089 = vrcp.f32 %v6341_v20  ;;  %v23738_v20 = vld [vmem:[%s29920_s14 + $0x80] ss:$12 sps:$4 sm:$0xff]  }
 0x6d3   : > { %22590 = vmatprep.mubr.msk.f32.mxu0 %vm6200_vm12, %v6366_v57 }
 0x6d4   : > { %20948 = vmatmul.mubr.msk.f32.vlgmr.msra.gmra.mrb[42].mxu1 %vm6200_vm12, %v6366_v57  ;;  %22591 = vmatmul.mubr.msk.f32.vlgmr.msra.gmra.mrb[46].mxu0 %vm6200_vm12, %v6368_v21  ;;  %v23734_v57 = vld [vmem:[%s29920_s14 + $0x138] ss:$12 sps:$4 sm:$0xff]  }
 0x6d5   : > { %22949 = vmatpush1.bf16.msra.mxu1 %v27402_v34  ;;  %22953 = vmatpush3.bf16.msra.mxu0 %v27333_v52  ;;  %v23687_v52 = vld [vmem:[%s29920_s14 + $0x4] ss:$12 sps:$4 sm:$0xff]  }
 0x6d6   : > { %22955 = vmatprep.subr.bf16.mxu1 %v29921_v32  ;;  %22959 = vmatprep.subr.bf16.mxu0 %v27340_v54  ;;  %v23742_v32 = vld [vmem:[%s29920_s14 + $0x158] ss:$12 sps:$4 sm:$0xff]  }
 0x6d7   : > { %v24084_v33 = vpop.eup %24083  ;;  %7291 = vmatprep.mubr.f32.mxu1 %v29913_v3 }
 0x6d8   : > { %v24086_v25 = vpop.eup %24085  ;;  %20949 = vmatmul.mubr.msk.f32.gmra.mrb[44].mxu1 %vm6200_vm12, %v6368_v21  ;;  %v6372_v59 = vmul.f32 %v24084_v33, %v27587_v23  ;;  %v23741_v21 = vld [vmem:[%s29920_s14 + $0x154] ss:$12 sps:$4 sm:$0xff]   ;;  %v23739_v33 = vld [vmem:[%s29920_s14 + $0x150] ss:$12 sps:$4 sm:$0xff]  }
 0x6d9   : > { %v6370_v28 = vmul.f32 %v24086_v25, %v27589_v11  ;;  %7443 = vmatprep.mubr.f32.mxu1 %v29913_v3  ;;  %v23685_v11 = vld [vmem:[%s29920_s14] ss:$12 sps:$4 sm:$0xff]   ;;  %v23743_v25 = vld [vmem:[%s29920_s14 + $0x98] ss:$12 sps:$4 sm:$0xff]  }
 0x6db   : > { %v24088_v15 = vpop.eup %24087  ;;  %22597 = vmatprep.mubr.msk.f32.mxu0 %vm6200_vm12, %v6370_v28 }
 0x6dc   : > { %v24090_v35 = vpop.eup %24089  ;;  %20952 = vmatmul.mubr.msk.f32.vlgmr.msra.gmra.mrb[42].mxu1 %vm6200_vm12, %v6370_v28  ;;  %22598 = vmatmul.mubr.msk.f32.vlgmr.msra.gmra.mrb[48].mxu0 %vm6200_vm12, %v6372_v59  ;;  %v6376_v23 = vmul.f32 %v24088_v15, %v27595_v63  ;;  %v23693_v63 = vld [vmem:[%s29920_s14 + $0x34] ss:$12 sps:$4 sm:$0xff]   ;;  %v23746_v28 = vld [vmem:[%s29920_s14 + $0x16c] ss:$12 sps:$4 sm:$0xff]   ;;  %v23748_v15 = vld [vmem:[%s29920_s14 + $0xb0] ss:$12 sps:$4 sm:$0xff]  }
 0x6dd   : > { %22957 = vmatpush1.bf16.msra.mxu1 %v27402_v34  ;;  %22961 = vmatpush3.bf16.msra.mxu0 %v27340_v54  ;;  %v6374_v36 = vmul.f32 %v24090_v35, %v27597_v45  ;;  %v23688_v54 = vld [vmem:[%s29920_s14 + $0x18] ss:$12 sps:$4 sm:$0xff]   ;;  %v23690_v34 = vld [vmem:[%s29920_s14 + $0x1c] ss:$12 sps:$4 sm:$0xff]  }
 0x6de   : > { %7449 = vmatprep.mubr.f32.mxu1 %v29913_v3  ;;  %8057 = vmatprep.subr.bf16.mxu0 %v23687_v52  ;;  %v23691_v45 = vld [vmem:[%s29920_s14 + $0x30] ss:$12 sps:$4 sm:$0xff]   ;;  %v23744_v52 = vld [vmem:[%s29920_s14 + $0x168] ss:$12 sps:$4 sm:$0xff]  }
 0x6df   : > { %22604 = vmatprep.mubr.msk.f32.mxu0 %vm6200_vm12, %v6374_v36  ;;  %22075 = vmatprep.subr.bf16.mxu1 %v23712_v24  ;;  %v23751_v35 = vld [vmem:[%s29920_s14 + $0x184] ss:$12 sps:$4 sm:$0xff]  }
 0x6e0   : > { %20953 = vmatmul.mubr.msk.f32.gmra.mrb[44].mxu1 %vm6200_vm12, %v6372_v59  ;;  %22605 = vmatmul.mubr.msk.f32.vlgmr.msra.gmra.mrb[50].mxu0 %vm6200_vm12, %v6376_v23  ;;  %v23747_v59 = vld [vmem:[%s29920_s14 + $0x170] ss:$12 sps:$4 sm:$0xff]  }
 0x6e1   : > { %7601 = vmatprep.mubr.f32.mxu1 %v29913_v3  ;;  %8058 = vmatpush1.bf16.msra.mxu0 %v23685_v11 }
 0x6e2   : > { %8059 = vmatprep.subr.bf16.mxu0 %v23690_v34 }
 0x6e4   : > { %20956 = vmatmul.mubr.msk.f32.vlgmr.msra.gmra.mrb[42].mxu1 %vm6200_vm12, %v6374_v36  ;;  %v23752_v36 = vld [vmem:[%s29920_s14 + $0x188] ss:$12 sps:$4 sm:$0xff]  }
 0x6e5   : > { %7607 = vmatprep.mubr.f32.mxu1 %v29913_v3  ;;  %8060 = vmatpush1.bf16.msra.mxu0 %v23688_v54 }
 0x6e6   : > { %8061 = vmatprep.subr.bf16.mxu0 %v23693_v63  ;;  %22076 = vmatpush3.bf16.msra.mxu1 %v23713_v48 }
 0x6e7   : > { %22077 = vmatprep.subr.bf16.mxu1 %v23717_v1 }
 0x6e8   : > { %20957 = vmatmul.mubr.msk.f32.gmra.mrb[44].mxu1 %vm6200_vm12, %v6376_v23 }
 0x6e9   : > { %8062 = vmatpush1.bf16.msra.mxu0 %v23691_v45 }
 0x6ea   : > { %8063 = vmatprep.subr.bf16.mxu0 %v23696_v56  ;;  %22078 = vmatpush3.bf16.msra.mxu1 %v23718_v26 }
 0x6eb   : > { %22079 = vmatprep.subr.bf16.mxu1 %v23722_v4 }
 0x6ed   : > { %8064 = vmatpush1.bf16.msra.mxu0 %v23694_v60 }
 0x6ee   : > { %8065 = vmatprep.subr.bf16.mxu0 %v23699_v40  ;;  %22080 = vmatpush3.bf16.msra.mxu1 %v23723_v27 }
 0x6ef   : > { %22081 = vmatprep.subr.bf16.mxu1 %v23727_v42 }
 0x6f1   : > { %8066 = vmatpush1.bf16.msra.mxu0 %v23697_v55 }
 0x6f2   : > { %8067 = vmatprep.subr.bf16.mxu0 %v23702_v38  ;;  %22082 = vmatpush3.bf16.msra.mxu1 %v23728_v58 }
 0x6f3   : > { %22083 = vmatprep.subr.bf16.mxu1 %v23732_v31 }
 0x6f5   : > { %8068 = vmatpush1.bf16.msra.mxu0 %v23700_v0 }
 0x6f6   : > { %8069 = vmatprep.subr.bf16.mxu0 %v23705_v61  ;;  %22084 = vmatpush3.bf16.msra.mxu1 %v23733_v30 }
 0x6f7   : > { %22085 = vmatprep.subr.bf16.mxu1 %v23737_v16 }
 0x6f9   : > { %8070 = vmatpush1.bf16.msra.mxu0 %v23703_v41 }
 0x6fa   : > { %8071 = vmatprep.subr.bf16.mxu0 %v23708_v22  ;;  %22086 = vmatpush3.bf16.msra.mxu1 %v23738_v20 }
 0x6fb   : > { %22087 = vmatprep.subr.bf16.mxu1 %v23742_v32 }
 0x6fd   : > { %8072 = vmatpush1.bf16.msra.mxu0 %v23706_v18 }
 0x6fe   : > { %8073 = vmatprep.subr.bf16.mxu0 %v23711_v17  ;;  %22088 = vmatpush3.bf16.msra.mxu1 %v23743_v25 }
 0x6ff   : > { %22089 = vmatprep.subr.bf16.mxu1 %v23747_v59 }
 0x701   : > { %8074 = vmatpush1.bf16.msra.mxu0 %v23709_v39 }
 0x702   : > { %8075 = vmatprep.subr.bf16.mxu0 %v23716_v50  ;;  %22090 = vmatpush3.bf16.msra.mxu1 %v23748_v15  ;;  %v23749_v15 = vld [vmem:[%s29920_s14 + $0x180] ss:$12 sps:$4 sm:$0xff]  }
 0x703   : > { %22607 = vmatprep.subr.bf16.mxu1 %v23752_v36 }
 0x705   : > { %8076 = vmatpush1.bf16.msra.mxu0 %v23714_v53 }
 0x706   : > { %8077 = vmatprep.subr.bf16.mxu0 %v23721_v2 }
 0x709   : > { %8078 = vmatpush1.bf16.msra.mxu0 %v23719_v51 }
 0x70a   : > { %8079 = vmatprep.subr.bf16.mxu0 %v23726_v49 }
 0x70d   : > { %8080 = vmatpush1.bf16.msra.mxu0 %v23724_v44 }
 0x70e   : > { %8081 = vmatprep.subr.bf16.mxu0 %v23731_v46 }
 0x711   : > { %8082 = vmatpush1.bf16.msra.mxu0 %v23729_v37 }
 0x712   : > { %8083 = vmatprep.subr.bf16.mxu0 %v23736_v29 }
 0x715   : > { %8084 = vmatpush1.bf16.msra.mxu0 %v23734_v57 }
 0x716   : > { %8085 = vmatprep.subr.bf16.mxu0 %v23741_v21 }
 0x719   : > { %8086 = vmatpush1.bf16.msra.mxu0 %v23739_v33 }
 0x71a   : > { %8087 = vmatprep.subr.bf16.mxu0 %v23746_v28 }
 0x71d   : > { %8088 = vmatpush1.bf16.msra.mxu0 %v23744_v52 }
 0x71e   : > { %8102 = vmatprep.subr.bf16.mxu0 %v23751_v35 }
 0x77a   : > { %v22557_v11 = vpop.f32.mrb[36].mxu0 }
 0x77b   : > { %v6574_v23 = vpop.f32.mrb[37].mxu0  ;;  %v7732_v34 = vsel %vm3534_vm10, %v22557_v11, 0.0  ;;  %v23755_v11 = vld [vmem:[%s29920_s14 + $0x19c] ss:$12 sps:$4 sm:$0xff]  }
 0x77c   : > { %v7703_v56 = vsel %vm3534_vm10, %v6574_v23, 0.0  ;;  %v23756_v23 = vld [vmem:[%s29920_s14 + $0x1a0] ss:$12 sps:$4 sm:$0xff]  }
 0x78a   : > { %v22564_v54 = vpop.f32.mrb[38].mxu0 }
 0x78b   : > { %v7733_v63 = vsel %vm3534_vm10, %v22564_v54, 0.0  ;;  %v6732_v45 = vpop.f32.mrb[39].mxu0 }
 0x78c   : > { %v7734_v60 = vadd.f32 %v7733_v63, %v7732_v34  ;;  %v7704_v40 = vsel %vm3534_vm10, %v6732_v45, 0.0  ;;  %v23753_v34 = vld [vmem:[%s29920_s14 + $0x198] ss:$12 sps:$4 sm:$0xff]  }
 0x78d   : > { %v7705_v55 = vadd.f32 %v7704_v40, %v7703_v56  ;;  %v4895_v56 = vld [vmem:[%s29923_s3] sm:$0x7] }
 0x790   : > { %v22571_v0 = vpop.f32.mrb[40].mxu0 }
 0x791   : > { %v7735_v38 = vsel %vm3534_vm10, %v22571_v0, 0.0  ;;  %v6890_v61 = vpop.f32.mrb[41].mxu0 }
 0x792   : > { %v7736_v41 = vadd.f32 %v7735_v38, %v7734_v60  ;;  %v7706_v22 = vsel %vm3534_vm10, %v6890_v61, 0.0  ;;  %v7751_v38 = vrot.slane %v4895_v56, %v27150_v19 }
 0x793   : > { %v7707_v18 = vadd.f32 %v7706_v22, %v7705_v55  ;;  %v7759_v55 = vrot.slane %v4895_v56, %v27124_v47 }
 0x797   : > { %v22578_v17 = vpop.f32.mrb[42].mxu0 }
 0x798   : > { %v7737_v24 = vsel %vm3534_vm10, %v22578_v17, 0.0  ;;  %v7048_v39 = vpop.f32.mrb[43].mxu0 }
 0x799   : > { %v7738_v48 = vadd.f32 %v7737_v24, %v7736_v41  ;;  %v7708_v50 = vsel %vm3534_vm10, %v7048_v39, 0.0  ;;  %v7755_v41 = vrot.slane %v4895_v56, %v27135_v62  ;;  %v23769_v56 = vld [vmem:[%s26871_s28 + $0x50] ss:$20 sps:$4 sm:$0xff]  }
 0x79a   : > { %v7709_v1 = vadd.f32 %v7708_v50, %v7707_v18 }
 0x79f   : > { %v22585_v53 = vpop.f32.mrb[44].mxu0 }
 0x7a0   : > { %v7739_v26 = vsel %vm3534_vm10, %v22585_v53, 0.0  ;;  %v7206_v2 = vpop.f32.mrb[45].mxu0 }
 0x7a1   : > { %v7740_v4 = vadd.f32 %v7739_v26, %v7738_v48  ;;  %v7710_v51 = vsel %vm3534_vm10, %v7206_v2, 0.0  ;;  %v24105_v2 = vld [vmem:[#allocation2] sm:$0xff] }
 0x7a2   : > { %v7711_v27 = vadd.f32 %v7710_v51, %v7709_v1  ;;  %v24106_v51 = vld [vmem:[#allocation2 + $0x8] sm:$0xff] }
 0x7a7   : > { %v22592_v49 = vpop.f32.mrb[46].mxu0 }
 0x7a8   : > { %v7741_v42 = vsel %vm3534_vm10, %v22592_v49, 0.0  ;;  %v7364_v44 = vpop.f32.mrb[47].mxu0  ;;  %v24107_v49 = vld [vmem:[#allocation2 + $0x10] sm:$0xff] }
 0x7a9   : > { %v7742_v58 = vadd.f32 %v7741_v42, %v7740_v4  ;;  %v7712_v46 = vsel %vm3534_vm10, %v7364_v44, 0.0 }
 0x7aa   : > { %v7713_v31 = vadd.f32 %v7712_v46, %v7711_v27 }
 0x7af   : > { %v22599_v37 = vpop.f32.mrb[48].mxu0 }
 0x7b0   : > { %v7743_v30 = vsel %vm3534_vm10, %v22599_v37, 0.0  ;;  %v7522_v29 = vpop.f32.mrb[49].mxu0 }
 0x7b1   : > { %v7744_v16 = vadd.f32 %v7743_v30, %v7742_v58  ;;  %v7714_v57 = vsel %vm3534_vm10, %v7522_v29, 0.0  ;;  %v24108_v29 = vld [vmem:[#allocation2 + $0x28] sm:$0xff] }
 0x7b2   : > { %v7715_v20 = vadd.f32 %v7714_v57, %v7713_v31  ;;  %v24109_v57 = vld [vmem:[#allocation2 + $0x18] sm:$0xff] }
 0x7b3   : > { %v22606_v21 = vpop.f32.mrb[50].mxu0 }
 0x7b4   : > { %v7745_v32 = vsel %vm3534_vm10, %v22606_v21, 0.0  ;;  %v7680_v33 = vpop.f32.mrb[51].mxu0  ;;  %v24110_v21 = vld [vmem:[#allocation2 + $0x20] sm:$0xff] }
 0x7b5   : > { %v7746_v25 = vadd.f32 %v7745_v32, %v7744_v16  ;;  %v7716_v28 = vsel %vm3534_vm10, %v7680_v33, 0.0 }
 0x7b6   : > { %v7717_v59 = vadd.f32 %v7716_v28, %v7715_v20 }
 0x7b7   : > { %v7603_v52 = vpop.f32.mrb[42].mxu1 }
 0x7b8   : > { %v7605_v35 = vpop.f32.mrb[43].mxu1 }
 0x7b9   : > { %8089 = vmatprep.mubr.f32.mxu0 %v7605_v35  ;;  %8179 = vmatprep.mubr.f32.mxu1 %v7605_v35  ;;  %v23760_v35 = vld [vmem:[%s26871_s28 + $0x8] ss:$20 sps:$4 sm:$0xff]  }
 0x7ba   : > { %8090 = vmatmul.mubr.f32.vlgmr.msra.gmra.mrb[52].mxu0 %v7603_v52  ;;  %8180 = vmatmul.mubr.f32.vlgmr.msra.gmra.mrb[46].mxu1 %v7603_v52  ;;  %v23757_v52 = vld [vmem:[%s26871_s28] ss:$20 sps:$4 sm:$0xff]  }
 0x7bb   : > { %v7609_v54 = vpop.f32.mrb[44].mxu1  ;;  %8103 = vmatpush1.bf16.msra.mxu0 %v23749_v15  ;;  %22608 = vmatpush3.bf16.msra.mxu1 %v23752_v36  ;;  %v23759_v15 = vld [vmem:[%s26871_s28 + $0x4] ss:$20 sps:$4 sm:$0xff]  }
 0x7bc   : > { %v7611_v63 = vpop.f32.mrb[45].mxu1  ;;  %8104 = vmatprep.subr.bf16.mxu0 %v23755_v11  ;;  %22609 = vmatprep.subr.bf16.mxu1 %v23756_v23  ;;  %v23762_v11 = vld [vmem:[%s26871_s28 + $0xc] ss:$20 sps:$4 sm:$0xff]  }
 0x7bd   : > { %8095 = vmatprep.mubr.f32.mxu0 %v7611_v63  ;;  %8184 = vmatprep.mubr.f32.mxu1 %v7611_v63  ;;  %v23766_v63 = vld [vmem:[%s26871_s28 + $0x30] ss:$20 sps:$4 sm:$0xff]  }
 0x7be   : > { %8096 = vmatmul.mubr.f32.gmra.mrb[54].mxu0 %v7609_v54  ;;  %8185 = vmatmul.mubr.f32.gmra.mrb[48].mxu1 %v7609_v54  ;;  %v23768_v54 = vld [vmem:[%s26871_s28 + $0x34] ss:$20 sps:$4 sm:$0xff]  }
 0x7bf   : > { %8105 = vmatpush1.bf16.msra.mxu0 %v23753_v34  ;;  %22610 = vmatpush3.bf16.msra.mxu1 %v23756_v23  ;;  %v23765_v23 = vld [vmem:[%s26871_s28 + $0x2c] ss:$20 sps:$4 sm:$0xff]   ;;  %v23763_v34 = vld [vmem:[%s26871_s28 + $0x28] ss:$20 sps:$4 sm:$0xff]  }
 0x7c0   : > { %22611 = vmatprep.mubr.msk.f32.mxu1 %vm3534_vm10, %v7717_v59  ;;  %8134 = vmatprep.mubr.f32.mxu0 %v29913_v3 }
 0x7c1   : > { %9086 = vmatprep.subr.bf16.mxu1 %v23759_v15  ;;  %9176 = vmatprep.subr.bf16.mxu0 %v23762_v11 }
 0x7c2   : > { %21014 = vmatmul.mubr.msk.f32.vlgmr.msra.gmra.mrb[52].mxu0 %vm3534_vm10, %v7717_v59  ;;  %22612 = vmatmul.mubr.msk.f32.vlgmr.msra.gmra.mrb[50].mxu1 %vm3534_vm10, %v7746_v25 }
 0x7c3   : > { %8140 = vmatprep.mubr.f32.mxu0 %v29913_v3  ;;  %9087 = vmatpush1.bf16.msra.mxu1 %v23757_v52 }
 0x7c4   : > { %9177 = vmatpush1.bf16.msra.mxu0 %v23760_v35  ;;  %9088 = vmatprep.subr.bf16.mxu1 %v23765_v23 }
 0x7c5   : > { %9178 = vmatprep.subr.bf16.mxu0 %v23768_v54 }
 0x7c6   : > { %21015 = vmatmul.mubr.msk.f32.gmra.mrb[54].mxu0 %vm3534_vm10, %v7746_v25 }
 0x7c7   : > { %9089 = vmatpush1.bf16.msra.mxu1 %v23763_v34 }
 0x7c8   : > { %9179 = vmatpush1.bf16.msra.mxu0 %v23766_v63 }
 0x88d   : > { %v22091_v36 = vpop.f32.mrb[46].mxu1 }
 0x88e   : > { %v22092_v45 = vpop.f32.mrb[47].mxu1 }
 0x88f   : > { %v22093_v60 = vadd.f32 %v22092_v45, %v22091_v36  ;;  %v23771_v36 = vld [vmem:[%s26871_s28 + $0x54] ss:$20 sps:$4 sm:$0xff]   ;;  %v23774_v45 = vld [vmem:[%s26871_s28 + $0x5c] ss:$20 sps:$4 sm:$0xff]  }
 0x890   : > { %9090 = vmatprep.subr.bf16.mxu1 %v23771_v36  ;;  %9180 = vmatprep.subr.bf16.mxu0 %v23774_v45 }
 0x891   : > { %v22094_v40 = vpop.f32.mrb[48].mxu1  ;;  %v8182_v24 = vadd.f32 %v22093_v60, %v7759_v55  ;;  %v23772_v60 = vld [vmem:[%s26871_s28 + $0x58] ss:$20 sps:$4 sm:$0xff]   ;;  %9091 = vmatpush1.bf16.msra.mxu1 %v23769_v56 }
 0x892   : > { %v22095_v0 = vpop.f32.mrb[49].mxu1  ;;  %9181 = vmatpush1.bf16.msra.mxu0 %v23772_v60 }
 0x893   : > { %v22096_v61 = vadd.f32 %v22095_v0, %v22094_v40  ;;  %v23777_v40 = vld [vmem:[%s26871_s28 + $0x7c] ss:$20 sps:$4 sm:$0xff]   ;;  %v23775_v0 = vld [vmem:[%s26871_s28 + $0x78] ss:$20 sps:$4 sm:$0xff]  }
 0x894   : > { %9092 = vmatprep.subr.bf16.mxu1 %v23777_v40 }
 0x895   : > { %v8136_v22 = vpop.f32.mrb[52].mxu0  ;;  %v8187_v18 = vadd.f32 %v22096_v61, %v7759_v55  ;;  %v22613_v17 = vpop.f32.mrb[50].mxu1  ;;  %v23780_v55 = vld [vmem:[%s26871_s28 + $0x84] ss:$20 sps:$4 sm:$0xff]   ;;  %9093 = vmatpush1.bf16.msra.mxu1 %v23775_v0 }
 0x896   : > { %v23094_v39 = vadd.f32 %v8136_v22, %v7751_v38  ;;  %v8138_v48 = vpop.f32.mrb[53].mxu0  ;;  %v8224_v50 = vpop.f32.mrb[51].mxu1  ;;  %v23783_v61 = vld [vmem:[%s26871_s28 + $0xa4] ss:$20 sps:$4 sm:$0xff]   ;;  %9182 = vmatprep.subr.bf16.mxu0 %v23780_v55  ;;  %v23781_v22 = vld [vmem:[%s26871_s28 + $0xa0] ss:$20 sps:$4 sm:$0xff]  }
 0x897   : > { %v8230_v1 = vadd.f32 %v22613_v17, %v8187_v18  ;;  %v23095_v53 = vadd.f32 %v8138_v48, %v7755_v41  ;;  %v8225_v26 = vadd.f32 %v8224_v50, %v8182_v24  ;;  %9094 = vmatprep.subr.bf16.mxu1 %v23783_v61  ;;  %v23784_v18 = vld [vmem:[%s26871_s28 + $0xa8] ss:$20 sps:$4 sm:$0xff]   ;;  %v23789_v17 = vld [vmem:[%s26871_s28 + $0xcc] ss:$20 sps:$4 sm:$0xff]   ;;  %v23790_v48 = vld [vmem:[%s26871_s28 + $0xd0] ss:$20 sps:$4 sm:$0xff]  }
 0x898   : > { %v27790_v4 = vadd.f32 %v24105_v2, %v23094_v39  ;;  %v23792_v24 = vld [vmem:[%s26871_s28 + $0xd4] ss:$20 sps:$4 sm:$0xff]   ;;  %v23801_v2 = vld [vmem:[%s26871_s28 + $0x11c] ss:$20 sps:$4 sm:$0xff]  }
 0x899   : > { %v27792_v27 = vadd.f32 %v24106_v51, %v23095_v53  ;;  %v27794_v42 = vadd.f32 %v24107_v49, %v8225_v26  ;;  %v8142_v44 = vpop.f32.mrb[54].mxu0  ;;  %v27800_v16 = vadd.f32 %v24108_v29, %v8230_v1  ;;  %9095 = vmatpush1.bf16.msra.mxu1 %v23781_v22  ;;  %v23787_v39 = vld [vmem:[%s26871_s28 + $0xc8] ss:$20 sps:$4 sm:$0xff]   ;;  %v23793_v53 = vld [vmem:[%s26871_s28 + $0xf0] ss:$20 sps:$4 sm:$0xff]  }
 0x89a   : > { %v23096_v58 = vadd.f32 %v8142_v44, %v7751_v38  ;;  %v8144_v46 = vpop.f32.mrb[55].mxu0  ;;  %v23778_v38 = vld [vmem:[%s26871_s28 + $0x80] ss:$20 sps:$4 sm:$0xff]   ;;  %9096 = vmatprep.subr.bf16.mxu1 %v23789_v17  ;;  %v23798_v1 = vld [vmem:[%s26871_s28 + $0xfc] ss:$20 sps:$4 sm:$0xff]  }
 0x89b   : > { %v23097_v31 = vadd.f32 %v8144_v46, %v7755_v41  ;;  %v8241_v37 = vadd.f32 %v27792_v27, %v27790_v4  ;;  %v8242_v30 = vsel %vm3534_vm10, %v27794_v42, 0.0  ;;  %v8247_v28 = vsel %vm3534_vm10, %v27800_v16, 0.0  ;;  %v23786_v41 = vld [vmem:[%s26871_s28 + $0xac] ss:$20 sps:$4 sm:$0xff]   ;;  %9183 = vmatpush1.bf16.msra.mxu0 %v23778_v38  ;;  %v23795_v50 = vld [vmem:[%s26871_s28 + $0xf4] ss:$20 sps:$4 sm:$0xff]  }
 0x89c   : > { %v27802_v20 = vadd.f32 %v24109_v57, %v23096_v58  ;;  %9184 = vmatprep.subr.bf16.mxu0 %v23786_v41  ;;  %v23796_v26 = vld [vmem:[%s26871_s28 + $0xf8] ss:$20 sps:$4 sm:$0xff]   ;;  %v23802_v44 = vld [vmem:[%s26871_s28 + $0x120] ss:$20 sps:$4 sm:$0xff]   ;;  %v23811_v57 = vld [vmem:[%s26871_s28 + $0x168] ss:$20 sps:$4 sm:$0xff]  }
 0x89d   : > { %v27804_v32 = vadd.f32 %v24110_v21, %v23097_v31  ;;  %v8243_v33 = vadd.f32 %v8242_v30, %v8241_v37  ;;  %9097 = vmatpush1.bf16.msra.mxu1 %v23787_v39  ;;  %v23804_v51 = vld [vmem:[%s26871_s28 + $0x124] ss:$20 sps:$4 sm:$0xff]   ;;  %v23810_v46 = vld [vmem:[%s26871_s28 + $0x14c] ss:$20 sps:$4 sm:$0xff]   ;;  %v23808_v37 = vld [vmem:[%s26871_s28 + $0x148] ss:$20 sps:$4 sm:$0xff]  }
 0x89e   : > { %9098 = vmatprep.subr.bf16.mxu1 %v23795_v50  ;;  %v23799_v49 = vld [vmem:[%s26871_s28 + $0x118] ss:$20 sps:$4 sm:$0xff]   ;;  %v23805_v31 = vld [vmem:[%s26871_s28 + $0x140] ss:$20 sps:$4 sm:$0xff]   ;;  %v23814_v21 = vld [vmem:[%s26871_s28 + $0x170] ss:$20 sps:$4 sm:$0xff]  }
 0x89f   : > { %8244 = vadd.xlane.f32.xlu0 %v8243_v33  ;;  %v8246_v25 = vadd.f32 %v27804_v32, %v27802_v20  ;;  %9185 = vmatpush1.bf16.msra.mxu0 %v23784_v18  ;;  %v23807_v58 = vld [vmem:[%s26871_s28 + $0x144] ss:$20 sps:$4 sm:$0xff]   ;;  %v23813_v30 = vld [vmem:[%s26871_s28 + $0x16c] ss:$20 sps:$4 sm:$0xff]   ;;  %v23816_v29 = vld [vmem:[%s26871_s28 + $0x174] ss:$20 sps:$4 sm:$0xff]  }
 0x8a0   : > { %9186 = vmatprep.subr.bf16.mxu0 %v23792_v24  ;;  %v23819_v33 = vld [vmem:[%s26871_s28 + $0x194] ss:$20 sps:$4 sm:$0xff]   ;;  %v23825_v61 = vld [vmem:[%s26871_s28 + $0x1bc] ss:$20 sps:$4 sm:$0xff]   ;;  %v23823_v41 = vld [vmem:[%s26871_s28 + $0x1b8] ss:$20 sps:$4 sm:$0xff]  }
 0x8a1   : > { %v8248_v59 = vadd.f32 %v8247_v28, %v8246_v25  ;;  %9099 = vmatpush1.bf16.msra.mxu1 %v23793_v53  ;;  %v23822_v25 = vld [vmem:[%s26871_s28 + $0x19c] ss:$20 sps:$4 sm:$0xff]   ;;  %v23828_v22 = vld [vmem:[%s26871_s28 + $0x1c4] ss:$20 sps:$4 sm:$0xff]   ;;  %v23826_v18 = vld [vmem:[%s26871_s28 + $0x1c0] ss:$20 sps:$4 sm:$0xff]  }
 0x8a2   : > { %9100 = vmatprep.subr.bf16.mxu1 %v23801_v2  ;;  %v23817_v28 = vld [vmem:[%s26871_s28 + $0x190] ss:$20 sps:$4 sm:$0xff]   ;;  %v23829_v24 = vld [vmem:[%s26871_s28 + $0x1e0] ss:$20 sps:$4 sm:$0xff]   ;;  %v23835_v50 = vld [vmem:[%s26871_s28 + $0x208] ss:$20 sps:$4 sm:$0xff]  }
 0x8a3   : > { %8249 = vadd.xlane.f32.xlu1 %v8248_v59  ;;  %9187 = vmatpush1.bf16.msra.mxu0 %v23790_v48  ;;  %v23820_v59 = vld [vmem:[%s26871_s28 + $0x198] ss:$20 sps:$4 sm:$0xff]   ;;  %v23832_v48 = vld [vmem:[%s26871_s28 + $0x1e8] ss:$20 sps:$4 sm:$0xff]   ;;  %v23838_v53 = vld [vmem:[%s26871_s28 + $0x210] ss:$20 sps:$4 sm:$0xff]  }
 0x8a4   : > { %9188 = vmatprep.subr.bf16.mxu0 %v23798_v1  ;;  %v23831_v17 = vld [vmem:[%s26871_s28 + $0x1e4] ss:$20 sps:$4 sm:$0xff]   ;;  %v23834_v39 = vld [vmem:[%s26871_s28 + $0x1ec] ss:$20 sps:$4 sm:$0xff]   ;;  %v23843_v2 = vld [vmem:[%s26871_s28 + $0x234] ss:$20 sps:$4 sm:$0xff]  }
 0x8a5   : > { %9101 = vmatpush1.bf16.msra.mxu1 %v23799_v49  ;;  %v23837_v1 = vld [vmem:[%s26871_s28 + $0x20c] ss:$20 sps:$4 sm:$0xff]   ;;  %v23841_v49 = vld [vmem:[%s26871_s28 + $0x230] ss:$20 sps:$4 sm:$0xff]  }
 0x8a6   : > { %9102 = vmatprep.subr.bf16.mxu1 %v23807_v58  ;;  %v23849_v58 = vld [vmem:[%s26871_s28 + $0x25c] ss:$20 sps:$4 sm:$0xff]  }
 0x8a7   : > { %9189 = vmatpush1.bf16.msra.mxu0 %v23796_v26  ;;  %v23840_v26 = vld [vmem:[%s26871_s28 + $0x214] ss:$20 sps:$4 sm:$0xff]  }
 0x8a8   : > { %9190 = vmatprep.subr.bf16.mxu0 %v23804_v51  ;;  %v23846_v51 = vld [vmem:[%s26871_s28 + $0x23c] ss:$20 sps:$4 sm:$0xff]  }
 0x8a9   : > { %9103 = vmatpush1.bf16.msra.mxu1 %v23805_v31  ;;  %v23847_v31 = vld [vmem:[%s26871_s28 + $0x258] ss:$20 sps:$4 sm:$0xff]  }
 0x8aa   : > { %9104 = vmatprep.subr.bf16.mxu1 %v23813_v30  ;;  %v23855_v30 = vld [vmem:[%s26871_s28 + $0x284] ss:$20 sps:$4 sm:$0xff]  }
 0x8ab   : > { %9191 = vmatpush1.bf16.msra.mxu0 %v23802_v44  ;;  %v23844_v44 = vld [vmem:[%s26871_s28 + $0x238] ss:$20 sps:$4 sm:$0xff]  }
 0x8ac   : > { %9192 = vmatprep.subr.bf16.mxu0 %v23810_v46  ;;  %v23852_v46 = vld [vmem:[%s26871_s28 + $0x264] ss:$20 sps:$4 sm:$0xff]  }
 0x8ad   : > { %9105 = vmatpush1.bf16.msra.mxu1 %v23811_v57 }
 0x8ae   : > { %9106 = vmatprep.subr.bf16.mxu1 %v23819_v33 }
 0x8af   : > { %9193 = vmatpush1.bf16.msra.mxu0 %v23808_v37  ;;  %v23850_v37 = vld [vmem:[%s26871_s28 + $0x260] ss:$20 sps:$4 sm:$0xff]  }
 0x8b0   : > { %9194 = vmatprep.subr.bf16.mxu0 %v23816_v29  ;;  %v23858_v29 = vld [vmem:[%s26871_s28 + $0x28c] ss:$20 sps:$4 sm:$0xff]  }
 0x8b1   : > { %9107 = vmatpush1.bf16.msra.mxu1 %v23817_v28 }
 0x8b2   : > { %9108 = vmatprep.subr.bf16.mxu1 %v23825_v61 }
 0x8b3   : > { %9195 = vmatpush1.bf16.msra.mxu0 %v23814_v21 }
 0x8b4   : > { %9196 = vmatprep.subr.bf16.mxu0 %v23822_v25 }
 0x8b5   : > { %9109 = vmatpush1.bf16.msra.mxu1 %v23823_v41 }
 0x8b6   : > { %9110 = vmatprep.subr.bf16.mxu1 %v23831_v17 }
 0x8b7   : > { %9197 = vmatpush1.bf16.msra.mxu0 %v23820_v59 }
 0x8b8   : > { %9198 = vmatprep.subr.bf16.mxu0 %v23828_v22 }
 0x8b9   : > { %9111 = vmatpush1.bf16.msra.mxu1 %v23829_v24 }
 0x8ba   : > { %9112 = vmatprep.subr.bf16.mxu1 %v23837_v1 }
 0x8bb   : > { %9199 = vmatpush1.bf16.msra.mxu0 %v23826_v18  ;;  %v23864_v18 = vld [vmem:[%s26871_s28 + $0x2b4] ss:$20 sps:$4 sm:$0xff]  }
 0x8bc   : > { %9200 = vmatprep.subr.bf16.mxu0 %v23834_v39  ;;  %v23862_v39 = vld [vmem:[%s26871_s28 + $0x2b0] ss:$20 sps:$4 sm:$0xff]  }
 0x8bd   : > { %9113 = vmatpush1.bf16.msra.mxu1 %v23835_v50 }
 0x8be   : > { %9114 = vmatprep.subr.bf16.mxu1 %v23843_v2  ;;  %v23866_v2 = vld [vmem:[%s26871_s28 + $0x10] ss:$20 sps:$4 sm:$0xff]  }
 0x8bf   : > { %9201 = vmatpush1.bf16.msra.mxu0 %v23832_v48 }
 0x8c0   : > { %9202 = vmatprep.subr.bf16.mxu0 %v23840_v26  ;;  %v23867_v26 = vld [vmem:[%s26871_s28 + $0x290] ss:$20 sps:$4 sm:$0xff]  }
 0x8c1   : > { %9115 = vmatpush1.bf16.msra.mxu1 %v23841_v49  ;;  %v23868_v49 = vld [vmem:[%s26871_s28 + $0x178] ss:$20 sps:$4 sm:$0xff]  }
 0x8c2   : > { %9116 = vmatprep.subr.bf16.mxu1 %v23849_v58  ;;  %v23869_v58 = vld [vmem:[%s26871_s28 + $0x38] ss:$20 sps:$4 sm:$0xff]  }
 0x8c3   : > { %9203 = vmatpush1.bf16.msra.mxu0 %v23838_v53  ;;  %v23865_v53 = vld [vmem:[%s26871_s28 + $0x150] ss:$20 sps:$4 sm:$0xff]  }
 0x8c4   : > { %9204 = vmatprep.subr.bf16.mxu0 %v23846_v51 }
 0x8c5   : > { %9117 = vmatpush1.bf16.msra.mxu1 %v23847_v31  ;;  %v23871_v31 = vld [vmem:[%s26871_s28 + $0x1a0] ss:$20 sps:$4 sm:$0xff]  }
 0x8c6   : > { %9131 = vmatprep.subr.bf16.mxu1 %v23855_v30  ;;  %v23872_v30 = vld [vmem:[%s26871_s28 + $0x60] ss:$20 sps:$4 sm:$0xff]  }
 0x8c7   : > { %9205 = vmatpush1.bf16.msra.mxu0 %v23844_v44  ;;  %v23870_v44 = vld [vmem:[%s26871_s28 + $0x2b8] ss:$20 sps:$4 sm:$0xff]  }
 0x8c8   : > { %9206 = vmatprep.subr.bf16.mxu0 %v23852_v46 }
 0x8cb   : > { %9207 = vmatpush1.bf16.msra.mxu0 %v23850_v37  ;;  %v23885_v37 = vld [vmem:[%s26880_s7 + $0x4] ss:$12 sps:$4 sm:$0xff]  }
 0x8cc   : > { %9221 = vmatprep.subr.bf16.mxu0 %v23858_v29  ;;  %v23873_v29 = vld [vmem:[%s26871_s28 + $0x1c8] ss:$20 sps:$4 sm:$0xff]  }
 0x92c   : > { %v8245_v52 = vpop.xlane.xlu0 %8244 }
 0x92d   : > { %v8252_v15 = vmul.f32 0.0034722222, %v8245_v52  ;;  %v8239_v52 = vld [vmem:[%s29926_s0] sm:$0x7] }
 0x92e   : > { %v8300_v41 = vrot.slane %v8239_v52, %v27124_v47 }
 0x92f   : > { %v27855_v35 = vsub.f32 %v27790_v4, %v8252_v15  ;;  %v27858_v11 = vsub.f32 %v27792_v27, %v8252_v15  ;;  %v27861_v23 = vsub.f32 %v27794_v42, %v8252_v15  ;;  %v8240_v15 = vld [vmem:[%s29927_s13] sm:$0x7] }
 0x930   : > { %v8250_v54 = vpop.xlane.xlu1 %8249 }
 0x931   : > { %v8253_v34 = vmul.f32 0.0034722222, %v8250_v54  ;;  %v8260_v63 = vmul.f32 %v27855_v35, %v27855_v35  ;;  %v8261_v36 = vmul.f32 %v27858_v11, %v27858_v11  ;;  %v8262_v45 = vmul.f32 %v27861_v23, %v27861_v23 }
 0x932   : > { %v8296_v54 = vrot.slane %v8239_v52, %v27135_v62 }
 0x933   : > { %v27870_v4 = vsub.f32 %v27802_v20, %v8253_v34  ;;  %v27873_v27 = vsub.f32 %v27804_v32, %v8253_v34  ;;  %v27876_v42 = vsub.f32 %v27800_v16, %v8253_v34  ;;  %v8266_v56 = vadd.f32 %v8261_v36, %v8260_v63 }
 0x934   : > { %v8267_v60 = vsel %vm3534_vm10, %v8262_v45, 0.0  ;;  %v8292_v34 = vrot.slane %v8239_v52, %v27150_v19  ;;  %v8318_v45 = vrot.slane %v8240_v15, %v27135_v62  ;;  %v23876_v52 = vld [vmem:[%s26871_s28 + $0xb0] ss:$20 sps:$4 sm:$0xff]  }
 0x935   : > { %v8268_v40 = vadd.f32 %v8267_v60, %v8266_v56  ;;  %v8263_v55 = vmul.f32 %v27870_v4, %v27870_v4  ;;  %v8264_v20 = vmul.f32 %v27873_v27, %v27873_v27  ;;  %v8265_v32 = vmul.f32 %v27876_v42, %v27876_v42 }
 0x936   : > { %v8314_v60 = vrot.slane %v8240_v15, %v27150_v19 }
 0x937   : > { %8269 = vadd.xlane.f32.xlu0 %v8268_v40  ;;  %v8271_v16 = vadd.f32 %v8264_v20, %v8263_v55  ;;  %v8272_v0 = vsel %vm3534_vm10, %v8265_v32, 0.0 }
 0x939   : > { %v8273_v38 = vadd.f32 %v8272_v0, %v8271_v16  ;;  %v23853_v16 = vld [vmem:[%s26871_s28 + $0x280] ss:$20 sps:$4 sm:$0xff]  }
 0x93b   : > { %8274 = vadd.xlane.f32.xlu1 %v8273_v38  ;;  %v23856_v38 = vld [vmem:[%s26871_s28 + $0x288] ss:$20 sps:$4 sm:$0xff]  }
 0x9c4   : > { %v8270_v57 = vpop.xlane.xlu0 %8269 }
 0x9c5   : > { %v8276_v21 = vmul.f32 0.0034722222, %v8270_v57  ;;  %v23883_v57 = vld [vmem:[%s26880_s7] ss:$12 sps:$4 sm:$0xff]  }
 0x9c7   : > { %v8278_v33 = vadd.f32 1e-05, %v8276_v21  ;;  %v23888_v21 = vld [vmem:[%s26880_s7 + $0x1c] ss:$12 sps:$4 sm:$0xff]  }
 0x9c8   : > { %v8275_v25 = vpop.xlane.xlu1 %8274 }
 0x9c9   : > { %24091 = vrsqrt.f32 %v8278_v33  ;;  %v8277_v28 = vmul.f32 0.0034722222, %v8275_v25  ;;  %v23874_v33 = vld [vmem:[%s26871_s28 + $0x88] ss:$20 sps:$4 sm:$0xff]   ;;  %v23875_v25 = vld [vmem:[%s26871_s28 + $0x1f0] ss:$20 sps:$4 sm:$0xff]  }
 0x9cb   : > { %v8279_v59 = vadd.f32 1e-05, %v8277_v28  ;;  %v23886_v28 = vld [vmem:[%s26880_s7 + $0x18] ss:$12 sps:$4 sm:$0xff]  }
 0x9cd   : > { %24093 = vrsqrt.f32 %v8279_v59  ;;  %v23891_v59 = vld [vmem:[%s26880_s7 + $0x34] ss:$12 sps:$4 sm:$0xff]  }
 0x9d3   : > { %v24092_v63 = vpop.eup %24091 }
 0x9d4   : > { %v8283_v36 = vmul.f32 %v24092_v63, %v27858_v11  ;;  %v8282_v56 = vmul.f32 %v24092_v63, %v27855_v35  ;;  %v8284_v11 = vmul.f32 %v24092_v63, %v27861_v23  ;;  %v23861_v35 = vld [vmem:[%s26871_s28 + $0x2ac] ss:$20 sps:$4 sm:$0xff]   ;;  %v8322_v23 = vrot.slane %v8240_v15, %v27124_v47 }
 0x9d5   : > { %v23877_v15 = vld [vmem:[%s26871_s28 + $0x218] ss:$20 sps:$4 sm:$0xff]  }
 0x9d6   : > { %v8305_v40 = vmul.f32 %v8296_v54, %v8283_v36  ;;  %v8304_v55 = vmul.f32 %v8292_v34, %v8282_v56  ;;  %v8306_v48 = vmul.f32 %v8300_v41, %v8284_v11  ;;  %v23878_v63 = vld [vmem:[%s26871_s28 + $0xd8] ss:$20 sps:$4 sm:$0xff]   ;;  %v23879_v36 = vld [vmem:[%s26871_s28 + $0x240] ss:$20 sps:$4 sm:$0xff]   ;;  %v23897_v56 = vld [vmem:[%s26880_s7 + $0x64] ss:$12 sps:$4 sm:$0xff]  }
 0x9d7   : > { %v24094_v20 = vpop.eup %24093  ;;  %v23903_v11 = vld [vmem:[%s26880_s7 + $0x94] ss:$12 sps:$4 sm:$0xff]  }
 0x9d8   : > { %v27920_v32 = vadd.f32 %v8318_v45, %v8305_v40  ;;  %v27923_v0 = vadd.f32 %v8314_v60, %v8304_v55  ;;  %v8286_v61 = vmul.f32 %v24094_v20, %v27873_v27  ;;  %v8285_v22 = vmul.f32 %v24094_v20, %v27870_v4  ;;  %v23859_v4 = vld [vmem:[%s26871_s28 + $0x2a8] ss:$20 sps:$4 sm:$0xff]   ;;  %v23895_v55 = vld [vmem:[%s26880_s7 + $0x60] ss:$12 sps:$4 sm:$0xff]  }
 0x9d9   : > { %v8287_v1 = vmul.f32 %v24094_v20, %v27876_v42  ;;  %v27951_v51 = vadd.f32 %v8322_v23, %v8306_v48  ;;  %v23881_v40 = vld [vmem:[%s26871_s28 + $0x268] ss:$20 sps:$4 sm:$0xff]   ;;  %v23907_v48 = vld [vmem:[%s26880_s7 + $0xc0] ss:$12 sps:$4 sm:$0xff]  }
 0x9da   : > { %9118 = vmatprep.mubr.f32.mxu1 %v27920_v32  ;;  %9208 = vmatprep.mubr.f32.mxu0 %v27920_v32  ;;  %v8308_v17 = vmul.f32 %v8296_v54, %v8286_v61  ;;  %v8307_v27 = vmul.f32 %v8292_v34, %v8285_v22  ;;  %v23889_v54 = vld [vmem:[%s26880_s7 + $0x30] ss:$12 sps:$4 sm:$0xff]   ;;  %v23894_v34 = vld [vmem:[%s26880_s7 + $0x4c] ss:$12 sps:$4 sm:$0xff]   ;;  %v23910_v61 = vld [vmem:[%s26880_s7 + $0xc8] ss:$12 sps:$4 sm:$0xff]  }
 0x9db   : > { %9119 = vmatmul.mubr.f32.vlgmr.msra.gmra.mrb[52].mxu1 %v27923_v0  ;;  %9209 = vmatmul.mubr.f32.vlgmr.msra.gmra.mrb[56].mxu0 %v27923_v0  ;;  %v8309_v42 = vmul.f32 %v8300_v41, %v8287_v1  ;;  %v23900_v20 = vld [vmem:[%s26880_s7 + $0x7c] ss:$12 sps:$4 sm:$0xff]   ;;  %v23915_v22 = vld [vmem:[%s26880_s7 + $0xe0] ss:$12 sps:$4 sm:$0xff]  }
 0x9dc   : > { %9132 = vmatpush1.bf16.msra.mxu1 %v23853_v16  ;;  %9222 = vmatpush1.bf16.msra.mxu0 %v23856_v38  ;;  %v27937_v24 = vadd.f32 %v8318_v45, %v8308_v17  ;;  %v27941_v50 = vadd.f32 %v8314_v60, %v8307_v27  ;;  %v23892_v45 = vld [vmem:[%s26880_s7 + $0x48] ss:$12 sps:$4 sm:$0xff]   ;;  %v23898_v38 = vld [vmem:[%s26880_s7 + $0x78] ss:$12 sps:$4 sm:$0xff]   ;;  %v23916_v17 = vld [vmem:[%s26880_s7 + $0x20] ss:$12 sps:$4 sm:$0xff]  }
 0x9dd   : > { %9133 = vmatprep.subr.bf16.mxu1 %v23861_v35  ;;  %9223 = vmatprep.subr.bf16.mxu0 %v23864_v18  ;;  %v27964_v46 = vadd.f32 %v8322_v23, %v8309_v42  ;;  %v23880_v60 = vld [vmem:[%s26871_s28 + $0x100] ss:$20 sps:$4 sm:$0xff]   ;;  %v23882_v16 = vld [vmem:[%s26871_s28 + $0x128] ss:$20 sps:$4 sm:$0xff]   ;;  %v23906_v18 = vld [vmem:[%s26880_s7 + $0xac] ss:$12 sps:$4 sm:$0xff]  }
 0x9de   : > { %9124 = vmatprep.mubr.f32.mxu1 %v27937_v24  ;;  %9214 = vmatprep.mubr.f32.mxu0 %v27937_v24  ;;  %v23911_v41 = vld [vmem:[%s26880_s7 + $0x8] ss:$12 sps:$4 sm:$0xff]   ;;  %v23901_v35 = vld [vmem:[%s26880_s7 + $0x90] ss:$12 sps:$4 sm:$0xff]   ;;  %v23920_v23 = vld [vmem:[%s26880_s7 + $0xf8] ss:$12 sps:$4 sm:$0xff]  }
 0x9df   : > { %9125 = vmatmul.mubr.f32.gmra.mrb[54].mxu1 %v27941_v50  ;;  %9215 = vmatmul.mubr.f32.gmra.mrb[58].mxu0 %v27941_v50  ;;  %v23904_v27 = vld [vmem:[%s26880_s7 + $0xa8] ss:$12 sps:$4 sm:$0xff]   ;;  %v23925_v1 = vld [vmem:[%s26880_s7 + $0x110] ss:$12 sps:$4 sm:$0xff]  }
 0x9e0   : > { %9134 = vmatpush1.bf16.msra.mxu1 %v23859_v4  ;;  %9224 = vmatpush1.bf16.msra.mxu0 %v23862_v39  ;;  %v23909_v4 = vld [vmem:[%s26880_s7 + $0xc4] ss:$12 sps:$4 sm:$0xff]   ;;  %v23930_v42 = vld [vmem:[%s26880_s7 + $0x128] ss:$12 sps:$4 sm:$0xff]  }
 0x9e1   : > { %9163 = vmatprep.mubr.f32.mxu1 %v29913_v3  ;;  %9253 = vmatprep.mubr.f32.mxu0 %v29913_v3  ;;  %v23921_v39 = vld [vmem:[%s26880_s7 + $0x38] ss:$12 sps:$4 sm:$0xff]  }
 0x9e2   : > { %22101 = vmatprep.subr.bf16.mxu1 %v23865_v53  ;;  %22614 = vmatprep.subr.bf16.mxu0 %v23867_v26  ;;  %v23914_v53 = vld [vmem:[%s26880_s7 + $0xdc] ss:$12 sps:$4 sm:$0xff]  }
 0x9e3   : > { %21108 = vmatmul.mubr.msk.f32.vlgmr.msra.gmra.mrb[52].mxu1 %vm3534_vm10, %v27951_v51  ;;  %21110 = vmatmul.mubr.msk.f32.vlgmr.msra.gmra.mrb[56].mxu0 %vm3534_vm10, %v27951_v51 }
 0x9e4   : > { %22102 = vmatpush3.bf16.msra.mxu1 %v23866_v2  ;;  %22615 = vmatpush3.bf16.msra.mxu0 %v23867_v26  ;;  %v23926_v26 = vld [vmem:[%s26880_s7 + $0x50] ss:$12 sps:$4 sm:$0xff]   ;;  %v23912_v2 = vld [vmem:[%s26880_s7 + $0xd8] ss:$12 sps:$4 sm:$0xff]  }
 0x9e5   : > { %9169 = vmatprep.mubr.f32.mxu1 %v29913_v3  ;;  %9259 = vmatprep.mubr.f32.mxu0 %v29913_v3 }
 0x9e6   : > { %22103 = vmatprep.subr.bf16.mxu1 %v23868_v49  ;;  %22616 = vmatprep.subr.bf16.mxu0 %v23870_v44  ;;  %v23919_v49 = vld [vmem:[%s26880_s7 + $0xf4] ss:$12 sps:$4 sm:$0xff]  }
 0x9e7   : > { %21109 = vmatmul.mubr.msk.f32.gmra.mrb[54].mxu1 %vm3534_vm10, %v27964_v46  ;;  %21111 = vmatmul.mubr.msk.f32.gmra.mrb[58].mxu0 %vm3534_vm10, %v27964_v46 }
 0x9e8   : > { %22104 = vmatpush3.bf16.msra.mxu1 %v23869_v58  ;;  %9298 = vmatprep.mubr.f32.mxu1 %v27920_v32  ;;  %v23917_v58 = vld [vmem:[%s26880_s7 + $0xf0] ss:$12 sps:$4 sm:$0xff]  }
 0x9e9   : > { %22617 = vmatpush3.bf16.msra.mxu0 %v23870_v44  ;;  %22618 = vmatprep.mubr.msk.f32.mxu0 %vm3534_vm10, %v27951_v51  ;;  %v23931_v44 = vld [vmem:[%s26880_s7 + $0x68] ss:$12 sps:$4 sm:$0xff]  }
 0x9ea   : > { %22105 = vmatprep.subr.bf16.mxu1 %v23871_v31  ;;  %9961 = vmatprep.subr.bf16.mxu0 %v23885_v37  ;;  %v23935_v31 = vld [vmem:[%s26880_s7 + $0x140] ss:$12 sps:$4 sm:$0xff]  }
 0x9eb   : > { %v23924_v37 = vld [vmem:[%s26880_s7 + $0x10c] ss:$12 sps:$4 sm:$0xff]  }
 0x9ec   : > { %22106 = vmatpush3.bf16.msra.mxu1 %v23872_v30  ;;  %22619 = vmatmul.mubr.msk.f32.vlgmr.msra.gmra.mrb[60].mxu0 %vm3534_vm10, %v27964_v46  ;;  %v23936_v30 = vld [vmem:[%s26880_s7 + $0x80] ss:$12 sps:$4 sm:$0xff]  }
 0x9ed   : > { %22107 = vmatprep.subr.bf16.mxu1 %v23873_v29  ;;  %9962 = vmatpush1.bf16.msra.mxu0 %v23883_v57  ;;  %v23922_v29 = vld [vmem:[%s26880_s7 + $0x108] ss:$12 sps:$4 sm:$0xff]   ;;  %v23940_v57 = vld [vmem:[%s26880_s7 + $0x158] ss:$12 sps:$4 sm:$0xff]  }
 0x9ee   : > { %9963 = vmatprep.subr.bf16.mxu0 %v23888_v21  ;;  %v23929_v21 = vld [vmem:[%s26880_s7 + $0x124] ss:$12 sps:$4 sm:$0xff]  }
 0x9f0   : > { %22108 = vmatpush3.bf16.msra.mxu1 %v23874_v33  ;;  %v23941_v33 = vld [vmem:[%s26880_s7 + $0x98] ss:$12 sps:$4 sm:$0xff]  }
 0x9f1   : > { %22109 = vmatprep.subr.bf16.mxu1 %v23875_v25  ;;  %9964 = vmatpush1.bf16.msra.mxu0 %v23886_v28  ;;  %v23927_v25 = vld [vmem:[%s26880_s7 + $0x120] ss:$12 sps:$4 sm:$0xff]   ;;  %v23934_v28 = vld [vmem:[%s26880_s7 + $0x13c] ss:$12 sps:$4 sm:$0xff]  }
 0x9f2   : > { %9965 = vmatprep.subr.bf16.mxu0 %v23891_v59  ;;  %v23932_v59 = vld [vmem:[%s26880_s7 + $0x138] ss:$12 sps:$4 sm:$0xff]  }
 0x9f4   : > { %22110 = vmatpush3.bf16.msra.mxu1 %v23876_v52  ;;  %v23939_v52 = vld [vmem:[%s26880_s7 + $0x154] ss:$12 sps:$4 sm:$0xff]  }
 0x9f5   : > { %22111 = vmatprep.subr.bf16.mxu1 %v23877_v15  ;;  %9966 = vmatpush1.bf16.msra.mxu0 %v23889_v54  ;;  %v23937_v15 = vld [vmem:[%s26880_s7 + $0x150] ss:$12 sps:$4 sm:$0xff]   ;;  %v23944_v54 = vld [vmem:[%s26880_s7 + $0x16c] ss:$12 sps:$4 sm:$0xff]  }
 0x9f6   : > { %9967 = vmatprep.subr.bf16.mxu0 %v23894_v34  ;;  %v23945_v34 = vld [vmem:[%s26880_s7 + $0x170] ss:$12 sps:$4 sm:$0xff]  }
 0x9f8   : > { %22112 = vmatpush3.bf16.msra.mxu1 %v23878_v63  ;;  %v23942_v63 = vld [vmem:[%s26880_s7 + $0x168] ss:$12 sps:$4 sm:$0xff]  }
 0x9f9   : > { %22113 = vmatprep.subr.bf16.mxu1 %v23879_v36  ;;  %9968 = vmatpush1.bf16.msra.mxu0 %v23892_v45  ;;  %v23946_v36 = vld [vmem:[%s26880_s7 + $0xb0] ss:$12 sps:$4 sm:$0xff]  }
 0x9fa   : > { %9969 = vmatprep.subr.bf16.mxu0 %v23897_v56  ;;  %v23949_v45 = vld [vmem:[%s26880_s7 + $0x184] ss:$12 sps:$4 sm:$0xff]   ;;  %v23950_v56 = vld [vmem:[%s26880_s7 + $0x248] ss:$12 sps:$4 sm:$0xff]  }
 0x9fc   : > { %22114 = vmatpush3.bf16.msra.mxu1 %v23880_v60  ;;  %v28041_v60 = vld [vmem:[%s26875_s8] sm:$0x1f] }
 0x9fd   : > { %22115 = vmatprep.subr.bf16.mxu1 %v23881_v40  ;;  %9970 = vmatpush1.bf16.msra.mxu0 %v23895_v55  ;;  %v8590_v40 = vrot.slane %v28041_v60, %v27150_v19  ;;  %v8594_v55 = vrot.slane %v28041_v60, %v27135_v62 }
 0x9fe   : > { %9971 = vmatprep.subr.bf16.mxu0 %v23900_v20  ;;  %v8601_v20 = vsub.s32 3, %v27121_v43 }
 0xa00   : > { %22116 = vmatpush3.bf16.msra.mxu1 %v23882_v16 }
 0xa01   : > { %9972 = vmatpush1.bf16.msra.mxu0 %v23898_v38  ;;  %22127 = vmatprep.subr.bf16.mxu1 %v23910_v61 }
 0xa02   : > { %9973 = vmatprep.subr.bf16.mxu0 %v23903_v11 }
 0xa03   : > { %9299 = vmatmul.mubr.f32.vlgmr.msra.gmra.mrb[56].mxu1 %v27923_v0 }
 0xa04   : > { %9303 = vmatprep.mubr.f32.mxu1 %v27937_v24  ;;  %22128 = vmatpush3.bf16.msra.mxu1 %v23911_v41 }
 0xa05   : > { %9974 = vmatpush1.bf16.msra.mxu0 %v23901_v35  ;;  %22129 = vmatprep.subr.bf16.mxu1 %v23915_v22  ;;  %v28051_v22 = vrot.slane %v28041_v60, %v8601_v20  ;;  %v23976_v20 = vld [vmem:[%s26880_s7 + $0x200] ss:$12 sps:$4 sm:$0xff]  }
 0xa06   : > { %9975 = vmatprep.subr.bf16.mxu0 %v23906_v18  ;;  %v23947_v18 = vld [vmem:[%s26880_s7 + $0x180] ss:$12 sps:$4 sm:$0xff]  }
 0xa07   : > { %9304 = vmatmul.mubr.f32.gmra.mrb[58].mxu1 %v27941_v50 }
 0xa08   : > { %22130 = vmatpush3.bf16.msra.mxu1 %v23916_v17  ;;  %v23951_v17 = vld [vmem:[%s26880_s7 + $0x188] ss:$12 sps:$4 sm:$0xff]  }
 0xa09   : > { %9976 = vmatpush1.bf16.msra.mxu0 %v23904_v27  ;;  %22131 = vmatprep.subr.bf16.mxu1 %v23920_v23 }
 0xa0a   : > { %9977 = vmatprep.subr.bf16.mxu0 %v23909_v4 }
 0xa0c   : > { %22132 = vmatpush3.bf16.msra.mxu1 %v23921_v39  ;;  %v23954_v39 = vld [vmem:[%s26880_s7 + $0x19c] ss:$12 sps:$4 sm:$0xff]  }
 0xa0d   : > { %9978 = vmatpush1.bf16.msra.mxu0 %v23907_v48  ;;  %22133 = vmatprep.subr.bf16.mxu1 %v23925_v1 }
 0xa0e   : > { %9979 = vmatprep.subr.bf16.mxu0 %v23914_v53 }
 0xa10   : > { %22134 = vmatpush3.bf16.msra.mxu1 %v23926_v26 }
 0xa11   : > { %9980 = vmatpush1.bf16.msra.mxu0 %v23912_v2  ;;  %22135 = vmatprep.subr.bf16.mxu1 %v23930_v42  ;;  %v23955_v2 = vld [vmem:[%s26880_s7 + $0x260] ss:$12 sps:$4 sm:$0xff]  }
 0xa12   : > { %9981 = vmatprep.subr.bf16.mxu0 %v23919_v49 }
 0xa14   : > { %22136 = vmatpush3.bf16.msra.mxu1 %v23931_v44 }
 0xa15   : > { %9982 = vmatpush1.bf16.msra.mxu0 %v23917_v58  ;;  %22137 = vmatprep.subr.bf16.mxu1 %v23935_v31  ;;  %v23952_v58 = vld [vmem:[%s26880_s7 + $0x198] ss:$12 sps:$4 sm:$0xff]   ;;  %v23956_v31 = vld [vmem:[%s26880_s7 + $0x1a0] ss:$12 sps:$4 sm:$0xff]  }
 0xa16   : > { %9983 = vmatprep.subr.bf16.mxu0 %v23924_v37 }
 0xa18   : > { %22138 = vmatpush3.bf16.msra.mxu1 %v23936_v30 }
 0xa19   : > { %9984 = vmatpush1.bf16.msra.mxu0 %v23922_v29  ;;  %22139 = vmatprep.subr.bf16.mxu1 %v23940_v57  ;;  %v23959_v57 = vld [vmem:[%s26880_s7 + $0x1b4] ss:$12 sps:$4 sm:$0xff]  }
 0xa1a   : > { %9985 = vmatprep.subr.bf16.mxu0 %v23929_v21  ;;  %v23960_v21 = vld [vmem:[%s26880_s7 + $0x278] ss:$12 sps:$4 sm:$0xff]  }
 0xa1c   : > { %22140 = vmatpush3.bf16.msra.mxu1 %v23941_v33 }
 0xa1d   : > { %9986 = vmatpush1.bf16.msra.mxu0 %v23927_v25  ;;  %22141 = vmatprep.subr.bf16.mxu1 %v23945_v34  ;;  %v23957_v25 = vld [vmem:[%s26880_s7 + $0x1b0] ss:$12 sps:$4 sm:$0xff]  }
 0xa1e   : > { %9987 = vmatprep.subr.bf16.mxu0 %v23934_v28  ;;  %v23961_v28 = vld [vmem:[%s26880_s7 + $0x1b8] ss:$12 sps:$4 sm:$0xff]  }
 0xa1f   : > { %v23969_v34 = vld [vmem:[%s26880_s7 + $0x1e4] ss:$12 sps:$4 sm:$0xff]  }
 0xa20   : > { %22142 = vmatpush3.bf16.msra.mxu1 %v23946_v36  ;;  %v23967_v36 = vld [vmem:[%s26880_s7 + $0x1e0] ss:$12 sps:$4 sm:$0xff]  }
 0xa21   : > { %9988 = vmatpush1.bf16.msra.mxu0 %v23932_v59  ;;  %22149 = vmatprep.subr.bf16.mxu1 %v23950_v56  ;;  %v23964_v59 = vld [vmem:[%s26880_s7 + $0x1cc] ss:$12 sps:$4 sm:$0xff]   ;;  %v23974_v56 = vld [vmem:[%s26880_s7 + $0x1fc] ss:$12 sps:$4 sm:$0xff]  }
 0xa22   : > { %9989 = vmatprep.subr.bf16.mxu0 %v23939_v52  ;;  %v23965_v52 = vld [vmem:[%s26880_s7 + $0x290] ss:$12 sps:$4 sm:$0xff]  }
 0xa25   : > { %9990 = vmatpush1.bf16.msra.mxu0 %v23937_v15  ;;  %v23962_v15 = vld [vmem:[%s26880_s7 + $0x1c8] ss:$12 sps:$4 sm:$0xff]  }
 0xa26   : > { %9991 = vmatprep.subr.bf16.mxu0 %v23944_v54  ;;  %v23966_v54 = vld [vmem:[%s26880_s7 + $0x1d0] ss:$12 sps:$4 sm:$0xff]  }
 0xa29   : > { %9992 = vmatpush1.bf16.msra.mxu0 %v23942_v63  ;;  %v23970_v63 = vld [vmem:[%s26880_s7 + $0x2a8] ss:$12 sps:$4 sm:$0xff]  }
 0xa2a   : > { %10006 = vmatprep.subr.bf16.mxu0 %v23949_v45  ;;  %v23971_v45 = vld [vmem:[%s26880_s7 + $0x1e8] ss:$12 sps:$4 sm:$0xff]  }
 0xab6   : > { %v9165_v16 = vpop.f32.mrb[52].mxu1  ;;  %v28048_v38 = vpop.f32.mrb[56].mxu0 }
 0xab7   : > { %v23098_v61 = vadd.f32 %v9165_v16, %v8590_v40  ;;  %v9167_v11 = vpop.f32.mrb[53].mxu1  ;;  %v9257_v41 = vpop.f32.mrb[57].mxu0  ;;  %v23979_v16 = vld [vmem:[%s26880_s7 + $0x214] ss:$12 sps:$4 sm:$0xff]  }
 0xab8   : > { %v23099_v35 = vadd.f32 %v9167_v11, %v8594_v55  ;;  %v23103_v49 = vadd.f32 %v9257_v41, %v28051_v22  ;;  %v23977_v11 = vld [vmem:[%s26880_s7 + $0x210] ss:$12 sps:$4 sm:$0xff]   ;;  %v23981_v41 = vld [vmem:[%s26880_s7 + $0x218] ss:$12 sps:$4 sm:$0xff]  }
 0xab9   : > { %v9352_v48 = vmax.f32 %v23098_v61, 0.0  ;;  %v23980_v61 = vld [vmem:[%s26880_s7 + $0x2d8] ss:$12 sps:$4 sm:$0xff]  }
 0xaba   : > { %v9353_v27 = vmax.f32 %v23099_v35, 0.0  ;;  %v9171_v23 = vpop.f32.mrb[54].mxu1  ;;  %v28055_v4 = vpop.f32.mrb[58].mxu0  ;;  %v9355_v33 = vmax.f32 %v23103_v49, 0.0  ;;  %v8605_v35 = vsub.s32 4, %v27121_v43 }
 0xabb   : > { %v23100_v1 = vadd.f32 %v9171_v23, %v8590_v40  ;;  %v9173_v53 = vpop.f32.mrb[55].mxu1  ;;  %v28058_v26 = vpop.f32.mrb[59].mxu0  ;;  %v23975_v40 = vld [vmem:[%s26880_s7 + $0x2c0] ss:$12 sps:$4 sm:$0xff]  }
 0xabc   : > { %v23101_v42 = vadd.f32 %v9173_v53, %v8594_v55  ;;  %9993 = vmatprep.mubr.f32.mxu0 %v9353_v27  ;;  %10128 = vmatprep.mubr.f32.mxu1 %v9353_v27  ;;  %v23972_v55 = vld [vmem:[%s26880_s7 + $0x1f8] ss:$12 sps:$4 sm:$0xff]   ;;  %v23985_v27 = vld [vmem:[%s26880_s7 + $0x2f0] ss:$12 sps:$4 sm:$0xff]   ;;  %v28103_v49 = vadd.f32 %v28058_v26, %v28051_v22 }
 0xabd   : > { %9994 = vmatmul.mubr.f32.vlgmr.msra.gmra.mrb[62].mxu0 %v9352_v48  ;;  %10129 = vmatmul.mubr.f32.vlgmr.msra.gmra.mrb[60].mxu1 %v9352_v48  ;;  %v9357_v37 = vmax.f32 %v23100_v1, 0.0  ;;  %v23982_v48 = vld [vmem:[%s26880_s7 + $0x228] ss:$12 sps:$4 sm:$0xff]   ;;  %v23986_v1 = vld [vmem:[%s26880_s7 + $0x230] ss:$12 sps:$4 sm:$0xff]  }
 0xabe   : > { %v9358_v44 = vmax.f32 %v23101_v42, 0.0  ;;  %10007 = vmatpush1.bf16.msra.mxu0 %v23947_v18  ;;  %22150 = vmatpush3.bf16.msra.mxu1 %v23951_v17  ;;  %v8598_v18 = vrot.slane %v28041_v60, %v27124_v47  ;;  %v23984_v17 = vld [vmem:[%s26880_s7 + $0x22c] ss:$12 sps:$4 sm:$0xff]   ;;  %v23990_v42 = vld [vmem:[%s26880_s7 + $0x308] ss:$12 sps:$4 sm:$0xff]   ;;  %v9360_v22 = vmax.f32 %v28103_v49, 0.0 }
 0xabf   : > { %v28064_v30 = vpop.f32.mrb[60].mxu0  ;;  %10008 = vmatprep.subr.bf16.mxu0 %v23954_v39  ;;  %22151 = vmatprep.subr.bf16.mxu1 %v23955_v2  ;;  %v8606_v39 = vrot.slane %v28041_v60, %v8605_v35  ;;  %v23989_v2 = vld [vmem:[%s26880_s7 + $0x244] ss:$12 sps:$4 sm:$0xff]   ;;  %v23987_v60 = vld [vmem:[%s26880_s7 + $0x240] ss:$12 sps:$4 sm:$0xff]  }
 0xac0   : > { %v28066_v29 = vpop.f32.mrb[61].mxu0  ;;  %9999 = vmatprep.mubr.f32.mxu0 %v9358_v44  ;;  %10133 = vmatprep.mubr.f32.mxu1 %v9358_v44  ;;  %v28097_v53 = vadd.f32 %v28048_v38, %v8598_v18  ;;  %v24017_v35 = vld [vmem:[%s26880_s7 + $0x304] ss:$12 sps:$4 sm:$0xff]  }
 0xac1   : > { %10000 = vmatmul.mubr.f32.gmra.mrb[64].mxu0 %v9357_v37  ;;  %10134 = vmatmul.mubr.f32.gmra.mrb[62].mxu1 %v9357_v37  ;;  %v28108_v37 = vadd.f32 %v28055_v4, %v8598_v18  ;;  %v23991_v4 = vld [vmem:[%s26880_s7 + $0x258] ss:$12 sps:$4 sm:$0xff]   ;;  %v24015_v18 = vld [vmem:[%s26880_s7 + $0x300] ss:$12 sps:$4 sm:$0xff]  }
 0xac2   : > { %10009 = vmatpush1.bf16.msra.mxu0 %v23952_v58  ;;  %22152 = vmatpush3.bf16.msra.mxu1 %v23956_v31  ;;  %v9354_v38 = vmax.f32 %v28097_v53, 0.0 }
 0xac3   : > { %10038 = vmatprep.mubr.f32.mxu0 %v9355_v33  ;;  %10171 = vmatprep.mubr.f32.mxu1 %v9355_v33 }
 0xac4   : > { %10010 = vmatprep.subr.bf16.mxu0 %v23959_v57  ;;  %22153 = vmatprep.subr.bf16.mxu1 %v23960_v21  ;;  %v23993_v21 = vld [vmem:[%s26880_s7 + $0x25c] ss:$12 sps:$4 sm:$0xff]  }
 0xac6   : > { %10011 = vmatpush1.bf16.msra.mxu0 %v23957_v25  ;;  %22154 = vmatpush3.bf16.msra.mxu1 %v23961_v28  ;;  %v23994_v25 = vld [vmem:[%s26880_s7 + $0x320] ss:$12 sps:$4 sm:$0xff]  }
 0xac7   : > { %10012 = vmatprep.subr.bf16.mxu0 %v23964_v59  ;;  %22155 = vmatprep.subr.bf16.mxu1 %v23965_v52  ;;  %v9359_v59 = vmax.f32 %v28108_v37, 0.0  ;;  %v23997_v52 = vld [vmem:[%s26880_s7 + $0x274] ss:$12 sps:$4 sm:$0xff]  }
 0xaca   : > { %10013 = vmatpush1.bf16.msra.mxu0 %v23962_v15  ;;  %22156 = vmatpush3.bf16.msra.mxu1 %v23966_v54  ;;  %v23998_v54 = vld [vmem:[%s26880_s7 + $0x338] ss:$12 sps:$4 sm:$0xff]  }
 0xacb   : > { %10014 = vmatprep.subr.bf16.mxu0 %v23969_v34  ;;  %22157 = vmatprep.subr.bf16.mxu1 %v23970_v63  ;;  %v23995_v34 = vld [vmem:[%s26880_s7 + $0x270] ss:$12 sps:$4 sm:$0xff]   ;;  %v24001_v63 = vld [vmem:[%s26880_s7 + $0x28c] ss:$12 sps:$4 sm:$0xff]  }
 0xace   : > { %10015 = vmatpush1.bf16.msra.mxu0 %v23967_v36  ;;  %22158 = vmatpush3.bf16.msra.mxu1 %v23971_v45  ;;  %v24002_v36 = vld [vmem:[%s26880_s7 + $0x350] ss:$12 sps:$4 sm:$0xff]   ;;  %v23999_v45 = vld [vmem:[%s26880_s7 + $0x288] ss:$12 sps:$4 sm:$0xff]  }
 0xacf   : > { %10016 = vmatprep.subr.bf16.mxu0 %v23974_v56  ;;  %22159 = vmatprep.subr.bf16.mxu1 %v23975_v40  ;;  %v24003_v56 = vld [vmem:[%s26880_s7 + $0x2a0] ss:$12 sps:$4 sm:$0xff]   ;;  %v24008_v40 = vld [vmem:[%s26880_s7 + $0x2bc] ss:$12 sps:$4 sm:$0xff]  }
 0xad2   : > { %10017 = vmatpush1.bf16.msra.mxu0 %v23972_v55  ;;  %22160 = vmatpush3.bf16.msra.mxu1 %v23976_v20  ;;  %v24006_v20 = vld [vmem:[%s26880_s7 + $0x2b8] ss:$12 sps:$4 sm:$0xff]  }
 0xad3   : > { %10018 = vmatprep.subr.bf16.mxu0 %v23979_v16  ;;  %22161 = vmatprep.subr.bf16.mxu1 %v23980_v61  ;;  %v24011_v16 = vld [vmem:[%s26880_s7 + $0x2d4] ss:$12 sps:$4 sm:$0xff]   ;;  %v24009_v61 = vld [vmem:[%s26880_s7 + $0x2d0] ss:$12 sps:$4 sm:$0xff]  }
 0xad6   : > { %v22117_v23 = vpop.f32.mrb[56].mxu1  ;;  %10019 = vmatpush1.bf16.msra.mxu0 %v23977_v11  ;;  %22162 = vmatpush3.bf16.msra.mxu1 %v23981_v41  ;;  %v24014_v11 = vld [vmem:[%s26880_s7 + $0x2ec] ss:$12 sps:$4 sm:$0xff]   ;;  %v24012_v41 = vld [vmem:[%s26880_s7 + $0x2e8] ss:$12 sps:$4 sm:$0xff]  }
 0xad7   : > { %v22118_v43 = vpop.f32.mrb[57].mxu1  ;;  %10020 = vmatprep.subr.bf16.mxu0 %v23984_v17  ;;  %22163 = vmatprep.subr.bf16.mxu1 %v23985_v27  ;;  %v24020_v17 = vld [vmem:[%s26880_s7 + $0x31c] ss:$12 sps:$4 sm:$0xff]   ;;  %v24018_v27 = vld [vmem:[%s26880_s7 + $0x318] ss:$12 sps:$4 sm:$0xff]  }
 0xad8   : > { %v22119_v44 = vadd.f32 %v22118_v43, %v22117_v23  ;;  %v24023_v23 = vld [vmem:[%s26880_s7 + $0x334] ss:$12 sps:$4 sm:$0xff]  }
 0xada   : > { %v9301_v58 = vadd.f32 %v22119_v44, %v8606_v39  ;;  %v22120_v31 = vpop.f32.mrb[58].mxu1  ;;  %10021 = vmatpush1.bf16.msra.mxu0 %v23982_v48  ;;  %22164 = vmatpush3.bf16.msra.mxu1 %v23986_v1  ;;  %v24026_v48 = vld [vmem:[%s26880_s7 + $0x34c] ss:$12 sps:$4 sm:$0xff]   ;;  %v24024_v1 = vld [vmem:[%s26880_s7 + $0x348] ss:$12 sps:$4 sm:$0xff]  }
 0xadb   : > { %v22121_v57 = vpop.f32.mrb[59].mxu1  ;;  %10022 = vmatprep.subr.bf16.mxu0 %v23989_v2  ;;  %22621 = vmatprep.subr.bf16.mxu1 %v23990_v42 }
 0xadc   : > { %v28113_v26 = vadd.f32 %v28066_v29, %v9301_v58  ;;  %v22122_v33 = vadd.f32 %v22121_v57, %v22120_v31  ;;  %v8585_v58 = vld [vmem:[%s2915_s20] sm:$0x7] }
 0xadd   : > { %10172 = vmatmul.mubr.f32.vlgmr.msra.gmra.mrb[64].mxu1 %v9354_v38  ;;  %v9374_v31 = vrot.slane %v8585_v58, %v27124_v47 }
 0xade   : > { %v9306_v28 = vadd.f32 %v22122_v33, %v8606_v39  ;;  %10023 = vmatpush1.bf16.msra.mxu0 %v23987_v60  ;;  %10176 = vmatprep.mubr.f32.mxu1 %v9360_v22  ;;  %v9356_v29 = vmax.f32 %v28113_v26, 0.0  ;;  %v24021_v39 = vld [vmem:[%s26880_s7 + $0x330] ss:$12 sps:$4 sm:$0xff]  }
 0xadf   : > { %22622 = vmatpush3.bf16.msra.mxu1 %v23990_v42  ;;  %10024 = vmatprep.subr.bf16.mxu0 %v23993_v21 }
 0xae0   : > { %v9349_v15 = vadd.f32 %v28064_v30, %v9306_v28  ;;  %22623 = vmatprep.subr.bf16.mxu1 %v23994_v25  ;;  %v24005_v30 = vld [vmem:[%s26880_s7 + $0x2a4] ss:$12 sps:$4 sm:$0xff]  }
 0xae1   : > { %10177 = vmatmul.mubr.f32.gmra.mrb[66].mxu1 %v9359_v59 }
 0xae2   : > { %10025 = vmatpush1.bf16.msra.mxu0 %v23991_v4  ;;  %22629 = vmatprep.mubr.msk.f32.mxu1 %vm9954_vm13, %v9356_v29  ;;  %v9361_v55 = vmax.f32 %v9349_v15, 0.0  ;;  %v9370_v15 = vrot.slane %v8585_v58, %v27135_v62 }
 0xae3   : > { %22624 = vmatpush3.bf16.msra.mxu1 %v23994_v25  ;;  %10026 = vmatprep.subr.bf16.mxu0 %v23997_v52 }
 0xae4   : > { %22625 = vmatprep.subr.bf16.mxu1 %v23998_v54 }
 0xae6   : > { %10027 = vmatpush1.bf16.msra.mxu0 %v23995_v34 }
 0xae7   : > { %22626 = vmatpush3.bf16.msra.mxu1 %v23998_v54  ;;  %10028 = vmatprep.subr.bf16.mxu0 %v24001_v63 }
 0xae8   : > { %22627 = vmatprep.subr.bf16.mxu1 %v24002_v36 }
 0xaea   : > { %10029 = vmatpush1.bf16.msra.mxu0 %v23999_v45 }
 0xaeb   : > { %22628 = vmatpush3.bf16.msra.mxu1 %v24002_v36  ;;  %10030 = vmatprep.subr.bf16.mxu0 %v24005_v30 }
 0xaee   : > { %22630 = vmatmul.mubr.msk.f32.vlgmr.msra.gmra.mrb[68].mxu1 %vm9954_vm13, %v9361_v55  ;;  %10031 = vmatpush1.bf16.msra.mxu0 %v24003_v56 }
 0xaef   : > { %10032 = vmatprep.subr.bf16.mxu0 %v24008_v40 }
 0xaf2   : > { %10033 = vmatpush1.bf16.msra.mxu0 %v24006_v20 }
 0xaf3   : > { %10034 = vmatprep.subr.bf16.mxu0 %v24011_v16 }
 0xaf6   : > { %10035 = vmatpush1.bf16.msra.mxu0 %v24009_v61 }
 0xaf7   : > { %10036 = vmatprep.subr.bf16.mxu0 %v24014_v11 }
 0xafa   : > { %10037 = vmatpush1.bf16.msra.mxu0 %v24012_v41 }
 0xafb   : > { %10051 = vmatprep.subr.bf16.mxu0 %v24017_v35 }
 0xafd   : > { %10039 = vmatmul.mubr.f32.vlgmr.msra.gmra.mrb[62].mxu0 %v9354_v38 }
 0xafe   : > { %10044 = vmatprep.mubr.f32.mxu0 %v9360_v22  ;;  %10052 = vmatpush1.bf16.msra.mxu0 %v24015_v18 }
 0xaff   : > { %10053 = vmatprep.subr.bf16.mxu0 %v24020_v17 }
 0xb01   : > { %10045 = vmatmul.mubr.f32.gmra.mrb[64].mxu0 %v9359_v59 }
 0xb02   : > { %10054 = vmatpush1.bf16.msra.mxu0 %v24018_v27  ;;  %10083 = vmatprep.mubr.f32.mxu0 %v29913_v3 }
 0xb03   : > { %10055 = vmatprep.subr.bf16.mxu0 %v24023_v23 }
 0xb06   : > { %10056 = vmatpush1.bf16.msra.mxu0 %v24021_v39 }
 0xb07   : > { %10057 = vmatprep.subr.bf16.mxu0 %v24026_v48 }
 0xb0a   : > { %10058 = vmatpush1.bf16.msra.mxu0 %v24024_v1 }
 0xb0d   : > { %21222 = vmatmul.mubr.msk.f32.vlgmr.msra.gmra.mrb[62].mxu0 %vm9954_vm13, %v9356_v29  ;;  %v9366_v29 = vrot.slane %v8585_v58, %v27150_v19 }
 0xb0e   : > { %10089 = vmatprep.mubr.f32.mxu0 %v29913_v3 }
 0xb11   : > { %21223 = vmatmul.mubr.msk.f32.gmra.mrb[64].mxu0 %vm9954_vm13, %v9361_v55 }
 0xb90   : > { %v22143_v53 = vpop.f32.mrb[60].mxu1 }
 0xb91   : > { %v22144_v43 = vpop.f32.mrb[61].mxu1 }
 0xb92   : > { %v22145_v2 = vadd.f32 %v22144_v43, %v22143_v53 }
 0xb94   : > { %v22146_v42 = vpop.f32.mrb[62].mxu1  ;;  %v10131_v37 = vadd.f32 %v22145_v2, %v9374_v31 }
 0xb95   : > { %v22147_v49 = vpop.f32.mrb[63].mxu1 }
 0xb96   : > { %v22148_v44 = vadd.f32 %v22147_v49, %v22146_v42 }
 0xb98   : > { %v10136_v3 = vadd.f32 %v22148_v44, %v9374_v31 }
 0xbb0   : > { %v22165_v60 = vpop.f32.mrb[64].mxu1 }
 0xbb1   : > { %v22166_v38 = vpop.f32.mrb[65].mxu1 }
 0xbb2   : > { %v22167_v57 = vadd.f32 %v22166_v38, %v22165_v60 }
 0xbb4   : > { %v22168_v21 = vpop.f32.mrb[66].mxu1  ;;  %v10174_v22 = vadd.f32 %v22167_v57, %v10131_v37 }
 0xbb5   : > { %v22169_v26 = vpop.f32.mrb[67].mxu1 }
 0xbb6   : > { %v22170_v33 = vadd.f32 %v22169_v26, %v22168_v21 }
 0xbb8   : > { %v10179_v25 = vadd.f32 %v22170_v33, %v10136_v3 }
 0xbc1   : > { %v22631_v28 = vpop.f32.mrb[68].mxu1 }
 0xbc2   : > { %v10222_v4 = vadd.f32 %v22631_v28, %v10179_v25  ;;  %v10216_v59 = vpop.f32.mrb[69].mxu1 }
 0xbc3   : > { %v10217_v52 = vadd.f32 %v10216_v59, %v10174_v22  ;;  %v10231_v59 = vld [vmem:[%s2923_s11] sm:$0x7] }
 0xbc4   : > { %v10230_v11 = vadd.f32 %v10222_v4, %v27964_v46 }
 0xbc5   : > { %v10227_v45 = vadd.f32 %v10217_v52, %v27951_v51  ;;  %v10232_v52 = vld [vmem:[%s2931_s12] sm:$0x7] }
 0xbc7   : > { %v10234_v35 = vsel %vm3534_vm10, %v10227_v45, 0.0 }
 0xbe0   : > { %v10085_v54 = vpop.f32.mrb[62].mxu0 }
 0xbe1   : > { %v23106_v34 = vadd.f32 %v10085_v54, %v9366_v29  ;;  %v10087_v63 = vpop.f32.mrb[63].mxu0  ;;  %v10291_v54 = vrot.slane %v10231_v59, %v27124_v47 }
 0xbe2   : > { %v23107_v36 = vadd.f32 %v10087_v63, %v9370_v15  ;;  %v10305_v63 = vrot.slane %v10232_v52, %v27150_v19 }
 0xbe3   : > { %v10225_v30 = vadd.f32 %v23106_v34, %v27923_v0  ;;  %v10239_v0 = vsel %vm3534_vm10, %v10230_v11, 0.0 }
 0xbe4   : > { %v10226_v56 = vadd.f32 %v23107_v36, %v27920_v32  ;;  %v10091_v40 = vpop.f32.mrb[64].mxu0  ;;  %v10309_v36 = vrot.slane %v10232_v52, %v27135_v62 }
 0xbe5   : > { %v23108_v55 = vadd.f32 %v10091_v40, %v9366_v29  ;;  %v10093_v20 = vpop.f32.mrb[65].mxu0  ;;  %v10283_v29 = vrot.slane %v10231_v59, %v27150_v19 }
 0xbe6   : > { %v23109_v16 = vadd.f32 %v10093_v20, %v9370_v15  ;;  %v10233_v61 = vadd.f32 %v10226_v56, %v10225_v30  ;;  %v10287_v15 = vrot.slane %v10231_v59, %v27135_v62 }
 0xbe7   : > { %v10228_v41 = vadd.f32 %v23108_v55, %v27941_v50 }
 0xbe8   : > { %v10229_v18 = vadd.f32 %v23109_v16, %v27937_v24  ;;  %v10235_v17 = vadd.f32 %v10234_v35, %v10233_v61 }
 0xbea   : > { %10236 = vadd.xlane.f32.xlu0 %v10235_v17  ;;  %v10238_v51 = vadd.f32 %v10229_v18, %v10228_v41 }
 0xbec   : > { %v10240_v27 = vadd.f32 %v10239_v0, %v10238_v51 }
 0xbee   : > { %10241 = vadd.xlane.f32.xlu1 %v10240_v27 }
 0xc77   : > { %v10237_v32 = vpop.xlane.xlu0 %10236 }
 0xc78   : > { %v10243_v23 = vmul.f32 0.0034722222, %v10237_v32 }
 0xc7a   : > { %v10245_v39 = vsub.f32 %v10225_v30, %v10243_v23  ;;  %v10246_v48 = vsub.f32 %v10226_v56, %v10243_v23  ;;  %v10247_v1 = vsub.f32 %v10227_v45, %v10243_v23  ;;  %v10313_v45 = vrot.slane %v10232_v52, %v27124_v47 }
 0xc7b   : > { %v10242_v53 = vpop.xlane.xlu1 %10241 }
 0xc7c   : > { %v10244_v46 = vmul.f32 0.0034722222, %v10242_v53  ;;  %v10251_v43 = vmul.f32 %v10245_v39, %v10245_v39  ;;  %v10252_v50 = vmul.f32 %v10246_v48, %v10246_v48  ;;  %v10253_v2 = vmul.f32 %v10247_v1, %v10247_v1 }
 0xc7e   : > { %v10248_v42 = vsub.f32 %v10228_v41, %v10244_v46  ;;  %v10249_v49 = vsub.f32 %v10229_v18, %v10244_v46  ;;  %v10250_v24 = vsub.f32 %v10230_v11, %v10244_v46  ;;  %v10257_v44 = vadd.f32 %v10252_v50, %v10251_v43 }
 0xc7f   : > { %v10258_v58 = vsel %vm3534_vm10, %v10253_v2, 0.0 }
 0xc80   : > { %v10259_v31 = vadd.f32 %v10258_v58, %v10257_v44  ;;  %v10254_v60 = vmul.f32 %v10248_v42, %v10248_v42  ;;  %v10255_v38 = vmul.f32 %v10249_v49, %v10249_v49  ;;  %v10256_v37 = vmul.f32 %v10250_v24, %v10250_v24 }
 0xc82   : > { %10260 = vadd.xlane.f32.xlu0 %v10259_v31  ;;  %v10262_v57 = vadd.f32 %v10255_v38, %v10254_v60  ;;  %v10263_v21 = vsel %vm3534_vm10, %v10256_v37, 0.0 }
 0xc84   : > { %v10264_v22 = vadd.f32 %v10263_v21, %v10262_v57 }
 0xc86   : > { %10265 = vadd.xlane.f32.xlu1 %v10264_v22 }
 0xd0f   : > { %v10261_v26 = vpop.xlane.xlu0 %10260 }
 0xd10   : > { %v10267_v3 = vmul.f32 0.0034722222, %v10261_v26 }
 0xd12   : > { %v10269_v33 = vadd.f32 1e-05, %v10267_v3 }
 0xd13   : > { %v10266_v25 = vpop.xlane.xlu1 %10265 }
 0xd14   : > { %24095 = vrsqrt.f32 %v10269_v33  ;;  %v10268_v28 = vmul.f32 0.0034722222, %v10266_v25 }
 0xd16   : > { %v10270_v4 = vadd.f32 1e-05, %v10268_v28 }
 0xd18   : > { %24097 = vrsqrt.f32 %v10270_v4 }
 0xd1e   : > { %v24096_v34 = vpop.eup %24095 }
 0xd1f   : > { %v10273_v30 = vmul.f32 %v24096_v34, %v10245_v39  ;;  %v10274_v56 = vmul.f32 %v24096_v34, %v10246_v48  ;;  %v10275_v40 = vmul.f32 %v24096_v34, %v10247_v1 }
 0xd21   : > { %v10295_v55 = vmul.f32 %v10283_v29, %v10273_v30  ;;  %v10296_v20 = vmul.f32 %v10287_v15, %v10274_v56  ;;  %v10297_v16 = vmul.f32 %v10291_v54, %v10275_v40 }
 0xd22   : > { %v24098_v61 = vpop.eup %24097 }
 0xd23   : > { %v10317_v11 = vadd.f32 %v10305_v63, %v10295_v55  ;;  %v10318_v41 = vadd.f32 %v10309_v36, %v10296_v20  ;;  %v10319_v35 = vadd.f32 %v10313_v45, %v10297_v16  ;;  %v10276_v18 = vmul.f32 %v24098_v61, %v10248_v42 }
 0xd24   : > { %v10277_v17 = vmul.f32 %v24098_v61, %v10249_v49  ;;  %v10278_v51 = vmul.f32 %v24098_v61, %v10250_v24 }
 0xd25   : > { %10323 = vst [vmem:[#allocation2] sm:$0xff] %v10317_v11  ;;  %10324 = vst [vmem:[#allocation2 + $0x8] sm:$0xff] %v10318_v41  ;;  %v10298_v62 = vmul.f32 %v10283_v29, %v10276_v18 }
 0xd26   : > { %10325 = vst.msk [vmem:[#allocation2 + $0x10] sm:$0xff] %vm3534_vm10, %v10319_v35  ;;  %v10299_v19 = vmul.f32 %v10287_v15, %v10277_v17  ;;  %v10300_v47 = vmul.f32 %v10291_v54, %v10278_v51 }
 0xd27   : > { %v10320_v0 = vadd.f32 %v10305_v63, %v10298_v62 }
 0xd28   : > { %v10321_v27 = vadd.f32 %v10309_v36, %v10299_v19  ;;  %v10322_v32 = vadd.f32 %v10313_v45, %v10300_v47 }
 0xd29   : > { %10326 = vst [vmem:[#allocation2 + $0x18] sm:$0xff] %v10320_v0 }
 0xd2a   : > { %10327 = vst [vmem:[#allocation2 + $0x20] sm:$0xff] %v10321_v27  ;;  %10328 = vst.msk [vmem:[#allocation2 + $0x28] sm:$0xff] %vm3534_vm10, %v10322_v32 }
 0xd2b PF: > { %s29931_s12 = sld [smem:[#allocation106_spill]] }
 0xd31   : > { %p21226_p3 = scmp.lt.s32.totalorder %s29931_s12, 6 }
 0xd32   : > { %s29932_s5 = sld [smem:[#allocation114_spill]] (!%p21226_p3)  ;;  %v25801_v48 = vmov (!%p21226_p3), 0.0   ;;  %vm25802_vm14 = vmmov (!%p21226_p3), 0   ;;  %v25803_v2 = vmov (!%p21226_p3), 1983009808   ;;  %v29933_v44 = vlaneseq (!%p21226_p3)  ;;  %s29934_s11 = sld [smem:[#allocation115_spill]] (!%p21226_p3) }
 0xd33   : > { %10332 = sbr.rel (%p21226_p3) target bundleno = 6828 (0x1aac), region = 312  ;;  %22632 = vmatprep.subr.bf16.mxu1 (!%p21226_p3), %v25801_v48  ;;  %22636 = vmatprep.mubr.msk.f32.mxu1 (!%p21226_p3), %vm25802_vm14, %v25801_v48  ;;  %v10526_v42 = vunpack.c.l.s4 (!%p21226_p3), %v25803_v2  ;;  %v10333_v22 = vld [vmem:[#allocation3] sm:$0x3f] (!%p21226_p3)  ;;  %vm10343_vm15 = vcmask (!%p21226_p3), 261120   ;;  %s29935_s20 = scalar_lea.vmem (!%p21226_p3), [#allocation10], %s26725_s23  ;;  %vm11563_vm0 = vcmask (!%p21226_p3), 1041408  }
 0xd34   : > { %v28192_v58 = vshrl.u32 (!%p21226_p3), %v29933_v44, 7  ;;  %v10524_v56 = vcombine.high (!%p21226_p3), %v10333_v22, %v10333_v22  ;;  %s29936_s24 = scalar_lea.vmem (!%p21226_p3), [#allocation13], %s26725_s23  ;;  %s29937_s22 = sld [smem:[#allocation116_spill]] (!%p21226_p3)  ;;  %vm11567_vm4 = vcmask (!%p21226_p3), 254976   ;;  %vm28728_vm1 = vmpackc.low (!%p21226_p3), %vm10343_vm15, %vm10343_vm15  ;;  %vm14598_vm2 = vcmask (!%p21226_p3), 123904  }
 0xd35   : > { %v10527_v31 = vunpack.c.0.s8 (!%p21226_p3), %v10526_v42  ;;  %s29938_s27 = scalar_lea.vmem (!%p21226_p3), [#allocation15], %s26725_s23  ;;  %s29939_s17 = scalar_lea.vmem (!%p21226_p3), [#allocation16], %s26725_s23  ;;  %vm14735_vm3 = vcmask (!%p21226_p3), 130048   ;;  %vm18156_vm5 = vcmask (!%p21226_p3), 523264   ;;  %vm18555_vm6 = vcmask (!%p21226_p3), 1043458  }
 0xd36   : > { %s29940_s21 = sld [smem:[#allocation70_spill]] (!%p21226_p3)  ;;  %s29941_s16 = sld [smem:[#allocation71_spill]] (!%p21226_p3)  ;;  %vm18556_vm7 = vmor (!%p21226_p3), %vm18555_vm6, %vm11563_vm0  ;;  %vm18557_vm8 = vcmask (!%p21226_p3), 259076  }
 0xd37   : > { %v28197_v37 = vsub.s32 (!%p21226_p3), %v10527_v31, %v28192_v58  ;;  %s29942_s30 = sld [smem:[#allocation117_spill]] (!%p21226_p3)  ;;  %s29943_s15 = sld [smem:[#allocation118_spill]] (!%p21226_p3)  ;;  %vm18558_vm9 = vmor (!%p21226_p3), %vm18557_vm8, %vm18556_vm7 }
 0xd38   : > { %v24111_v23 = vld [vmem:[%s29932_s5 + $0x4] ss:$12 sps:$4 sm:$0xff] (!%p21226_p3)   ;;  %v24113_v39 = vld [vmem:[%s29932_s5] ss:$12 sps:$4 sm:$0xff] (!%p21226_p3)   ;;  %v24114_v1 = vld [vmem:[%s29932_s5 + $0x1c] ss:$12 sps:$4 sm:$0xff] (!%p21226_p3)  }
 0xd39   : > { %10832 = vmatprep.subr.bf16.mxu0 (!%p21226_p3), %v24111_v23  ;;  %v24116_v53 = vld [vmem:[%s29932_s5 + $0x18] ss:$12 sps:$4 sm:$0xff] (!%p21226_p3)   ;;  %v24117_v46 = vld [vmem:[%s29932_s5 + $0x34] ss:$12 sps:$4 sm:$0xff] (!%p21226_p3)   ;;  %v24119_v43 = vld [vmem:[%s29932_s5 + $0x30] ss:$12 sps:$4 sm:$0xff] (!%p21226_p3)   ;;  %v28202_v26 = vrot.slane (!%p21226_p3), %v10333_v22, %v28197_v37  ;;  %v10538_v61 = vrot.slane (!%p21226_p3), %v10524_v56, %v28197_v37 }
 0xd3a   : > { %10833 = vmatpush1.bf16.msra.mxu0 %v24113_v39  ;;  %v24120_v50 = vld [vmem:[%s29932_s5 + $0x4c] ss:$12 sps:$4 sm:$0xff]   ;;  %v24122_v49 = vld [vmem:[%s29932_s5 + $0x48] ss:$12 sps:$4 sm:$0xff]   ;;  %v24123_v24 = vld [vmem:[%s29932_s5 + $0x64] ss:$12 sps:$4 sm:$0xff]  }
 0xd3b   : > { %10834 = vmatprep.subr.bf16.mxu0 %v24114_v1  ;;  %v24125_v60 = vld [vmem:[%s29932_s5 + $0x60] ss:$12 sps:$4 sm:$0xff]   ;;  %v24126_v38 = vld [vmem:[%s29932_s5 + $0x7c] ss:$12 sps:$4 sm:$0xff]   ;;  %v24128_v57 = vld [vmem:[%s29932_s5 + $0x78] ss:$12 sps:$4 sm:$0xff]   ;;  %v28208_v25 = vcombine.high %v28202_v26, %v28202_v26 }
 0xd3c   : > { %v24129_v21 = vld [vmem:[%s29932_s5 + $0x94] ss:$12 sps:$4 sm:$0xff]   ;;  %v24131_v3 = vld [vmem:[%s29932_s5 + $0x90] ss:$12 sps:$4 sm:$0xff]   ;;  %v24132_v33 = vld [vmem:[%s29932_s5 + $0xac] ss:$12 sps:$4 sm:$0xff]  }
 0xd3d   : > { %10864 = vmatprep.mubr.f32.mxu0 %v28208_v25  ;;  %v24134_v28 = vld [vmem:[%s29932_s5 + $0xa8] ss:$12 sps:$4 sm:$0xff]   ;;  %v24135_v4 = vld [vmem:[%s29932_s5 + $0xc4] ss:$12 sps:$4 sm:$0xff]   ;;  %v24137_v59 = vld [vmem:[%s29932_s5 + $0xc0] ss:$12 sps:$4 sm:$0xff]  }
 0xd3e   : > { %10835 = vmatpush1.bf16.msra.mxu0 %v24116_v53  ;;  %v24138_v52 = vld [vmem:[%s29932_s5 + $0xdc] ss:$12 sps:$4 sm:$0xff]   ;;  %v24140_v29 = vld [vmem:[%s29932_s5 + $0xd8] ss:$12 sps:$4 sm:$0xff]   ;;  %v24141_v15 = vld [vmem:[%s29932_s5 + $0xf4] ss:$12 sps:$4 sm:$0xff]  }
 0xd3f   : > { %10836 = vmatprep.subr.bf16.mxu0 %v24117_v46  ;;  %v24143_v54 = vld [vmem:[%s29932_s5 + $0xf0] ss:$12 sps:$4 sm:$0xff]   ;;  %v24144_v34 = vld [vmem:[%s29932_s5 + $0x10c] ss:$12 sps:$4 sm:$0xff]   ;;  %v24182_v63 = vld [vmem:[%s29932_s5 + $0x188] ss:$12 sps:$4 sm:$0xff]  }
 0xd40   : > { %v24146_v36 = vld [vmem:[%s29932_s5 + $0x108] ss:$12 sps:$4 sm:$0xff]   ;;  %22633 = vmatpush3.bf16.msra.mxu1 %v24182_v63  ;;  %v24183_v45 = vld [vmem:[%s29932_s5 + $0x1a0] ss:$12 sps:$4 sm:$0xff]   ;;  %v24147_v30 = vld [vmem:[%s29932_s5 + $0x124] ss:$12 sps:$4 sm:$0xff]  }
 0xd41   : > { %22634 = vmatprep.subr.bf16.mxu1 %v25801_v48  ;;  %v24186_v40 = vld [vmem:[%s29934_s11 + $0x4] ss:$12 sps:$4 sm:$0xff]   ;;  %v24149_v55 = vld [vmem:[%s29932_s5 + $0x120] ss:$12 sps:$4 sm:$0xff]   ;;  %v24150_v16 = vld [vmem:[%s29932_s5 + $0x13c] ss:$12 sps:$4 sm:$0xff]  }
 0xd42   : > { %10837 = vmatpush1.bf16.msra.mxu0 %v24119_v43  ;;  %v24184_v20 = vld [vmem:[%s29934_s11] ss:$12 sps:$4 sm:$0xff]   ;;  %v24189_v11 = vld [vmem:[%s29934_s11 + $0x1c] ss:$12 sps:$4 sm:$0xff]   ;;  %v24152_v41 = vld [vmem:[%s29932_s5 + $0x138] ss:$12 sps:$4 sm:$0xff]  }
 0xd43   : > { %10838 = vmatprep.subr.bf16.mxu0 %v24120_v50  ;;  %v24187_v35 = vld [vmem:[%s29934_s11 + $0x18] ss:$12 sps:$4 sm:$0xff]   ;;  %v24153_v18 = vld [vmem:[%s29932_s5 + $0x154] ss:$12 sps:$4 sm:$0xff]   ;;  %v24155_v51 = vld [vmem:[%s29932_s5 + $0x150] ss:$12 sps:$4 sm:$0xff]  }
 0xd44   : > { %22635 = vmatpush3.bf16.msra.mxu1 %v24183_v45  ;;  %v24192_v17 = vld [vmem:[%s29934_s11 + $0x34] ss:$12 sps:$4 sm:$0xff]   ;;  %v24156_v62 = vld [vmem:[%s29932_s5 + $0x16c] ss:$12 sps:$4 sm:$0xff]   ;;  %v24190_v19 = vld [vmem:[%s29934_s11 + $0x30] ss:$12 sps:$4 sm:$0xff]  }
 0xd45   : > { %11366 = vmatprep.subr.bf16.mxu1 %v24186_v40  ;;  %v24195_v47 = vld [vmem:[%s29934_s11 + $0x4c] ss:$12 sps:$4 sm:$0xff]   ;;  %v24158_v0 = vld [vmem:[%s29932_s5 + $0x168] ss:$12 sps:$4 sm:$0xff]   ;;  %v24161_v32 = vld [vmem:[%s29932_s5 + $0x184] ss:$12 sps:$4 sm:$0xff]  }
 0xd46   : > { %10839 = vmatpush1.bf16.msra.mxu0 %v24122_v49  ;;  %v24193_v27 = vld [vmem:[%s29934_s11 + $0x48] ss:$12 sps:$4 sm:$0xff]   ;;  %v24198_v23 = vld [vmem:[%s29934_s11 + $0x64] ss:$12 sps:$4 sm:$0xff]   ;;  %v24159_v39 = vld [vmem:[%s29932_s5 + $0x180] ss:$12 sps:$4 sm:$0xff]  }
 0xd47   : > { %10840 = vmatprep.subr.bf16.mxu0 %v24123_v24  ;;  %22637 = vmatmul.mubr.msk.f32.vlgmr.msra.gmra.mrb[0].mxu1 %vm10343_vm15, %v10538_v61  ;;  %v24164_v1 = vld [vmem:[%s29932_s5 + $0x19c] ss:$12 sps:$4 sm:$0xff]   ;;  %v24196_v53 = vld [vmem:[%s29934_s11 + $0x60] ss:$12 sps:$4 sm:$0xff]   ;;  %v24162_v43 = vld [vmem:[%s29932_s5 + $0x198] ss:$12 sps:$4 sm:$0xff]  }
 0xd48   : > { %11367 = vmatpush1.bf16.msra.mxu1 %v24184_v20  ;;  %v24201_v46 = vld [vmem:[%s29934_s11 + $0x7c] ss:$12 sps:$4 sm:$0xff]   ;;  %v24199_v2 = vld [vmem:[%s29934_s11 + $0x78] ss:$12 sps:$4 sm:$0xff]   ;;  %v24204_v42 = vld [vmem:[%s29934_s11 + $0x94] ss:$12 sps:$4 sm:$0xff]  }
 0xd49   : > { %11368 = vmatprep.subr.bf16.mxu1 %v24189_v11  ;;  %v24166_v50 = vld [vmem:[%s29932_s5 + $0xc8] ss:$12 sps:$4 sm:$0xff]   ;;  %v24168_v24 = vld [vmem:[%s29932_s5 + $0xe0] ss:$12 sps:$4 sm:$0xff]   ;;  %v24202_v44 = vld [vmem:[%s29934_s11 + $0x90] ss:$12 sps:$4 sm:$0xff]  }
 0xd4a   : > { %10841 = vmatpush1.bf16.msra.mxu0 %v24125_v60  ;;  %v24167_v49 = vld [vmem:[%s29932_s5 + $0x8] ss:$12 sps:$4 sm:$0xff]   ;;  %v24207_v31 = vld [vmem:[%s29934_s11 + $0xac] ss:$12 sps:$4 sm:$0xff]   ;;  %v24180_v40 = vld [vmem:[%s29932_s5 + $0x170] ss:$12 sps:$4 sm:$0xff]  }
 0xd4b   : > { %10842 = vmatprep.subr.bf16.mxu0 %v24126_v38  ;;  %v24169_v60 = vld [vmem:[%s29932_s5 + $0x20] ss:$12 sps:$4 sm:$0xff]   ;;  %v24170_v38 = vld [vmem:[%s29932_s5 + $0xf8] ss:$12 sps:$4 sm:$0xff]   ;;  %v24223_v45 = vld [vmem:[%s29934_s11 + $0x108] ss:$12 sps:$4 sm:$0xff]  }
 0xd4c   : > { %11369 = vmatpush1.bf16.msra.mxu1 %v24187_v35  ;;  %v24171_v22 = vld [vmem:[%s29932_s5 + $0x38] ss:$12 sps:$4 sm:$0xff]   ;;  %v24177_v63 = vld [vmem:[%s29932_s5 + $0x80] ss:$12 sps:$4 sm:$0xff]   ;;  %v24235_v20 = vld [vmem:[%s29934_s11 + $0x13c] ss:$12 sps:$4 sm:$0xff]  }
 0xd4d   : > { %11370 = vmatprep.subr.bf16.mxu1 %v24192_v17  ;;  %v24179_v56 = vld [vmem:[%s29932_s5 + $0x98] ss:$12 sps:$4 sm:$0xff]   ;;  %v24212_v35 = vld [vmem:[%s29934_s11 + $0x8] ss:$12 sps:$4 sm:$0xff]   ;;  %v24238_v17 = vld [vmem:[%s29934_s11 + $0x150] ss:$12 sps:$4 sm:$0xff]  }
 0xd4e   : > { %10843 = vmatpush1.bf16.msra.mxu0 %v24128_v57  ;;  %v24205_v57 = vld [vmem:[%s29934_s11 + $0xa8] ss:$12 sps:$4 sm:$0xff]   ;;  %v24233_v11 = vld [vmem:[%s29934_s11 + $0x138] ss:$12 sps:$4 sm:$0xff]   ;;  %s29944_s1 = scalar_lea.vmem [#allocation19], %s26725_s23  ;;  %s29945_s25 = scalar_lea.vmem [#allocation22], %s26725_s23 }
 0xd4f   : > { %10844 = vmatprep.subr.bf16.mxu0 %v24129_v21  ;;  %v24210_v21 = vld [vmem:[%s29934_s11 + $0xc4] ss:$12 sps:$4 sm:$0xff]   ;;  %s29948_s14 = scalar_lea.vmem [#allocation25], %s26725_s23  ;;  %s29950_s4 = sld [smem:[#allocation53_spill]] }
 0xd50   : > { %11371 = vmatpush1.bf16.msra.mxu1 %v24190_v19  ;;  %v24222_v19 = vld [vmem:[%s29934_s11 + $0x38] ss:$12 sps:$4 sm:$0xff]   ;;  %s29951_s3 = sld [smem:[#allocation119_spill]]  ;;  %s29952_s2 = scalar_lea.vmem [#allocation28], %s26725_s23 }
 0xd51   : > { %11372 = vmatprep.subr.bf16.mxu1 %v24195_v47  ;;  %v24226_v47 = vld [vmem:[%s29934_s11 + $0x110] ss:$12 sps:$4 sm:$0xff]   ;;  %s29953_s18 = scalar_lea.vmem [#allocation30], %s26725_s23  ;;  %s29954_s0 = scalar_lea.vmem [#allocation31], %s26725_s23 }
 0xd52   : > { %10845 = vmatpush1.bf16.msra.mxu0 %v24131_v3  ;;  %v24172_v3 = vld [vmem:[%s29932_s5 + $0x110] ss:$12 sps:$4 sm:$0xff]  }
 0xd53   : > { %10846 = vmatprep.subr.bf16.mxu0 %v24132_v33  ;;  %v24208_v33 = vld [vmem:[%s29934_s11 + $0xc0] ss:$12 sps:$4 sm:$0xff]  }
 0xd54   : > { %11373 = vmatpush1.bf16.msra.mxu1 %v24193_v27  ;;  %v24231_v27 = vld [vmem:[%s29934_s11 + $0x128] ss:$12 sps:$4 sm:$0xff]  }
 0xd55   : > { %11374 = vmatprep.subr.bf16.mxu1 %v24198_v23  ;;  %v24237_v23 = vld [vmem:[%s29934_s11 + $0x80] ss:$12 sps:$4 sm:$0xff]  }
 0xd56   : > { %10847 = vmatpush1.bf16.msra.mxu0 %v24134_v28  ;;  %v24215_v28 = vld [vmem:[%s29934_s11 + $0xdc] ss:$12 sps:$4 sm:$0xff]  }
 0xd57   : > { %10848 = vmatprep.subr.bf16.mxu0 %v24135_v4  ;;  %v24173_v4 = vld [vmem:[%s29932_s5 + $0x50] ss:$12 sps:$4 sm:$0xff]  }
 0xd58   : > { %11375 = vmatpush1.bf16.msra.mxu1 %v24196_v53  ;;  %v24245_v53 = vld [vmem:[%s29934_s11 + $0x16c] ss:$12 sps:$4 sm:$0xff]  }
 0xd59   : > { %11376 = vmatprep.subr.bf16.mxu1 %v24201_v46  ;;  %v24246_v46 = vld [vmem:[%s29934_s11 + $0x170] ss:$12 sps:$4 sm:$0xff]  }
 0xd5a   : > { %10849 = vmatpush1.bf16.msra.mxu0 %v24137_v59  ;;  %v24213_v59 = vld [vmem:[%s29934_s11 + $0xd8] ss:$12 sps:$4 sm:$0xff]  }
 0xd5b   : > { %10850 = vmatprep.subr.bf16.mxu0 %v24138_v52  ;;  %v24220_v52 = vld [vmem:[%s29934_s11 + $0xf4] ss:$12 sps:$4 sm:$0xff]  }
 0xd5c   : > { %11377 = vmatpush1.bf16.msra.mxu1 %v24199_v2  ;;  %v24250_v2 = vld [vmem:[%s29934_s11 + $0x184] ss:$12 sps:$4 sm:$0xff]  }
 0xd5d   : > { %11378 = vmatprep.subr.bf16.mxu1 %v24204_v42 }
 0xd5e   : > { %10851 = vmatpush1.bf16.msra.mxu0 %v24140_v29  ;;  %v24175_v29 = vld [vmem:[%s29932_s5 + $0x68] ss:$12 sps:$4 sm:$0xff]  }
 0xd5f   : > { %10852 = vmatprep.subr.bf16.mxu0 %v24141_v15  ;;  %v24176_v15 = vld [vmem:[%s29932_s5 + $0x140] ss:$12 sps:$4 sm:$0xff]  }
 0xd60   : > { %11379 = vmatpush1.bf16.msra.mxu1 %v24202_v44  ;;  %v28312_v44 = vsub.s32 0, %v28192_v58 }
 0xd61   : > { %11380 = vmatprep.subr.bf16.mxu1 %v24207_v31  ;;  %v10506_v31 = vld [vmem:[%s29935_s20] sm:$0x7] }
 0xd62   : > { %10853 = vmatpush1.bf16.msra.mxu0 %v24143_v54  ;;  %v24218_v54 = vld [vmem:[%s29934_s11 + $0xf0] ss:$12 sps:$4 sm:$0xff]  }
 0xd63   : > { %10854 = vmatprep.subr.bf16.mxu0 %v24144_v34  ;;  %v24225_v34 = vld [vmem:[%s29934_s11 + $0x10c] ss:$12 sps:$4 sm:$0xff]  }
 0xd64   : > { %11381 = vmatpush1.bf16.msra.mxu1 %v24205_v57 }
 0xd65   : > { %11382 = vmatprep.subr.bf16.mxu1 %v24210_v21 }
 0xd66   : > { %10855 = vmatpush1.bf16.msra.mxu0 %v24146_v36  ;;  %v24178_v36 = vld [vmem:[%s29932_s5 + $0x158] ss:$12 sps:$4 sm:$0xff]  }
 0xd67   : > { %10856 = vmatprep.subr.bf16.mxu0 %v24147_v30  ;;  %v24230_v30 = vld [vmem:[%s29934_s11 + $0x124] ss:$12 sps:$4 sm:$0xff]  }
 0xd68   : > { %11383 = vmatpush1.bf16.msra.mxu1 %v24208_v33  ;;  %v24251_v33 = vld [vmem:[%s29934_s11 + $0x188] ss:$12 sps:$4 sm:$0xff]  }
 0xd69   : > { %11384 = vmatprep.subr.bf16.mxu1 %v24215_v28 }
 0xd6a   : > { %10857 = vmatpush1.bf16.msra.mxu0 %v24149_v55  ;;  %v24228_v55 = vld [vmem:[%s29934_s11 + $0x120] ss:$12 sps:$4 sm:$0xff]  }
 0xd6b   : > { %10858 = vmatprep.subr.bf16.mxu0 %v24150_v16  ;;  %v24181_v16 = vld [vmem:[%s29932_s5 + $0xb0] ss:$12 sps:$4 sm:$0xff]  }
 0xd6c   : > { %11385 = vmatpush1.bf16.msra.mxu1 %v24213_v59  ;;  %v24255_v59 = vld [vmem:[%s29934_s11 + $0x1a0] ss:$12 sps:$4 sm:$0xff]  }
 0xd6d   : > { %11386 = vmatprep.subr.bf16.mxu1 %v24220_v52  ;;  %v28328_v52 = vsub.s32 2, %v28192_v58 }
 0xd6e   : > { %10859 = vmatpush1.bf16.msra.mxu0 %v24152_v41  ;;  %v24240_v41 = vld [vmem:[%s29934_s11 + $0x154] ss:$12 sps:$4 sm:$0xff]  }
 0xd6f   : > { %10860 = vmatprep.subr.bf16.mxu0 %v24153_v18  ;;  %v24216_v18 = vld [vmem:[%s29934_s11 + $0xe0] ss:$12 sps:$4 sm:$0xff]  }
 0xd70   : > { %11387 = vmatpush1.bf16.msra.mxu1 %v24218_v54 }
 0xd71   : > { %11388 = vmatprep.subr.bf16.mxu1 %v24225_v34 }
 0xd72   : > { %10861 = vmatpush1.bf16.msra.mxu0 %v24155_v51  ;;  %v24217_v51 = vld [vmem:[%s29934_s11 + $0x20] ss:$12 sps:$4 sm:$0xff]  }
 0xd73   : > { %10862 = vmatprep.subr.bf16.mxu0 %v24156_v62  ;;  %v24221_v62 = vld [vmem:[%s29934_s11 + $0xf8] ss:$12 sps:$4 sm:$0xff]  }
 0xd74   : > { %11389 = vmatpush1.bf16.msra.mxu1 %v24223_v45  ;;  %v28333_v45 = vld [vmem:[#allocation2 + $0x18] sm:$0xff] }
 0xd75   : > { %11390 = vmatprep.subr.bf16.mxu1 %v24230_v30  ;;  %v28335_v30 = vld [vmem:[#allocation2 + $0x20] sm:$0xff] }
 0xd76   : > { %10863 = vmatpush1.bf16.msra.mxu0 %v24158_v0  ;;  %v24227_v0 = vld [vmem:[%s29934_s11 + $0x50] ss:$12 sps:$4 sm:$0xff]  }
 0xd77   : > { %10871 = vmatprep.subr.bf16.mxu0 %v24161_v32  ;;  %v24236_v32 = vld [vmem:[%s29934_s11 + $0x140] ss:$12 sps:$4 sm:$0xff]  }
 0xd78   : > { %11391 = vmatpush1.bf16.msra.mxu1 %v24228_v55 }
 0xd79   : > { %10865 = vmatmul.mubr.f32.vlgmr.msra.gmra.mrb[0].mxu0 %v28202_v26  ;;  %11392 = vmatprep.subr.bf16.mxu1 %v24235_v20 }
 0xd7a   : > { %10872 = vmatpush1.bf16.msra.mxu0 %v24159_v39  ;;  %10903 = vmatprep.mubr.f32.mxu0 %v25801_v48  ;;  %v24241_v39 = vld [vmem:[%s29934_s11 + $0x158] ss:$12 sps:$4 sm:$0xff]  }
 0xd7b   : > { %10873 = vmatprep.subr.bf16.mxu0 %v24164_v1  ;;  %v24242_v1 = vld [vmem:[%s29934_s11 + $0x98] ss:$12 sps:$4 sm:$0xff]  }
 0xd7c   : > { %11393 = vmatpush1.bf16.msra.mxu1 %v24233_v11 }
 0xd7d   : > { %11394 = vmatprep.subr.bf16.mxu1 %v24240_v41  ;;  %v11058_v41 = vld [vmem:[%s29936_s24] sm:$0x7] }
 0xd7e   : > { %10874 = vmatpush1.bf16.msra.mxu0 %v24162_v43  ;;  %v24243_v43 = vld [vmem:[%s29934_s11 + $0x168] ss:$12 sps:$4 sm:$0xff]  }
 0xd7f   : > { %22177 = vmatprep.subr.bf16.mxu0 %v24166_v50  ;;  %v24247_v50 = vld [vmem:[%s29934_s11 + $0xb0] ss:$12 sps:$4 sm:$0xff]  }
 0xd80   : > { %11395 = vmatpush1.bf16.msra.mxu1 %v24238_v17 }
 0xd81   : > { %21281 = vmatmul.mubr.msk.f32.vlgmr.msra.gmra.mrb[0].mxu0 %vm10343_vm15, %v10538_v61  ;;  %v24211_v61 = vld [vmem:[%s29934_s11 + $0xc8] ss:$12 sps:$4 sm:$0xff]   ;;  %11396 = vmatprep.subr.bf16.mxu1 %v24245_v53 }
 0xd82   : > { %22178 = vmatpush3.bf16.msra.mxu0 %v24167_v49  ;;  %10942 = vmatprep.mubr.f32.mxu0 %v28208_v25  ;;  %v24174_v25 = vld [vmem:[%s29932_s5 + $0x128] ss:$12 sps:$4 sm:$0xff]  }
 0xd83   : > { %22179 = vmatprep.subr.bf16.mxu0 %v24168_v24  ;;  %v28309_v24 = vsub.s32 1, %v28192_v58 }
 0xd84   : > { %11397 = vmatpush1.bf16.msra.mxu1 %v24243_v43 }
 0xd85   : > { %11405 = vmatprep.subr.bf16.mxu1 %v24250_v2  ;;  %v11067_v17 = vrot.slane %v11058_v41, %v28309_v24 }
 0xd86   : > { %22180 = vmatpush3.bf16.msra.mxu0 %v24169_v60  ;;  %v10515_v60 = vrot.slane %v10506_v31, %v28309_v24 }
 0xd87   : > { %22181 = vmatprep.subr.bf16.mxu0 %v24170_v38  ;;  %v10511_v38 = vrot.slane %v10506_v31, %v28312_v44 }
 0xd8a   : > { %22182 = vmatpush3.bf16.msra.mxu0 %v24171_v22 }
 0xd8b   : > { %22183 = vmatprep.subr.bf16.mxu0 %v24172_v3  ;;  %v24248_v3 = vld [vmem:[%s29934_s11 + $0x180] ss:$12 sps:$4 sm:$0xff]  }
 0xd8e   : > { %22184 = vmatpush3.bf16.msra.mxu0 %v24173_v4  ;;  %v24254_v4 = vld [vmem:[%s29934_s11 + $0x19c] ss:$12 sps:$4 sm:$0xff]  }
 0xd8f   : > { %22185 = vmatprep.subr.bf16.mxu0 %v24174_v25  ;;  %v24252_v25 = vld [vmem:[%s29934_s11 + $0x198] ss:$12 sps:$4 sm:$0xff]  }
 0xd92   : > { %22186 = vmatpush3.bf16.msra.mxu0 %v24175_v29 }
 0xd93   : > { %22187 = vmatprep.subr.bf16.mxu0 %v24176_v15  ;;  %v10519_v15 = vrot.slane %v10506_v31, %v28328_v52  ;;  %v28357_v31 = vld [vmem:[#allocation2] sm:$0xff] }
 0xd96   : > { %22188 = vmatpush3.bf16.msra.mxu0 %v24177_v63 }
 0xd97   : > { %22189 = vmatprep.subr.bf16.mxu0 %v24178_v36 }
 0xd9a   : > { %22190 = vmatpush3.bf16.msra.mxu0 %v24179_v56  ;;  %v28337_v56 = vld [vmem:[#allocation2 + $0x28] sm:$0xff] }
 0xd9b   : > { %22191 = vmatprep.subr.bf16.mxu0 %v24180_v40  ;;  %v10348_v40 = vadd.f32 %v28335_v30, %v28333_v45  ;;  %v10349_v55 = vsel %vm10343_vm15, %v28337_v56, 0.0 }
 0xd9d   : > { %v10350_v20 = vadd.f32 %v10349_v55, %v10348_v40  ;;  %v24262_v40 = vld [vmem:[%s29937_s22 + $0x30] ss:$12 sps:$4 sm:$0xff]   ;;  %v24267_v55 = vld [vmem:[%s29937_s22 + $0x4c] ss:$12 sps:$4 sm:$0xff]  }
 0xd9e   : > { %22192 = vmatpush3.bf16.msra.mxu0 %v24181_v16 }
 0xd9f   : > { %22199 = vmatprep.subr.bf16.mxu0 %v24211_v61  ;;  %10351 = vadd.xlane.f32.xlu1 %v10350_v20  ;;  %v24265_v20 = vld [vmem:[%s29937_s22 + $0x48] ss:$12 sps:$4 sm:$0xff]  }
 0xda1   : > { %10943 = vmatmul.mubr.f32.vlgmr.msra.gmra.mrb[2].mxu0 %v28202_v26  ;;  %v24232_v26 = vld [vmem:[%s29934_s11 + $0x68] ss:$12 sps:$4 sm:$0xff]  }
 0xda2   : > { %22200 = vmatpush3.bf16.msra.mxu0 %v24212_v35  ;;  %v11071_v35 = vrot.slane %v11058_v41, %v28328_v52 }
 0xda3   : > { %22201 = vmatprep.subr.bf16.mxu0 %v24216_v18  ;;  %v11063_v18 = vrot.slane %v11058_v41, %v28312_v44  ;;  %v24271_v41 = vld [vmem:[%s29937_s22 + $0x78] ss:$12 sps:$4 sm:$0xff]  }
 0xda6   : > { %22202 = vmatpush3.bf16.msra.mxu0 %v24217_v51 }
 0xda7   : > { %22203 = vmatprep.subr.bf16.mxu0 %v24221_v62 }
 0xdaa   : > { %22204 = vmatpush3.bf16.msra.mxu0 %v24222_v19 }
 0xdab   : > { %22205 = vmatprep.subr.bf16.mxu0 %v24226_v47 }
 0xdae   : > { %22206 = vmatpush3.bf16.msra.mxu0 %v24227_v0 }
 0xdaf   : > { %22207 = vmatprep.subr.bf16.mxu0 %v24231_v27 }
 0xdb2   : > { %22208 = vmatpush3.bf16.msra.mxu0 %v24232_v26 }
 0xdb3   : > { %22209 = vmatprep.subr.bf16.mxu0 %v24236_v32 }
 0xdb6   : > { %22210 = vmatpush3.bf16.msra.mxu0 %v24237_v23 }
 0xdb7   : > { %22211 = vmatprep.subr.bf16.mxu0 %v24241_v39 }
 0xdba   : > { %22212 = vmatpush3.bf16.msra.mxu0 %v24242_v1 }
 0xdbb   : > { %22213 = vmatprep.subr.bf16.mxu0 %v24246_v46  ;;  %v24856_v46 = vld [vmem:[#allocation3] sm:$0x3f] }
 0xdbe   : > { %22214 = vmatpush3.bf16.msra.mxu0 %v24247_v50 }
 0xdbf   : > { %22639 = vmatprep.subr.bf16.mxu0 %v25801_v48 }
 0xe1a   : > { %v10982_v42 = vpop.f32.mrb[0].mxu1 }
 0xe1b   : > { %v22638_v49 = vpop.f32.mrb[1].mxu1 }
 0xe54   : > { %v10905_v57 = vpop.f32.mrb[0].mxu0 }
 0xe55   : > { %v10907_v21 = vpop.f32.mrb[1].mxu0  ;;  %v23170_v28 = vadd.f32 %v10905_v57, %v10511_v38  ;;  %v28361_v38 = vld [vmem:[#allocation2 + $0x10] sm:$0xff] }
 0xe56   : > { %v23171_v22 = vadd.f32 %v10907_v21, %v10515_v60  ;;  %v28359_v60 = vld [vmem:[#allocation2 + $0x8] sm:$0xff] }
 0xe58   : > { %11398 = vmatprep.mubr.f32.mxu1 %v23171_v22  ;;  %11476 = vmatprep.mubr.f32.mxu0 %v23171_v22 }
 0xe59   : > { %11399 = vmatmul.mubr.f32.vlgmr.msra.gmra.mrb[2].mxu1 %v23170_v28  ;;  %11477 = vmatmul.mubr.f32.vlgmr.msra.gmra.mrb[4].mxu0 %v23170_v28  ;;  %v10344_v28 = vsel %vm10343_vm15, %v28361_v38, 0.0 }
 0xe5a   : > { %11406 = vmatpush1.bf16.msra.mxu1 %v24248_v3  ;;  %22640 = vmatpush3.bf16.msra.mxu0 %v24251_v33  ;;  %v10342_v3 = vadd.f32 %v28359_v60, %v28357_v31 }
 0xe5b   : > { %11407 = vmatprep.subr.bf16.mxu1 %v24254_v4  ;;  %22641 = vmatprep.subr.bf16.mxu0 %v25801_v48 }
 0xe5c   : > { %11437 = vmatprep.mubr.f32.mxu1 %v25801_v48  ;;  %22643 = vmatprep.mubr.msk.f32.mxu0 %vm25802_vm14, %v25801_v48 }
 0xe5e   : > { %11408 = vmatpush1.bf16.msra.mxu1 %v24252_v25  ;;  %22642 = vmatpush3.bf16.msra.mxu0 %v24255_v59  ;;  %v10345_v25 = vadd.f32 %v10344_v28, %v10342_v3  ;;  %v24256_v59 = vld [vmem:[%s29937_s22] ss:$12 sps:$4 sm:$0xff]  }
 0xe74   : > { %v22193_v29 = vpop.f32.mrb[2].mxu0 }
 0xe75   : > { %v22194_v54 = vpop.f32.mrb[3].mxu0 }
 0xe76   : > { %v22195_v34 = vadd.f32 %v22194_v54, %v22193_v29  ;;  %v24258_v29 = vld [vmem:[%s29937_s22 + $0x4] ss:$12 sps:$4 sm:$0xff]  }
 0xe77   : > { %12084 = vmatprep.subr.bf16.mxu0 %v24258_v29  ;;  %v24259_v54 = vld [vmem:[%s29937_s22 + $0x18] ss:$12 sps:$4 sm:$0xff]  }
 0xe78   : > { %v10945_v63 = vadd.f32 %v22195_v34, %v10519_v15  ;;  %v24261_v15 = vld [vmem:[%s29937_s22 + $0x1c] ss:$12 sps:$4 sm:$0xff]   ;;  %v24264_v34 = vld [vmem:[%s29937_s22 + $0x34] ss:$12 sps:$4 sm:$0xff]  }
 0xe7a   : > { %v10983_v36 = vadd.f32 %v10982_v42, %v10945_v63  ;;  %v24283_v63 = vld [vmem:[%s29937_s22 + $0xc8] ss:$12 sps:$4 sm:$0xff]  }
 0xe7b   : > { %22221 = vmatprep.subr.bf16.mxu1 %v24283_v63 }
 0xe7c   : > { %21337 = vmatmul.mubr.msk.f32.vlgmr.msra.gmra.mrb[2].mxu1 %vm10343_vm15, %v10983_v36  ;;  %22644 = vmatmul.mubr.msk.f32.vlgmr.msra.gmra.mrb[6].mxu0 %vm10343_vm15, %v10983_v36  ;;  %v24284_v36 = vld [vmem:[%s29937_s22 + $0x8] ss:$12 sps:$4 sm:$0xff]  }
 0xe7d   : > { %12085 = vmatpush1.bf16.msra.mxu0 %v24256_v59  ;;  %22222 = vmatpush3.bf16.msra.mxu1 %v24284_v36 }
 0xe7e   : > { %12086 = vmatprep.subr.bf16.mxu0 %v24261_v15 }
 0xe81   : > { %12087 = vmatpush1.bf16.msra.mxu0 %v24259_v54 }
 0xe82   : > { %12088 = vmatprep.subr.bf16.mxu0 %v24264_v34 }
 0xe85   : > { %12089 = vmatpush1.bf16.msra.mxu0 %v24262_v40 }
 0xe86   : > { %12090 = vmatprep.subr.bf16.mxu0 %v24267_v55 }
 0xe89   : > { %12091 = vmatpush1.bf16.msra.mxu0 %v24265_v20 }
 0xf2c   : > { %v22215_v16 = vpop.f32.mrb[4].mxu0 }
 0xf2d   : > { %v22216_v61 = vpop.f32.mrb[5].mxu0 }
 0xf2e   : > { %v22217_v11 = vadd.f32 %v22216_v61, %v22215_v16  ;;  %v24270_v16 = vld [vmem:[%s29937_s22 + $0x64] ss:$12 sps:$4 sm:$0xff]   ;;  %v24268_v61 = vld [vmem:[%s29937_s22 + $0x60] ss:$12 sps:$4 sm:$0xff]  }
 0xf2f   : > { %12092 = vmatprep.subr.bf16.mxu0 %v24270_v16 }
 0xf30   : > { %v11479_v51 = vadd.f32 %v22217_v11, %v11071_v35  ;;  %v24273_v11 = vld [vmem:[%s29937_s22 + $0x7c] ss:$12 sps:$4 sm:$0xff]   ;;  %12093 = vmatpush1.bf16.msra.mxu0 %v24268_v61  ;;  %v24276_v35 = vld [vmem:[%s29937_s22 + $0x94] ss:$12 sps:$4 sm:$0xff]  }
 0xf31   : > { %12094 = vmatprep.subr.bf16.mxu0 %v24273_v11  ;;  %v24287_v61 = vld [vmem:[%s29937_s22 + $0xdc] ss:$12 sps:$4 sm:$0xff]   ;;  %v24288_v11 = vld [vmem:[%s29937_s22 + $0xe0] ss:$12 sps:$4 sm:$0xff]  }
 0xf32   : > { %22223 = vmatprep.subr.bf16.mxu1 %v24288_v11 }
 0xf34   : > { %12095 = vmatpush1.bf16.msra.mxu0 %v24271_v41  ;;  %v24285_v41 = vld [vmem:[%s29937_s22 + $0xd8] ss:$12 sps:$4 sm:$0xff]  }
 0xf35   : > { %12096 = vmatprep.subr.bf16.mxu0 %v24276_v35  ;;  %v24289_v35 = vld [vmem:[%s29937_s22 + $0x20] ss:$12 sps:$4 sm:$0xff]  }
 0xf36   : > { %22224 = vmatpush3.bf16.msra.mxu1 %v24289_v35 }
 0xf4f   : > { %v11439_v62 = vpop.f32.mrb[2].mxu1  ;;  %v11516_v19 = vpop.f32.mrb[6].mxu0 }
 0xf50   : > { %v23172_v47 = vadd.f32 %v11439_v62, %v11063_v18  ;;  %v11517_v0 = vadd.f32 %v11516_v19, %v11479_v51  ;;  %v11441_v27 = vpop.f32.mrb[3].mxu1  ;;  %v22645_v26 = vpop.f32.mrb[7].mxu0  ;;  %v24274_v18 = vld [vmem:[%s29937_s22 + $0x90] ss:$12 sps:$4 sm:$0xff]   ;;  %v24277_v51 = vld [vmem:[%s29937_s22 + $0xa8] ss:$12 sps:$4 sm:$0xff]  }
 0xf51   : > { %v23173_v32 = vadd.f32 %v11441_v27, %v11067_v17  ;;  %v24279_v17 = vld [vmem:[%s29937_s22 + $0xac] ss:$12 sps:$4 sm:$0xff]   ;;  %12097 = vmatpush1.bf16.msra.mxu0 %v24274_v18  ;;  %v24282_v62 = vld [vmem:[%s29937_s22 + $0xc4] ss:$12 sps:$4 sm:$0xff]   ;;  %v24292_v18 = vld [vmem:[%s29937_s22 + $0xf4] ss:$12 sps:$4 sm:$0xff]  }
 0xf52   : > { %v11537_v39 = vrot.slane %v11517_v0, %v28197_v37  ;;  %12098 = vmatprep.subr.bf16.mxu0 %v24279_v17  ;;  %v24280_v19 = vld [vmem:[%s29937_s22 + $0xc0] ss:$12 sps:$4 sm:$0xff]   ;;  %v24293_v17 = vld [vmem:[%s29937_s22 + $0xf8] ss:$12 sps:$4 sm:$0xff]  }
 0xf53   : > { %v11523_v23 = vcombine.low %v23172_v47, %v23173_v32  ;;  %v25804_v47 = vmov 269488144   ;;  %v10352_v32 = vpop.xlane.xlu1 %10351  ;;  %22225 = vmatprep.subr.bf16.mxu1 %v24293_v17 }
 0xf54   : > { %v11575_v0 = vunpack.c.l.s4 %v25804_v47  ;;  %v24298_v47 = vld [vmem:[%s29937_s22 + $0x110] ss:$12 sps:$4 sm:$0xff]  }
 0xf55   : > { %v11530_v1 = vrot.slane %v11523_v23, %v28197_v37  ;;  %12099 = vmatpush1.bf16.msra.mxu0 %v24277_v51  ;;  %v24290_v51 = vld [vmem:[%s29937_s22 + $0xf0] ss:$12 sps:$4 sm:$0xff]  }
 0xf56   : > { %12100 = vmatprep.subr.bf16.mxu0 %v24282_v62  ;;  %v11576_v27 = vunpack.c.0.s8 %v11575_v0  ;;  %v24294_v62 = vld [vmem:[%s29937_s22 + $0x38] ss:$12 sps:$4 sm:$0xff]   ;;  %v24295_v0 = vld [vmem:[%s29937_s22 + $0x108] ss:$12 sps:$4 sm:$0xff]  }
 0xf57   : > { %v11538_v53 = vcombine.low %v11530_v1, %v11537_v39  ;;  %v10355_v1 = vmul.f32 0.0034722222, %v10352_v32  ;;  %22226 = vmatpush3.bf16.msra.mxu1 %v24294_v62  ;;  %v24302_v32 = vld [vmem:[%s29937_s22 + $0x124] ss:$12 sps:$4 sm:$0xff]  }
 0xf58   : > { %v28391_v26 = vsub.s32 %v11576_v27, %v28192_v58  ;;  %v24299_v27 = vld [vmem:[%s29937_s22 + $0x50] ss:$12 sps:$4 sm:$0xff]   ;;  %22227 = vmatprep.subr.bf16.mxu1 %v24298_v47 }
 0xf59   : > { %v28350_v43 = vadd.f32 %v24856_v46, %v11538_v53  ;;  %12101 = vmatpush1.bf16.msra.mxu0 %v24280_v19  ;;  %v24297_v19 = vld [vmem:[%s29937_s22 + $0x10c] ss:$12 sps:$4 sm:$0xff]  }
 0xf5a   : > { %12102 = vmatprep.subr.bf16.mxu0 %v24287_v61 }
 0xf5b   : > { %v11544_v50 = vcombine.high %v28350_v43, %v28350_v43  ;;  %v11551_v2 = vrot.slane %v28350_v43, %v28197_v37  ;;  %22228 = vmatpush3.bf16.msra.mxu1 %v24299_v27 }
 0xf5d   : > { %v11558_v42 = vrot.slane %v11544_v50, %v28197_v37  ;;  %v11559_v49 = vcombine.high %v11551_v2, %v11551_v2  ;;  %v11564_v57 = vsel %vm11563_vm0, %v11551_v2, 0.0  ;;  %12103 = vmatpush1.bf16.msra.mxu0 %v24285_v41 }
 0xf5e   : > { %12104 = vmatprep.subr.bf16.mxu0 %v24292_v18 }
 0xf5f   : > { %v11565_v21 = vsel %vm11563_vm0, %v11559_v49, 0.0  ;;  %v11568_v33 = vsel %vm11567_vm4, %v11558_v42, 0.0  ;;  %v28398_v42 = vsub.f32 %v28333_v45, %v10355_v1  ;;  %v28401_v49 = vsub.f32 %v28335_v30, %v10355_v1 }
 0xf60   : > { %v11566_v22 = vadd.f32 %v11565_v21, %v11564_v57 }
 0xf61   : > { %12105 = vmatpush1.bf16.msra.mxu0 %v24290_v51 }
 0xf62   : > { %v11569_v4 = vadd.f32 %v11568_v33, %v11566_v22  ;;  %12106 = vmatprep.subr.bf16.mxu0 %v24297_v19 }
 0xf64   : > { %11570 = vadd.xlane.f32.xlu0 %v11569_v4 }
 0xf65   : > { %12107 = vmatpush1.bf16.msra.mxu0 %v24295_v0 }
 0xf66   : > { %12108 = vmatprep.subr.bf16.mxu0 %v24302_v32 }
 0xf68   : > { %10346 = vadd.xlane.f32.xlu0 %v10345_v25 }
 0xff1   : > { %v11571_v23 = vpop.xlane.xlu0 %11570 }
 0xff2   : > { %v11572_v39 = vmul.f32 0.0034722222, %v11571_v23  ;;  %v24303_v23 = vld [vmem:[%s29937_s22 + $0x128] ss:$12 sps:$4 sm:$0xff]  }
 0xff3   : > { %22229 = vmatprep.subr.bf16.mxu1 %v24303_v23 }
 0xff4   : > { %v11580_v53 = vrot.slane %v11572_v39, %v28391_v26  ;;  %v24300_v39 = vld [vmem:[%s29937_s22 + $0x120] ss:$12 sps:$4 sm:$0xff]  }
 0xff5   : > { %v10347_v46 = vpop.xlane.xlu0 %10346  ;;  %12109 = vmatpush1.bf16.msra.mxu0 %v24300_v39 }
 0xff6   : > { %v28395_v50 = vsub.f32 %v28350_v43, %v11580_v53  ;;  %v10354_v2 = vmul.f32 0.0034722222, %v10347_v46  ;;  %v28415_v43 = vsub.f32 %v28337_v56, %v10355_v1  ;;  %v10366_v56 = vmul.f32 %v28401_v49, %v28401_v49  ;;  %v24304_v1 = vld [vmem:[%s29937_s22 + $0x68] ss:$12 sps:$4 sm:$0xff]   ;;  %v24308_v46 = vld [vmem:[%s29937_s22 + $0x140] ss:$12 sps:$4 sm:$0xff]  }
 0xff7   : > { %22230 = vmatpush3.bf16.msra.mxu1 %v24304_v1  ;;  %v24307_v53 = vld [vmem:[%s29937_s22 + $0x13c] ss:$12 sps:$4 sm:$0xff]  }
 0xff8   : > { %v11583_v57 = vmul.f32 %v28395_v50, %v28395_v50  ;;  %v28406_v21 = vsub.f32 %v28357_v31, %v10354_v2  ;;  %v28409_v22 = vsub.f32 %v28359_v60, %v10354_v2  ;;  %v28412_v3 = vsub.f32 %v28361_v38, %v10354_v2  ;;  %v24305_v2 = vld [vmem:[%s29937_s22 + $0x138] ss:$12 sps:$4 sm:$0xff]   ;;  %12110 = vmatprep.subr.bf16.mxu0 %v24307_v53 }
 0xff9   : > { %v10365_v38 = vmul.f32 %v28398_v42, %v28398_v42  ;;  %v10367_v29 = vmul.f32 %v28415_v43, %v28415_v43  ;;  %22231 = vmatprep.subr.bf16.mxu1 %v24308_v46  ;;  %12111 = vmatpush1.bf16.msra.mxu0 %v24305_v2  ;;  %v28489_v46 = vld [vmem:[%s29940_s21] sm:$0x7] }
 0xffa   : > { %v10362_v45 = vmul.f32 %v28406_v21, %v28406_v21  ;;  %v10363_v30 = vmul.f32 %v28409_v22, %v28409_v22  ;;  %v10364_v33 = vmul.f32 %v28412_v3, %v28412_v3  ;;  %v11585_v31 = vcombine.high %v11583_v57, %v11583_v57 }
 0xffb   : > { %v11592_v28 = vrot.slane %v11583_v57, %v28197_v37  ;;  %v10373_v36 = vadd.f32 %v10366_v56, %v10365_v38  ;;  %v10374_v55 = vsel %vm10343_vm15, %v10367_v29, 0.0  ;;  %v24309_v57 = vld [vmem:[%s29937_s22 + $0x80] ss:$12 sps:$4 sm:$0xff]   ;;  %v24319_v38 = vld [vmem:[%s29937_s22 + $0xb0] ss:$12 sps:$4 sm:$0xff]  }
 0xffc   : > { %v10368_v60 = vadd.f32 %v10363_v30, %v10362_v45  ;;  %v10369_v4 = vsel %vm10343_vm15, %v10364_v33, 0.0  ;;  %v11599_v25 = vrot.slane %v11585_v31, %v28197_v37  ;;  %22232 = vmatpush3.bf16.msra.mxu1 %v24309_v57  ;;  %v24310_v45 = vld [vmem:[%s29937_s22 + $0x150] ss:$12 sps:$4 sm:$0xff]   ;;  %v24312_v30 = vld [vmem:[%s29937_s22 + $0x154] ss:$12 sps:$4 sm:$0xff]  }
 0xffd   : > { %v11600_v59 = vcombine.high %v11592_v28, %v11592_v28  ;;  %v11604_v54 = vsel %vm11563_vm0, %v11592_v28, 0.0  ;;  %v10375_v16 = vadd.f32 %v10374_v55, %v10373_v36  ;;  %v24313_v33 = vld [vmem:[%s29937_s22 + $0x158] ss:$12 sps:$4 sm:$0xff]   ;;  %12112 = vmatprep.subr.bf16.mxu0 %v24312_v30  ;;  %v24320_v57 = vld [vmem:[%s29937_s22 + $0x180] ss:$12 sps:$4 sm:$0xff]  }
 0xffe   : > { %v10370_v15 = vadd.f32 %v10369_v4, %v10368_v60  ;;  %v11607_v40 = vsel %vm11567_vm4, %v11599_v25, 0.0  ;;  %v24314_v31 = vld [vmem:[%s29937_s22 + $0x98] ss:$12 sps:$4 sm:$0xff]   ;;  %22233 = vmatprep.subr.bf16.mxu1 %v24313_v33  ;;  %v24318_v60 = vld [vmem:[%s29937_s22 + $0x170] ss:$12 sps:$4 sm:$0xff]   ;;  %12113 = vmatpush1.bf16.msra.mxu0 %v24310_v45  ;;  %v28498_v33 = vrot.slane %v28489_v46, %v28309_v24 }
 0xfff   : > { %v11605_v34 = vsel %vm11563_vm0, %v11600_v59, 0.0  ;;  %v24317_v28 = vld [vmem:[%s29937_s22 + $0x16c] ss:$12 sps:$4 sm:$0xff]   ;;  %v24315_v4 = vld [vmem:[%s29937_s22 + $0x168] ss:$12 sps:$4 sm:$0xff]  }
0x1000   : > { %10371 = vadd.xlane.f32.xlu0 %v10370_v15  ;;  %v11606_v63 = vadd.f32 %v11605_v34, %v11604_v54  ;;  %22234 = vmatpush3.bf16.msra.mxu1 %v24314_v31  ;;  %v24322_v56 = vld [vmem:[%s29937_s22 + $0x184] ss:$12 sps:$4 sm:$0xff]   ;;  %v11542_v54 = vld [vmem:[%s29939_s17] sm:$0x7]  ;;  %v28501_v31 = vld [vmem:[%s29941_s16] sm:$0x7] }
0x1001   : > { %12114 = vmatprep.subr.bf16.mxu0 %v24317_v28  ;;  %22235 = vmatprep.subr.bf16.mxu1 %v24318_v60  ;;  %v11541_v29 = vld [vmem:[%s29938_s27] sm:$0x7]  ;;  %v11663_v55 = vrot.slane %v11542_v54, %v28309_v24  ;;  %v11667_v11 = vrot.slane %v11542_v54, %v28328_v52  ;;  %v24323_v45 = vld [vmem:[%s29937_s22 + $0x188] ss:$12 sps:$4 sm:$0xff]  }
0x1002   : > { %v11608_v20 = vadd.f32 %v11607_v40, %v11606_v63  ;;  %12115 = vmatpush1.bf16.msra.mxu0 %v24315_v4  ;;  %v11628_v63 = vrot.slane %v11541_v29, %v28312_v44  ;;  %v11632_v36 = vrot.slane %v11541_v29, %v28309_v24  ;;  %v11659_v40 = vrot.slane %v11542_v54, %v28312_v44  ;;  %v24326_v30 = vld [vmem:[%s29937_s22 + $0x19c] ss:$12 sps:$4 sm:$0xff]   ;;  %v24324_v28 = vld [vmem:[%s29937_s22 + $0x198] ss:$12 sps:$4 sm:$0xff]   ;;  %v24327_v60 = vld [vmem:[%s29937_s22 + $0x1a0] ss:$12 sps:$4 sm:$0xff]  }
0x1003   : > { %12123 = vmatprep.subr.bf16.mxu0 %v24322_v56  ;;  %v11682_v62 = vrot.slane %v11667_v11, %v28197_v37  ;;  %v24330_v4 = vld [vmem:[%s29942_s30 + $0x4] ss:$12 sps:$4 sm:$0xff]  }
0x1004   : > { %11609 = vadd.xlane.f32.xlu1 %v11608_v20  ;;  %22236 = vmatpush3.bf16.msra.mxu1 %v24319_v38  ;;  %v11637_v61 = vcombine.low %v11628_v63, %v11632_v36  ;;  %v11668_v41 = vcombine.low %v11659_v40, %v11663_v55  ;;  %v24331_v38 = vld [vmem:[%s29942_s30 + $0xc8] ss:$12 sps:$4 sm:$0xff]   ;;  %v24336_v63 = vld [vmem:[%s29942_s30 + $0xe0] ss:$12 sps:$4 sm:$0xff]   ;;  %v24333_v40 = vld [vmem:[%s29942_s30 + $0x18] ss:$12 sps:$4 sm:$0xff]  }
0x1005   : > { %22646 = vmatprep.subr.bf16.mxu1 %v25801_v48  ;;  %v24337_v55 = vld [vmem:[%s29942_s30 + $0x20] ss:$12 sps:$4 sm:$0xff]   ;;  %v24338_v11 = vld [vmem:[%s29942_s30 + $0x30] ss:$12 sps:$4 sm:$0xff]  }
0x1006   : > { %v11644_v18 = vrot.slane %v11637_v61, %v28197_v37  ;;  %v11675_v51 = vrot.slane %v11668_v41, %v28197_v37  ;;  %v24341_v61 = vld [vmem:[%s29942_s30 + $0xf8] ss:$12 sps:$4 sm:$0xff]  }
0x1007   : > { %v24342_v41 = vld [vmem:[%s29942_s30 + $0x38] ss:$12 sps:$4 sm:$0xff]  }
0x1008   : > { %10376 = vadd.xlane.f32.xlu1 %v10375_v16  ;;  %v11636_v16 = vrot.slane %v11541_v29, %v28328_v52  ;;  %v11683_v32 = vcombine.low %v11675_v51, %v11682_v62  ;;  %v24343_v51 = vld [vmem:[%s29942_s30 + $0x48] ss:$12 sps:$4 sm:$0xff]   ;;  %v24347_v62 = vld [vmem:[%s29942_s30 + $0x50] ss:$12 sps:$4 sm:$0xff]  }
0x100a   : > { %v11651_v17 = vrot.slane %v11636_v16, %v28197_v37 }
0x100c   : > { %v11652_v0 = vcombine.low %v11644_v18, %v11651_v17  ;;  %v24346_v17 = vld [vmem:[%s29942_s30 + $0x110] ss:$12 sps:$4 sm:$0xff]  }
0x108d   : > { %v10372_v34 = vpop.xlane.xlu0 %10371 }
0x108e   : > { %v10378_v20 = vmul.f32 0.0034722222, %v10372_v34  ;;  %v24335_v34 = vld [vmem:[%s29942_s30 + $0x1c] ss:$12 sps:$4 sm:$0xff]  }
0x1090   : > { %v10380_v35 = vadd.f32 1e-05, %v10378_v20  ;;  %v24340_v20 = vld [vmem:[%s29942_s30 + $0x34] ss:$12 sps:$4 sm:$0xff]  }
0x1091   : > { %v11610_v25 = vpop.xlane.xlu1 %11609 }
0x1092   : > { %v11611_v59 = vmul.f32 0.0034722222, %v11610_v25  ;;  %v28516_v25 = vrot.slane %v28501_v31, %v28309_v24 }
0x1094   : > { %v11612_v15 = vadd.f32 1e-05, %v11611_v59  ;;  %v24328_v59 = vld [vmem:[%s29942_s30] ss:$12 sps:$4 sm:$0xff]  }
0x1095   : > { %v10377_v36 = vpop.xlane.xlu1 %10376 }
0x1096   : > { %24814 = vrsqrt.f32 %v11612_v15  ;;  %v24332_v15 = vld [vmem:[%s29942_s30 + $0x8] ss:$12 sps:$4 sm:$0xff]   ;;  %v10379_v16 = vmul.f32 0.0034722222, %v10377_v36 }
0x1097   : > { %24816 = vrsqrt.f32 %v10380_v35  ;;  %v24345_v35 = vld [vmem:[%s29942_s30 + $0x4c] ss:$12 sps:$4 sm:$0xff]  }
0x1098   : > { %v10381_v18 = vadd.f32 1e-05, %v10379_v16 }
0x109a   : > { %24818 = vrsqrt.f32 %v10381_v18  ;;  %v24381_v18 = vld [vmem:[%s29943_s15 + $0x4] ss:$12 sps:$4 sm:$0xff]  }
0x10a0   : > { %v24815_v19 = vpop.eup %24814 }
0x10a1   : > { %v11621_v47 = vrot.slane %v24815_v19, %v28391_v26  ;;  %v28486_v53 = vpop.eup %24816  ;;  %v24350_v19 = vld [vmem:[%s29942_s30 + $0x64] ss:$12 sps:$4 sm:$0xff]  }
0x10a3   : > { %v11623_v27 = vmul.f32 %v11621_v47, %v28395_v50  ;;  %v10385_v50 = vmul.f32 %v28486_v53, %v28409_v22  ;;  %v24351_v47 = vld [vmem:[%s29942_s30 + $0x128] ss:$12 sps:$4 sm:$0xff]  }
0x10a5   : > { %v11654_v23 = vmul.f32 %v11652_v0, %v11623_v27  ;;  %v10407_v56 = vmul.f32 %v28498_v33, %v10385_v50  ;;  %v24348_v0 = vld [vmem:[%s29942_s30 + $0x60] ss:$12 sps:$4 sm:$0xff]   ;;  %v24352_v27 = vld [vmem:[%s29942_s30 + $0x68] ss:$12 sps:$4 sm:$0xff]   ;;  %v24358_v50 = vld [vmem:[%s29942_s30 + $0x90] ss:$12 sps:$4 sm:$0xff]  }
0x10a7   : > { %v28482_v39 = vadd.f32 %v11683_v32, %v11654_v23  ;;  %v28522_v54 = vadd.f32 %v28516_v25, %v10407_v56  ;;  %v24355_v32 = vld [vmem:[%s29942_s30 + $0x7c] ss:$12 sps:$4 sm:$0xff]   ;;  %v24356_v23 = vld [vmem:[%s29942_s30 + $0x140] ss:$12 sps:$4 sm:$0xff]  }
0x10a9   : > { %v11783_v1 = vrot.slane %v28482_v39, %v28197_v37  ;;  %v11776_v22 = vcombine.high %v28482_v39, %v28482_v39 }
0x10ab   : > { %v11791_v2 = vcombine.high %v11783_v1, %v11783_v1  ;;  %v11790_v29 = vrot.slane %v11776_v22, %v28197_v37  ;;  %v24366_v22 = vld [vmem:[%s29942_s30 + $0x170] ss:$12 sps:$4 sm:$0xff]  }
0x10ad   : > { %12116 = vmatprep.mubr.f32.mxu0 %v11791_v2  ;;  %12194 = vmatprep.mubr.f32.mxu1 %v11791_v2  ;;  %v24357_v2 = vld [vmem:[%s29942_s30 + $0x80] ss:$12 sps:$4 sm:$0xff]  }
0x10ae   : > { %12117 = vmatmul.mubr.f32.vlgmr.msra.gmra.mrb[8].mxu0 %v11783_v1  ;;  %12195 = vmatmul.mubr.f32.vlgmr.msra.gmra.mrb[4].mxu1 %v11783_v1  ;;  %v24353_v1 = vld [vmem:[%s29942_s30 + $0x78] ss:$12 sps:$4 sm:$0xff]  }
0x10af   : > { %12124 = vmatpush1.bf16.msra.mxu0 %v24320_v57  ;;  %22647 = vmatpush3.bf16.msra.mxu1 %v24323_v45  ;;  %v24360_v57 = vld [vmem:[%s29942_s30 + $0x94] ss:$12 sps:$4 sm:$0xff]   ;;  %v24361_v45 = vld [vmem:[%s29942_s30 + $0x158] ss:$12 sps:$4 sm:$0xff]  }
0x10b0   : > { %12125 = vmatprep.subr.bf16.mxu0 %v24326_v30  ;;  %22648 = vmatprep.subr.bf16.mxu1 %v25801_v48  ;;  %v24819_v30 = vpop.eup %24818 }
0x10b1   : > { %22650 = vmatprep.mubr.msk.f32.mxu1 %vm25802_vm14, %v25801_v48  ;;  %12155 = vmatprep.mubr.f32.mxu0 %v25801_v48  ;;  %v10388_v56 = vmul.f32 %v24819_v30, %v28401_v49  ;;  %v10387_v36 = vmul.f32 %v24819_v30, %v28398_v42  ;;  %v10386_v49 = vmul.f32 %v28486_v53, %v28412_v3  ;;  %v24375_v42 = vld [vmem:[%s29942_s30 + $0x1a0] ss:$12 sps:$4 sm:$0xff]  }
0x10b3   : > { %12126 = vmatpush1.bf16.msra.mxu0 %v24324_v28  ;;  %22649 = vmatpush3.bf16.msra.mxu1 %v24327_v60  ;;  %v24362_v28 = vld [vmem:[%s29942_s30 + $0x98] ss:$12 sps:$4 sm:$0xff]  }
0x10b4   : > { %12621 = vmatprep.subr.bf16.mxu1 %v24330_v4  ;;  %22243 = vmatprep.subr.bf16.mxu0 %v24331_v38  ;;  %v24365_v60 = vld [vmem:[%s29942_s30 + $0xac] ss:$12 sps:$4 sm:$0xff]   ;;  %v10384_v4 = vmul.f32 %v28486_v53, %v28406_v21  ;;  %v10394_v38 = vrot.slane %v28489_v46, %v28312_v44  ;;  %v24371_v21 = vld [vmem:[%s29942_s30 + $0x188] ss:$12 sps:$4 sm:$0xff]  }
0x10b6   : > { %22651 = vmatmul.mubr.msk.f32.vlgmr.msra.gmra.mrb[6].mxu1 %vm10343_vm15, %v11790_v29  ;;  %21393 = vmatmul.mubr.msk.f32.vlgmr.msra.gmra.mrb[8].mxu0 %vm10343_vm15, %v11790_v29  ;;  %v24367_v29 = vld [vmem:[%s29942_s30 + $0xb0] ss:$12 sps:$4 sm:$0xff]  }
0x10b7   : > { %12622 = vmatpush1.bf16.msra.mxu1 %v24328_v59  ;;  %12653 = vmatprep.mubr.f32.mxu1 %v28522_v54  ;;  %v24363_v59 = vld [vmem:[%s29942_s30 + $0xa8] ss:$12 sps:$4 sm:$0xff]  }
0x10b8   : > { %22244 = vmatpush3.bf16.msra.mxu0 %v24332_v15  ;;  %12743 = vmatprep.mubr.f32.mxu0 %v28522_v54  ;;  %v24370_v15 = vld [vmem:[%s29942_s30 + $0xc4] ss:$12 sps:$4 sm:$0xff]  }
0x10b9   : > { %12623 = vmatprep.subr.bf16.mxu1 %v24335_v34  ;;  %22245 = vmatprep.subr.bf16.mxu0 %v24336_v63  ;;  %v10406_v34 = vmul.f32 %v10394_v38, %v10384_v4  ;;  %v10416_v63 = vrot.slane %v28501_v31, %v28312_v44  ;;  %v24403_v4 = vld [vmem:[%s29943_s15 + $0x60] ss:$12 sps:$4 sm:$0xff]  }
0x10bb   : > { %12624 = vmatpush1.bf16.msra.mxu1 %v24333_v40  ;;  %v10410_v40 = vmul.f32 %v28498_v33, %v10388_v56  ;;  %v28572_v16 = vadd.f32 %v10416_v63, %v10406_v34  ;;  %v10389_v33 = vmul.f32 %v24819_v30, %v28415_v43  ;;  %v24394_v30 = vld [vmem:[%s29942_s30 + $0x138] ss:$12 sps:$4 sm:$0xff]   ;;  %v24411_v56 = vld [vmem:[%s29943_s15 + $0x7c] ss:$12 sps:$4 sm:$0xff]   ;;  %v24417_v34 = vld [vmem:[%s29943_s15 + $0x94] ss:$12 sps:$4 sm:$0xff]  }
0x10bc   : > { %22246 = vmatpush3.bf16.msra.mxu0 %v24337_v55  ;;  %12625 = vmatprep.subr.bf16.mxu1 %v24340_v20  ;;  %v10402_v55 = vrot.slane %v28489_v46, %v28328_v52  ;;  %v24368_v20 = vld [vmem:[%s29942_s30 + $0xc0] ss:$12 sps:$4 sm:$0xff]   ;;  %v10424_v46 = vrot.slane %v28501_v31, %v28328_v52  ;;  %v24376_v31 = vld [vmem:[%s29942_s30 + $0xf0] ss:$12 sps:$4 sm:$0xff]  }
0x10bd   : > { %22247 = vmatprep.subr.bf16.mxu0 %v24341_v61  ;;  %v24374_v61 = vld [vmem:[%s29942_s30 + $0xdc] ss:$12 sps:$4 sm:$0xff]   ;;  %v28578_v3 = vadd.f32 %v28516_v25, %v10410_v40  ;;  %v24378_v25 = vld [vmem:[%s29942_s30 + $0xf4] ss:$12 sps:$4 sm:$0xff]   ;;  %v24423_v40 = vld [vmem:[%s29943_s15 + $0xac] ss:$12 sps:$4 sm:$0xff]  }
0x10be   : > { %v10408_v53 = vmul.f32 %v10402_v55, %v10386_v49  ;;  %v10411_v43 = vmul.f32 %v10402_v55, %v10389_v33  ;;  %v24418_v49 = vld [vmem:[%s29942_s30 + $0x198] ss:$12 sps:$4 sm:$0xff]   ;;  %v24421_v55 = vld [vmem:[%s29943_s15 + $0xa8] ss:$12 sps:$4 sm:$0xff]   ;;  %v24432_v33 = vld [vmem:[%s29943_s15 + $0xe0] ss:$12 sps:$4 sm:$0xff]  }
0x10bf   : > { %12626 = vmatpush1.bf16.msra.mxu1 %v24338_v11  ;;  %v10409_v11 = vmul.f32 %v10394_v38, %v10387_v36  ;;  %v24408_v38 = vld [vmem:[%s29942_s30 + $0x16c] ss:$12 sps:$4 sm:$0xff]   ;;  %v24420_v36 = vld [vmem:[%s29942_s30 + $0x19c] ss:$12 sps:$4 sm:$0xff]  }
0x10c0   : > { %22248 = vmatpush3.bf16.msra.mxu0 %v24342_v41  ;;  %12627 = vmatprep.subr.bf16.mxu1 %v24345_v35  ;;  %v24372_v41 = vld [vmem:[%s29942_s30 + $0xd8] ss:$12 sps:$4 sm:$0xff]  }
0x10c1   : > { %22249 = vmatprep.subr.bf16.mxu0 %v24346_v17  ;;  %v28585_v35 = vadd.f32 %v10416_v63, %v10409_v11  ;;  %v28589_v17 = vadd.f32 %v10424_v46, %v10408_v53  ;;  %v24412_v63 = vld [vmem:[%s29942_s30 + $0x180] ss:$12 sps:$4 sm:$0xff]   ;;  %v24428_v11 = vld [vmem:[%s29943_s15 + $0x8] ss:$12 sps:$4 sm:$0xff]  }
0x10c2   : > { %v24431_v53 = vld [vmem:[%s29943_s15 + $0xdc] ss:$12 sps:$4 sm:$0xff]  }
0x10c3   : > { %12628 = vmatpush1.bf16.msra.mxu1 %v24343_v51  ;;  %v24379_v51 = vld [vmem:[%s29943_s15] ss:$12 sps:$4 sm:$0xff]  }
0x10c4   : > { %22250 = vmatpush3.bf16.msra.mxu0 %v24347_v62  ;;  %12629 = vmatprep.subr.bf16.mxu1 %v24350_v19  ;;  %v28596_v62 = vadd.f32 %v10424_v46, %v10411_v43  ;;  %v24384_v19 = vld [vmem:[%s29942_s30 + $0x10c] ss:$12 sps:$4 sm:$0xff]  }
0x10c5   : > { %22251 = vmatprep.subr.bf16.mxu0 %v24351_v47  ;;  %v24387_v47 = vld [vmem:[%s29943_s15 + $0x1c] ss:$12 sps:$4 sm:$0xff]   ;;  %v24433_v46 = vld [vmem:[%s29943_s15 + $0x20] ss:$12 sps:$4 sm:$0xff]   ;;  %v24437_v43 = vld [vmem:[%s29943_s15 + $0xf8] ss:$12 sps:$4 sm:$0xff]  }
0x10c7   : > { %12630 = vmatpush1.bf16.msra.mxu1 %v24348_v0  ;;  %v24382_v0 = vld [vmem:[%s29942_s30 + $0x108] ss:$12 sps:$4 sm:$0xff]  }
0x10c8   : > { %22252 = vmatpush3.bf16.msra.mxu0 %v24352_v27  ;;  %12631 = vmatprep.subr.bf16.mxu1 %v24355_v32  ;;  %v24385_v27 = vld [vmem:[%s29943_s15 + $0x18] ss:$12 sps:$4 sm:$0xff]  }
0x10c9   : > { %22253 = vmatprep.subr.bf16.mxu0 %v24356_v23  ;;  %v24390_v32 = vld [vmem:[%s29942_s30 + $0x124] ss:$12 sps:$4 sm:$0xff]   ;;  %v24393_v23 = vld [vmem:[%s29943_s15 + $0x34] ss:$12 sps:$4 sm:$0xff]  }
0x10cb   : > { %12632 = vmatpush1.bf16.msra.mxu1 %v24353_v1  ;;  %v24388_v1 = vld [vmem:[%s29942_s30 + $0x120] ss:$12 sps:$4 sm:$0xff]  }
0x10cc   : > { %22254 = vmatpush3.bf16.msra.mxu0 %v24357_v2  ;;  %12633 = vmatprep.subr.bf16.mxu1 %v24360_v57  ;;  %v24391_v2 = vld [vmem:[%s29943_s15 + $0x30] ss:$12 sps:$4 sm:$0xff]  }
0x10cd   : > { %22255 = vmatprep.subr.bf16.mxu0 %v24361_v45  ;;  %v24396_v57 = vld [vmem:[%s29942_s30 + $0x13c] ss:$12 sps:$4 sm:$0xff]   ;;  %v24399_v45 = vld [vmem:[%s29943_s15 + $0x4c] ss:$12 sps:$4 sm:$0xff]  }
0x10cf   : > { %12634 = vmatpush1.bf16.msra.mxu1 %v24358_v50  ;;  %v24397_v50 = vld [vmem:[%s29943_s15 + $0x48] ss:$12 sps:$4 sm:$0xff]  }
0x10d0   : > { %22256 = vmatpush3.bf16.msra.mxu0 %v24362_v28  ;;  %12635 = vmatprep.subr.bf16.mxu1 %v24365_v60  ;;  %v24402_v28 = vld [vmem:[%s29942_s30 + $0x154] ss:$12 sps:$4 sm:$0xff]   ;;  %v24405_v60 = vld [vmem:[%s29943_s15 + $0x64] ss:$12 sps:$4 sm:$0xff]  }
0x10d1   : > { %22257 = vmatprep.subr.bf16.mxu0 %v24366_v22  ;;  %v24400_v22 = vld [vmem:[%s29942_s30 + $0x150] ss:$12 sps:$4 sm:$0xff]  }
0x10d3   : > { %12636 = vmatpush1.bf16.msra.mxu1 %v24363_v59  ;;  %v24406_v59 = vld [vmem:[%s29942_s30 + $0x168] ss:$12 sps:$4 sm:$0xff]  }
0x10d4   : > { %22258 = vmatpush3.bf16.msra.mxu0 %v24367_v29  ;;  %12637 = vmatprep.subr.bf16.mxu1 %v24370_v15  ;;  %v24409_v29 = vld [vmem:[%s29943_s15 + $0x78] ss:$12 sps:$4 sm:$0xff]  }
0x10d5   : > { %22653 = vmatprep.subr.bf16.mxu0 %v24371_v21  ;;  %v24414_v15 = vld [vmem:[%s29942_s30 + $0x184] ss:$12 sps:$4 sm:$0xff]  }
0x10d7   : > { %12744 = vmatmul.mubr.f32.vlgmr.msra.gmra.mrb[10].mxu0 %v28572_v16  ;;  %12638 = vmatpush1.bf16.msra.mxu1 %v24368_v20  ;;  %v24427_v20 = vld [vmem:[%s29943_s15 + $0xc8] ss:$12 sps:$4 sm:$0xff]  }
0x10d8   : > { %12748 = vmatprep.mubr.f32.mxu0 %v28578_v3  ;;  %22654 = vmatpush3.bf16.msra.mxu0 %v24371_v21  ;;  %v24415_v21 = vld [vmem:[%s29943_s15 + $0x90] ss:$12 sps:$4 sm:$0xff]  }
0x10d9   : > { %12639 = vmatprep.subr.bf16.mxu1 %v24374_v61  ;;  %22655 = vmatprep.subr.bf16.mxu0 %v24375_v42  ;;  %v24426_v61 = vld [vmem:[%s29943_s15 + $0xc4] ss:$12 sps:$4 sm:$0xff]  }
0x10db   : > { %12749 = vmatmul.mubr.f32.gmra.mrb[12].mxu0 %v28585_v35  ;;  %12640 = vmatpush1.bf16.msra.mxu1 %v24372_v41  ;;  %v24429_v41 = vld [vmem:[%s29943_s15 + $0xd8] ss:$12 sps:$4 sm:$0xff]  }
0x10dc   : > { %22656 = vmatpush3.bf16.msra.mxu0 %v24375_v42  ;;  %22657 = vmatprep.mubr.msk.f32.mxu0 %vm10343_vm15, %v28589_v17  ;;  %v24424_v42 = vld [vmem:[%s29943_s15 + $0xc0] ss:$12 sps:$4 sm:$0xff]  }
0x10dd   : > { %12641 = vmatprep.subr.bf16.mxu1 %v24378_v25  ;;  %13174 = vmatprep.subr.bf16.mxu0 %v24381_v18  ;;  %v24436_v25 = vld [vmem:[%s29943_s15 + $0xf4] ss:$12 sps:$4 sm:$0xff]   ;;  %v24438_v18 = vld [vmem:[%s29943_s15 + $0x38] ss:$12 sps:$4 sm:$0xff]  }
0x10df   : > { %22658 = vmatmul.mubr.msk.f32.vlgmr.msra.gmra.mrb[14].mxu0 %vm10343_vm15, %v28596_v62  ;;  %12642 = vmatpush1.bf16.msra.mxu1 %v24376_v31  ;;  %v24434_v31 = vld [vmem:[%s29943_s15 + $0xf0] ss:$12 sps:$4 sm:$0xff]  }
0x10e0   : > { %13175 = vmatpush1.bf16.msra.mxu0 %v24379_v51  ;;  %13206 = vmatprep.mubr.f32.mxu0 %v28522_v54  ;;  %v24442_v51 = vld [vmem:[%s29943_s15 + $0x110] ss:$12 sps:$4 sm:$0xff]  }
0x10e1   : > { %12643 = vmatprep.subr.bf16.mxu1 %v24384_v19  ;;  %13176 = vmatprep.subr.bf16.mxu0 %v24387_v47  ;;  %v24441_v19 = vld [vmem:[%s29943_s15 + $0x10c] ss:$12 sps:$4 sm:$0xff]   ;;  %v24443_v47 = vld [vmem:[%s29943_s15 + $0x50] ss:$12 sps:$4 sm:$0xff]  }
0x10e3   : > { %12644 = vmatpush1.bf16.msra.mxu1 %v24382_v0  ;;  %v24439_v0 = vld [vmem:[%s29943_s15 + $0x108] ss:$12 sps:$4 sm:$0xff]  }
0x10e4   : > { %13177 = vmatpush1.bf16.msra.mxu0 %v24385_v27  ;;  %12645 = vmatprep.subr.bf16.mxu1 %v24390_v32  ;;  %v24447_v27 = vld [vmem:[%s29943_s15 + $0x128] ss:$12 sps:$4 sm:$0xff]  }
0x10e5   : > { %13178 = vmatprep.subr.bf16.mxu0 %v24393_v23  ;;  %v24448_v32 = vld [vmem:[%s29943_s15 + $0x68] ss:$12 sps:$4 sm:$0xff]   ;;  %v24444_v23 = vld [vmem:[%s29943_s15 + $0x120] ss:$12 sps:$4 sm:$0xff]  }
0x10e7   : > { %12646 = vmatpush1.bf16.msra.mxu1 %v24388_v1  ;;  %v24452_v1 = vld [vmem:[%s29943_s15 + $0x140] ss:$12 sps:$4 sm:$0xff]  }
0x10e8   : > { %13179 = vmatpush1.bf16.msra.mxu0 %v24391_v2  ;;  %12647 = vmatprep.subr.bf16.mxu1 %v24396_v57  ;;  %v24451_v2 = vld [vmem:[%s29943_s15 + $0x13c] ss:$12 sps:$4 sm:$0xff]   ;;  %v24453_v57 = vld [vmem:[%s29943_s15 + $0x80] ss:$12 sps:$4 sm:$0xff]  }
0x10e9   : > { %13180 = vmatprep.subr.bf16.mxu0 %v24399_v45  ;;  %v24449_v45 = vld [vmem:[%s29943_s15 + $0x138] ss:$12 sps:$4 sm:$0xff]  }
0x10eb   : > { %12648 = vmatpush1.bf16.msra.mxu1 %v24394_v30  ;;  %v24457_v30 = vld [vmem:[%s29943_s15 + $0x158] ss:$12 sps:$4 sm:$0xff]  }
0x10ec   : > { %13181 = vmatpush1.bf16.msra.mxu0 %v24397_v50  ;;  %12649 = vmatprep.subr.bf16.mxu1 %v24402_v28  ;;  %v24456_v50 = vld [vmem:[%s29943_s15 + $0x154] ss:$12 sps:$4 sm:$0xff]   ;;  %v24458_v28 = vld [vmem:[%s29943_s15 + $0x98] ss:$12 sps:$4 sm:$0xff]  }
0x10ed   : > { %13182 = vmatprep.subr.bf16.mxu0 %v24405_v60  ;;  %v24454_v60 = vld [vmem:[%s29943_s15 + $0x150] ss:$12 sps:$4 sm:$0xff]  }
0x10ef   : > { %12650 = vmatpush1.bf16.msra.mxu1 %v24400_v22  ;;  %v24462_v22 = vld [vmem:[%s29943_s15 + $0x170] ss:$12 sps:$4 sm:$0xff]  }
0x10f0   : > { %13183 = vmatpush1.bf16.msra.mxu0 %v24403_v4  ;;  %12651 = vmatprep.subr.bf16.mxu1 %v24408_v38  ;;  %v24461_v4 = vld [vmem:[%s29943_s15 + $0x16c] ss:$12 sps:$4 sm:$0xff]   ;;  %v24463_v38 = vld [vmem:[%s29943_s15 + $0xb0] ss:$12 sps:$4 sm:$0xff]  }
0x10f1   : > { %13184 = vmatprep.subr.bf16.mxu0 %v24411_v56  ;;  %v24459_v56 = vld [vmem:[%s29943_s15 + $0x168] ss:$12 sps:$4 sm:$0xff]  }
0x10f3   : > { %12652 = vmatpush1.bf16.msra.mxu1 %v24406_v59  ;;  %v24467_v59 = vld [vmem:[%s29943_s15 + $0x188] ss:$12 sps:$4 sm:$0xff]  }
0x10f4   : > { %13185 = vmatpush1.bf16.msra.mxu0 %v24409_v29  ;;  %12666 = vmatprep.subr.bf16.mxu1 %v24414_v15  ;;  %v24466_v29 = vld [vmem:[%s29943_s15 + $0x184] ss:$12 sps:$4 sm:$0xff]   ;;  %v24464_v15 = vld [vmem:[%s29943_s15 + $0x180] ss:$12 sps:$4 sm:$0xff]  }
0x10f5   : > { %13186 = vmatprep.subr.bf16.mxu0 %v24417_v34  ;;  %v24470_v34 = vld [vmem:[%s29943_s15 + $0x19c] ss:$12 sps:$4 sm:$0xff]  }
0x10f6   : > { %12654 = vmatmul.mubr.f32.vlgmr.msra.gmra.mrb[8].mxu1 %v28572_v16 }
0x10f7   : > { %12659 = vmatprep.mubr.f32.mxu1 %v28578_v3  ;;  %12667 = vmatpush1.bf16.msra.mxu1 %v24412_v63  ;;  %v24471_v63 = vld [vmem:[%s29943_s15 + $0x1a0] ss:$12 sps:$4 sm:$0xff]  }
0x10f8   : > { %13187 = vmatpush1.bf16.msra.mxu0 %v24415_v21  ;;  %12668 = vmatprep.subr.bf16.mxu1 %v24420_v36  ;;  %v24468_v21 = vld [vmem:[%s29943_s15 + $0x198] ss:$12 sps:$4 sm:$0xff]  }
0x10f9   : > { %13188 = vmatprep.subr.bf16.mxu0 %v24423_v40 }
0x10fa   : > { %12660 = vmatmul.mubr.f32.gmra.mrb[10].mxu1 %v28585_v35 }
0x10fb   : > { %12669 = vmatpush1.bf16.msra.mxu1 %v24418_v49  ;;  %12698 = vmatprep.mubr.f32.mxu1 %v25801_v48 }
0x10fc   : > { %13189 = vmatpush1.bf16.msra.mxu0 %v24421_v55  ;;  %22269 = vmatprep.subr.bf16.mxu1 %v24427_v20 }
0x10fd   : > { %13190 = vmatprep.subr.bf16.mxu0 %v24426_v61 }
0x10fe   : > { %21449 = vmatmul.mubr.msk.f32.vlgmr.msra.gmra.mrb[8].mxu1 %vm10343_vm15, %v28589_v17 }
0x10ff   : > { %22270 = vmatpush3.bf16.msra.mxu1 %v24428_v11  ;;  %12704 = vmatprep.mubr.f32.mxu1 %v25801_v48 }
0x1100   : > { %13191 = vmatpush1.bf16.msra.mxu0 %v24424_v42  ;;  %22271 = vmatprep.subr.bf16.mxu1 %v24432_v33 }
0x1101   : > { %13192 = vmatprep.subr.bf16.mxu0 %v24431_v53 }
0x1102   : > { %21450 = vmatmul.mubr.msk.f32.gmra.mrb[10].mxu1 %vm10343_vm15, %v28596_v62 }
0x1103   : > { %22272 = vmatpush3.bf16.msra.mxu1 %v24433_v46  ;;  %13296 = vmatprep.mubr.f32.mxu1 %v28522_v54  ;;  %v24446_v54 = vld [vmem:[%s29943_s15 + $0x124] ss:$12 sps:$4 sm:$0xff]  }
0x1104   : > { %13193 = vmatpush1.bf16.msra.mxu0 %v24429_v41  ;;  %22273 = vmatprep.subr.bf16.mxu1 %v24437_v43 }
0x1105   : > { %13194 = vmatprep.subr.bf16.mxu0 %v24436_v25  ;;  %v12310_v25 = vld [vmem:[%s29945_s25] sm:$0x7] }
0x1107   : > { %22274 = vmatpush3.bf16.msra.mxu1 %v24438_v18 }
0x1108   : > { %13195 = vmatpush1.bf16.msra.mxu0 %v24434_v31  ;;  %22275 = vmatprep.subr.bf16.mxu1 %v24442_v51  ;;  %v12323_v51 = vrot.slane %v12310_v25, %v28328_v52 }
0x1109   : > { %13196 = vmatprep.subr.bf16.mxu0 %v24441_v19 }
0x110b   : > { %22276 = vmatpush3.bf16.msra.mxu1 %v24443_v47 }
0x110c   : > { %13197 = vmatpush1.bf16.msra.mxu0 %v24439_v0  ;;  %22277 = vmatprep.subr.bf16.mxu1 %v24447_v27 }
0x110d   : > { %13198 = vmatprep.subr.bf16.mxu0 %v24446_v54 }
0x110f   : > { %22278 = vmatpush3.bf16.msra.mxu1 %v24448_v32 }
0x1110   : > { %13199 = vmatpush1.bf16.msra.mxu0 %v24444_v23  ;;  %22279 = vmatprep.subr.bf16.mxu1 %v24452_v1 }
0x1111   : > { %13200 = vmatprep.subr.bf16.mxu0 %v24451_v2 }
0x1113   : > { %22280 = vmatpush3.bf16.msra.mxu1 %v24453_v57 }
0x1114   : > { %13201 = vmatpush1.bf16.msra.mxu0 %v24449_v45  ;;  %22281 = vmatprep.subr.bf16.mxu1 %v24457_v30  ;;  %v12315_v45 = vrot.slane %v12310_v25, %v28312_v44 }
0x1115   : > { %13202 = vmatprep.subr.bf16.mxu0 %v24456_v50  ;;  %v12319_v50 = vrot.slane %v12310_v25, %v28309_v24 }
0x1117   : > { %22282 = vmatpush3.bf16.msra.mxu1 %v24458_v28 }
0x1118   : > { %13203 = vmatpush1.bf16.msra.mxu0 %v24454_v60  ;;  %22283 = vmatprep.subr.bf16.mxu1 %v24462_v22 }
0x1119   : > { %13204 = vmatprep.subr.bf16.mxu0 %v24461_v4 }
0x111b   : > { %22284 = vmatpush3.bf16.msra.mxu1 %v24463_v38 }
0x111c   : > { %13205 = vmatpush1.bf16.msra.mxu0 %v24459_v56  ;;  %22660 = vmatprep.subr.bf16.mxu1 %v24467_v59 }
0x111d   : > { %13219 = vmatprep.subr.bf16.mxu0 %v24466_v29 }
0x111e   : > { %13297 = vmatmul.mubr.f32.vlgmr.msra.gmra.mrb[12].mxu1 %v28572_v16 }
0x111f   : > { %13207 = vmatmul.mubr.f32.vlgmr.msra.gmra.mrb[16].mxu0 %v28572_v16  ;;  %13301 = vmatprep.mubr.f32.mxu1 %v28578_v3  ;;  %v11758_v16 = vld [vmem:[%s29944_s1] sm:$0x7] }
0x1120   : > { %13212 = vmatprep.mubr.f32.mxu0 %v28578_v3  ;;  %13220 = vmatpush1.bf16.msra.mxu0 %v24464_v15  ;;  %v11763_v55 = vrot.slane %v11758_v16, %v28312_v44  ;;  %v25805_v15 = vmov 0.0|0.0  }
0x1121   : > { %22661 = vmatpush3.bf16.msra.mxu1 %v24467_v59  ;;  %13221 = vmatprep.subr.bf16.mxu0 %v24470_v34 }
0x1122   : > { %13302 = vmatmul.mubr.f32.gmra.mrb[14].mxu1 %v28585_v35  ;;  %22662 = vmatprep.subr.bf16.mxu1 %v24471_v63 }
0x1123   : > { %13213 = vmatmul.mubr.f32.gmra.mrb[18].mxu0 %v28585_v35  ;;  %22664 = vmatprep.mubr.msk.f32.mxu1 %vm10343_vm15, %v28589_v17  ;;  %v11771_v35 = vrot.slane %v11758_v16, %v28328_v52 }
0x1124   : > { %13222 = vmatpush1.bf16.msra.mxu0 %v24468_v21  ;;  %13251 = vmatprep.mubr.f32.mxu0 %v25801_v48 }
0x1125   : > { %22663 = vmatpush3.bf16.msra.mxu1 %v24471_v63 }
0x1127   : > { %21507 = vmatmul.mubr.msk.f32.vlgmr.msra.gmra.mrb[16].mxu0 %vm10343_vm15, %v28589_v17  ;;  %v11767_v17 = vrot.slane %v11758_v16, %v28309_v24 }
0x1128   : > { %22665 = vmatmul.mubr.msk.f32.vlgmr.msra.gmra.mrb[16].mxu1 %vm10343_vm15, %v28596_v62  ;;  %13257 = vmatprep.mubr.f32.mxu0 %v25801_v48 }
0x112b   : > { %21508 = vmatmul.mubr.msk.f32.gmra.mrb[18].mxu0 %vm10343_vm15, %v28596_v62 }
0x1181   : > { %v22237_v3 = vpop.f32.mrb[4].mxu1 }
0x1182   : > { %v22238_v36 = vpop.f32.mrb[5].mxu1 }
0x1183   : > { %v22239_v40 = vadd.f32 %v22238_v36, %v22237_v3 }
0x1185   : > { %v12197_v49 = vadd.f32 %v22239_v40, %v11771_v35  ;;  %v12869_v35 = vld [vmem:[%s29948_s14] sm:$0x7] }
0x1189   : > { %v12234_v20 = vpop.f32.mrb[6].mxu1  ;;  %v12157_v61 = vpop.f32.mrb[8].mxu0 }
0x118a   : > { %v28698_v11 = vadd.f32 %v12234_v20, %v12197_v49  ;;  %v28700_v42 = vadd.f32 %v12157_v61, %v11763_v55  ;;  %v22652_v62 = vpop.f32.mrb[7].mxu1  ;;  %v12159_v33 = vpop.f32.mrb[9].mxu0  ;;  %v12882_v49 = vrot.slane %v12869_v35, %v28328_v52 }
0x118b   : > { %v28702_v53 = vadd.f32 %v12159_v33, %v11767_v17 }
0x118c   : > { %v13424_v34 = vmul.f32 %v28700_v42, %v26825_v5  ;;  %v13430_v63 = vmul.f32 %v28700_v42, %v26829_v7  ;;  %v28745_v16 = vmul.f32 0.0, %v28698_v11  ;;  %v13427_v40 = vmul.f32 %v28700_v42, %v26827_v6 }
0x118d   : > { %v13425_v46 = vmul.f32 0.0, %v28702_v53  ;;  %v13437_v3 = vmul.f32 %v28702_v53, %v26842_v10  ;;  %v28763_v17 = vmul.f32 0.0, %v28700_v42 }
0x118f   : > { %13521 = vmatprep.mubr.f32.mxu1 %v13425_v46  ;;  %13807 = vmatprep.mubr.f32.mxu0 %v13425_v46 }
0x11aa   : > { %v22259_v41 = vpop.f32.mrb[10].mxu0 }
0x11ab   : > { %v22260_v43 = vpop.f32.mrb[11].mxu0 }
0x11ac   : > { %v22261_v18 = vadd.f32 %v22260_v43, %v22259_v41  ;;  %v12874_v41 = vrot.slane %v12869_v35, %v28312_v44  ;;  %v12878_v43 = vrot.slane %v12869_v35, %v28309_v24 }
0x11ae   : > { %v22262_v31 = vpop.f32.mrb[12].mxu0  ;;  %v12746_v54 = vadd.f32 %v22261_v18, %v12323_v51 }
0x11af   : > { %v22263_v19 = vpop.f32.mrb[13].mxu0 }
0x11b0   : > { %v22264_v47 = vadd.f32 %v22263_v19, %v22262_v31 }
0x11b2   : > { %v12751_v0 = vadd.f32 %v22264_v47, %v12323_v51  ;;  %v22659_v27 = vpop.f32.mrb[14].mxu0  ;;  %v13434_v47 = vmul.f32 %v28702_v53, %v26840_v9 }
0x11b3   : > { %v12788_v32 = vpop.f32.mrb[15].mxu0 }
0x11b4   : > { %v12794_v23 = vadd.f32 %v22659_v27, %v12751_v0  ;;  %v12789_v1 = vadd.f32 %v12788_v32, %v12746_v54  ;;  %v13443_v0 = vmul.f32 %v28702_v53, %v26862_v14 }
0x11b6   : > { %v28708_v2 = vpack.c.bf16 %v12794_v23, %v12789_v1  ;;  %v13433_v23 = vmul.f32 %v28700_v42, %v26837_v8 }
0x11d1   : > { %v12700_v57 = vpop.f32.mrb[8].mxu1 }
0x11d2   : > { %v12702_v30 = vpop.f32.mrb[9].mxu1  ;;  %v23176_v60 = vadd.f32 %v12700_v57, %v12315_v45 }
0x11d3   : > { %v23177_v38 = vadd.f32 %v12702_v30, %v12319_v50 }
0x11d5   : > { %v12706_v28 = vpop.f32.mrb[10].mxu1 }
0x11d6   : > { %v23178_v22 = vadd.f32 %v12706_v28, %v12315_v45  ;;  %v12708_v4 = vpop.f32.mrb[11].mxu1 }
0x11d7   : > { %v23179_v56 = vadd.f32 %v12708_v4, %v12319_v50 }
0x11d8   : > { %v28712_v59 = vpack.c.bf16 %v23178_v22, %v23176_v60 }
0x11d9   : > { %v28714_v29 = vpack.c.bf16 %v23179_v56, %v23177_v38 }
0x11db   : > { %22963 = vmatprep.subr.bf16.mxu1 %v28714_v29  ;;  %22979 = vmatprep.subr.bf16.mxu0 %v28714_v29 }
0x11dc   : > { %22965 = vmatpush1.bf16.xpose.msra.mxu1 %v28712_v59  ;;  %22981 = vmatpush1.bf16.xpose.msra.mxu0 %v28712_v59 }
0x11dd   : > { %22966 = vmatprep.subr.bf16.mxu1 %v25805_v15  ;;  %22982 = vmatprep.subr.bf16.mxu0 %v25805_v15 }
0x11e3   : > { %13522 = vmatmul.mubr.f32.vlgmr.msra.gmra.mrb[18].mxu1 %v13424_v34  ;;  %13808 = vmatmul.mubr.f32.vlgmr.msra.gmra.mrb[20].mxu0 %v13430_v63 }
0x11e4   : > { %22969 = vmatpush3.bf16.xpose.msk.msra.mxu1 %vm28728_vm1, %v28708_v2  ;;  %22985 = vmatpush3.bf16.xpose.msk.msra.mxu0 %vm28728_vm1, %v28708_v2 }
0x11e5   : > { %22971 = vmatprep.subr.bf16.mxu1 %v28714_v29  ;;  %22995 = vmatprep.subr.bf16.mxu0 %v28714_v29 }
0x11e6   : > { %22671 = vmatprep.mubr.msk.f32.mxu1 %vm25802_vm14, %v25801_v48  ;;  %22685 = vmatprep.mubr.msk.f32.mxu0 %vm25802_vm14, %v25801_v48 }
0x11eb   : > { %22672 = vmatmul.mubr.msk.f32.vlgmr.msra.gmra.mrb[18].mxu1 %vm10343_vm15, %v28745_v16  ;;  %22686 = vmatmul.mubr.msk.f32.vlgmr.msra.gmra.mrb[20].mxu0 %vm10343_vm15, %v28745_v16 }
0x11ec   : > { %22973 = vmatpush1.bf16.xpose.msra.mxu1 %v28712_v59  ;;  %13664 = vmatprep.mubr.f32.mxu1 %v13425_v46 }
0x11ed   : > { %22997 = vmatpush1.bf16.xpose.msra.mxu0 %v28712_v59  ;;  %14093 = vmatprep.mubr.f32.mxu0 %v13437_v3 }
0x11ee   : > { %22974 = vmatprep.subr.bf16.mxu1 %v25805_v15  ;;  %22998 = vmatprep.subr.bf16.mxu0 %v25805_v15 }
0x11f1   : > { %v22285_v36 = vpop.f32.mrb[12].mxu1 }
0x11f2   : > { %v22286_v55 = vpop.f32.mrb[13].mxu1 }
0x11f3   : > { %v22287_v20 = vadd.f32 %v22286_v55, %v22285_v36  ;;  %13665 = vmatmul.mubr.f32.vlgmr.msra.gmra.mrb[20].mxu1 %v13427_v40 }
0x11f4   : > { %14094 = vmatmul.mubr.f32.vlgmr.msra.gmra.mrb[22].mxu0 %v28763_v17  ;;  %22977 = vmatpush3.bf16.xpose.msk.msra.mxu1 %vm28728_vm1, %v28708_v2 }
0x11f5   : > { %23001 = vmatpush3.bf16.xpose.msk.msra.mxu0 %vm28728_vm1, %v28708_v2  ;;  %v22288_v61 = vpop.f32.mrb[14].mxu1  ;;  %22987 = vmatprep.subr.bf16.mxu1 %v28714_v29  ;;  %v13299_v62 = vadd.f32 %v22287_v20, %v12882_v49 }
0x11f6   : > { %23011 = vmatprep.subr.bf16.mxu0 %v28714_v29  ;;  %v22289_v33 = vpop.f32.mrb[15].mxu1  ;;  %22678 = vmatprep.mubr.msk.f32.mxu1 %vm25802_vm14, %v25801_v48 }
0x11f7   : > { %v22290_v46 = vadd.f32 %v22289_v33, %v22288_v61  ;;  %22699 = vmatprep.mubr.msk.f32.mxu0 %vm25802_vm14, %v25801_v48 }
0x11f9   : > { %v13304_v25 = vadd.f32 %v22290_v46, %v12882_v49 }
0x11fa   : > { %v13253_v18 = vpop.f32.mrb[16].mxu0 }
0x11fb   : > { %v23180_v31 = vadd.f32 %v13253_v18, %v12874_v41  ;;  %v22666_v51 = vpop.f32.mrb[16].mxu1  ;;  %v13255_v19 = vpop.f32.mrb[17].mxu0  ;;  %22679 = vmatmul.mubr.msk.f32.vlgmr.msra.gmra.mrb[20].mxu1 %vm10343_vm15, %v28745_v16 }
0x11fc   : > { %v13347_v27 = vadd.f32 %v22666_v51, %v13304_v25  ;;  %v23181_v54 = vadd.f32 %v13255_v19, %v12878_v43  ;;  %v13341_v32 = vpop.f32.mrb[17].mxu1  ;;  %22700 = vmatmul.mubr.msk.f32.vlgmr.msra.gmra.mrb[22].mxu0 %vm10343_vm15, %v28745_v16  ;;  %22989 = vmatpush1.bf16.xpose.msra.mxu1 %v28712_v59 }
0x11fd   : > { %v13342_v1 = vadd.f32 %v13341_v32, %v13299_v62  ;;  %13950 = vmatprep.mubr.f32.mxu1 %v13434_v47  ;;  %23013 = vmatpush1.bf16.xpose.msra.mxu0 %v28712_v59  ;;  %v14693_v57 = vmul.f32 %v23180_v31, %v26827_v6  ;;  %v28794_v45 = vmul.f32 %v23180_v31, %v26825_v5  ;;  %v14711_v30 = vmul.f32 0.0, %v23180_v31 }
0x11fe   : > { %v14692_v50 = vmul.f32 0.0, %v13347_v27  ;;  %v28797_v28 = vmul.f32 %v13347_v27, %v26856_v13  ;;  %14379 = vmatprep.mubr.f32.mxu0 %v13443_v0  ;;  %v13259_v60 = vpop.f32.mrb[18].mxu0  ;;  %22990 = vmatprep.subr.bf16.mxu1 %v25805_v15  ;;  %v14688_v22 = vmul.f32 0.0, %v23181_v54  ;;  %v28801_v42 = vmul.f32 %v23180_v31, %v26829_v7  ;;  %v29949_v0 = vld [vmem:[#allocation120_spill] sm:$0xff] }
0x11ff   : > { %v14689_v4 = vmul.f32 0.0, %v13342_v1  ;;  %v28804_v38 = vmul.f32 %v13342_v1, %v26856_v13  ;;  %v23182_v56 = vadd.f32 %v13259_v60, %v12874_v41  ;;  %v13261_v34 = vpop.f32.mrb[19].mxu0  ;;  %23014 = vmatprep.subr.bf16.mxu0 %v25805_v15  ;;  %v28808_v63 = vmul.f32 %v23181_v54, %v26840_v9 }
0x1200   : > { %v23183_v3 = vadd.f32 %v13261_v34, %v12878_v43  ;;  %v28811_v35 = vmul.f32 %v23180_v31, %v26837_v8  ;;  %v28814_v36 = vmul.f32 %v23181_v54, %v26842_v10  ;;  %v28817_v40 = vmul.f32 %v23181_v54, %v26853_v12 }
0x1201   : > { %v28819_v49 = vpack.c.bf16 %v14692_v50, %v14689_v4  ;;  %v23080_v55 = vpack.c.bf16 %v28797_v28, %v28804_v38  ;;  %v14696_v20 = vmul.f32 %v23182_v56, %v26827_v6  ;;  %v14690_v61 = vmul.f32 %v23182_v56, %v26825_v5  ;;  %v24477_v28 = vld [vmem:[%s29951_s3 + $0x1c] ss:$12 sps:$4 sm:$0xff]   ;;  %v24475_v38 = vld [vmem:[%s29951_s3 + $0x18] ss:$12 sps:$4 sm:$0xff]  }
0x1202   : > { %v14691_v62 = vmul.f32 0.0, %v23183_v3  ;;  %v28826_v33 = vmul.f32 %v23182_v56, %v26829_v7  ;;  %v28829_v46 = vmul.f32 %v23183_v3, %v26840_v9  ;;  %v28832_v41 = vmul.f32 %v23182_v56, %v26837_v8 }
0x1203   : > { %13951 = vmatmul.mubr.f32.vlgmr.msra.gmra.mrb[22].mxu1 %v13433_v23  ;;  %v23035_v43 = vpack.c.bf16 %v14696_v20, %v14693_v57  ;;  %v23028_v25 = vpack.c.bf16 %v14690_v61, %v28794_v45  ;;  %v28836_v18 = vmul.f32 %v23183_v3, %v26842_v10  ;;  %v14714_v6 = vmul.f32 0.0, %v23182_v56 }
0x1204   : > { %14380 = vmatmul.mubr.f32.vlgmr.msra.gmra.mrb[24].mxu0 %v28763_v17  ;;  %22993 = vmatpush3.bf16.xpose.msk.msra.mxu1 %vm28728_vm1, %v28708_v2  ;;  %v23026_v5 = vpack.c.bf16 %v14691_v62, %v14688_v22  ;;  %v23042_v7 = vpack.c.bf16 %v28826_v33, %v28801_v42  ;;  %v23047_v8 = vpack.c.bf16 %v28829_v46, %v28808_v63 }
0x1205   : > { %23017 = vmatpush3.bf16.xpose.msk.msra.mxu0 %vm28728_vm1, %v28708_v2  ;;  %23003 = vmatprep.subr.bf16.mxu1 %v28714_v29  ;;  %v23049_v9 = vpack.c.bf16 %v28832_v41, %v28811_v35  ;;  %v23054_v10 = vpack.c.bf16 %v28836_v18, %v28814_v36  ;;  %v28854_v31 = vpack.c.bf16 %v14714_v6, %v14711_v30 }
0x1206   : > { %23034 = vmatprep.subr.bf16.mxu0 %v23026_v5  ;;  %22692 = vmatprep.mubr.msk.f32.mxu1 %vm25802_vm14, %v25801_v48  ;;  %v28859_v51 = vmul.f32 %v23183_v3, %v26853_v12  ;;  %v28862_v19 = vmul.f32 %v23181_v54, %v26862_v14  ;;  %v28865_v47 = vmul.f32 %v23183_v3, %v26862_v14 }
0x1207   : > { %22713 = vmatprep.mubr.msk.f32.mxu0 %vm25802_vm14, %v25801_v48  ;;  %v28870_v27 = vmul.f32 %v23181_v54, %v29949_v0  ;;  %v28873_v32 = vmul.f32 %v23183_v3, %v29949_v0  ;;  %v13440_v14 = vmul.f32 %v28702_v53, %v26853_v12  ;;  %v13446_v12 = vmul.f32 %v28702_v53, %v29949_v0 }
0x1208   : > { %v23061_v23 = vpack.c.bf16 %v28859_v51, %v28817_v40  ;;  %v23068_v1 = vpack.c.bf16 %v28865_v47, %v28862_v19  ;;  %v13447_v53 = vmul.f32 %v28698_v11, %v26856_v13  ;;  %v24481_v51 = vld [vmem:[%s29951_s3 + $0x48] ss:$12 sps:$4 sm:$0xff]   ;;  %v24483_v19 = vld [vmem:[%s29951_s3 + $0x4c] ss:$12 sps:$4 sm:$0xff]  }
0x1209   : > { %v23075_v57 = vpack.c.bf16 %v28873_v32, %v28870_v27  ;;  %v24484_v47 = vld [vmem:[%s29951_s3 + $0x60] ss:$12 sps:$4 sm:$0xff]   ;;  %v24486_v27 = vld [vmem:[%s29951_s3 + $0x64] ss:$12 sps:$4 sm:$0xff]   ;;  %v24489_v32 = vld [vmem:[%s29951_s3 + $0x7c] ss:$12 sps:$4 sm:$0xff]  }
0x120b   : > { %22693 = vmatmul.mubr.msk.f32.vlgmr.msra.gmra.mrb[22].mxu1 %vm10343_vm15, %v28745_v16 }
0x120c   : > { %22714 = vmatmul.mubr.msk.f32.vlgmr.msra.gmra.mrb[24].mxu0 %vm10343_vm15, %v28745_v16  ;;  %23005 = vmatpush1.bf16.xpose.msra.mxu1 %v28712_v59 }
0x120d   : > { %14236 = vmatprep.mubr.f32.mxu1 %v13440_v14  ;;  %23036 = vmatpush1.bf16.msra.mxu0 %v23035_v43 }
0x120e   : > { %23041 = vmatprep.subr.bf16.mxu0 %v23026_v5  ;;  %23006 = vmatprep.subr.bf16.mxu1 %v25805_v15 }
0x120f   : > { %14947 = vmatprep.mubr.f32.mxu0 %v25801_v48 }
0x1213   : > { %14237 = vmatmul.mubr.f32.vlgmr.msra.gmra.mrb[24].mxu1 %v28763_v17 }
0x1214   : > { %23009 = vmatpush3.bf16.xpose.msk.msra.mxu1 %vm28728_vm1, %v28708_v2  ;;  %22706 = vmatprep.mubr.msk.f32.mxu1 %vm25802_vm14, %v25801_v48 }
0x1215   : > { %23019 = vmatprep.subr.bf16.mxu1 %v28714_v29 }
0x121b   : > { %22707 = vmatmul.mubr.msk.f32.vlgmr.msra.gmra.mrb[24].mxu1 %vm10343_vm15, %v28745_v16 }
0x121c   : > { %23021 = vmatpush1.bf16.xpose.msra.mxu1 %v28712_v59  ;;  %14522 = vmatprep.mubr.f32.mxu1 %v13446_v12  ;;  %v13423_v59 = vld [vmem:[%s29950_s4] sm:$0x3] }
0x121d   : > { %23022 = vmatprep.subr.bf16.mxu1 %v25805_v15 }
0x1223   : > { %14523 = vmatmul.mubr.f32.vlgmr.msra.gmra.mrb[26].mxu1 %v28763_v17 }
0x1224   : > { %23025 = vmatpush3.bf16.xpose.msk.msra.mxu1 %vm28728_vm1, %v28708_v2  ;;  %22720 = vmatprep.mubr.msk.f32.mxu1 %vm25802_vm14, %v25801_v48 }
0x1225   : > { %23027 = vmatprep.subr.bf16.mxu1 %v23026_v5 }
0x122b   : > { %22721 = vmatmul.mubr.msk.f32.vlgmr.msra.gmra.mrb[26].mxu1 %vm10343_vm15, %v13447_v53 }
0x122c   : > { %23029 = vmatpush1.bf16.msra.mxu1 %v23028_v25  ;;  %14803 = vmatprep.mubr.f32.mxu1 %v25801_v48 }
0x122d   : > { %23030 = vmatprep.subr.bf16.mxu1 %v25805_v15 }
0x12be   : > { %v13593_v29 = vpop.f32.mrb[18].mxu1  ;;  %v13879_v16 = vpop.f32.mrb[20].mxu0 }
0x12bf   : > { %v23184_v21 = vadd.f32 %v13593_v29, %v13423_v59  ;;  %v22673_v2 = vpop.f32.mrb[19].mxu1  ;;  %v22687_v17 = vpop.f32.mrb[21].mxu0  ;;  %v23186_v60 = vadd.f32 %v13879_v16, %v13423_v59 }
0x12c1   : > { %v14599_v54 = vsel %vm14598_vm2, %v23184_v21, -inf  ;;  %v14605_v56 = vsel %vm14598_vm2, %v23186_v60, -inf }
0x12c2   : > { %14600 = vmax.xlane.f32.xlu1 %v14599_v54 }
0x12ce   : > { %v13736_v45 = vpop.f32.mrb[20].mxu1 }
0x12cf   : > { %v23185_v30 = vadd.f32 %v13736_v45, %v13423_v59  ;;  %v14165_v13 = vpop.f32.mrb[22].mxu0  ;;  %v22680_v11 = vpop.f32.mrb[21].mxu1 }
0x12d0   : > { %v22701_v50 = vpop.f32.mrb[23].mxu0  ;;  %v23188_v4 = vadd.f32 %v14165_v13, %v13423_v59 }
0x12d1   : > { %v14602_v22 = vsel %vm14598_vm2, %v23185_v30, -inf }
0x12d2   : > { %14603 = vmax.xlane.f32.xlu0 %v14602_v22  ;;  %v14611_v34 = vsel %vm14598_vm2, %v23188_v4, -inf }
0x12d6   : > { %14606 = vmax.xlane.f32.xlu0 %v14605_v56 }
0x12da   : > { %14612 = vmax.xlane.f32.xlu0 %v14611_v34 }
0x12de   : > { %v14022_v3 = vpop.f32.mrb[22].mxu1 }
0x12df   : > { %v23187_v20 = vadd.f32 %v14022_v3, %v13423_v59  ;;  %v14451_v61 = vpop.f32.mrb[24].mxu0  ;;  %v22694_v62 = vpop.f32.mrb[23].mxu1 }
0x12e0   : > { %v23190_v43 = vadd.f32 %v14451_v61, %v13423_v59  ;;  %v22715_v25 = vpop.f32.mrb[25].mxu0 }
0x12e1   : > { %v14608_v6 = vsel %vm14598_vm2, %v23187_v20, -inf }
0x12e2   : > { %v14617_v5 = vsel %vm14598_vm2, %v23190_v43, -inf  ;;  %14609 = vmax.xlane.f32.xlu1 %v14608_v6 }
0x12e3   : > { %14618 = vmax.xlane.f32.xlu0 %v14617_v5 }
0x12ee   : > { %v14308_v0 = vpop.f32.mrb[24].mxu1 }
0x12ef   : > { %v23189_v14 = vadd.f32 %v14308_v0, %v13423_v59  ;;  %v22708_v12 = vpop.f32.mrb[25].mxu1 }
0x12f1   : > { %v14614_v53 = vsel %vm14598_vm2, %v23189_v14, -inf }
0x12f2   : > { %14615 = vmax.xlane.f32.xlu1 %v14614_v53 }
0x12fe   : > { %v14594_v29 = vpop.f32.mrb[26].mxu1 }
0x12ff   : > { %v23191_v16 = vadd.f32 %v14594_v29, %v13423_v59  ;;  %v22722_v2 = vpop.f32.mrb[27].mxu1 }
0x1301   : > { %v14620_v17 = vsel %vm14598_vm2, %v23191_v16, -inf }
0x1302   : > { %14621 = vmax.xlane.f32.xlu1 %v14620_v17 }
0x134f   : > { %v14601_v54 = vpop.xlane.xlu1 %14600 }
0x1350   : > { %v14623_v45 = vsub.f32 %v23184_v21, %v14601_v54 }
0x1352   : > { %v14631_v13 = vmul.f32 1.442695, %v14623_v45 }
0x1354   : > { %24820 = vpow2.f32 %v14631_v13 }
0x135e   : > { %v24821_v11 = vpop.eup %24820 }
0x135f   : > { %v14604_v50 = vpop.xlane.xlu0 %14603  ;;  %v14647_v22 = vsel %vm14598_vm2, %v24821_v11, 0.0 }
0x1360   : > { %v14624_v56 = vsub.f32 %v23185_v30, %v14604_v50  ;;  %14648 = vadd.xlane.f32.xlu1 %v14647_v22 }
0x1362   : > { %v14633_v34 = vmul.f32 1.442695, %v14624_v56 }
0x1363   : > { %v14607_v3 = vpop.xlane.xlu0 %14606 }
0x1364   : > { %24822 = vpow2.f32 %v14633_v34  ;;  %v14625_v61 = vsub.f32 %v23186_v60, %v14607_v3 }
0x1366   : > { %v14635_v62 = vmul.f32 1.442695, %v14625_v61 }
0x1367   : > { %v14613_v59 = vpop.xlane.xlu0 %14612 }
0x1368   : > { %24824 = vpow2.f32 %v14635_v62  ;;  %v14627_v25 = vsub.f32 %v23188_v4, %v14613_v59 }
0x136a   : > { %v14639_v6 = vmul.f32 1.442695, %v14627_v25 }
0x136c   : > { %24826 = vpow2.f32 %v14639_v6 }
0x136e   : > { %v24823_v5 = vpop.eup %24822 }
0x136f   : > { %v14610_v21 = vpop.xlane.xlu1 %14609  ;;  %v14650_v0 = vsel %vm14598_vm2, %v24823_v5, 0.0 }
0x1370   : > { %v14619_v12 = vpop.xlane.xlu0 %14618  ;;  %v14626_v53 = vsub.f32 %v23187_v20, %v14610_v21  ;;  %14651 = vadd.xlane.f32.xlu0 %v14650_v0 }
0x1371   : > { %v14629_v29 = vsub.f32 %v23190_v43, %v14619_v12 }
0x1372   : > { %v24825_v30 = vpop.eup %24824  ;;  %v14637_v2 = vmul.f32 1.442695, %v14626_v53 }
0x1373   : > { %v14643_v17 = vmul.f32 1.442695, %v14629_v29  ;;  %v14653_v54 = vsel %vm14598_vm2, %v24825_v30, 0.0 }
0x1374   : > { %24828 = vpow2.f32 %v14637_v2  ;;  %14654 = vadd.xlane.f32.xlu0 %v14653_v54 }
0x1375   : > { %24830 = vpow2.f32 %v14643_v17 }
0x1376   : > { %v28926_v60 = vpop.eup %24826 }
0x1377   : > { %v14659_v4 = vsel %vm14598_vm2, %v28926_v60, 0.0 }
0x1378   : > { %14660 = vadd.xlane.f32.xlu0 %v14659_v4  ;;  %v24497_v4 = vld [vmem:[%s29951_s3 + $0xc0] ss:$12 sps:$4 sm:$0xff]  }
0x137e   : > { %v24829_v45 = vpop.eup %24828 }
0x137f   : > { %v28930_v13 = vpop.eup %24830  ;;  %v14616_v20 = vpop.xlane.xlu1 %14615  ;;  %v14656_v43 = vsel %vm14598_vm2, %v24829_v45, 0.0 }
0x1380   : > { %v14628_v50 = vsub.f32 %v23189_v14, %v14616_v20  ;;  %v14665_v22 = vsel %vm14598_vm2, %v28930_v13, 0.0  ;;  %14657 = vadd.xlane.f32.xlu1 %v14656_v43  ;;  %v24501_v20 = vld [vmem:[%s29951_s3 + $0xe0] ss:$12 sps:$4 sm:$0xff]   ;;  %v24504_v43 = vld [vmem:[%s29951_s3 + $0xdc] ss:$12 sps:$4 sm:$0xff]  }
0x1381   : > { %14666 = vadd.xlane.f32.xlu0 %v14665_v22  ;;  %v24505_v22 = vld [vmem:[%s29951_s3 + $0x20] ss:$12 sps:$4 sm:$0xff]  }
0x1382   : > { %v14641_v56 = vmul.f32 1.442695, %v14628_v50  ;;  %v24502_v50 = vld [vmem:[%s29951_s3 + $0xd8] ss:$12 sps:$4 sm:$0xff]  }
0x1384   : > { %24832 = vpow2.f32 %v14641_v56  ;;  %v24506_v56 = vld [vmem:[%s29951_s3 + $0xf8] ss:$12 sps:$4 sm:$0xff]  }
0x138e   : > { %v28935_v34 = vpop.eup %24832 }
0x138f   : > { %v14622_v3 = vpop.xlane.xlu1 %14621  ;;  %v14662_v61 = vsel %vm14598_vm2, %v28935_v34, 0.0 }
0x1390   : > { %v14630_v62 = vsub.f32 %v23191_v16, %v14622_v3  ;;  %14663 = vadd.xlane.f32.xlu1 %v14662_v61  ;;  %v24507_v3 = vld [vmem:[%s29951_s3 + $0xf0] ss:$12 sps:$4 sm:$0xff]   ;;  %v24510_v61 = vld [vmem:[%s29951_s3 + $0x38] ss:$12 sps:$4 sm:$0xff]  }
0x1392   : > { %v14645_v59 = vmul.f32 1.442695, %v14630_v62  ;;  %v24511_v62 = vld [vmem:[%s29951_s3 + $0x110] ss:$12 sps:$4 sm:$0xff]  }
0x1394   : > { %24834 = vpow2.f32 %v14645_v59  ;;  %v24512_v59 = vld [vmem:[%s29951_s3 + $0x108] ss:$12 sps:$4 sm:$0xff]  }
0x139e   : > { %v28939_v25 = vpop.eup %24834 }
0x139f   : > { %v14668_v14 = vsel %vm14598_vm2, %v28939_v25, 0.0 }
0x13a0   : > { %14669 = vadd.xlane.f32.xlu1 %v14668_v14  ;;  %v24515_v14 = vld [vmem:[%s29951_s3 + $0x50] ss:$12 sps:$4 sm:$0xff]  }
0x13ed   : > { %v14649_v6 = vpop.xlane.xlu1 %14648 }
0x13ee   : > { %24836 = vrcp.f32 %v14649_v6  ;;  %v24516_v6 = vld [vmem:[%s29951_s3 + $0x128] ss:$12 sps:$4 sm:$0xff]  }
0x13f8   : > { %v24837_v21 = vpop.eup %24836 }
0x13f9   : > { %v14672_v0 = vmul.f32 %v24837_v21, %v24821_v11  ;;  %v24517_v21 = vld [vmem:[%s29951_s3 + $0x120] ss:$12 sps:$4 sm:$0xff]  }
0x13fb   : > { %21535 = vmatmul.mubr.msk.f32.vlgmr.msra.gmra.mrb[28].mxu1 %vm14735_vm3, %v14672_v0 }
0x13fc   : > { %23032 = vmatpush3.bf16.msra.mxu1 %v28819_v49  ;;  %22727 = vmatprep.mubr.msk.f32.mxu1 %vm25802_vm14, %v25801_v48 }
0x13fd   : > { %v14652_v16 = vpop.xlane.xlu0 %14651  ;;  %23037 = vmatprep.subr.bf16.mxu1 %v25805_v15 }
0x13fe   : > { %24838 = vrcp.f32 %v14652_v16  ;;  %v24520_v16 = vld [vmem:[%s29951_s3 + $0x68] ss:$12 sps:$4 sm:$0xff]  }
0x13ff   : > { %22728 = vmatmul.mubr.msk.f32.vlgmr.msra.gmra.mrb[30].mxu1 %vm14735_vm3, %v14672_v0  ;;  %v24519_v0 = vld [vmem:[%s29951_s3 + $0x124] ss:$12 sps:$4 sm:$0xff]  }
0x1400   : > { %23039 = vmatpush3.bf16.msra.mxu1 %v28819_v49  ;;  %22734 = vmatprep.mubr.msk.f32.mxu1 %vm25802_vm14, %v25801_v48 }
0x1401   : > { %v14655_v12 = vpop.xlane.xlu0 %14654  ;;  %23044 = vmatprep.subr.bf16.mxu1 %v25805_v15 }
0x1402   : > { %24840 = vrcp.f32 %v14655_v12  ;;  %v24521_v12 = vld [vmem:[%s29951_s3 + $0x140] ss:$12 sps:$4 sm:$0xff]  }
0x1405   : > { %v14661_v17 = vpop.xlane.xlu0 %14660 }
0x1408   : > { %v24839_v11 = vpop.eup %24838 }
0x1409   : > { %v14674_v53 = vmul.f32 %v24839_v11, %v24823_v5  ;;  %v24493_v5 = vld [vmem:[%s29951_s3 + $0xa8] ss:$12 sps:$4 sm:$0xff]  }
0x140a   : > { %v24524_v11 = vld [vmem:[%s29951_s3 + $0x13c] ss:$12 sps:$4 sm:$0xff]  }
0x140b   : > { %21537 = vmatmul.mubr.msk.f32.vlgmr.msra.gmra.mrb[26].mxu0 %vm14735_vm3, %v14674_v53  ;;  %22735 = vmatmul.mubr.msk.f32.vlgmr.msra.gmra.mrb[32].mxu1 %vm14735_vm3, %v14674_v53  ;;  %v24522_v53 = vld [vmem:[%s29951_s3 + $0x138] ss:$12 sps:$4 sm:$0xff]  }
0x140c   : > { %v24841_v29 = vpop.eup %24840  ;;  %23043 = vmatpush1.bf16.msra.mxu0 %v23042_v7  ;;  %23046 = vmatpush3.bf16.msra.mxu1 %v28819_v49 }
0x140d   : > { %v14676_v2 = vmul.f32 %v24841_v29, %v24825_v30  ;;  %23048 = vmatprep.subr.bf16.mxu0 %v23047_v8  ;;  %v14658_v54 = vpop.xlane.xlu1 %14657  ;;  %15091 = vmatprep.mubr.f32.mxu0 %v25801_v48  ;;  %v24495_v30 = vld [vmem:[%s29951_s3 + $0xac] ss:$12 sps:$4 sm:$0xff]  }
0x140e   : > { %24842 = vrcp.f32 %v14658_v54  ;;  %22741 = vmatprep.mubr.msk.f32.mxu1 %vm25802_vm14, %v25801_v48  ;;  %23051 = vmatprep.subr.bf16.mxu1 %v25805_v15  ;;  %v14667_v36 = vpop.xlane.xlu0 %14666  ;;  %v24525_v29 = vld [vmem:[%s29951_s3 + $0x80] ss:$12 sps:$4 sm:$0xff]   ;;  %v24527_v54 = vld [vmem:[%s29951_s3 + $0x150] ss:$12 sps:$4 sm:$0xff]  }
0x140f   : > { %21539 = vmatmul.mubr.msk.f32.vlgmr.msra.gmra.mrb[28].mxu0 %vm14735_vm3, %v14676_v2  ;;  %22742 = vmatmul.mubr.msk.f32.vlgmr.msra.gmra.mrb[34].mxu1 %vm14735_vm3, %v14676_v2  ;;  %24844 = vrcp.f32 %v14661_v17  ;;  %v24526_v2 = vld [vmem:[%s29951_s3 + $0x158] ss:$12 sps:$4 sm:$0xff]   ;;  %v24529_v17 = vld [vmem:[%s29951_s3 + $0x154] ss:$12 sps:$4 sm:$0xff]  }
0x1410   : > { %23050 = vmatpush1.bf16.msra.mxu0 %v23049_v9  ;;  %23053 = vmatpush3.bf16.msra.mxu1 %v28819_v49  ;;  %v24472_v9 = vld [vmem:[%s29951_s3] ss:$12 sps:$4 sm:$0xff]  }
0x1411   : > { %23055 = vmatprep.subr.bf16.mxu0 %v23054_v10  ;;  %15235 = vmatprep.mubr.f32.mxu0 %v25801_v48  ;;  %v24474_v10 = vld [vmem:[%s29951_s3 + $0x4] ss:$12 sps:$4 sm:$0xff]  }
0x1412   : > { %22748 = vmatprep.mubr.msk.f32.mxu1 %vm25802_vm14, %v25801_v48  ;;  %23058 = vmatprep.subr.bf16.mxu1 %v25805_v15 }
0x1418   : > { %v24843_v42 = vpop.eup %24842 }
0x1419   : > { %v14678_v63 = vmul.f32 %v24843_v42, %v24829_v45  ;;  %v24845_v33 = vpop.eup %24844  ;;  %v24499_v45 = vld [vmem:[%s29951_s3 + $0xc4] ss:$12 sps:$4 sm:$0xff]  }
0x141a   : > { %v14680_v35 = vmul.f32 %v24845_v33, %v28926_v60  ;;  %v24496_v60 = vld [vmem:[%s29951_s3 + $0xc8] ss:$12 sps:$4 sm:$0xff]   ;;  %v24530_v42 = vld [vmem:[%s29951_s3 + $0x98] ss:$12 sps:$4 sm:$0xff]  }
0x141b   : > { %21541 = vmatmul.mubr.msk.f32.vlgmr.msra.gmra.mrb[30].mxu0 %vm14735_vm3, %v14678_v63  ;;  %22749 = vmatmul.mubr.msk.f32.vlgmr.msra.gmra.mrb[36].mxu1 %vm14735_vm3, %v14678_v63  ;;  %v24531_v63 = vld [vmem:[%s29951_s3 + $0x170] ss:$12 sps:$4 sm:$0xff]   ;;  %v24532_v33 = vld [vmem:[%s29951_s3 + $0x168] ss:$12 sps:$4 sm:$0xff]  }
0x141c   : > { %23057 = vmatpush1.bf16.msra.mxu0 %v28854_v31  ;;  %23060 = vmatpush3.bf16.msra.mxu1 %v28819_v49 }
0x141d   : > { %23062 = vmatprep.subr.bf16.mxu0 %v23061_v23  ;;  %v14664_v46 = vpop.xlane.xlu1 %14663  ;;  %15379 = vmatprep.mubr.f32.mxu0 %v25801_v48  ;;  %v24487_v23 = vld [vmem:[%s29951_s3 + $0x78] ss:$12 sps:$4 sm:$0xff]  }
0x141e   : > { %24846 = vrcp.f32 %v14664_v46  ;;  %22755 = vmatprep.mubr.msk.f32.mxu1 %vm25802_vm14, %v25801_v48  ;;  %23065 = vmatprep.subr.bf16.mxu1 %v25805_v15  ;;  %v24538_v46 = vld [vmem:[%s29951_s3 + $0x184] ss:$12 sps:$4 sm:$0xff]  }
0x141f   : > { %21543 = vmatmul.mubr.msk.f32.vlgmr.msra.gmra.mrb[32].mxu0 %vm14735_vm3, %v14680_v35  ;;  %22756 = vmatmul.mubr.msk.f32.vlgmr.msra.gmra.mrb[38].mxu1 %vm14735_vm3, %v14680_v35  ;;  %24848 = vrcp.f32 %v14667_v36  ;;  %v24534_v35 = vld [vmem:[%s29951_s3 + $0x16c] ss:$12 sps:$4 sm:$0xff]   ;;  %v24535_v36 = vld [vmem:[%s29951_s3 + $0xb0] ss:$12 sps:$4 sm:$0xff]  }
0x1420   : > { %23064 = vmatpush1.bf16.msra.mxu0 %v28854_v31  ;;  %23067 = vmatpush3.bf16.msra.mxu1 %v28819_v49 }
0x1421   : > { %23069 = vmatprep.subr.bf16.mxu0 %v23068_v1  ;;  %15523 = vmatprep.mubr.f32.mxu0 %v25801_v48  ;;  %v24492_v1 = vld [vmem:[%s29951_s3 + $0x94] ss:$12 sps:$4 sm:$0xff]  }
0x1422   : > { %22762 = vmatprep.mubr.msk.f32.mxu1 %vm25802_vm14, %v25801_v48  ;;  %23072 = vmatprep.subr.bf16.mxu1 %v25805_v15 }
0x1428   : > { %v24847_v40 = vpop.eup %24846 }
0x1429   : > { %v14682_v41 = vmul.f32 %v24847_v40, %v28935_v34  ;;  %v24849_v18 = vpop.eup %24848  ;;  %v24509_v34 = vld [vmem:[%s29951_s3 + $0xf4] ss:$12 sps:$4 sm:$0xff]  }
0x142a   : > { %v14684_v7 = vmul.f32 %v24849_v18, %v28930_v13  ;;  %v24500_v13 = vld [vmem:[%s29951_s3 + $0x8] ss:$12 sps:$4 sm:$0xff]  }
0x142b   : > { %21545 = vmatmul.mubr.msk.f32.vlgmr.msra.gmra.mrb[34].mxu0 %vm14735_vm3, %v14682_v41  ;;  %22763 = vmatmul.mubr.msk.f32.vlgmr.msra.gmra.mrb[40].mxu1 %vm14735_vm3, %v14682_v41 }
0x142c   : > { %23071 = vmatpush1.bf16.msra.mxu0 %v28854_v31  ;;  %23074 = vmatpush3.bf16.msra.mxu1 %v28819_v49 }
0x142d   : > { %23076 = vmatprep.subr.bf16.mxu0 %v23075_v57  ;;  %v14670_v8 = vpop.xlane.xlu1 %14669  ;;  %15667 = vmatprep.mubr.f32.mxu0 %v25801_v48  ;;  %v24490_v57 = vld [vmem:[%s29951_s3 + $0x90] ss:$12 sps:$4 sm:$0xff]  }
0x142e   : > { %24850 = vrcp.f32 %v14670_v8  ;;  %22769 = vmatprep.mubr.msk.f32.mxu1 %vm25802_vm14, %v25801_v48  ;;  %23079 = vmatprep.subr.bf16.mxu1 %v25805_v15 }
0x142f   : > { %21547 = vmatmul.mubr.msk.f32.vlgmr.msra.gmra.mrb[36].mxu0 %vm14735_vm3, %v14684_v7  ;;  %22770 = vmatmul.mubr.msk.f32.vlgmr.msra.gmra.mrb[42].mxu1 %vm14735_vm3, %v14684_v7 }
0x1430   : > { %23078 = vmatpush1.bf16.msra.mxu0 %v28854_v31  ;;  %23081 = vmatpush3.bf16.msra.mxu1 %v23080_v55  ;;  %v24480_v55 = vld [vmem:[%s29951_s3 + $0x34] ss:$12 sps:$4 sm:$0xff]   ;;  %v24478_v31 = vld [vmem:[%s29951_s3 + $0x30] ss:$12 sps:$4 sm:$0xff]  }
0x1431   : > { %15811 = vmatprep.mubr.f32.mxu0 %v25801_v48  ;;  %22776 = vmatprep.mubr.msk.f32.mxu1 %vm25802_vm14, %v25801_v48 }
0x1432   : > { %16240 = vmatprep.subr.bf16.mxu0 %v24474_v10  ;;  %22343 = vmatprep.subr.bf16.mxu1 %v24496_v60 }
0x1438   : > { %v24851_v49 = vpop.eup %24850 }
0x1439   : > { %v14686_v15 = vmul.f32 %v24851_v49, %v28939_v25  ;;  %v24514_v25 = vld [vmem:[%s29951_s3 + $0x10c] ss:$12 sps:$4 sm:$0xff]  }
0x143b   : > { %21549 = vmatmul.mubr.msk.f32.vlgmr.msra.gmra.mrb[38].mxu0 %vm14735_vm3, %v14686_v15  ;;  %22777 = vmatmul.mubr.msk.f32.vlgmr.msra.gmra.mrb[44].mxu1 %vm14735_vm3, %v14686_v15 }
0x143c   : > { %16241 = vmatpush1.bf16.msra.mxu0 %v24472_v9  ;;  %22344 = vmatpush3.bf16.msra.mxu1 %v24500_v13 }
0x143d   : > { %16242 = vmatprep.subr.bf16.mxu0 %v24477_v28  ;;  %22345 = vmatprep.subr.bf16.mxu1 %v24501_v20 }
0x1440   : > { %16243 = vmatpush1.bf16.msra.mxu0 %v24475_v38  ;;  %22346 = vmatpush3.bf16.msra.mxu1 %v24505_v22 }
0x1441   : > { %16244 = vmatprep.subr.bf16.mxu0 %v24480_v55  ;;  %22347 = vmatprep.subr.bf16.mxu1 %v24506_v56 }
0x1444   : > { %16245 = vmatpush1.bf16.msra.mxu0 %v24478_v31  ;;  %22348 = vmatpush3.bf16.msra.mxu1 %v24510_v61 }
0x1445   : > { %16246 = vmatprep.subr.bf16.mxu0 %v24483_v19  ;;  %22349 = vmatprep.subr.bf16.mxu1 %v24511_v62 }
0x1448   : > { %16247 = vmatpush1.bf16.msra.mxu0 %v24481_v51  ;;  %22350 = vmatpush3.bf16.msra.mxu1 %v24515_v14 }
0x1449   : > { %16248 = vmatprep.subr.bf16.mxu0 %v24486_v27  ;;  %22351 = vmatprep.subr.bf16.mxu1 %v24516_v6 }
0x144c   : > { %16249 = vmatpush1.bf16.msra.mxu0 %v24484_v47  ;;  %22352 = vmatpush3.bf16.msra.mxu1 %v24520_v16 }
0x144d   : > { %16250 = vmatprep.subr.bf16.mxu0 %v24489_v32  ;;  %22353 = vmatprep.subr.bf16.mxu1 %v24521_v12 }
0x1450   : > { %16251 = vmatpush1.bf16.msra.mxu0 %v24487_v23  ;;  %22354 = vmatpush3.bf16.msra.mxu1 %v24525_v29 }
0x1451   : > { %16252 = vmatprep.subr.bf16.mxu0 %v24492_v1  ;;  %22355 = vmatprep.subr.bf16.mxu1 %v24526_v2 }
0x1454   : > { %16253 = vmatpush1.bf16.msra.mxu0 %v24490_v57  ;;  %22356 = vmatpush3.bf16.msra.mxu1 %v24530_v42 }
0x1455   : > { %16254 = vmatprep.subr.bf16.mxu0 %v24495_v30  ;;  %22357 = vmatprep.subr.bf16.mxu1 %v24531_v63 }
0x1458   : > { %16255 = vmatpush1.bf16.msra.mxu0 %v24493_v5  ;;  %22358 = vmatpush3.bf16.msra.mxu1 %v24535_v36 }
0x1459   : > { %16256 = vmatprep.subr.bf16.mxu0 %v24499_v45  ;;  %22779 = vmatprep.subr.bf16.mxu1 %v25801_v48 }
0x145c   : > { %16257 = vmatpush1.bf16.msra.mxu0 %v24497_v4 }
0x145d   : > { %16258 = vmatprep.subr.bf16.mxu0 %v24504_v43 }
0x1460   : > { %16259 = vmatpush1.bf16.msra.mxu0 %v24502_v50 }
0x1461   : > { %16260 = vmatprep.subr.bf16.mxu0 %v24509_v34 }
0x1464   : > { %16261 = vmatpush1.bf16.msra.mxu0 %v24507_v3 }
0x1465   : > { %16262 = vmatprep.subr.bf16.mxu0 %v24514_v25 }
0x1468   : > { %16263 = vmatpush1.bf16.msra.mxu0 %v24512_v59 }
0x1469   : > { %16264 = vmatprep.subr.bf16.mxu0 %v24519_v0 }
0x146c   : > { %16265 = vmatpush1.bf16.msra.mxu0 %v24517_v21 }
0x146d   : > { %16266 = vmatprep.subr.bf16.mxu0 %v24524_v11 }
0x1470   : > { %16267 = vmatpush1.bf16.msra.mxu0 %v24522_v53 }
0x1471   : > { %16268 = vmatprep.subr.bf16.mxu0 %v24529_v17 }
0x1474   : > { %16269 = vmatpush1.bf16.msra.mxu0 %v24527_v54 }
0x1475   : > { %16270 = vmatprep.subr.bf16.mxu0 %v24534_v35 }
0x1478   : > { %16271 = vmatpush1.bf16.msra.mxu0 %v24532_v33 }
0x1479   : > { %16279 = vmatprep.subr.bf16.mxu0 %v24538_v46 }
0x14ce   : > { %v14805_v40 = vpop.f32.mrb[28].mxu1 }
0x14cf   : > { %v14807_v41 = vpop.f32.mrb[29].mxu1  ;;  %v15888_v15 = vsel %vm11563_vm0, %v14805_v40, 0.0 }
0x14d0   : > { %v15903_v31 = vsel %vm11563_vm0, %v14807_v41, 0.0 }
0x14d2   : > { %v14876_v18 = vpop.f32.mrb[30].mxu1 }
0x14d3   : > { %v22729_v7 = vpop.f32.mrb[31].mxu1  ;;  %v15918_v9 = vsel %vm11567_vm4, %v14876_v18, 0.0 }
0x14de   : > { %v14949_v8 = vpop.f32.mrb[26].mxu0  ;;  %v15020_v49 = vpop.f32.mrb[32].mxu1 }
0x14df   : > { %v15889_v10 = vsel %vm11563_vm0, %v14949_v8, 0.0  ;;  %v15919_v28 = vsel %vm11567_vm4, %v15020_v49, 0.0  ;;  %v14951_v38 = vpop.f32.mrb[27].mxu0  ;;  %v22736_v55 = vpop.f32.mrb[33].mxu1 }
0x14e0   : > { %v15890_v51 = vadd.f32 %v15889_v10, %v15888_v15  ;;  %v15920_v19 = vadd.f32 %v15919_v28, %v15918_v9  ;;  %v15904_v47 = vsel %vm11563_vm0, %v14951_v38, 0.0 }
0x14e1   : > { %v15905_v27 = vadd.f32 %v15904_v47, %v15903_v31 }
0x14e2   : > { %v15093_v32 = vpop.f32.mrb[28].mxu0  ;;  %v15164_v23 = vpop.f32.mrb[34].mxu1 }
0x14e3   : > { %v15891_v1 = vsel %vm11563_vm0, %v15093_v32, 0.0  ;;  %v15921_v57 = vsel %vm11567_vm4, %v15164_v23, 0.0  ;;  %v15095_v5 = vpop.f32.mrb[29].mxu0  ;;  %v22743_v30 = vpop.f32.mrb[35].mxu1 }
0x14e4   : > { %v15892_v60 = vadd.f32 %v15891_v1, %v15890_v51  ;;  %v15922_v4 = vadd.f32 %v15921_v57, %v15920_v19  ;;  %v15906_v45 = vsel %vm11563_vm0, %v15095_v5, 0.0  ;;  %v24536_v5 = vld [vmem:[%s29951_s3 + $0x180] ss:$12 sps:$4 sm:$0xff]   ;;  %v24539_v30 = vld [vmem:[%s29951_s3 + $0x188] ss:$12 sps:$4 sm:$0xff]  }
0x14e5   : > { %v15907_v13 = vadd.f32 %v15906_v45, %v15905_v27  ;;  %v24543_v45 = vld [vmem:[%s29951_s3 + $0x1a0] ss:$12 sps:$4 sm:$0xff]  }
0x14ee   : > { %v15237_v20 = vpop.f32.mrb[30].mxu0  ;;  %v15308_v43 = vpop.f32.mrb[36].mxu1 }
0x14ef   : > { %v15893_v50 = vsel %vm11563_vm0, %v15237_v20, 0.0  ;;  %v15923_v22 = vsel %vm11567_vm4, %v15308_v43, 0.0  ;;  %v15239_v56 = vpop.f32.mrb[31].mxu0  ;;  %v22750_v34 = vpop.f32.mrb[37].mxu1  ;;  %v13422_v20 = vld [vmem:[%s29952_s2] sm:$0x7] }
0x14f0   : > { %v15894_v3 = vadd.f32 %v15893_v50, %v15892_v60  ;;  %v15924_v61 = vadd.f32 %v15923_v22, %v15922_v4  ;;  %v15908_v62 = vsel %vm11563_vm0, %v15239_v56, 0.0  ;;  %v24542_v60 = vld [vmem:[%s29951_s3 + $0x19c] ss:$12 sps:$4 sm:$0xff]   ;;  %v24540_v4 = vld [vmem:[%s29951_s3 + $0x198] ss:$12 sps:$4 sm:$0xff]   ;;  %v15945_v22 = vrot.slane %v13422_v20, %v28328_v52 }
0x14f1   : > { %v15909_v59 = vadd.f32 %v15908_v62, %v15907_v13  ;;  %v15937_v56 = vrot.slane %v13422_v20, %v28312_v44  ;;  %v15941_v34 = vrot.slane %v13422_v20, %v28309_v24  ;;  %v24591_v20 = vld [vmem:[%s26886_s10 + $0x124] ss:$20 sps:$4 sm:$0xff]  }
0x14f2   : > { %v15381_v25 = vpop.f32.mrb[32].mxu0  ;;  %v15452_v14 = vpop.f32.mrb[38].mxu1 }
0x14f3   : > { %v15895_v6 = vsel %vm11563_vm0, %v15381_v25, 0.0  ;;  %v15925_v21 = vsel %vm11567_vm4, %v15452_v14, 0.0  ;;  %v15383_v0 = vpop.f32.mrb[33].mxu0  ;;  %v22757_v16 = vpop.f32.mrb[39].mxu1 }
0x14f4   : > { %v15896_v12 = vadd.f32 %v15895_v6, %v15894_v3  ;;  %v15926_v11 = vadd.f32 %v15925_v21, %v15924_v61  ;;  %v15910_v53 = vsel %vm11563_vm0, %v15383_v0, 0.0 }
0x14f5   : > { %v15911_v29 = vadd.f32 %v15910_v53, %v15909_v59 }
0x14fe   : > { %v15525_v2 = vpop.f32.mrb[34].mxu0  ;;  %v15596_v17 = vpop.f32.mrb[40].mxu1 }
0x14ff   : > { %v15897_v54 = vsel %vm11563_vm0, %v15525_v2, 0.0  ;;  %v15927_v42 = vsel %vm11567_vm4, %v15596_v17, 0.0  ;;  %v15527_v63 = vpop.f32.mrb[35].mxu0  ;;  %v22764_v33 = vpop.f32.mrb[41].mxu1 }
0x1500   : > { %v15898_v35 = vadd.f32 %v15897_v54, %v15896_v12  ;;  %v15928_v36 = vadd.f32 %v15927_v42, %v15926_v11  ;;  %v15912_v46 = vsel %vm11563_vm0, %v15527_v63, 0.0 }
0x1501   : > { %v15913_v40 = vadd.f32 %v15912_v46, %v15911_v29  ;;  %v24546_v46 = vld [vmem:[%s26886_s10 + $0x4] ss:$20 sps:$4 sm:$0xff]  }
0x1502   : > { %v15669_v41 = vpop.f32.mrb[36].mxu0  ;;  %v15740_v18 = vpop.f32.mrb[42].mxu1 }
0x1503   : > { %v15899_v7 = vsel %vm11563_vm0, %v15669_v41, 0.0  ;;  %v15929_v8 = vsel %vm11567_vm4, %v15740_v18, 0.0  ;;  %v15671_v49 = vpop.f32.mrb[37].mxu0  ;;  %v22771_v15 = vpop.f32.mrb[43].mxu1  ;;  %v24549_v41 = vld [vmem:[%s26886_s10 + $0xc] ss:$20 sps:$4 sm:$0xff]  }
0x1504   : > { %v15900_v9 = vadd.f32 %v15899_v7, %v15898_v35  ;;  %v15930_v10 = vadd.f32 %v15929_v8, %v15928_v36  ;;  %v15914_v28 = vsel %vm11563_vm0, %v15671_v49, 0.0  ;;  %v24544_v36 = vld [vmem:[%s26886_s10] ss:$20 sps:$4 sm:$0xff]   ;;  %v24550_v8 = vld [vmem:[%s26886_s10 + $0x28] ss:$20 sps:$4 sm:$0xff]  }
0x1505   : > { %v15915_v38 = vadd.f32 %v15914_v28, %v15913_v40  ;;  %v24547_v40 = vld [vmem:[%s26886_s10 + $0x8] ss:$20 sps:$4 sm:$0xff]   ;;  %v24552_v18 = vld [vmem:[%s26886_s10 + $0x2c] ss:$20 sps:$4 sm:$0xff]   ;;  %v24553_v49 = vld [vmem:[%s26886_s10 + $0x30] ss:$20 sps:$4 sm:$0xff]  }
0x1506   : > { %v24555_v7 = vld [vmem:[%s26886_s10 + $0x34] ss:$20 sps:$4 sm:$0xff]   ;;  %v24559_v28 = vld [vmem:[%s26886_s10 + $0x58] ss:$20 sps:$4 sm:$0xff]  }
0x1507   : > { %v24558_v15 = vld [vmem:[%s26886_s10 + $0x54] ss:$20 sps:$4 sm:$0xff]  }
0x150e   : > { %v15813_v55 = vpop.f32.mrb[38].mxu0  ;;  %v15884_v31 = vpop.f32.mrb[44].mxu1 }
0x150f   : > { %v15901_v51 = vsel %vm11563_vm0, %v15813_v55, 0.0  ;;  %v15931_v19 = vsel %vm11567_vm4, %v15884_v31, 0.0  ;;  %v15815_v47 = vpop.f32.mrb[39].mxu0  ;;  %v22778_v27 = vpop.f32.mrb[45].mxu1  ;;  %v24567_v55 = vld [vmem:[%s26886_s10 + $0x84] ss:$20 sps:$4 sm:$0xff]  }
0x1510   : > { %v15902_v32 = vadd.f32 %v15901_v51, %v15900_v9  ;;  %v15932_v23 = vadd.f32 %v15931_v19, %v15930_v10  ;;  %v15916_v1 = vsel %vm11563_vm0, %v15815_v47, 0.0  ;;  %v24561_v9 = vld [vmem:[%s26886_s10 + $0x5c] ss:$20 sps:$4 sm:$0xff]   ;;  %v24562_v31 = vld [vmem:[%s26886_s10 + $0x78] ss:$20 sps:$4 sm:$0xff]  }
0x1511   : > { %v15917_v57 = vadd.f32 %v15916_v1, %v15915_v38  ;;  %v24556_v10 = vld [vmem:[%s26886_s10 + $0x50] ss:$20 sps:$4 sm:$0xff]   ;;  %v24565_v51 = vld [vmem:[%s26886_s10 + $0x80] ss:$20 sps:$4 sm:$0xff]  }
0x1512   : > { %v24564_v38 = vld [vmem:[%s26886_s10 + $0x7c] ss:$20 sps:$4 sm:$0xff]   ;;  %v24570_v19 = vld [vmem:[%s26886_s10 + $0xa4] ss:$20 sps:$4 sm:$0xff]   ;;  %v24573_v47 = vld [vmem:[%s26886_s10 + $0xac] ss:$20 sps:$4 sm:$0xff]  }
0x1513   : > { %16272 = vmatprep.mubr.f32.mxu0 %v15917_v57  ;;  %16350 = vmatprep.mubr.f32.mxu1 %v15917_v57  ;;  %v24568_v27 = vld [vmem:[%s26886_s10 + $0xa0] ss:$20 sps:$4 sm:$0xff]   ;;  %v24574_v57 = vld [vmem:[%s26886_s10 + $0xc8] ss:$20 sps:$4 sm:$0xff]  }
0x1514   : > { %16273 = vmatmul.mubr.f32.vlgmr.msra.gmra.mrb[40].mxu0 %v15902_v32  ;;  %16351 = vmatmul.mubr.f32.vlgmr.msra.gmra.mrb[46].mxu1 %v15902_v32  ;;  %v24571_v32 = vld [vmem:[%s26886_s10 + $0xa8] ss:$20 sps:$4 sm:$0xff]  }
0x1515   : > { %22780 = vmatpush3.bf16.msra.mxu1 %v24539_v30  ;;  %16280 = vmatpush1.bf16.msra.mxu0 %v24536_v5  ;;  %v24579_v1 = vld [vmem:[%s26886_s10 + $0xd4] ss:$20 sps:$4 sm:$0xff]   ;;  %v24577_v5 = vld [vmem:[%s26886_s10 + $0xd0] ss:$20 sps:$4 sm:$0xff]  }
0x1516   : > { %22781 = vmatprep.subr.bf16.mxu1 %v25801_v48  ;;  %16281 = vmatprep.subr.bf16.mxu0 %v24542_v60  ;;  %v24582_v30 = vld [vmem:[%s26886_s10 + $0xf4] ss:$20 sps:$4 sm:$0xff]   ;;  %v24585_v60 = vld [vmem:[%s26886_s10 + $0xfc] ss:$20 sps:$4 sm:$0xff]  }
0x1517   : > { %22783 = vmatprep.mubr.msk.f32.mxu1 %vm25802_vm14, %v25801_v48  ;;  %16311 = vmatprep.mubr.f32.mxu0 %v25801_v48 }
0x1519   : > { %22782 = vmatpush3.bf16.msra.mxu1 %v24543_v45  ;;  %16282 = vmatpush1.bf16.msra.mxu0 %v24540_v4  ;;  %v24580_v4 = vld [vmem:[%s26886_s10 + $0xf0] ss:$20 sps:$4 sm:$0xff]   ;;  %v24583_v45 = vld [vmem:[%s26886_s10 + $0xf8] ss:$20 sps:$4 sm:$0xff]  }
0x151a   : > { %17327 = vmatprep.subr.bf16.mxu1 %v24546_v46  ;;  %17405 = vmatprep.subr.bf16.mxu0 %v24549_v41  ;;  %v24612_v46 = vld [vmem:[%s26886_s10 + $0x1bc] ss:$20 sps:$4 sm:$0xff]   ;;  %v24610_v41 = vld [vmem:[%s26886_s10 + $0x1b8] ss:$20 sps:$4 sm:$0xff]  }
0x151c   : > { %22784 = vmatmul.mubr.msk.f32.vlgmr.msra.gmra.mrb[48].mxu1 %vm10343_vm15, %v15932_v23  ;;  %21605 = vmatmul.mubr.msk.f32.vlgmr.msra.gmra.mrb[40].mxu0 %vm10343_vm15, %v15932_v23  ;;  %v24576_v23 = vld [vmem:[%s26886_s10 + $0xcc] ss:$20 sps:$4 sm:$0xff]  }
0x151d   : > { %17328 = vmatpush1.bf16.msra.mxu1 %v24544_v36  ;;  %17406 = vmatpush1.bf16.msra.mxu0 %v24547_v40  ;;  %v24607_v36 = vld [vmem:[%s26886_s10 + $0x198] ss:$20 sps:$4 sm:$0xff]  }
0x151e   : > { %17329 = vmatprep.subr.bf16.mxu1 %v24552_v18  ;;  %17407 = vmatprep.subr.bf16.mxu0 %v24555_v7  ;;  %v24615_v40 = vld [vmem:[%s26886_s10 + $0x1c4] ss:$20 sps:$4 sm:$0xff]   ;;  %v24613_v18 = vld [vmem:[%s26886_s10 + $0x1c0] ss:$20 sps:$4 sm:$0xff]  }
0x151f   : > { %v24616_v7 = vld [vmem:[%s26886_s10 + $0x1e0] ss:$20 sps:$4 sm:$0xff]  }
0x1521   : > { %17330 = vmatpush1.bf16.msra.mxu1 %v24550_v8  ;;  %17408 = vmatpush1.bf16.msra.mxu0 %v24553_v49  ;;  %v24618_v8 = vld [vmem:[%s26886_s10 + $0x1e4] ss:$20 sps:$4 sm:$0xff]   ;;  %v24619_v49 = vld [vmem:[%s26886_s10 + $0x1e8] ss:$20 sps:$4 sm:$0xff]  }
0x1522   : > { %17331 = vmatprep.subr.bf16.mxu1 %v24558_v15  ;;  %17409 = vmatprep.subr.bf16.mxu0 %v24561_v9  ;;  %v24621_v15 = vld [vmem:[%s26886_s10 + $0x1ec] ss:$20 sps:$4 sm:$0xff]  }
0x1523   : > { %v24624_v9 = vld [vmem:[%s26886_s10 + $0x20c] ss:$20 sps:$4 sm:$0xff]  }
0x1525   : > { %17332 = vmatpush1.bf16.msra.mxu1 %v24556_v10  ;;  %17410 = vmatpush1.bf16.msra.mxu0 %v24559_v28  ;;  %v24627_v10 = vld [vmem:[%s26886_s10 + $0x214] ss:$20 sps:$4 sm:$0xff]  }
0x1526   : > { %17333 = vmatprep.subr.bf16.mxu1 %v24564_v38  ;;  %17411 = vmatprep.subr.bf16.mxu0 %v24567_v55  ;;  %v24622_v28 = vld [vmem:[%s26886_s10 + $0x208] ss:$20 sps:$4 sm:$0xff]   ;;  %v24625_v38 = vld [vmem:[%s26886_s10 + $0x210] ss:$20 sps:$4 sm:$0xff]  }
0x1527   : > { %v24630_v55 = vld [vmem:[%s26886_s10 + $0x234] ss:$20 sps:$4 sm:$0xff]  }
0x1529   : > { %17334 = vmatpush1.bf16.msra.mxu1 %v24562_v31  ;;  %17412 = vmatpush1.bf16.msra.mxu0 %v24565_v51  ;;  %v24633_v31 = vld [vmem:[%s26886_s10 + $0x23c] ss:$20 sps:$4 sm:$0xff]  }
0x152a   : > { %17335 = vmatprep.subr.bf16.mxu1 %v24570_v19  ;;  %17413 = vmatprep.subr.bf16.mxu0 %v24573_v47  ;;  %v24628_v51 = vld [vmem:[%s26886_s10 + $0x230] ss:$20 sps:$4 sm:$0xff]   ;;  %v24631_v19 = vld [vmem:[%s26886_s10 + $0x238] ss:$20 sps:$4 sm:$0xff]  }
0x152b   : > { %v24636_v47 = vld [vmem:[%s26886_s10 + $0x25c] ss:$20 sps:$4 sm:$0xff]  }
0x152d   : > { %17336 = vmatpush1.bf16.msra.mxu1 %v24568_v27  ;;  %17414 = vmatpush1.bf16.msra.mxu0 %v24571_v32  ;;  %v24639_v27 = vld [vmem:[%s26886_s10 + $0x264] ss:$20 sps:$4 sm:$0xff]  }
0x152e   : > { %17337 = vmatprep.subr.bf16.mxu1 %v24576_v23  ;;  %17415 = vmatprep.subr.bf16.mxu0 %v24579_v1  ;;  %v24634_v32 = vld [vmem:[%s26886_s10 + $0x258] ss:$20 sps:$4 sm:$0xff]   ;;  %v24637_v23 = vld [vmem:[%s26886_s10 + $0x260] ss:$20 sps:$4 sm:$0xff]  }
0x152f   : > { %v24642_v1 = vld [vmem:[%s26886_s10 + $0x284] ss:$20 sps:$4 sm:$0xff]  }
0x1531   : > { %17338 = vmatpush1.bf16.msra.mxu1 %v24574_v57  ;;  %17416 = vmatpush1.bf16.msra.mxu0 %v24577_v5  ;;  %v24645_v57 = vld [vmem:[%s26886_s10 + $0x28c] ss:$20 sps:$4 sm:$0xff]  }
0x1532   : > { %17339 = vmatprep.subr.bf16.mxu1 %v24582_v30  ;;  %17417 = vmatprep.subr.bf16.mxu0 %v24585_v60  ;;  %v16415_v30 = vld [vmem:[%s29953_s18] sm:$0x7] }
0x1535   : > { %17340 = vmatpush1.bf16.msra.mxu1 %v24580_v4  ;;  %17418 = vmatpush1.bf16.msra.mxu0 %v24583_v45  ;;  %v16416_v45 = vld [vmem:[%s29954_s0] sm:$0x7] }
0x1536   : > { %17419 = vmatprep.subr.bf16.mxu0 %v24591_v20  ;;  %v16504_v20 = vrot.slane %v16415_v30, %v28309_v24 }
0x15e7   : > { %v22359_v13 = vpop.f32.mrb[46].mxu1 }
0x15e8   : > { %v22360_v43 = vpop.f32.mrb[47].mxu1 }
0x15e9   : > { %v22361_v50 = vadd.f32 %v22360_v43, %v22359_v13  ;;  %v24588_v13 = vld [vmem:[%s26886_s10 + $0x11c] ss:$20 sps:$4 sm:$0xff]   ;;  %v24586_v43 = vld [vmem:[%s26886_s10 + $0x118] ss:$20 sps:$4 sm:$0xff]  }
0x15ea   : > { %17341 = vmatprep.subr.bf16.mxu1 %v24588_v13  ;;  %v16500_v13 = vrot.slane %v16415_v30, %v28312_v44 }
0x15eb   : > { %v16353_v3 = vadd.f32 %v22361_v50, %v15945_v22  ;;  %v24589_v50 = vld [vmem:[%s26886_s10 + $0x120] ss:$20 sps:$4 sm:$0xff]   ;;  %v24594_v22 = vld [vmem:[%s26886_s10 + $0x144] ss:$20 sps:$4 sm:$0xff]   ;;  %17342 = vmatpush1.bf16.msra.mxu1 %v24586_v43  ;;  %v16531_v43 = vrot.slane %v16416_v45, %v28312_v44 }
0x15ec   : > { %17420 = vmatpush1.bf16.msra.mxu0 %v24589_v50  ;;  %17343 = vmatprep.subr.bf16.mxu1 %v24594_v22  ;;  %v16535_v50 = vrot.slane %v16416_v45, %v28309_v24  ;;  %v16508_v22 = vrot.slane %v16415_v30, %v28328_v52  ;;  %v24667_v30 = vld [vmem:[%s26886_s10 + $0x100] ss:$20 sps:$4 sm:$0xff]  }
0x15ef   : > { %v16390_v61 = vpop.f32.mrb[48].mxu1  ;;  %v16313_v62 = vpop.f32.mrb[40].mxu0 }
0x15f0   : > { %v16391_v59 = vadd.f32 %v16390_v61, %v16353_v3  ;;  %v23192_v25 = vadd.f32 %v16313_v62, %v15937_v56  ;;  %v22785_v14 = vpop.f32.mrb[49].mxu1  ;;  %v16315_v6 = vpop.f32.mrb[41].mxu0  ;;  %v24597_v56 = vld [vmem:[%s26886_s10 + $0x14c] ss:$20 sps:$4 sm:$0xff]   ;;  %v24595_v3 = vld [vmem:[%s26886_s10 + $0x148] ss:$20 sps:$4 sm:$0xff]  }
0x15f1   : > { %v23193_v21 = vadd.f32 %v16315_v6, %v15941_v34  ;;  %v24592_v34 = vld [vmem:[%s26886_s10 + $0x140] ss:$20 sps:$4 sm:$0xff]   ;;  %17421 = vmatprep.subr.bf16.mxu0 %v24597_v56  ;;  %v16509_v56 = vcombine.low %v16500_v13, %v16504_v20  ;;  %v24669_v13 = vld [vmem:[%s26886_s10 + $0x128] ss:$20 sps:$4 sm:$0xff]  }
0x15f2   : > { %v16411_v16 = vrot.slane %v16391_v59, %v28197_v37  ;;  %v24600_v61 = vld [vmem:[%s26886_s10 + $0x16c] ss:$20 sps:$4 sm:$0xff]   ;;  %v24603_v62 = vld [vmem:[%s26886_s10 + $0x174] ss:$20 sps:$4 sm:$0xff]   ;;  %17344 = vmatpush1.bf16.msra.mxu1 %v24592_v34  ;;  %17422 = vmatpush1.bf16.msra.mxu0 %v24595_v3  ;;  %v16539_v34 = vrot.slane %v16416_v45, %v28328_v52  ;;  %v16540_v3 = vcombine.low %v16531_v43, %v16535_v50  ;;  %v24672_v43 = vld [vmem:[%s26892_s6 + $0x4] ss:$12 sps:$4 sm:$0xff]  }
0x15f3   : > { %v16397_v0 = vcombine.low %v23192_v25, %v23193_v21  ;;  %v24598_v59 = vld [vmem:[%s26886_s10 + $0x168] ss:$20 sps:$4 sm:$0xff]   ;;  %17345 = vmatprep.subr.bf16.mxu1 %v24600_v61  ;;  %v24601_v25 = vld [vmem:[%s26886_s10 + $0x170] ss:$20 sps:$4 sm:$0xff]   ;;  %17423 = vmatprep.subr.bf16.mxu0 %v24603_v62  ;;  %v16516_v61 = vrot.slane %v16509_v56, %v28197_v37  ;;  %v16523_v62 = vrot.slane %v16508_v22, %v28197_v37  ;;  %v24722_v45 = vld [vmem:[%s26892_s6 + $0x140] ss:$12 sps:$4 sm:$0xff]  }
0x15f4   : > { %v24723_v20 = vld [vmem:[%s26892_s6 + $0x80] ss:$12 sps:$4 sm:$0xff]   ;;  %v24727_v50 = vld [vmem:[%s26892_s6 + $0x158] ss:$12 sps:$4 sm:$0xff]  }
0x15f5   : > { %v16404_v12 = vrot.slane %v16397_v0, %v28197_v37  ;;  %v24670_v22 = vld [vmem:[%s26892_s6] ss:$12 sps:$4 sm:$0xff]   ;;  %v24728_v56 = vld [vmem:[%s26892_s6 + $0x98] ss:$12 sps:$4 sm:$0xff]  }
0x15f6   : > { %17346 = vmatpush1.bf16.msra.mxu1 %v24598_v59  ;;  %17424 = vmatpush1.bf16.msra.mxu0 %v24601_v25  ;;  %v16547_v59 = vrot.slane %v16540_v3, %v28197_v37  ;;  %v16554_v25 = vrot.slane %v16539_v34, %v28197_v37  ;;  %v24675_v34 = vld [vmem:[%s26892_s6 + $0x1c] ss:$12 sps:$4 sm:$0xff]   ;;  %v24673_v3 = vld [vmem:[%s26892_s6 + $0x18] ss:$12 sps:$4 sm:$0xff]  }
0x15f7   : > { %v16412_v11 = vcombine.low %v16404_v12, %v16411_v16 }
0x15f9   : > { %v29120_v53 = vadd.f32 %v16412_v11, %v28482_v39 }
0x15fb   : > { %v16418_v29 = vcombine.high %v29120_v53, %v29120_v53  ;;  %v16425_v2 = vrot.slane %v29120_v53, %v28197_v37 }
0x15fd   : > { %v16432_v17 = vrot.slane %v16418_v29, %v28197_v37  ;;  %v16433_v54 = vcombine.high %v16425_v2, %v16425_v2  ;;  %v16437_v42 = vsel %vm11563_vm0, %v16425_v2, 0.0 }
0x15ff   : > { %v16438_v63 = vsel %vm11563_vm0, %v16433_v54, 0.0  ;;  %v16440_v39 = vsel %vm11567_vm4, %v16432_v17, 0.0 }
0x1600   : > { %v16439_v33 = vadd.f32 %v16438_v63, %v16437_v42 }
0x1602   : > { %v16441_v35 = vadd.f32 %v16440_v39, %v16439_v33  ;;  %v24606_v33 = vld [vmem:[%s26886_s10 + $0x194] ss:$20 sps:$4 sm:$0xff]   ;;  %v24609_v39 = vld [vmem:[%s26886_s10 + $0x19c] ss:$20 sps:$4 sm:$0xff]  }
0x1603   : > { %17347 = vmatprep.subr.bf16.mxu1 %v24606_v33  ;;  %17425 = vmatprep.subr.bf16.mxu0 %v24609_v39  ;;  %v24649_v33 = vld [vmem:[%s26886_s10 + $0x2b0] ss:$20 sps:$4 sm:$0xff]  }
0x1604   : > { %16442 = vadd.xlane.f32.xlu0 %v16441_v35  ;;  %v24604_v35 = vld [vmem:[%s26886_s10 + $0x190] ss:$20 sps:$4 sm:$0xff]   ;;  %17426 = vmatpush1.bf16.msra.mxu0 %v24607_v36 }
0x1605   : > { %17348 = vmatpush1.bf16.msra.mxu1 %v24604_v35  ;;  %17427 = vmatprep.subr.bf16.mxu0 %v24615_v40  ;;  %v24652_v39 = vld [vmem:[%s26886_s10 + $0x150] ss:$20 sps:$4 sm:$0xff]  }
0x1606   : > { %17349 = vmatprep.subr.bf16.mxu1 %v24612_v46  ;;  %v24653_v36 = vld [vmem:[%s26886_s10 + $0x10] ss:$20 sps:$4 sm:$0xff]  }
0x1607   : > { %v24654_v46 = vld [vmem:[%s26886_s10 + $0x290] ss:$20 sps:$4 sm:$0xff]  }
0x1608   : > { %17428 = vmatpush1.bf16.msra.mxu0 %v24613_v18  ;;  %v24656_v18 = vld [vmem:[%s26886_s10 + $0x38] ss:$20 sps:$4 sm:$0xff]  }
0x1609   : > { %17350 = vmatpush1.bf16.msra.mxu1 %v24610_v41  ;;  %17429 = vmatprep.subr.bf16.mxu0 %v24621_v15  ;;  %v24655_v41 = vld [vmem:[%s26886_s10 + $0x178] ss:$20 sps:$4 sm:$0xff]   ;;  %v24659_v15 = vld [vmem:[%s26886_s10 + $0x60] ss:$20 sps:$4 sm:$0xff]  }
0x160a   : > { %17351 = vmatprep.subr.bf16.mxu1 %v24618_v8  ;;  %v24658_v8 = vld [vmem:[%s26886_s10 + $0x1a0] ss:$20 sps:$4 sm:$0xff]  }
0x160c   : > { %17430 = vmatpush1.bf16.msra.mxu0 %v24619_v49  ;;  %v24697_v49 = vld [vmem:[%s26892_s6 + $0xc8] ss:$12 sps:$4 sm:$0xff]  }
0x160d   : > { %17352 = vmatpush1.bf16.msra.mxu1 %v24616_v7  ;;  %17431 = vmatprep.subr.bf16.mxu0 %v24627_v10  ;;  %v24657_v7 = vld [vmem:[%s26886_s10 + $0x2b8] ss:$20 sps:$4 sm:$0xff]   ;;  %v24660_v10 = vld [vmem:[%s26886_s10 + $0x1c8] ss:$20 sps:$4 sm:$0xff]  }
0x160e   : > { %17353 = vmatprep.subr.bf16.mxu1 %v24624_v9  ;;  %v24698_v9 = vld [vmem:[%s26892_s6 + $0x8] ss:$12 sps:$4 sm:$0xff]  }
0x1610   : > { %17432 = vmatpush1.bf16.msra.mxu0 %v24625_v38  ;;  %v24661_v38 = vld [vmem:[%s26886_s10 + $0x88] ss:$20 sps:$4 sm:$0xff]  }
0x1611   : > { %17354 = vmatpush1.bf16.msra.mxu1 %v24622_v28  ;;  %17433 = vmatprep.subr.bf16.mxu0 %v24633_v31  ;;  %v24702_v28 = vld [vmem:[%s26892_s6 + $0xe0] ss:$12 sps:$4 sm:$0xff]   ;;  %v24662_v31 = vld [vmem:[%s26886_s10 + $0x1f0] ss:$20 sps:$4 sm:$0xff]  }
0x1612   : > { %17355 = vmatprep.subr.bf16.mxu1 %v24630_v55  ;;  %v24703_v55 = vld [vmem:[%s26892_s6 + $0x20] ss:$12 sps:$4 sm:$0xff]  }
0x1614   : > { %17434 = vmatpush1.bf16.msra.mxu0 %v24631_v19  ;;  %v24663_v19 = vld [vmem:[%s26886_s10 + $0xb0] ss:$20 sps:$4 sm:$0xff]  }
0x1615   : > { %17356 = vmatpush1.bf16.msra.mxu1 %v24628_v51  ;;  %17435 = vmatprep.subr.bf16.mxu0 %v24639_v27  ;;  %v24707_v51 = vld [vmem:[%s26892_s6 + $0xf8] ss:$12 sps:$4 sm:$0xff]  }
0x1616   : > { %17357 = vmatprep.subr.bf16.mxu1 %v24636_v47  ;;  %v24708_v47 = vld [vmem:[%s26892_s6 + $0x38] ss:$12 sps:$4 sm:$0xff]  }
0x1617   : > { %v24664_v27 = vld [vmem:[%s26886_s10 + $0x218] ss:$20 sps:$4 sm:$0xff]  }
0x1618   : > { %17436 = vmatpush1.bf16.msra.mxu0 %v24637_v23  ;;  %v24665_v23 = vld [vmem:[%s26886_s10 + $0xd8] ss:$20 sps:$4 sm:$0xff]  }
0x1619   : > { %17358 = vmatpush1.bf16.msra.mxu1 %v24634_v32  ;;  %17444 = vmatprep.subr.bf16.mxu0 %v24645_v57  ;;  %v24712_v32 = vld [vmem:[%s26892_s6 + $0x110] ss:$12 sps:$4 sm:$0xff]   ;;  %v24666_v57 = vld [vmem:[%s26886_s10 + $0x240] ss:$20 sps:$4 sm:$0xff]  }
0x161a   : > { %17366 = vmatprep.subr.bf16.mxu1 %v24642_v1  ;;  %v24713_v1 = vld [vmem:[%s26892_s6 + $0x50] ss:$12 sps:$4 sm:$0xff]  }
0x1691   : > { %v16443_v14 = vpop.xlane.xlu0 %16442 }
0x1692   : > { %v16444_v6 = vmul.f32 0.0034722222, %v16443_v14 }
0x1694   : > { %v16452_v21 = vrot.slane %v16444_v6, %v28391_v26  ;;  %v16524_v6 = vcombine.low %v16516_v61, %v16523_v62  ;;  %v24678_v61 = vld [vmem:[%s26892_s6 + $0x34] ss:$12 sps:$4 sm:$0xff]   ;;  %v24676_v62 = vld [vmem:[%s26892_s6 + $0x30] ss:$12 sps:$4 sm:$0xff]  }
0x1696   : > { %v29172_v0 = vsub.f32 %v29120_v53, %v16452_v21 }
0x1698   : > { %v16455_v16 = vmul.f32 %v29172_v0, %v29172_v0 }
0x169a   : > { %v16457_v12 = vcombine.high %v16455_v16, %v16455_v16  ;;  %v16464_v11 = vrot.slane %v16455_v16, %v28197_v37 }
0x169c   : > { %v16471_v29 = vrot.slane %v16457_v12, %v28197_v37  ;;  %v16472_v2 = vcombine.high %v16464_v11, %v16464_v11  ;;  %v16476_v17 = vsel %vm11563_vm0, %v16464_v11, 0.0  ;;  %v16555_v12 = vcombine.low %v16547_v59, %v16554_v25  ;;  %v24681_v59 = vld [vmem:[%s26892_s6 + $0x4c] ss:$12 sps:$4 sm:$0xff]   ;;  %v24679_v25 = vld [vmem:[%s26892_s6 + $0x48] ss:$12 sps:$4 sm:$0xff]  }
0x169e   : > { %v16477_v54 = vsel %vm11563_vm0, %v16472_v2, 0.0  ;;  %v16479_v53 = vsel %vm11567_vm4, %v16471_v29, 0.0 }
0x169f   : > { %v16478_v42 = vadd.f32 %v16477_v54, %v16476_v17  ;;  %v24640_v54 = vld [vmem:[%s26886_s10 + $0x280] ss:$20 sps:$4 sm:$0xff]  }
0x16a1   : > { %v16480_v63 = vadd.f32 %v16479_v53, %v16478_v42  ;;  %v24643_v42 = vld [vmem:[%s26886_s10 + $0x288] ss:$20 sps:$4 sm:$0xff]   ;;  %v24648_v53 = vld [vmem:[%s26886_s10 + $0x2ac] ss:$20 sps:$4 sm:$0xff]  }
0x16a3   : > { %16481 = vadd.xlane.f32.xlu1 %v16480_v63  ;;  %v24651_v63 = vld [vmem:[%s26886_s10 + $0x2b4] ss:$20 sps:$4 sm:$0xff]  }
0x1730   : > { %v16482_v5 = vpop.xlane.xlu1 %16481 }
0x1731   : > { %v16483_v60 = vmul.f32 0.0034722222, %v16482_v5  ;;  %v24717_v5 = vld [vmem:[%s26892_s6 + $0x128] ss:$12 sps:$4 sm:$0xff]  }
0x1733   : > { %v16484_v4 = vadd.f32 1e-05, %v16483_v60  ;;  %v24718_v60 = vld [vmem:[%s26892_s6 + $0x68] ss:$12 sps:$4 sm:$0xff]  }
0x1735   : > { %24852 = vrsqrt.f32 %v16484_v4  ;;  %v24668_v4 = vld [vmem:[%s26886_s10 + $0x268] ss:$20 sps:$4 sm:$0xff]  }
0x173f   : > { %v24853_v14 = vpop.eup %24852 }
0x1740   : > { %v16493_v21 = vrot.slane %v24853_v14, %v28391_v26  ;;  %v24684_v14 = vld [vmem:[%s26892_s6 + $0x64] ss:$12 sps:$4 sm:$0xff]  }
0x1742   : > { %v16495_v16 = vmul.f32 %v16493_v21, %v29172_v0  ;;  %v24646_v0 = vld [vmem:[%s26886_s10 + $0x2a8] ss:$20 sps:$4 sm:$0xff]   ;;  %s29955_s10 = scalar_lea.vmem [#allocation33], %s26725_s23 }
0x1743   : > { %v24687_v21 = vld [vmem:[%s26892_s6 + $0x7c] ss:$12 sps:$4 sm:$0xff]  }
0x1744   : > { %v16526_v11 = vmul.f32 %v16524_v6, %v16495_v16  ;;  %v24682_v6 = vld [vmem:[%s26892_s6 + $0x60] ss:$12 sps:$4 sm:$0xff]   ;;  %v24685_v16 = vld [vmem:[%s26892_s6 + $0x78] ss:$12 sps:$4 sm:$0xff]  }
0x1746   : > { %v29223_v29 = vadd.f32 %v16555_v12, %v16526_v11  ;;  %v24690_v12 = vld [vmem:[%s26892_s6 + $0x94] ss:$12 sps:$4 sm:$0xff]   ;;  %v24688_v11 = vld [vmem:[%s26892_s6 + $0x90] ss:$12 sps:$4 sm:$0xff]  }
0x1748   : > { %v29227_v2 = vrot.slane %v29223_v29, %v28197_v37  ;;  %v16839_v35 = vcombine.high %v29223_v29, %v29223_v29 }
0x174a   : > { %v16854_v17 = vcombine.high %v29227_v2, %v29227_v2  ;;  %v16853_v40 = vrot.slane %v16839_v35, %v28197_v37  ;;  %v24709_v35 = vld [vmem:[%s26892_s6 + $0x108] ss:$12 sps:$4 sm:$0xff]  }
0x174c   : > { %17359 = vmatprep.mubr.f32.mxu1 %v16854_v17  ;;  %17437 = vmatprep.mubr.f32.mxu0 %v16854_v17 }
0x174d   : > { %17360 = vmatmul.mubr.f32.vlgmr.msra.gmra.mrb[50].mxu1 %v29227_v2  ;;  %17438 = vmatmul.mubr.f32.vlgmr.msra.gmra.mrb[42].mxu0 %v29227_v2 }
0x174e   : > { %17367 = vmatpush1.bf16.msra.mxu1 %v24640_v54  ;;  %17445 = vmatpush1.bf16.msra.mxu0 %v24643_v42  ;;  %v24696_v54 = vld [vmem:[%s26892_s6 + $0xc4] ss:$12 sps:$4 sm:$0xff]   ;;  %v24694_v42 = vld [vmem:[%s26892_s6 + $0xc0] ss:$12 sps:$4 sm:$0xff]  }
0x174f   : > { %17368 = vmatprep.subr.bf16.mxu1 %v24648_v53  ;;  %17446 = vmatprep.subr.bf16.mxu0 %v24651_v63  ;;  %v24701_v53 = vld [vmem:[%s26892_s6 + $0xdc] ss:$12 sps:$4 sm:$0xff]   ;;  %v24699_v63 = vld [vmem:[%s26892_s6 + $0xd8] ss:$12 sps:$4 sm:$0xff]  }
0x1750   : > { %17398 = vmatprep.mubr.f32.mxu1 %v25801_v48  ;;  %17476 = vmatprep.mubr.f32.mxu0 %v25801_v48 }
0x1752   : > { %17369 = vmatpush1.bf16.msra.mxu1 %v24646_v0  ;;  %17447 = vmatpush1.bf16.msra.mxu0 %v24649_v33  ;;  %v24706_v0 = vld [vmem:[%s26892_s6 + $0xf4] ss:$12 sps:$4 sm:$0xff]   ;;  %v24704_v33 = vld [vmem:[%s26892_s6 + $0xf0] ss:$12 sps:$4 sm:$0xff]  }
0x1753   : > { %22365 = vmatprep.subr.bf16.mxu1 %v24652_v39  ;;  %22786 = vmatprep.subr.bf16.mxu0 %v25801_v48  ;;  %v24711_v39 = vld [vmem:[%s26892_s6 + $0x10c] ss:$12 sps:$4 sm:$0xff]  }
0x1755   : > { %21697 = vmatmul.mubr.msk.f32.vlgmr.msra.gmra.mrb[50].mxu1 %vm10343_vm15, %v16853_v40  ;;  %21698 = vmatmul.mubr.msk.f32.vlgmr.msra.gmra.mrb[42].mxu0 %vm10343_vm15, %v16853_v40 }
0x1756   : > { %22366 = vmatpush3.bf16.msra.mxu1 %v24653_v36  ;;  %22787 = vmatpush3.bf16.msra.mxu0 %v24654_v46  ;;  %v24716_v36 = vld [vmem:[%s26892_s6 + $0x124] ss:$12 sps:$4 sm:$0xff]   ;;  %v24714_v46 = vld [vmem:[%s26892_s6 + $0x120] ss:$12 sps:$4 sm:$0xff]  }
0x1757   : > { %17515 = vmatprep.mubr.f32.mxu1 %v16854_v17  ;;  %22367 = vmatprep.subr.bf16.mxu1 %v24655_v41  ;;  %v24691_v17 = vld [vmem:[%s26892_s6 + $0xa8] ss:$12 sps:$4 sm:$0xff]   ;;  %v24719_v41 = vld [vmem:[%s26892_s6 + $0x138] ss:$12 sps:$4 sm:$0xff]  }
0x1758   : > { %22788 = vmatprep.subr.bf16.mxu0 %v25801_v48  ;;  %22790 = vmatprep.mubr.msk.f32.mxu0 %vm25802_vm14, %v25801_v48 }
0x175a   : > { %22368 = vmatpush3.bf16.msra.mxu1 %v24656_v18  ;;  %22789 = vmatpush3.bf16.msra.mxu0 %v24657_v7  ;;  %v24726_v18 = vld [vmem:[%s26892_s6 + $0x154] ss:$12 sps:$4 sm:$0xff]   ;;  %v24724_v7 = vld [vmem:[%s26892_s6 + $0x150] ss:$12 sps:$4 sm:$0xff]  }
0x175b   : > { %22369 = vmatprep.subr.bf16.mxu1 %v24658_v8  ;;  %22387 = vmatprep.subr.bf16.mxu0 %v24697_v49  ;;  %v24731_v8 = vld [vmem:[%s26892_s6 + $0x16c] ss:$12 sps:$4 sm:$0xff]   ;;  %v24732_v49 = vld [vmem:[%s26892_s6 + $0x170] ss:$12 sps:$4 sm:$0xff]  }
0x175d   : > { %22791 = vmatmul.mubr.msk.f32.vlgmr.msra.gmra.mrb[44].mxu0 %vm10343_vm15, %v16853_v40  ;;  %v24721_v40 = vld [vmem:[%s26892_s6 + $0x13c] ss:$12 sps:$4 sm:$0xff]  }
0x175e   : > { %22370 = vmatpush3.bf16.msra.mxu1 %v24659_v15  ;;  %22388 = vmatpush3.bf16.msra.mxu0 %v24698_v9  ;;  %v24733_v15 = vld [vmem:[%s26892_s6 + $0xb0] ss:$12 sps:$4 sm:$0xff]   ;;  %v24729_v9 = vld [vmem:[%s26892_s6 + $0x168] ss:$12 sps:$4 sm:$0xff]  }
0x175f   : > { %22371 = vmatprep.subr.bf16.mxu1 %v24660_v10  ;;  %22389 = vmatprep.subr.bf16.mxu0 %v24702_v28  ;;  %v24737_v10 = vld [vmem:[%s26892_s6 + $0x248] ss:$12 sps:$4 sm:$0xff]   ;;  %v24736_v28 = vld [vmem:[%s26892_s6 + $0x184] ss:$12 sps:$4 sm:$0xff]  }
0x1762   : > { %22372 = vmatpush3.bf16.msra.mxu1 %v24661_v38  ;;  %22390 = vmatpush3.bf16.msra.mxu0 %v24703_v55  ;;  %v29321_v38 = vld [vmem:[%s26889_s9] sm:$0x1f]  ;;  %v16827_v55 = vsub.s32 3, %v28192_v58  ;;  %s29956_s9 = scalar_lea.vmem [#allocation34], %s26725_s23 }
0x1763   : > { %22373 = vmatprep.subr.bf16.mxu1 %v24662_v31  ;;  %22391 = vmatprep.subr.bf16.mxu0 %v24707_v51  ;;  %v16816_v31 = vrot.slane %v29321_v38, %v28312_v44  ;;  %v16820_v51 = vrot.slane %v29321_v38, %v28309_v24 }
0x1766   : > { %22374 = vmatpush3.bf16.msra.mxu1 %v24663_v19  ;;  %22392 = vmatpush3.bf16.msra.mxu0 %v24708_v47  ;;  %v16828_v19 = vrot.slane %v29321_v38, %v16827_v55  ;;  %v24777_v55 = vld [vmem:[%s26892_s6 + $0x308] ss:$12 sps:$4 sm:$0xff]  }
0x1767   : > { %22375 = vmatprep.subr.bf16.mxu1 %v24664_v27  ;;  %22393 = vmatprep.subr.bf16.mxu0 %v24712_v32 }
0x176a   : > { %22376 = vmatpush3.bf16.msra.mxu1 %v24665_v23  ;;  %22394 = vmatpush3.bf16.msra.mxu0 %v24713_v1 }
0x176b   : > { %22377 = vmatprep.subr.bf16.mxu1 %v24666_v57  ;;  %22395 = vmatprep.subr.bf16.mxu0 %v24717_v5 }
0x176e   : > { %22378 = vmatpush3.bf16.msra.mxu1 %v24667_v30  ;;  %22396 = vmatpush3.bf16.msra.mxu0 %v24718_v60  ;;  %v24734_v60 = vld [vmem:[%s26892_s6 + $0x180] ss:$12 sps:$4 sm:$0xff]  }
0x176f   : > { %22379 = vmatprep.subr.bf16.mxu1 %v24668_v4  ;;  %22397 = vmatprep.subr.bf16.mxu0 %v24722_v45  ;;  %v24738_v4 = vld [vmem:[%s26892_s6 + $0x188] ss:$12 sps:$4 sm:$0xff]  }
0x1772   : > { %22380 = vmatpush3.bf16.msra.mxu1 %v24669_v13  ;;  %22398 = vmatpush3.bf16.msra.mxu0 %v24723_v20  ;;  %v24741_v13 = vld [vmem:[%s26892_s6 + $0x19c] ss:$12 sps:$4 sm:$0xff]   ;;  %v24742_v20 = vld [vmem:[%s26892_s6 + $0x260] ss:$12 sps:$4 sm:$0xff]  }
0x1773   : > { %18160 = vmatprep.subr.bf16.mxu1 %v24672_v43  ;;  %22399 = vmatprep.subr.bf16.mxu0 %v24727_v50 }
0x1775   : > { %17516 = vmatmul.mubr.f32.vlgmr.msra.gmra.mrb[52].mxu1 %v29227_v2  ;;  %v24693_v2 = vld [vmem:[%s26892_s6 + $0xac] ss:$12 sps:$4 sm:$0xff]  }
0x1776   : > { %18161 = vmatpush1.bf16.msra.mxu1 %v24670_v22  ;;  %22400 = vmatpush3.bf16.msra.mxu0 %v24728_v56  ;;  %v24739_v22 = vld [vmem:[%s26892_s6 + $0x198] ss:$12 sps:$4 sm:$0xff]   ;;  %v24743_v56 = vld [vmem:[%s26892_s6 + $0x1a0] ss:$12 sps:$4 sm:$0xff]  }
0x1777   : > { %18162 = vmatprep.subr.bf16.mxu1 %v24675_v34  ;;  %22401 = vmatprep.subr.bf16.mxu0 %v24732_v49 }
0x177a   : > { %18163 = vmatpush1.bf16.msra.mxu1 %v24673_v3  ;;  %22402 = vmatpush3.bf16.msra.mxu0 %v24733_v15  ;;  %v24746_v3 = vld [vmem:[%s26892_s6 + $0x1b4] ss:$12 sps:$4 sm:$0xff]   ;;  %v24776_v15 = vld [vmem:[%s26892_s6 + $0x244] ss:$12 sps:$4 sm:$0xff]  }
0x177b   : > { %18164 = vmatprep.subr.bf16.mxu1 %v24678_v61  ;;  %22406 = vmatprep.subr.bf16.mxu0 %v24737_v10  ;;  %v24747_v61 = vld [vmem:[%s26892_s6 + $0x278] ss:$12 sps:$4 sm:$0xff]  }
0x177e   : > { %18165 = vmatpush1.bf16.msra.mxu1 %v24676_v62  ;;  %v24744_v62 = vld [vmem:[%s26892_s6 + $0x1b0] ss:$12 sps:$4 sm:$0xff]  }
0x177f   : > { %18166 = vmatprep.subr.bf16.mxu1 %v24681_v59  ;;  %v24748_v59 = vld [vmem:[%s26892_s6 + $0x1b8] ss:$12 sps:$4 sm:$0xff]  }
0x1782   : > { %18167 = vmatpush1.bf16.msra.mxu1 %v24679_v25  ;;  %v24751_v25 = vld [vmem:[%s26892_s6 + $0x1cc] ss:$12 sps:$4 sm:$0xff]  }
0x1783   : > { %18168 = vmatprep.subr.bf16.mxu1 %v24684_v14  ;;  %v24752_v14 = vld [vmem:[%s26892_s6 + $0x290] ss:$12 sps:$4 sm:$0xff]  }
0x1786   : > { %18169 = vmatpush1.bf16.msra.mxu1 %v24682_v6  ;;  %v24749_v6 = vld [vmem:[%s26892_s6 + $0x1c8] ss:$12 sps:$4 sm:$0xff]  }
0x1787   : > { %18170 = vmatprep.subr.bf16.mxu1 %v24687_v21  ;;  %v24753_v21 = vld [vmem:[%s26892_s6 + $0x1d0] ss:$12 sps:$4 sm:$0xff]  }
0x178a   : > { %18171 = vmatpush1.bf16.msra.mxu1 %v24685_v16  ;;  %v24756_v16 = vld [vmem:[%s26892_s6 + $0x1e4] ss:$12 sps:$4 sm:$0xff]  }
0x178b   : > { %18172 = vmatprep.subr.bf16.mxu1 %v24690_v12  ;;  %v24757_v12 = vld [vmem:[%s26892_s6 + $0x2a8] ss:$12 sps:$4 sm:$0xff]  }
0x178e   : > { %18173 = vmatpush1.bf16.msra.mxu1 %v24688_v11  ;;  %v24754_v11 = vld [vmem:[%s26892_s6 + $0x1e0] ss:$12 sps:$4 sm:$0xff]  }
0x178f   : > { %18174 = vmatprep.subr.bf16.mxu1 %v24693_v2  ;;  %v24758_v2 = vld [vmem:[%s26892_s6 + $0x1e8] ss:$12 sps:$4 sm:$0xff]  }
0x1792   : > { %18175 = vmatpush1.bf16.msra.mxu1 %v24691_v17  ;;  %v24761_v17 = vld [vmem:[%s26892_s6 + $0x1fc] ss:$12 sps:$4 sm:$0xff]  }
0x1793   : > { %18176 = vmatprep.subr.bf16.mxu1 %v24696_v54  ;;  %v24762_v54 = vld [vmem:[%s26892_s6 + $0x2c0] ss:$12 sps:$4 sm:$0xff]  }
0x1796   : > { %18177 = vmatpush1.bf16.msra.mxu1 %v24694_v42  ;;  %v24759_v42 = vld [vmem:[%s26892_s6 + $0x1f8] ss:$12 sps:$4 sm:$0xff]  }
0x1797   : > { %18178 = vmatprep.subr.bf16.mxu1 %v24701_v53  ;;  %v24763_v53 = vld [vmem:[%s26892_s6 + $0x200] ss:$12 sps:$4 sm:$0xff]  }
0x179a   : > { %18179 = vmatpush1.bf16.msra.mxu1 %v24699_v63  ;;  %v24766_v63 = vld [vmem:[%s26892_s6 + $0x214] ss:$12 sps:$4 sm:$0xff]  }
0x179b   : > { %18180 = vmatprep.subr.bf16.mxu1 %v24706_v0  ;;  %v24767_v0 = vld [vmem:[%s26892_s6 + $0x2d8] ss:$12 sps:$4 sm:$0xff]  }
0x179e   : > { %18181 = vmatpush1.bf16.msra.mxu1 %v24704_v33  ;;  %v24764_v33 = vld [vmem:[%s26892_s6 + $0x210] ss:$12 sps:$4 sm:$0xff]  }
0x179f   : > { %18182 = vmatprep.subr.bf16.mxu1 %v24711_v39  ;;  %v24768_v39 = vld [vmem:[%s26892_s6 + $0x218] ss:$12 sps:$4 sm:$0xff]  }
0x17a2   : > { %18183 = vmatpush1.bf16.msra.mxu1 %v24709_v35  ;;  %v16831_v35 = vsub.s32 4, %v28192_v58 }
0x17a3   : > { %18184 = vmatprep.subr.bf16.mxu1 %v24716_v36  ;;  %v16824_v36 = vrot.slane %v29321_v38, %v28328_v52 }
0x17a6   : > { %18185 = vmatpush1.bf16.msra.mxu1 %v24714_v46  ;;  %v24771_v46 = vld [vmem:[%s26892_s6 + $0x22c] ss:$12 sps:$4 sm:$0xff]  }
0x17a7   : > { %18186 = vmatprep.subr.bf16.mxu1 %v24721_v40  ;;  %v24772_v40 = vld [vmem:[%s26892_s6 + $0x2f0] ss:$12 sps:$4 sm:$0xff]  }
0x17aa   : > { %18187 = vmatpush1.bf16.msra.mxu1 %v24719_v41 }
0x17ab   : > { %18188 = vmatprep.subr.bf16.mxu1 %v24726_v18  ;;  %v16832_v18 = vrot.slane %v29321_v38, %v16831_v35 }
0x17ae   : > { %18189 = vmatpush1.bf16.msra.mxu1 %v24724_v7  ;;  %v24769_v7 = vld [vmem:[%s26892_s6 + $0x228] ss:$12 sps:$4 sm:$0xff]  }
0x17af   : > { %18190 = vmatprep.subr.bf16.mxu1 %v24731_v8  ;;  %v24773_v8 = vld [vmem:[%s26892_s6 + $0x230] ss:$12 sps:$4 sm:$0xff]  }
0x17b2   : > { %18191 = vmatpush1.bf16.msra.mxu1 %v24729_v9 }
0x17b3   : > { %18199 = vmatprep.subr.bf16.mxu1 %v24736_v28  ;;  %v24774_v28 = vld [vmem:[%s26892_s6 + $0x240] ss:$12 sps:$4 sm:$0xff]  }
0x1828   : > { %v17400_v47 = vpop.f32.mrb[50].mxu1  ;;  %v29329_v27 = vpop.f32.mrb[42].mxu0 }
0x1829   : > { %v23194_v32 = vadd.f32 %v17400_v47, %v16816_v31  ;;  %v17402_v23 = vpop.f32.mrb[51].mxu1  ;;  %v17480_v1 = vpop.f32.mrb[43].mxu0  ;;  %v29368_v58 = vadd.f32 %v29329_v27, %v16824_v36  ;;  %v24780_v31 = vld [vmem:[%s26892_s6 + $0x25c] ss:$12 sps:$4 sm:$0xff]   ;;  %v24781_v47 = vld [vmem:[%s26892_s6 + $0x320] ss:$12 sps:$4 sm:$0xff]  }
0x182a   : > { %v23195_v57 = vadd.f32 %v17402_v23, %v16820_v51  ;;  %v23197_v5 = vadd.f32 %v17480_v1, %v16828_v19  ;;  %v24778_v19 = vld [vmem:[%s26892_s6 + $0x258] ss:$12 sps:$4 sm:$0xff]   ;;  %v24784_v27 = vld [vmem:[%s26892_s6 + $0x274] ss:$12 sps:$4 sm:$0xff]  }
0x182b   : > { %v17559_v45 = vmax.f32 %v23194_v32, 0.0  ;;  %v17561_v38 = vmax.f32 %v29368_v58, 0.0  ;;  %v24782_v32 = vld [vmem:[%s26892_s6 + $0x270] ss:$12 sps:$4 sm:$0xff]   ;;  %v24785_v23 = vld [vmem:[%s26892_s6 + $0x338] ss:$12 sps:$4 sm:$0xff]  }
0x182c   : > { %v17560_v30 = vmax.f32 %v23195_v57, 0.0  ;;  %v17562_v43 = vmax.f32 %v23197_v5, 0.0  ;;  %v24788_v1 = vld [vmem:[%s26892_s6 + $0x28c] ss:$12 sps:$4 sm:$0xff]   ;;  %v24786_v57 = vld [vmem:[%s26892_s6 + $0x288] ss:$12 sps:$4 sm:$0xff]  }
0x182d   : > { %v24789_v5 = vld [vmem:[%s26892_s6 + $0x350] ss:$12 sps:$4 sm:$0xff]  }
0x182e   : > { %18192 = vmatprep.mubr.f32.mxu1 %v17560_v30  ;;  %18309 = vmatprep.mubr.f32.mxu0 %v17560_v30  ;;  %v24792_v30 = vld [vmem:[%s26892_s6 + $0x2a4] ss:$12 sps:$4 sm:$0xff]  }
0x182f   : > { %18193 = vmatmul.mubr.f32.vlgmr.msra.gmra.mrb[54].mxu1 %v17559_v45  ;;  %18310 = vmatmul.mubr.f32.vlgmr.msra.gmra.mrb[46].mxu0 %v17559_v45  ;;  %v24795_v45 = vld [vmem:[%s26892_s6 + $0x2bc] ss:$12 sps:$4 sm:$0xff]  }
0x1830   : > { %v29335_v50 = vpop.f32.mrb[44].mxu0  ;;  %18200 = vmatpush1.bf16.msra.mxu1 %v24734_v60  ;;  %22407 = vmatpush3.bf16.msra.mxu0 %v24738_v4  ;;  %v24790_v60 = vld [vmem:[%s26892_s6 + $0x2a0] ss:$12 sps:$4 sm:$0xff]  }
0x1831   : > { %v22792_v34 = vpop.f32.mrb[45].mxu0  ;;  %18231 = vmatprep.mubr.f32.mxu1 %v17562_v43  ;;  %18347 = vmatprep.mubr.f32.mxu0 %v17562_v43  ;;  %v24796_v43 = vld [vmem:[%s26892_s6 + $0x2d0] ss:$12 sps:$4 sm:$0xff]  }
0x1832   : > { %18201 = vmatprep.subr.bf16.mxu1 %v24741_v13  ;;  %22408 = vmatprep.subr.bf16.mxu0 %v24742_v20  ;;  %v24793_v13 = vld [vmem:[%s26892_s6 + $0x2b8] ss:$12 sps:$4 sm:$0xff]   ;;  %v24798_v20 = vld [vmem:[%s26892_s6 + $0x2d4] ss:$12 sps:$4 sm:$0xff]  }
0x1833   : > { %v24802_v34 = vld [vmem:[%s26892_s6 + $0x300] ss:$12 sps:$4 sm:$0xff]  }
0x1834   : > { %18202 = vmatpush1.bf16.msra.mxu1 %v24739_v22  ;;  %22409 = vmatpush3.bf16.msra.mxu0 %v24743_v56  ;;  %v24799_v22 = vld [vmem:[%s26892_s6 + $0x2e8] ss:$12 sps:$4 sm:$0xff]   ;;  %v24804_v56 = vld [vmem:[%s26892_s6 + $0x304] ss:$12 sps:$4 sm:$0xff]  }
0x1835   : > { %18203 = vmatprep.subr.bf16.mxu1 %v24746_v3  ;;  %22410 = vmatprep.subr.bf16.mxu0 %v24747_v61  ;;  %v24807_v3 = vld [vmem:[%s26892_s6 + $0x31c] ss:$12 sps:$4 sm:$0xff]   ;;  %v24805_v61 = vld [vmem:[%s26892_s6 + $0x318] ss:$12 sps:$4 sm:$0xff]  }
0x1838   : > { %18204 = vmatpush1.bf16.msra.mxu1 %v24744_v62  ;;  %22411 = vmatpush3.bf16.msra.mxu0 %v24748_v59  ;;  %v24810_v62 = vld [vmem:[%s26892_s6 + $0x334] ss:$12 sps:$4 sm:$0xff]   ;;  %v24808_v59 = vld [vmem:[%s26892_s6 + $0x330] ss:$12 sps:$4 sm:$0xff]  }
0x1839   : > { %18205 = vmatprep.subr.bf16.mxu1 %v24751_v25  ;;  %22412 = vmatprep.subr.bf16.mxu0 %v24752_v14  ;;  %v24813_v25 = vld [vmem:[%s26892_s6 + $0x34c] ss:$12 sps:$4 sm:$0xff]   ;;  %v24811_v14 = vld [vmem:[%s26892_s6 + $0x348] ss:$12 sps:$4 sm:$0xff]  }
0x183c   : > { %18206 = vmatpush1.bf16.msra.mxu1 %v24749_v6  ;;  %22413 = vmatpush3.bf16.msra.mxu0 %v24753_v21 }
0x183d   : > { %18207 = vmatprep.subr.bf16.mxu1 %v24756_v16  ;;  %22414 = vmatprep.subr.bf16.mxu0 %v24757_v12  ;;  %v16811_v12 = vld [vmem:[%s29955_s10] sm:$0x7] }
0x1840   : > { %18208 = vmatpush1.bf16.msra.mxu1 %v24754_v11  ;;  %22415 = vmatpush3.bf16.msra.mxu0 %v24758_v2  ;;  %v17576_v11 = vrot.slane %v16811_v12, %v28328_v52 }
0x1841   : > { %18209 = vmatprep.subr.bf16.mxu1 %v24761_v17  ;;  %22416 = vmatprep.subr.bf16.mxu0 %v24762_v54 }
0x1844   : > { %18210 = vmatpush1.bf16.msra.mxu1 %v24759_v42  ;;  %22417 = vmatpush3.bf16.msra.mxu0 %v24763_v53 }
0x1845   : > { %18211 = vmatprep.subr.bf16.mxu1 %v24766_v63  ;;  %22418 = vmatprep.subr.bf16.mxu0 %v24767_v0 }
0x1848   : > { %v22381_v41 = vpop.f32.mrb[52].mxu1  ;;  %18212 = vmatpush1.bf16.msra.mxu1 %v24764_v33  ;;  %22419 = vmatpush3.bf16.msra.mxu0 %v24768_v39  ;;  %v17568_v33 = vrot.slane %v16811_v12, %v28312_v44  ;;  %v17572_v39 = vrot.slane %v16811_v12, %v28309_v24 }
0x1849   : > { %v22382_v49 = vpop.f32.mrb[53].mxu1  ;;  %18213 = vmatprep.subr.bf16.mxu1 %v24771_v46  ;;  %22420 = vmatprep.subr.bf16.mxu0 %v24772_v40 }
0x184a   : > { %v22383_v9 = vadd.f32 %v22382_v49, %v22381_v41 }
0x184c   : > { %v17518_v10 = vadd.f32 %v22383_v9, %v16832_v18  ;;  %18214 = vmatpush1.bf16.msra.mxu1 %v24769_v7  ;;  %22421 = vmatpush3.bf16.msra.mxu0 %v24773_v8 }
0x184d   : > { %18215 = vmatprep.subr.bf16.mxu1 %v24776_v15  ;;  %22793 = vmatprep.subr.bf16.mxu0 %v25801_v48 }
0x184e   : > { %v29377_v51 = vadd.f32 %v29335_v50, %v17518_v10  ;;  %v24801_v50 = vld [vmem:[%s26892_s6 + $0x2ec] ss:$12 sps:$4 sm:$0xff]  }
0x184f   : > { %18348 = vmatmul.mubr.f32.vlgmr.msra.gmra.mrb[48].mxu0 %v17561_v38 }
0x1850   : > { %18216 = vmatpush1.bf16.msra.mxu1 %v24774_v28  ;;  %22794 = vmatpush3.bf16.msra.mxu0 %v24777_v55  ;;  %v17563_v4 = vmax.f32 %v29377_v51, 0.0 }
0x1851   : > { %18217 = vmatprep.subr.bf16.mxu1 %v24780_v31  ;;  %22795 = vmatprep.subr.bf16.mxu0 %v25801_v48 }
0x1852   : > { %22801 = vmatprep.mubr.msk.f32.mxu0 %vm25802_vm14, %v25801_v48 }
0x1854   : > { %18218 = vmatpush1.bf16.msra.mxu1 %v24778_v19  ;;  %22796 = vmatpush3.bf16.msra.mxu0 %v24781_v47 }
0x1855   : > { %18219 = vmatprep.subr.bf16.mxu1 %v24784_v27  ;;  %22797 = vmatprep.subr.bf16.mxu0 %v25801_v48 }
0x1858   : > { %18220 = vmatpush1.bf16.msra.mxu1 %v24782_v32  ;;  %22798 = vmatpush3.bf16.msra.mxu0 %v24785_v23 }
0x1859   : > { %18221 = vmatprep.subr.bf16.mxu1 %v24788_v1  ;;  %22799 = vmatprep.subr.bf16.mxu0 %v25801_v48 }
0x185c   : > { %18222 = vmatpush1.bf16.msra.mxu1 %v24786_v57  ;;  %22800 = vmatpush3.bf16.msra.mxu0 %v24789_v5 }
0x185d   : > { %18223 = vmatprep.subr.bf16.mxu1 %v24792_v30 }
0x185f   : > { %22802 = vmatmul.mubr.msk.f32.vlgmr.msra.gmra.mrb[50].mxu0 %vm18156_vm5, %v17563_v4 }
0x1860   : > { %18224 = vmatpush1.bf16.msra.mxu1 %v24790_v60 }
0x1861   : > { %18225 = vmatprep.subr.bf16.mxu1 %v24795_v45 }
0x1864   : > { %18226 = vmatpush1.bf16.msra.mxu1 %v24793_v13 }
0x1865   : > { %18227 = vmatprep.subr.bf16.mxu1 %v24798_v20 }
0x1868   : > { %18228 = vmatpush1.bf16.msra.mxu1 %v24796_v43  ;;  %v18412_v43 = vld [vmem:[%s29956_s9] sm:$0x7] }
0x1869   : > { %18229 = vmatprep.subr.bf16.mxu1 %v24801_v50 }
0x186c   : > { %18230 = vmatpush1.bf16.msra.mxu1 %v24799_v22  ;;  %v18413_v22 = vld [vmem:[%s2493_s26] sm:$0x7] }
0x186d   : > { %18238 = vmatprep.subr.bf16.mxu1 %v24804_v56 }
0x186f   : > { %18232 = vmatmul.mubr.f32.vlgmr.msra.gmra.mrb[54].mxu1 %v17561_v38 }
0x1870   : > { %18239 = vmatpush1.bf16.msra.mxu1 %v24802_v34  ;;  %18270 = vmatprep.mubr.f32.mxu1 %v25801_v48  ;;  %v18497_v34 = vrot.slane %v18412_v43, %v28312_v44 }
0x1871   : > { %18240 = vmatprep.subr.bf16.mxu1 %v24807_v3  ;;  %v18501_v3 = vrot.slane %v18412_v43, %v28309_v24 }
0x1874   : > { %18241 = vmatpush1.bf16.msra.mxu1 %v24805_v61  ;;  %v18528_v61 = vrot.slane %v18413_v22, %v28312_v44 }
0x1875   : > { %18242 = vmatprep.subr.bf16.mxu1 %v24810_v62  ;;  %v18532_v62 = vrot.slane %v18413_v22, %v28309_v24 }
0x1878   : > { %18243 = vmatpush1.bf16.msra.mxu1 %v24808_v59  ;;  %v18505_v59 = vrot.slane %v18412_v43, %v28328_v52 }
0x1879   : > { %18244 = vmatprep.subr.bf16.mxu1 %v24813_v25  ;;  %v18506_v25 = vcombine.low %v18497_v34, %v18501_v3 }
0x187c   : > { %18245 = vmatpush1.bf16.msra.mxu1 %v24811_v14  ;;  %v18536_v14 = vrot.slane %v18413_v22, %v28328_v52 }
0x187f   : > { %21808 = vmatmul.mubr.msk.f32.vlgmr.msra.gmra.mrb[54].mxu1 %vm18156_vm5, %v17563_v4 }
0x1902   : > { %v22403_v6 = vpop.f32.mrb[46].mxu0 }
0x1903   : > { %v22404_v21 = vpop.f32.mrb[47].mxu0 }
0x1904   : > { %v22405_v16 = vadd.f32 %v22404_v21, %v22403_v6  ;;  %v18537_v6 = vcombine.low %v18528_v61, %v18532_v62  ;;  %v18513_v21 = vrot.slane %v18506_v25, %v28197_v37 }
0x1906   : > { %v18312_v17 = vadd.f32 %v22405_v16, %v17576_v11  ;;  %v18520_v16 = vrot.slane %v18505_v59, %v28197_v37  ;;  %v18544_v12 = vrot.slane %v18537_v6, %v28197_v37  ;;  %v18551_v11 = vrot.slane %v18536_v14, %v28197_v37 }
0x1908   : > { %v18552_v24 = vcombine.low %v18544_v12, %v18551_v11 }
0x1922   : > { %v22422_v48 = vpop.f32.mrb[48].mxu0 }
0x1923   : > { %v22423_v2 = vpop.f32.mrb[49].mxu0 }
0x1924   : > { %v22424_v54 = vadd.f32 %v22423_v2, %v22422_v48  ;;  %v18521_v2 = vcombine.low %v18513_v21, %v18520_v16 }
0x1926   : > { %v18350_v42 = vadd.f32 %v22424_v54, %v18312_v17 }
0x1932   : > { %v18387_v53 = vpop.f32.mrb[50].mxu0 }
0x1933   : > { %v18388_v63 = vadd.f32 %v18387_v53, %v18350_v42  ;;  %v22803_v0 = vpop.f32.mrb[51].mxu0 }
0x1935   : > { %v18408_v18 = vrot.slane %v18388_v63, %v28197_v37 }
0x1952   : > { %v18272_v35 = vpop.f32.mrb[54].mxu1 }
0x1953   : > { %v23198_v36 = vadd.f32 %v18272_v35, %v17568_v33  ;;  %v18274_v46 = vpop.f32.mrb[55].mxu1 }
0x1954   : > { %v23199_v40 = vadd.f32 %v18274_v46, %v17572_v39 }
0x1956   : > { %v18394_v41 = vcombine.low %v23198_v36, %v23199_v40 }
0x1958   : > { %v18401_v7 = vrot.slane %v18394_v41, %v28197_v37 }
0x195a   : > { %v18409_v8 = vcombine.low %v18401_v7, %v18408_v18 }
0x195c   : > { %v18411_v58 = vadd.f32 %v18409_v8, %v29223_v29 }
0x195e   : > { %v18415_v49 = vcombine.high %v18411_v58, %v18411_v58  ;;  %v18422_v15 = vrot.slane %v18411_v58, %v28197_v37 }
0x1960   : > { %v18429_v9 = vrot.slane %v18415_v49, %v28197_v37  ;;  %v18430_v10 = vcombine.high %v18422_v15, %v18422_v15  ;;  %v18434_v28 = vsel %vm11563_vm0, %v18422_v15, 0.0 }
0x1962   : > { %v18435_v55 = vsel %vm11563_vm0, %v18430_v10, 0.0  ;;  %v18437_v31 = vsel %vm11567_vm4, %v18429_v9, 0.0 }
0x1963   : > { %v18436_v38 = vadd.f32 %v18435_v55, %v18434_v28 }
0x1965   : > { %v18438_v51 = vadd.f32 %v18437_v31, %v18436_v38 }
0x1967   : > { %18439 = vadd.xlane.f32.xlu0 %v18438_v51 }
0x19f4   : > { %v18440_v19 = vpop.xlane.xlu0 %18439 }
0x19f5   : > { %v18441_v47 = vmul.f32 0.0034722222, %v18440_v19 }
0x19f7   : > { %v18449_v29 = vrot.slane %v18441_v47, %v28391_v26 }
0x19f9   : > { %v18451_v27 = vsub.f32 %v18411_v58, %v18449_v29 }
0x19fb   : > { %v18452_v32 = vmul.f32 %v18451_v27, %v18451_v27 }
0x19fd   : > { %v18454_v23 = vcombine.high %v18452_v32, %v18452_v32  ;;  %v18461_v1 = vrot.slane %v18452_v32, %v28197_v37 }
0x19ff   : > { %v18468_v57 = vrot.slane %v18454_v23, %v28197_v37  ;;  %v18469_v5 = vcombine.high %v18461_v1, %v18461_v1  ;;  %v18473_v30 = vsel %vm11563_vm0, %v18461_v1, 0.0 }
0x1a01   : > { %v18474_v60 = vsel %vm11563_vm0, %v18469_v5, 0.0  ;;  %v18476_v45 = vsel %vm11567_vm4, %v18468_v57, 0.0 }
0x1a02   : > { %v18475_v4 = vadd.f32 %v18474_v60, %v18473_v30 }
0x1a04   : > { %v18477_v13 = vadd.f32 %v18476_v45, %v18475_v4 }
0x1a06   : > { %18478 = vadd.xlane.f32.xlu1 %v18477_v13 }
0x1a93   : > { %v18479_v20 = vpop.xlane.xlu1 %18478 }
0x1a94   : > { %v18480_v50 = vmul.f32 0.0034722222, %v18479_v20 }
0x1a96   : > { %v18481_v56 = vadd.f32 1e-05, %v18480_v50 }
0x1a98   : > { %24854 = vrsqrt.f32 %v18481_v56 }
0x1aa2   : > { %v24855_v48 = vpop.eup %24854 }
0x1aa3   : > { %v18490_v44 = vrot.slane %v24855_v48, %v28391_v26 }
0x1aa5   : > { %v18492_v17 = vmul.f32 %v18490_v44, %v18451_v27 }
0x1aa7   : > { %v18523_v52 = vmul.f32 %v18521_v2, %v18492_v17 }
0x1aa9   : > { %v18554_v54 = vadd.f32 %v18552_v24, %v18523_v52 }
0x1aab   : > { %18559 = vst.msk [vmem:[#allocation3] sm:$0x3f] %vm18558_vm9, %v18554_v54 }
0x1aac PF: > { %s29957_s23 = sld [smem:[#allocation106_spill]] }
0x1ab2   : > { %p21810_p2 = scmp.ne.s32.totalorder %s29957_s23, 11 }
0x1ab3   : > { %v29448_v42 = vld [vmem:[#allocation3] sm:$0x3f] (!%p21810_p2)  ;;  %v25806_v37 = vmov (!%p21810_p2), 1983009808   ;;  %v29958_v63 = vlaneseq (!%p21810_p2)  ;;  %s29959_s6 = sld [smem:[#allocation96_spill]] (!%p21810_p2)  ;;  %vm18587_vm10 = vcmask (!%p21810_p2), 1041408  }
0x1ab4   : > { %18563 = sbr.rel (%p21810_p2) target bundleno = 7636 (0x1dd4), region = 316  ;;  %v18570_v53 = vunpack.c.l.s4 (!%p21810_p2), %v25806_v37  ;;  %v18568_v0 = vcombine.high (!%p21810_p2), %v29448_v42, %v29448_v42  ;;  %vm18591_vm11 = vcmask (!%p21810_p2), 254976   ;;  %v25807_v45 = vmov (!%p21810_p2), 269488144   ;;  %s29960_s26 = sld [smem:[#allocation94_spill]] (!%p21810_p2) }
0x1ab5   : > { %v29451_v26 = vshrl.u32 (!%p21810_p2), %v29958_v63, 7  ;;  %v18600_v13 = vunpack.c.l.s4 (!%p21810_p2), %v25807_v45  ;;  %s29961_s13 = sld [smem:[#allocation95_spill]] (!%p21810_p2)  ;;  %s29962_s8 = sld [smem:[#allocation98_spill]] (!%p21810_p2)  ;;  %vm25809_vm12 = vmmov (!%p21810_p2), 0   ;;  %vm19107_vm13 = vcmask (!%p21810_p2), 261120  }
0x1ab6   : > { %v18571_v33 = vunpack.c.0.s8 (!%p21810_p2), %v18570_v53  ;;  %s29963_s7 = sld [smem:[#allocation97_spill]] (!%p21810_p2)  ;;  %s29964_s28 = sld [smem:[#allocation99_spill]] (!%p21810_p2)  ;;  %vm19821_vm14 = vcmask (!%p21810_p2), 1043458   ;;  %vm19823_vm0 = vcmask (!%p21810_p2), 259076  }
0x1ab7   : > { %v18601_v20 = vunpack.c.0.s8 (!%p21810_p2), %v18600_v13  ;;  %vm19822_vm15 = vmor (!%p21810_p2), %vm19821_vm14, %vm18587_vm10 }
0x1ab8   : > { %v29456_v39 = vsub.s32 (!%p21810_p2), %v18571_v33, %v29451_v26  ;;  %vm19824_vm4 = vmor (!%p21810_p2), %vm19823_vm0, %vm19822_vm15 }
0x1ab9   : > { %v24858_v58 = vld [vmem:[%s29959_s6 + $0x4] ss:$12 sps:$4 sm:$0xff] (!%p21810_p2)   ;;  %v24860_v49 = vld [vmem:[%s29959_s6] ss:$12 sps:$4 sm:$0xff] (!%p21810_p2)   ;;  %v24861_v15 = vld [vmem:[%s29959_s6 + $0x1c] ss:$12 sps:$4 sm:$0xff] (!%p21810_p2)   ;;  %v29487_v43 = vsub.s32 (!%p21810_p2), %v18601_v20, %v29451_v26 }
0x1aba   : > { %v18575_v35 = vrot.slane (!%p21810_p2), %v29448_v42, %v29456_v39  ;;  %v18582_v36 = vrot.slane (!%p21810_p2), %v18568_v0, %v29456_v39  ;;  %19110 = vmatprep.subr.bf16.mxu0 (!%p21810_p2), %v24858_v58  ;;  %v24863_v9 = vld [vmem:[%s29959_s6 + $0x18] ss:$12 sps:$4 sm:$0xff] (!%p21810_p2)   ;;  %v24864_v10 = vld [vmem:[%s29959_s6 + $0x34] ss:$12 sps:$4 sm:$0xff] (!%p21810_p2)   ;;  %v24866_v55 = vld [vmem:[%s29959_s6 + $0x30] ss:$12 sps:$4 sm:$0xff] (!%p21810_p2)  }
0x1abb   : > { %19111 = vmatpush1.bf16.msra.mxu0 %v24860_v49  ;;  %v24884_v28 = vld [vmem:[%s29959_s6 + $0xc8] ss:$12 sps:$4 sm:$0xff]   ;;  %v24867_v38 = vld [vmem:[%s29959_s6 + $0x4c] ss:$12 sps:$4 sm:$0xff]   ;;  %v24870_v47 = vld [vmem:[%s29959_s6 + $0x64] ss:$12 sps:$4 sm:$0xff]  }
0x1abc   : > { %v18583_v46 = vcombine.high %v18575_v35, %v18575_v35  ;;  %v18588_v40 = vsel %vm18587_vm10, %v18575_v35, 0.0  ;;  %v18592_v41 = vsel %vm18591_vm11, %v18582_v36, 0.0  ;;  %19112 = vmatprep.subr.bf16.mxu0 %v24861_v15  ;;  %v24886_v31 = vld [vmem:[%s29959_s6 + $0x8] ss:$12 sps:$4 sm:$0xff]   ;;  %22430 = vmatprep.subr.bf16.mxu1 %v24884_v28  ;;  %v24889_v51 = vld [vmem:[%s29959_s6 + $0xe0] ss:$12 sps:$4 sm:$0xff]  }
0x1abd   : > { %22431 = vmatpush3.bf16.msra.mxu1 %v24886_v31  ;;  %v24869_v19 = vld [vmem:[%s29959_s6 + $0x48] ss:$12 sps:$4 sm:$0xff]   ;;  %v24872_v29 = vld [vmem:[%s29959_s6 + $0x60] ss:$12 sps:$4 sm:$0xff]   ;;  %v24875_v32 = vld [vmem:[%s29959_s6 + $0x78] ss:$12 sps:$4 sm:$0xff]  }
0x1abe   : > { %v18589_v18 = vsel %vm18587_vm10, %v18583_v46, 0.0  ;;  %22432 = vmatprep.subr.bf16.mxu1 %v24889_v51  ;;  %v24873_v27 = vld [vmem:[%s29959_s6 + $0x7c] ss:$12 sps:$4 sm:$0xff]   ;;  %v24876_v23 = vld [vmem:[%s29959_s6 + $0x94] ss:$12 sps:$4 sm:$0xff]   ;;  %v25808_v28 = vmov 0.0  }
0x1abf   : > { %v18590_v7 = vadd.f32 %v18589_v18, %v18588_v40  ;;  %19113 = vmatpush1.bf16.msra.mxu0 %v24863_v9  ;;  %v24878_v1 = vld [vmem:[%s29959_s6 + $0x90] ss:$12 sps:$4 sm:$0xff]   ;;  %v24879_v57 = vld [vmem:[%s29959_s6 + $0xac] ss:$12 sps:$4 sm:$0xff]   ;;  %v24881_v5 = vld [vmem:[%s29959_s6 + $0xa8] ss:$12 sps:$4 sm:$0xff]  }
0x1ac0   : > { %19114 = vmatprep.subr.bf16.mxu0 %v24864_v10  ;;  %v24882_v30 = vld [vmem:[%s29959_s6 + $0xc4] ss:$12 sps:$4 sm:$0xff]   ;;  %v24885_v60 = vld [vmem:[%s29959_s6 + $0xc0] ss:$12 sps:$4 sm:$0xff]   ;;  %v24887_v4 = vld [vmem:[%s29959_s6 + $0xdc] ss:$12 sps:$4 sm:$0xff]  }
0x1ac1   : > { %v18593_v8 = vadd.f32 %v18592_v41, %v18590_v7  ;;  %v24891_v11 = vld [vmem:[%s29959_s6 + $0x20] ss:$12 sps:$4 sm:$0xff]   ;;  %v24890_v48 = vld [vmem:[%s29959_s6 + $0xd8] ss:$12 sps:$4 sm:$0xff]   ;;  %v24895_v17 = vld [vmem:[%s29959_s6 + $0xf0] ss:$12 sps:$4 sm:$0xff]  }
0x1ac2   : > { %22433 = vmatpush3.bf16.msra.mxu1 %v24891_v11  ;;  %v24894_v2 = vld [vmem:[%s29959_s6 + $0xf8] ss:$12 sps:$4 sm:$0xff]   ;;  %v24892_v44 = vld [vmem:[%s29959_s6 + $0xf4] ss:$12 sps:$4 sm:$0xff]   ;;  %v24899_v52 = vld [vmem:[%s29959_s6 + $0x110] ss:$12 sps:$4 sm:$0xff]  }
0x1ac3   : > { %18594 = vadd.xlane.f32.xlu0 %v18593_v8  ;;  %19115 = vmatpush1.bf16.msra.mxu0 %v24866_v55  ;;  %v24896_v24 = vld [vmem:[%s29959_s6 + $0x38] ss:$12 sps:$4 sm:$0xff]   ;;  %v24900_v37 = vld [vmem:[%s29959_s6 + $0x108] ss:$12 sps:$4 sm:$0xff]   ;;  %v24905_v33 = vld [vmem:[%s29959_s6 + $0x120] ss:$12 sps:$4 sm:$0xff]  }
0x1ac4   : > { %19116 = vmatprep.subr.bf16.mxu0 %v24867_v38  ;;  %22434 = vmatprep.subr.bf16.mxu1 %v24894_v2  ;;  %v24897_v54 = vld [vmem:[%s29959_s6 + $0x10c] ss:$12 sps:$4 sm:$0xff]   ;;  %v24904_v53 = vld [vmem:[%s29959_s6 + $0x128] ss:$12 sps:$4 sm:$0xff]   ;;  %v24902_v63 = vld [vmem:[%s29959_s6 + $0x124] ss:$12 sps:$4 sm:$0xff]  }
0x1ac5   : > { %v24906_v0 = vld [vmem:[%s29959_s6 + $0x68] ss:$12 sps:$4 sm:$0xff]   ;;  %v24909_v35 = vld [vmem:[%s29959_s6 + $0x140] ss:$12 sps:$4 sm:$0xff]   ;;  %v24910_v40 = vld [vmem:[%s29959_s6 + $0x138] ss:$12 sps:$4 sm:$0xff]  }
0x1ac6   : > { %22435 = vmatpush3.bf16.msra.mxu1 %v24896_v24  ;;  %v24907_v36 = vld [vmem:[%s29959_s6 + $0x13c] ss:$12 sps:$4 sm:$0xff]   ;;  %v24911_v46 = vld [vmem:[%s29959_s6 + $0x80] ss:$12 sps:$4 sm:$0xff]   ;;  %v24914_v18 = vld [vmem:[%s29959_s6 + $0x158] ss:$12 sps:$4 sm:$0xff]  }
0x1ac7   : > { %19117 = vmatpush1.bf16.msra.mxu0 %v24869_v19  ;;  %22436 = vmatprep.subr.bf16.mxu1 %v24899_v52  ;;  %v24912_v41 = vld [vmem:[%s29959_s6 + $0x154] ss:$12 sps:$4 sm:$0xff]   ;;  %v24916_v7 = vld [vmem:[%s29959_s6 + $0x98] ss:$12 sps:$4 sm:$0xff]   ;;  %v24915_v8 = vld [vmem:[%s29959_s6 + $0x150] ss:$12 sps:$4 sm:$0xff]  }
0x1ac8   : > { %19118 = vmatprep.subr.bf16.mxu0 %v24870_v47  ;;  %v24919_v58 = vld [vmem:[%s29959_s6 + $0x170] ss:$12 sps:$4 sm:$0xff]   ;;  %v24917_v49 = vld [vmem:[%s29959_s6 + $0x16c] ss:$12 sps:$4 sm:$0xff]   ;;  %v24920_v9 = vld [vmem:[%s29959_s6 + $0x168] ss:$12 sps:$4 sm:$0xff]  }
0x1ac9   : > { %v24921_v15 = vld [vmem:[%s29959_s6 + $0xb0] ss:$12 sps:$4 sm:$0xff]   ;;  %v29529_v38 = vsub.s32 0, %v29451_v26  ;;  %v29532_v31 = vsub.s32 1, %v29451_v26  ;;  %v18565_v19 = vld [vmem:[%s29960_s26] sm:$0x7] }
0x1aca   : > { %v24924_v10 = vld [vmem:[%s29959_s6 + $0x184] ss:$12 sps:$4 sm:$0xff]   ;;  %v24930_v2 = vld [vmem:[%s29962_s8] ss:$12 sps:$4 sm:$0xff]  }
0x1acb   : > { %19119 = vmatpush1.bf16.msra.mxu0 %v24872_v29  ;;  %v18566_v29 = vld [vmem:[%s29961_s13] sm:$0x7]  ;;  %v24932_v11 = vld [vmem:[%s29962_s8 + $0x4] ss:$12 sps:$4 sm:$0xff]  }
0x1acc   : > { %19120 = vmatprep.subr.bf16.mxu0 %v24873_v27  ;;  %v18653_v27 = vrot.slane %v18565_v19, %v29529_v38  ;;  %v24962_v52 = vld [vmem:[%s29962_s8 + $0xe0] ss:$12 sps:$4 sm:$0xff]  }
0x1acf   : > { %19121 = vmatpush1.bf16.msra.mxu0 %v24875_v32  ;;  %v18657_v32 = vrot.slane %v18565_v19, %v29532_v31 }
0x1ad0   : > { %19122 = vmatprep.subr.bf16.mxu0 %v24876_v23  ;;  %v29539_v23 = vsub.s32 2, %v29451_v26 }
0x1ad3   : > { %19123 = vmatpush1.bf16.msra.mxu0 %v24878_v1  ;;  %v18684_v1 = vrot.slane %v18566_v29, %v29529_v38 }
0x1ad4   : > { %19124 = vmatprep.subr.bf16.mxu0 %v24879_v57  ;;  %v18688_v57 = vrot.slane %v18566_v29, %v29532_v31 }
0x1ad7   : > { %19125 = vmatpush1.bf16.msra.mxu0 %v24881_v5  ;;  %v18661_v5 = vrot.slane %v18565_v19, %v29539_v23  ;;  %v24961_v19 = vld [vmem:[%s29962_s8 + $0xdc] ss:$12 sps:$4 sm:$0xff]  }
0x1ad8   : > { %19126 = vmatprep.subr.bf16.mxu0 %v24882_v30  ;;  %v18662_v30 = vcombine.low %v18653_v27, %v18657_v32  ;;  %v24964_v27 = vld [vmem:[%s29962_s8 + $0xf0] ss:$12 sps:$4 sm:$0xff]   ;;  %v24971_v32 = vld [vmem:[%s29962_s8 + $0x10c] ss:$12 sps:$4 sm:$0xff]  }
0x1ad9   : > { %v18676_v13 = vrot.slane %v18661_v5, %v29456_v39  ;;  %v24974_v5 = vld [vmem:[%s29962_s8 + $0x120] ss:$12 sps:$4 sm:$0xff]  }
0x1ada   : > { %v18669_v45 = vrot.slane %v18662_v30, %v29456_v39  ;;  %v24982_v30 = vld [vmem:[%s29962_s8 + $0x140] ss:$12 sps:$4 sm:$0xff]  }
0x1adb   : > { %19127 = vmatpush1.bf16.msra.mxu0 %v24885_v60  ;;  %v18692_v60 = vrot.slane %v18566_v29, %v29539_v23  ;;  %v24966_v29 = vld [vmem:[%s29962_s8 + $0xf4] ss:$12 sps:$4 sm:$0xff]  }
0x1adc   : > { %19128 = vmatprep.subr.bf16.mxu0 %v24887_v4  ;;  %v18693_v4 = vcombine.low %v18684_v1, %v18688_v57  ;;  %v24969_v1 = vld [vmem:[%s29962_s8 + $0x108] ss:$12 sps:$4 sm:$0xff]   ;;  %v24976_v57 = vld [vmem:[%s29962_s8 + $0x124] ss:$12 sps:$4 sm:$0xff]  }
0x1add   : > { %v18707_v20 = vrot.slane %v18692_v60, %v29456_v39  ;;  %v24979_v60 = vld [vmem:[%s29962_s8 + $0x138] ss:$12 sps:$4 sm:$0xff]  }
0x1ade   : > { %v18700_v26 = vrot.slane %v18693_v4, %v29456_v39  ;;  %v24981_v4 = vld [vmem:[%s29962_s8 + $0x13c] ss:$12 sps:$4 sm:$0xff]  }
0x1adf   : > { %19129 = vmatpush1.bf16.msra.mxu0 %v24890_v48  ;;  %v24957_v48 = vld [vmem:[%s29962_s8 + $0xc8] ss:$12 sps:$4 sm:$0xff]  }
0x1ae0   : > { %19130 = vmatprep.subr.bf16.mxu0 %v24892_v44  ;;  %v24958_v44 = vld [vmem:[%s29962_s8 + $0x8] ss:$12 sps:$4 sm:$0xff]  }
0x1ae3   : > { %19131 = vmatpush1.bf16.msra.mxu0 %v24895_v17  ;;  %v24935_v17 = vld [vmem:[%s29962_s8 + $0x1c] ss:$12 sps:$4 sm:$0xff]  }
0x1ae4   : > { %19132 = vmatprep.subr.bf16.mxu0 %v24897_v54  ;;  %v24933_v54 = vld [vmem:[%s29962_s8 + $0x18] ss:$12 sps:$4 sm:$0xff]  }
0x1ae7   : > { %19133 = vmatpush1.bf16.msra.mxu0 %v24900_v37  ;;  %v24938_v37 = vld [vmem:[%s29962_s8 + $0x34] ss:$12 sps:$4 sm:$0xff]  }
0x1ae8   : > { %19134 = vmatprep.subr.bf16.mxu0 %v24902_v63  ;;  %v24936_v63 = vld [vmem:[%s29962_s8 + $0x30] ss:$12 sps:$4 sm:$0xff]  }
0x1aeb   : > { %19135 = vmatpush1.bf16.msra.mxu0 %v24905_v33  ;;  %v24941_v33 = vld [vmem:[%s29962_s8 + $0x4c] ss:$12 sps:$4 sm:$0xff]  }
0x1aec   : > { %19136 = vmatprep.subr.bf16.mxu0 %v24907_v36  ;;  %v24939_v36 = vld [vmem:[%s29962_s8 + $0x48] ss:$12 sps:$4 sm:$0xff]  }
0x1aef   : > { %19137 = vmatpush1.bf16.msra.mxu0 %v24910_v40  ;;  %v24944_v40 = vld [vmem:[%s29962_s8 + $0x64] ss:$12 sps:$4 sm:$0xff]  }
0x1af0   : > { %19138 = vmatprep.subr.bf16.mxu0 %v24912_v41  ;;  %v24977_v41 = vld [vmem:[%s29962_s8 + $0x128] ss:$12 sps:$4 sm:$0xff]  }
0x1af3   : > { %19139 = vmatpush1.bf16.msra.mxu0 %v24915_v8  ;;  %v24947_v8 = vld [vmem:[%s29962_s8 + $0x7c] ss:$12 sps:$4 sm:$0xff]  }
0x1af4   : > { %19140 = vmatprep.subr.bf16.mxu0 %v24917_v49  ;;  %v24950_v49 = vld [vmem:[%s29962_s8 + $0x94] ss:$12 sps:$4 sm:$0xff]  }
0x1af7   : > { %19141 = vmatpush1.bf16.msra.mxu0 %v24920_v9  ;;  %v24953_v9 = vld [vmem:[%s29962_s8 + $0xac] ss:$12 sps:$4 sm:$0xff]  }
0x1af8   : > { %19149 = vmatprep.subr.bf16.mxu0 %v24924_v10  ;;  %v24951_v10 = vld [vmem:[%s29962_s8 + $0xa8] ss:$12 sps:$4 sm:$0xff]  }
0x1b50   : > { %v18595_v50 = vpop.xlane.xlu0 %18594 }
0x1b51   : > { %v18597_v22 = vmul.f32 0.0034722222, %v18595_v50 }
0x1b53   : > { %v18605_v56 = vrot.slane %v18597_v22, %v29487_v43 }
0x1b55   : > { %v29491_v34 = vsub.f32 %v29448_v42, %v18605_v56  ;;  %v24901_v42 = vld [vmem:[%s29959_s6 + $0x50] ss:$12 sps:$4 sm:$0xff]   ;;  %v18677_v56 = vcombine.low %v18669_v45, %v18676_v13  ;;  %v24983_v45 = vld [vmem:[%s29962_s8 + $0x80] ss:$12 sps:$4 sm:$0xff]  }
0x1b56   : > { %22437 = vmatpush3.bf16.msra.mxu1 %v24901_v42  ;;  %v24963_v42 = vld [vmem:[%s29962_s8 + $0x20] ss:$12 sps:$4 sm:$0xff]  }
0x1b57   : > { %v18608_v3 = vmul.f32 %v29491_v34, %v29491_v34  ;;  %22438 = vmatprep.subr.bf16.mxu1 %v24904_v53  ;;  %v24967_v53 = vld [vmem:[%s29962_s8 + $0xf8] ss:$12 sps:$4 sm:$0xff]   ;;  %v24986_v13 = vld [vmem:[%s29962_s8 + $0x154] ss:$12 sps:$4 sm:$0xff]  }
0x1b59   : > { %v18610_v61 = vcombine.high %v18608_v3, %v18608_v3  ;;  %v18617_v62 = vrot.slane %v18608_v3, %v29456_v39 }
0x1b5a   : > { %22439 = vmatpush3.bf16.msra.mxu1 %v24906_v0  ;;  %v24968_v0 = vld [vmem:[%s29962_s8 + $0x38] ss:$12 sps:$4 sm:$0xff]  }
0x1b5b   : > { %v18624_v59 = vrot.slane %v18610_v61, %v29456_v39  ;;  %v18625_v25 = vcombine.high %v18617_v62, %v18617_v62  ;;  %v18629_v14 = vsel %vm18587_vm10, %v18617_v62, 0.0  ;;  %22440 = vmatprep.subr.bf16.mxu1 %v24909_v35  ;;  %v18708_v61 = vcombine.low %v18700_v26, %v18707_v20  ;;  %v24972_v35 = vld [vmem:[%s29962_s8 + $0x110] ss:$12 sps:$4 sm:$0xff]   ;;  %v24987_v26 = vld [vmem:[%s29962_s8 + $0x158] ss:$12 sps:$4 sm:$0xff]  }
0x1b5c   : > { %v24984_v20 = vld [vmem:[%s29962_s8 + $0x150] ss:$12 sps:$4 sm:$0xff]  }
0x1b5d   : > { %v18630_v6 = vsel %vm18587_vm10, %v18625_v25, 0.0  ;;  %v18632_v16 = vsel %vm18591_vm11, %v18624_v59, 0.0 }
0x1b5e   : > { %v18631_v21 = vadd.f32 %v18630_v6, %v18629_v14  ;;  %22441 = vmatpush3.bf16.msra.mxu1 %v24911_v46  ;;  %v24922_v6 = vld [vmem:[%s29959_s6 + $0x180] ss:$12 sps:$4 sm:$0xff]   ;;  %v24973_v46 = vld [vmem:[%s29962_s8 + $0x50] ss:$12 sps:$4 sm:$0xff]  }
0x1b5f   : > { %22442 = vmatprep.subr.bf16.mxu1 %v24914_v18  ;;  %v24942_v18 = vld [vmem:[%s29962_s8 + $0x60] ss:$12 sps:$4 sm:$0xff]  }
0x1b60   : > { %v18633_v12 = vadd.f32 %v18632_v16, %v18631_v21  ;;  %v24925_v21 = vld [vmem:[%s29959_s6 + $0x188] ss:$12 sps:$4 sm:$0xff]  }
0x1b61   : > { %v24928_v16 = vld [vmem:[%s29959_s6 + $0x19c] ss:$12 sps:$4 sm:$0xff]  }
0x1b62   : > { %18634 = vadd.xlane.f32.xlu0 %v18633_v12  ;;  %22443 = vmatpush3.bf16.msra.mxu1 %v24916_v7  ;;  %v24978_v7 = vld [vmem:[%s29962_s8 + $0x68] ss:$12 sps:$4 sm:$0xff]  }
0x1b63   : > { %22444 = vmatprep.subr.bf16.mxu1 %v24919_v58  ;;  %v24945_v58 = vld [vmem:[%s29962_s8 + $0x78] ss:$12 sps:$4 sm:$0xff]  }
0x1b66   : > { %22445 = vmatpush3.bf16.msra.mxu1 %v24921_v15  ;;  %v24948_v15 = vld [vmem:[%s29962_s8 + $0x90] ss:$12 sps:$4 sm:$0xff]  }
0x1b67   : > { %22804 = vmatprep.subr.bf16.mxu1 %v25808_v28 }
0x1bef   : > { %v18635_v55 = vpop.xlane.xlu0 %18634 }
0x1bf0   : > { %v18636_v51 = vmul.f32 0.0034722222, %v18635_v55  ;;  %v24956_v55 = vld [vmem:[%s29962_s8 + $0xc4] ss:$12 sps:$4 sm:$0xff]  }
0x1bf2   : > { %v18637_v47 = vadd.f32 1e-05, %v18636_v51  ;;  %v24954_v51 = vld [vmem:[%s29962_s8 + $0xc0] ss:$12 sps:$4 sm:$0xff]  }
0x1bf4   : > { %25002 = vrsqrt.f32 %v18637_v47  ;;  %v24959_v47 = vld [vmem:[%s29962_s8 + $0xd8] ss:$12 sps:$4 sm:$0xff]  }
0x1bfe   : > { %v25003_v50 = vpop.eup %25002 }
0x1bff   : > { %v18646_v22 = vrot.slane %v25003_v50, %v29487_v43  ;;  %v24926_v43 = vld [vmem:[%s29959_s6 + $0x198] ss:$12 sps:$4 sm:$0xff]  }
0x1c00   : > { %v24988_v50 = vld [vmem:[%s29962_s8 + $0x98] ss:$12 sps:$4 sm:$0xff]  }
0x1c01   : > { %v18648_v3 = vmul.f32 %v18646_v22, %v29491_v34  ;;  %v24929_v34 = vld [vmem:[%s29959_s6 + $0x1a0] ss:$12 sps:$4 sm:$0xff]   ;;  %v24992_v22 = vld [vmem:[%s29962_s8 + $0x170] ss:$12 sps:$4 sm:$0xff]  }
0x1c03   : > { %v18679_v62 = vmul.f32 %v18677_v56, %v18648_v3  ;;  %v24991_v56 = vld [vmem:[%s29962_s8 + $0x16c] ss:$12 sps:$4 sm:$0xff]   ;;  %v24993_v3 = vld [vmem:[%s29962_s8 + $0xb0] ss:$12 sps:$4 sm:$0xff]  }
0x1c05   : > { %v18710_v59 = vadd.f32 %v18708_v61, %v18679_v62  ;;  %v24989_v61 = vld [vmem:[%s29962_s8 + $0x168] ss:$12 sps:$4 sm:$0xff]   ;;  %v24996_v62 = vld [vmem:[%s29962_s8 + $0x184] ss:$12 sps:$4 sm:$0xff]  }
0x1c07   : > { %v18808_v25 = vrot.slane %v18710_v59, %v29456_v39  ;;  %v18801_v12 = vcombine.high %v18710_v59, %v18710_v59 }
0x1c09   : > { %v18816_v14 = vcombine.high %v18808_v25, %v18808_v25  ;;  %v18815_v24 = vrot.slane %v18801_v12, %v29456_v39 }
0x1c0b   : > { %19142 = vmatprep.mubr.f32.mxu0 %v18816_v14  ;;  %19220 = vmatprep.mubr.f32.mxu1 %v18816_v14 }
0x1c0c   : > { %19143 = vmatmul.mubr.f32.vlgmr.msra.gmra.mrb[0].mxu0 %v18808_v25  ;;  %19221 = vmatmul.mubr.f32.vlgmr.msra.gmra.mrb[0].mxu1 %v18808_v25  ;;  %v18783_v25 = vld [vmem:[%s29963_s7] sm:$0x7] }
0x1c0d   : > { %19150 = vmatpush1.bf16.msra.mxu0 %v24922_v6  ;;  %22805 = vmatpush3.bf16.msra.mxu1 %v24925_v21  ;;  %v18796_v21 = vrot.slane %v18783_v25, %v29539_v23 }
0x1c0e   : > { %19151 = vmatprep.subr.bf16.mxu0 %v24928_v16  ;;  %22806 = vmatprep.subr.bf16.mxu1 %v25808_v28  ;;  %v18788_v16 = vrot.slane %v18783_v25, %v29529_v38 }
0x1c0f   : > { %22808 = vmatprep.mubr.msk.f32.mxu1 %vm25809_vm12, %v25808_v28  ;;  %19181 = vmatprep.mubr.f32.mxu0 %v25808_v28 }
0x1c11   : > { %19152 = vmatpush1.bf16.msra.mxu0 %v24926_v43  ;;  %22807 = vmatpush3.bf16.msra.mxu1 %v24929_v34  ;;  %v18792_v43 = vrot.slane %v18783_v25, %v29532_v31 }
0x1c12   : > { %19647 = vmatprep.subr.bf16.mxu1 %v24932_v11  ;;  %22452 = vmatprep.subr.bf16.mxu0 %v24957_v48 }
0x1c14   : > { %22809 = vmatmul.mubr.msk.f32.vlgmr.msra.gmra.mrb[2].mxu1 %vm19107_vm13, %v18815_v24  ;;  %21865 = vmatmul.mubr.msk.f32.vlgmr.msra.gmra.mrb[0].mxu0 %vm19107_vm13, %v18815_v24 }
0x1c15   : > { %19648 = vmatpush1.bf16.msra.mxu1 %v24930_v2  ;;  %22453 = vmatpush3.bf16.msra.mxu0 %v24958_v44 }
0x1c16   : > { %19649 = vmatprep.subr.bf16.mxu1 %v24935_v17  ;;  %22454 = vmatprep.subr.bf16.mxu0 %v24962_v52 }
0x1c19   : > { %19650 = vmatpush1.bf16.msra.mxu1 %v24933_v54  ;;  %22455 = vmatpush3.bf16.msra.mxu0 %v24963_v42  ;;  %v24994_v54 = vld [vmem:[%s29962_s8 + $0x180] ss:$12 sps:$4 sm:$0xff]   ;;  %v24997_v42 = vld [vmem:[%s29962_s8 + $0x188] ss:$12 sps:$4 sm:$0xff]  }
0x1c1a   : > { %19651 = vmatprep.subr.bf16.mxu1 %v24938_v37  ;;  %22456 = vmatprep.subr.bf16.mxu0 %v24967_v53  ;;  %v25000_v53 = vld [vmem:[%s29962_s8 + $0x19c] ss:$12 sps:$4 sm:$0xff]  }
0x1c1d   : > { %19652 = vmatpush1.bf16.msra.mxu1 %v24936_v63  ;;  %22457 = vmatpush3.bf16.msra.mxu0 %v24968_v0  ;;  %v24998_v63 = vld [vmem:[%s29962_s8 + $0x198] ss:$12 sps:$4 sm:$0xff]   ;;  %v25001_v0 = vld [vmem:[%s29962_s8 + $0x1a0] ss:$12 sps:$4 sm:$0xff]  }
0x1c1e   : > { %19653 = vmatprep.subr.bf16.mxu1 %v24941_v33  ;;  %22458 = vmatprep.subr.bf16.mxu0 %v24972_v35 }
0x1c21   : > { %19654 = vmatpush1.bf16.msra.mxu1 %v24939_v36  ;;  %22459 = vmatpush3.bf16.msra.mxu0 %v24973_v46  ;;  %v19339_v36 = vld [vmem:[%s29964_s28] sm:$0x7] }
0x1c22   : > { %19655 = vmatprep.subr.bf16.mxu1 %v24944_v40  ;;  %22460 = vmatprep.subr.bf16.mxu0 %v24977_v41  ;;  %v19352_v41 = vrot.slane %v19339_v36, %v29539_v23 }
0x1c25   : > { %19656 = vmatpush1.bf16.msra.mxu1 %v24942_v18  ;;  %22461 = vmatpush3.bf16.msra.mxu0 %v24978_v7  ;;  %v19344_v18 = vrot.slane %v19339_v36, %v29529_v38  ;;  %v19348_v7 = vrot.slane %v19339_v36, %v29532_v31 }
0x1c26   : > { %19657 = vmatprep.subr.bf16.mxu1 %v24947_v8  ;;  %22462 = vmatprep.subr.bf16.mxu0 %v24982_v30 }
0x1c29   : > { %19658 = vmatpush1.bf16.msra.mxu1 %v24945_v58  ;;  %22463 = vmatpush3.bf16.msra.mxu0 %v24983_v45 }
0x1c2a   : > { %19659 = vmatprep.subr.bf16.mxu1 %v24950_v49  ;;  %22464 = vmatprep.subr.bf16.mxu0 %v24987_v26 }
0x1c2d   : > { %19660 = vmatpush1.bf16.msra.mxu1 %v24948_v15  ;;  %22465 = vmatpush3.bf16.msra.mxu0 %v24988_v50 }
0x1c2e   : > { %19661 = vmatprep.subr.bf16.mxu1 %v24953_v9  ;;  %22466 = vmatprep.subr.bf16.mxu0 %v24992_v22 }
0x1c31   : > { %19662 = vmatpush1.bf16.msra.mxu1 %v24951_v10  ;;  %22467 = vmatpush3.bf16.msra.mxu0 %v24993_v3 }
0x1c32   : > { %19663 = vmatprep.subr.bf16.mxu1 %v24956_v55  ;;  %22811 = vmatprep.subr.bf16.mxu0 %v25808_v28 }
0x1c35   : > { %19664 = vmatpush1.bf16.msra.mxu1 %v24954_v51 }
0x1c36   : > { %19665 = vmatprep.subr.bf16.mxu1 %v24961_v19 }
0x1c39   : > { %19666 = vmatpush1.bf16.msra.mxu1 %v24959_v47 }
0x1c3a   : > { %19667 = vmatprep.subr.bf16.mxu1 %v24966_v29 }
0x1c3d   : > { %19668 = vmatpush1.bf16.msra.mxu1 %v24964_v27 }
0x1c3e   : > { %19669 = vmatprep.subr.bf16.mxu1 %v24971_v32 }
0x1c41   : > { %19670 = vmatpush1.bf16.msra.mxu1 %v24969_v1 }
0x1c42   : > { %19671 = vmatprep.subr.bf16.mxu1 %v24976_v57 }
0x1c45   : > { %19672 = vmatpush1.bf16.msra.mxu1 %v24974_v5 }
0x1c46   : > { %19673 = vmatprep.subr.bf16.mxu1 %v24981_v4 }
0x1c49   : > { %19674 = vmatpush1.bf16.msra.mxu1 %v24979_v60 }
0x1c4a   : > { %19675 = vmatprep.subr.bf16.mxu1 %v24986_v13 }
0x1c4d   : > { %19676 = vmatpush1.bf16.msra.mxu1 %v24984_v20 }
0x1c4e   : > { %19677 = vmatprep.subr.bf16.mxu1 %v24991_v56 }
0x1c51   : > { %19678 = vmatpush1.bf16.msra.mxu1 %v24989_v61 }
0x1c52   : > { %19686 = vmatprep.subr.bf16.mxu1 %v24996_v62 }
0x1cdf   : > { %v22446_v59 = vpop.f32.mrb[0].mxu1 }
0x1ce0   : > { %v22447_v14 = vpop.f32.mrb[1].mxu1 }
0x1ce1   : > { %v22448_v6 = vadd.f32 %v22447_v14, %v22446_v59 }
0x1ce3   : > { %v19223_v34 = vadd.f32 %v22448_v6, %v18796_v21 }
0x1ce7   : > { %v19260_v12 = vpop.f32.mrb[2].mxu1  ;;  %v19183_v11 = vpop.f32.mrb[0].mxu0 }
0x1ce8   : > { %v19261_v48 = vadd.f32 %v19260_v12, %v19223_v34  ;;  %v23240_v2 = vadd.f32 %v19183_v11, %v18788_v16  ;;  %v22810_v44 = vpop.f32.mrb[3].mxu1  ;;  %v19185_v24 = vpop.f32.mrb[1].mxu0 }
0x1ce9   : > { %v23241_v17 = vadd.f32 %v19185_v24, %v18792_v43 }
0x1cea   : > { %v19264_v37 = vmax.f32 %v23240_v2, 0.0  ;;  %v19266_v33 = vmax.f32 %v19261_v48, 0.0 }
0x1ceb   : > { %v19265_v52 = vmax.f32 %v23241_v17, 0.0 }
0x1ced   : > { %19679 = vmatprep.mubr.f32.mxu1 %v19265_v52  ;;  %19757 = vmatprep.mubr.f32.mxu0 %v19265_v52 }
0x1cee   : > { %19680 = vmatmul.mubr.f32.vlgmr.msra.gmra.mrb[4].mxu1 %v19264_v37  ;;  %19758 = vmatmul.mubr.f32.vlgmr.msra.gmra.mrb[2].mxu0 %v19264_v37 }
0x1cef   : > { %19687 = vmatpush1.bf16.msra.mxu1 %v24994_v54  ;;  %22812 = vmatpush3.bf16.msra.mxu0 %v24997_v42 }
0x1cf0   : > { %19688 = vmatprep.subr.bf16.mxu1 %v25000_v53  ;;  %22813 = vmatprep.subr.bf16.mxu0 %v25808_v28 }
0x1cf1   : > { %22815 = vmatprep.mubr.msk.f32.mxu0 %vm25809_vm12, %v25808_v28  ;;  %19718 = vmatprep.mubr.f32.mxu1 %v25808_v28 }
0x1cf3   : > { %19689 = vmatpush1.bf16.msra.mxu1 %v24998_v63  ;;  %22814 = vmatpush3.bf16.msra.mxu0 %v25001_v0 }
0x1cf6   : > { %22816 = vmatmul.mubr.msk.f32.vlgmr.msra.gmra.mrb[4].mxu0 %vm19107_vm13, %v19266_v33  ;;  %21921 = vmatmul.mubr.msk.f32.vlgmr.msra.gmra.mrb[4].mxu1 %vm19107_vm13, %v19266_v33 }
0x1dc1   : > { %v22468_v35 = vpop.f32.mrb[2].mxu0 }
0x1dc2   : > { %v22469_v46 = vpop.f32.mrb[3].mxu0 }
0x1dc3   : > { %v22470_v40 = vadd.f32 %v22469_v46, %v22468_v35 }
0x1dc5   : > { %v19760_v8 = vadd.f32 %v22470_v40, %v19352_v41 }
0x1dc9   : > { %v19797_v58 = vpop.f32.mrb[4].mxu0  ;;  %v19720_v28 = vpop.f32.mrb[4].mxu1 }
0x1dca   : > { %v19798_v49 = vadd.f32 %v19797_v58, %v19760_v8  ;;  %v23242_v15 = vadd.f32 %v19720_v28, %v19344_v18  ;;  %v22817_v9 = vpop.f32.mrb[5].mxu0  ;;  %v19722_v10 = vpop.f32.mrb[5].mxu1 }
0x1dcb   : > { %v23243_v55 = vadd.f32 %v19722_v10, %v19348_v7 }
0x1dcc   : > { %v19818_v19 = vrot.slane %v19798_v49, %v29456_v39 }
0x1dcd   : > { %v19804_v51 = vcombine.low %v23242_v15, %v23243_v55 }
0x1dcf   : > { %v19811_v23 = vrot.slane %v19804_v51, %v29456_v39 }
0x1dd1   : > { %v19819_v38 = vcombine.low %v19811_v23, %v19818_v19 }
0x1dd3   : > { %19825 = vst.msk [vmem:[#allocation37] sm:$0x3f] %vm19824_vm4, %v19819_v38 }
0x1dd4 PF: > { %s29965_s12 = sld [smem:[#allocation106_spill]]  ;;  %s25810_s5 = smov [#allocation37]  }
0x1dd5   : > { %s19833_s11 = sshll.u32 %s25810_s5, 4  ;;  %s19834_s11 = int_to_ptr.vmem [resolvable:$true] %s19833_s11 }
0x1dd6   : > { %s25592_s20 = scalar_lea.vmem %s19834_s11, 96  ;;  %p25599_p1 = scmp.lt.s32.totalorder %s19834_s11, %s19834_s11 }
0x1dd7   : > { %p25593_p6 = scmp.ne.s32.totalorder %s19834_s11, %s25592_s20  ;;  %p25600_p8 = scmp.lt.s32.totalorder %s25592_s20, %s25592_s20 }
0x1dd9   : > { %p25601_p0 = por %p25600_p8, %p25599_p1 }
0x1dda   : > { %p23347_p4 = scmp.eq.s32.totalorder %s29965_s12, 11 }
0x1ddc   : > { %p25594_p13 = pnand %p25593_p6, %p23347_p4 }
0x1dde   : > { %p25595_p10 = pneg %p25594_p13 }
0x1de0   : > { %p25602_p9 = pnand %p25601_p0, %p25595_p10 }
0x1de2   : > { %25605 = shalt.err (!%p25602_p9)
}
0x1de3   : > { %s29966_s24 = sld [smem:[#allocation100_spill]] }
0x1de9   : > { %s25606_s22 = scalar_lea.hbm %s29966_s24, 96 }
0x1dea   : > { %p25607_p5 = scmp.ne.s32.totalorder %s29966_s24, %s25606_s22  ;;  %p25612_p12 = scmp.lt.u32.totalorder %s25606_s22, %s29966_s24 }
0x1dec   : > { %p25608_p7 = pnand %p25607_p5, %p23347_p4 }
0x1dee   : > { %p25609_p11 = pneg %p25608_p7 }
0x1df0   : > { %p25614_p3 = pnand %p25612_p12, %p25609_p11 }
0x1df2   : > { %25617 = shalt.err (!%p25614_p3)
}
0x1df3   : > { %23344 = dma.vmem_to_hbm [thread:$0]  (%p23347_p4), %s19834_s11, 96, %s29966_s24, [#allocation6]  }
0x1df4   : > { %25695 = dma.done.wait (%p23347_p4), [#allocation6], 96  }
0x1df5   : > { %25697 = vsyncadd (%p23347_p4), [#allocation6], 4294967200 }
0x1df6 PF: > { %s29967_s18 = sld [smem:[#allocation107_spill]]  ;;  %s29968_s0 = sld [smem:[#allocation101_spill]] }
0x1df7   : > { %s29969_s7 = sld [smem:[#allocation102_spill]]  ;;  %s29970_s10 = sld [smem:[#allocation111_spill]] }
0x1df8   : > { %s29971_s11 = sld [smem:[#allocation103_spill]]  ;;  %s29972_s15 = sld [smem:[#allocation104_spill]] }
0x1df9   : > { %s29973_s16 = sld [smem:[#allocation109_spill]] }
0x1dfc   : > { %p140_p2 = scmp.ge.s32.totalorder %s29967_s18, 14  }
0x1dfe   :  { %142 = sbr.rel (!%p140_p2) target bundleno = 130 (0x82), region = 609 }
0x1e05   :  { %19846 = vsyncpa [#allocation5], 1 }
0x1e06   :  { %19848 = vsyncpa [#allocation5 + $0x1], 1 }
0x1e07   :  { %19849 = vsyncpa [#allocation8], 1 }
0x1e08   :  { %19851 = vsyncpa [#allocation8 + $0x1], 1 }
0x1e09   :  { %19852 = vsyncpa [#allocation11], 1 }
0x1e0a   :  { %19854 = vsyncpa [#allocation11 + $0x1], 1 }
0x1e0b   :  { %19855 = vsyncpa [#allocation14], 1 }
0x1e0c   :  { %19857 = vsyncpa [#allocation14 + $0x1], 1 }
0x1e0d   :  { %19858 = vsyncpa [#allocation17], 1 }
0x1e0e   :  { %19860 = vsyncpa [#allocation17 + $0x1], 1 }
0x1e0f   :  { %19861 = vsyncpa [#allocation20], 1 }
0x1e10   :  { %19863 = vsyncpa [#allocation20 + $0x1], 1 }
0x1e11   :  { %19864 = vsyncpa [#allocation23], 1 }
0x1e12   :  { %19866 = vsyncpa [#allocation23 + $0x1], 1 }
0x1e13   :  { %19867 = vsyncpa [#allocation26], 1 }
0x1e14   :  { %19869 = vsyncpa [#allocation26 + $0x1], 1 }
0x1e15   :  { %19870 = vsyncpa [#allocation29], 1 }
0x1e16   :  { %19872 = vsyncpa [#allocation29 + $0x1], 1 }
0x1e17   :  { %19873 = vsyncpa [#allocation32], 1 }
0x1e18   :  { %19875 = vsyncpa [#allocation32 + $0x1], 1 }
0x1e19   :  { %19876 = vsyncpa [#allocation35], 1 }
0x1e1a   :  { %19878 = vsyncpa [#allocation35 + $0x1], 1 }
0x1e1b   :  { %19879 = vsyncpa [#allocation6], 1 }
0x1e1c   :  { %19881 = vsyncpa [#allocation6 + $0x1], 1 }

</bundles_post_ra>
